<compile_context>
chip_gen: v7x
topology: tpu7x:2x2x1
jax: 0.10.0
libtpu: 0.0.40
codegen_flags: <defaults>
</compile_context>

<pallas_src>
import jax
import jax.numpy as jnp
import numpy as np
from jax.experimental import pallas as pl
from jax.experimental.pallas import tpu as pltpu

BN_EPS = 1e-5            # PyTorch BatchNorm2d default eps
LEAKY_SLOPE = 0.1        # nn.LeakyReLU(negative_slope=0.1)
NUM_CLASSES = 10
ARCH = [(1, 128), 'M', (128, 64), 'M', (64, 32), 'M', (32, 16)]
CPAD = 128               # every channel dim padded to one full lane width
TAPS = tuple((dy, dx) for dy in range(3) for dx in range(3))
POOL_PHASES = ((0, 0), (0, 1), (1, 0), (1, 1))

# Fixed spatial plan for the 24x24 input implied by the module's fc layer.
# Per-stage layout:
#   P_k : zero-padded input map, flattened, row = y * WP_k + x  (halo rows = 0)
#   Y_k : conv output,           flattened, row = WP_k * i + j  (i, j map coords;
#         rows with j >= map width are garbage and never selected downstream)
H0 = W0 = 24
WP2, Q2, R2 = 14, 168, 200       # stage 2: 12x12 map, padded 14x14
WP3, Q3, R3 = 8, 48, 72          # stage 3:  6x6 map, padded  8x8
WP4, Q4, R4 = 5, 16, 32          # stage 4:  3x3 map, padded  5x5
NPOOL1 = 144                     # 12*12 pooled positions after stage 1


# ---------------------------------------------------------------------------
# Pallas kernel
# ---------------------------------------------------------------------------
def _lrelu(v):
    return jnp.where(v > 0.0, v, LEAKY_SLOPE * v)


def _fused_cnn_kernel(col1_ref, w1_ref, b1_ref, w2_ref, b2_ref, w3_ref,
                      b3_ref, w4_ref, b4_ref, wfc_ref, bfc_ref,
                      sel1_ref, sel2_ref, sel3_ref, o_ref,
                      col_ref, y_ref, p2_ref, p3_ref, p4_ref):
    f32 = jnp.float32

    # ---- stage 1: Conv2d(1->128) + BN + LeakyReLU + MaxPool ----------------
    # col1 is the K=9 im2col of the padded input, grouped by the four 2x2
    # pool phases (each group already in pooled-output row order pi*12+pj).
    # 4 GEMMs + elementwise max implement conv+pool with no spilled full-map
    # accumulator; one scatter GEMM then lays the pooled map out as stage 2's
    # zero-padded flattened input (selector's zero rows write the halo).
    m = None
    for g in range(4):
        z = jnp.dot(col1_ref[0, g * NPOOL1:(g + 1) * NPOOL1, :], w1_ref[...],
                    preferred_element_type=f32)
        z = _lrelu(z + b1_ref[...])
        m = z if m is None else jnp.maximum(m, z)
    y_ref[0:NPOOL1, :] = m
    p2_ref[...] = jnp.dot(sel1_ref[...], y_ref[0:NPOOL1, :],
                          preferred_element_type=f32)

    # ---- stages 2-4: lane-aligned im2col + ONE K=1152 GEMM per conv --------
    def conv_stage(p_ref, wp, q, w_ref, b_ref):
        # im2col: 9 sublane-shifted, lane-block-aligned slab copies.  Col row
        # r holds the 3x3 patch for map position (r // wp, r % wp); rows with
        # (r % wp) >= map width are garbage but finite and never selected.
        for t, (dy, dx) in enumerate(TAPS):
            s = dy * wp + dx
            col_ref[0:q, t * CPAD:(t + 1) * CPAD] = p_ref[s:s + q, :]
        y = jnp.dot(col_ref[0:q, :], w_ref[...], preferred_element_type=f32)
        y_ref[0:q, :] = _lrelu(y + b_ref[...])

    # Fused 2x2 max-pool + scatter into the next stage's zero-padded layout:
    # the stacked 0/1 selector has one block per pool phase; two batched
    # GEMMs + aligned elementwise maxes.  No zeroing needed anywhere.
    def pool_stage(sel_ref, q_in, r_out, dst_ref):
        za = jnp.dot(sel_ref[0:2 * r_out, :], y_ref[0:q_in, :],
                     preferred_element_type=f32)
        zb = jnp.dot(sel_ref[2 * r_out:4 * r_out, :], y_ref[0:q_in, :],
                     preferred_element_type=f32)
        dst_ref[...] = jnp.maximum(
            jnp.maximum(za[0:r_out, :], za[r_out:2 * r_out, :]),
            jnp.maximum(zb[0:r_out, :], zb[r_out:2 * r_out, :]))

    conv_stage(p2_ref, WP2, Q2, w2_ref, b2_ref)       # Conv(128->64)
    pool_stage(sel2_ref, Q2, R3, p3_ref)
    conv_stage(p3_ref, WP3, Q3, w3_ref, b3_ref)       # Conv(64->32)
    pool_stage(sel3_ref, Q3, R4, p4_ref)
    conv_stage(p4_ref, WP4, Q4, w4_ref, b4_ref)       # Conv(32->16)

    # ---- fc: Flatten(C,H,W order) + Linear == ONE (8,1152)@(1152,128) GEMM -
    # Assemble the 9 map positions into lane blocks of col row 0, then a
    # single long-K GEMM; rows 1..7 are stale (finite) and discarded.
    for t in range(9):
        i, j = divmod(t, 3)
        col_ref[0:1, t * CPAD:(t + 1) * CPAD] = \
            y_ref[WP4 * i + j:WP4 * i + j + 1, :]
    logits = jnp.dot(col_ref[0:8, :], wfc_ref[...], preferred_element_type=f32)
    o_ref[0] = logits[0:1, :] + bfc_ref[...]


# ---------------------------------------------------------------------------
# Forward wrapper (single pallas_call)
# ---------------------------------------------------------------------------
def _build_col1(x_nchw):
    """K=9 im2col of the 1-channel input, grouped by 2x2 pool phase.

    Returns (N, 4*144, 128) f32: group g rows are in pooled-output order
    (pi*12 + pj); lane t<9 holds the padded-input value of tap t, lanes
    9..127 are zero (stage-1 weight rows 9..127 are zero as well)."""
    x = x_nchw[:, 0].astype(jnp.float32)                     # (N, 24, 24)
    xpad = jnp.pad(x, ((0, 0), (1, 1), (1, 1)))              # (N, 26, 26)
    patches = jnp.stack([xpad[:, dy:dy + H0, dx:dx + W0]
                         for (dy, dx) in TAPS], axis=-1)     # (N, 24, 24, 9)
    groups = [patches[:, a::2, b::2, :].reshape(-1, NPOOL1, 9)
              for (a, b) in POOL_PHASES]
    col1 = jnp.concatenate(groups, axis=1)                   # (N, 576, 9)
    return jnp.pad(col1, ((0, 0), (0, 0), (0, CPAD - 9)))    # (N, 576, 128)


def cnn_forward(x_nchw, kp):
    N, cin, H, W = x_nchw.shape
    assert cin == 1 and H == H0 and W == W0, "fc layer implies a 24x24 input"
    col1 = _build_col1(x_nchw)

    out = pl.pallas_call(
        _fused_cnn_kernel,
        out_shape=jax.ShapeDtypeStruct((N, 1, CPAD), jnp.float32),
        grid=(N,),
        in_specs=[
            pl.BlockSpec((1, 4 * NPOOL1, CPAD), lambda n: (n, 0, 0)),  # col1
            pl.BlockSpec((CPAD, CPAD), lambda n: (0, 0)),              # w1
            pl.BlockSpec((1, CPAD), lambda n: (0, 0)),                 # b1
            pl.BlockSpec((9 * CPAD, CPAD), lambda n: (0, 0)),          # w2
            pl.BlockSpec((1, CPAD), lambda n: (0, 0)),                 # b2
            pl.BlockSpec((9 * CPAD, CPAD), lambda n: (0, 0)),          # w3
            pl.BlockSpec((1, CPAD), lambda n: (0, 0)),                 # b3
            pl.BlockSpec((9 * CPAD, CPAD), lambda n: (0, 0)),          # w4
            pl.BlockSpec((1, CPAD), lambda n: (0, 0)),                 # b4
            pl.BlockSpec((9 * CPAD, CPAD), lambda n: (0, 0)),          # wfc
            pl.BlockSpec((1, CPAD), lambda n: (0, 0)),                 # bfc
            pl.BlockSpec((R2, NPOOL1), lambda n: (0, 0)),              # sel1
            pl.BlockSpec((4 * R3, Q2), lambda n: (0, 0)),              # sel2
            pl.BlockSpec((4 * R4, Q3), lambda n: (0, 0)),              # sel3
        ],
        out_specs=pl.BlockSpec((1, 1, CPAD), lambda n: (n, 0, 0)),
        scratch_shapes=[
            pltpu.VMEM((Q2, 9 * CPAD), jnp.float32),   # shared im2col scratch
            pltpu.VMEM((Q2, CPAD), jnp.float32),       # shared conv-output Y
            pltpu.VMEM((R2, CPAD), jnp.float32),       # P2 (padded 14x14 map)
            pltpu.VMEM((R3, CPAD), jnp.float32),       # P3 (padded 8x8 map)
            pltpu.VMEM((R4, CPAD), jnp.float32),       # P4 (padded 5x5 map)
        ],
        compiler_params=pltpu.CompilerParams(
            dimension_semantics=("parallel",),
            vmem_limit_bytes=32 * 1024 * 1024),
    )(col1, kp['w1'], kp['b1'], kp['w2'], kp['b2'], kp['w3'], kp['b3'],
      kp['w4'], kp['b4'], kp['wfc'], kp['bfc'],
      kp['sel1'], kp['sel2'], kp['sel3'])
    return out[:, 0, :NUM_CLASSES]


# ---------------------------------------------------------------------------
# Selector construction (0/1 matrices, built once)
# ---------------------------------------------------------------------------
def _scatter_selector():
    """Dense pooled map (row = pi*12+pj) -> stage-2 padded flattened layout."""
    sel = np.zeros((R2, NPOOL1), np.float32)
    for pi in range(12):
        for pj in range(12):
            sel[(pi + 1) * WP2 + (pj + 1), pi * 12 + pj] = 1.0
    return sel


def _pool_selector(hw, src_stride, q_src, wp_out, r_alloc):
    """2x2 max-pool of an (hw x hw) map stored at row = src_stride*i + j,
    scattered into the next stage's padded flattened layout (halo rows 0).
    Stacked as 4 blocks of r_alloc rows, one per pool phase (a, b)."""
    sel = np.zeros((4 * r_alloc, q_src), np.float32)
    for k, (a, b) in enumerate(POOL_PHASES):
        for pi in range(hw // 2):
            for pj in range(hw // 2):
                r = src_stride * (2 * pi + a) + (2 * pj + b)
                sel[k * r_alloc + (pi + 1) * wp_out + (pj + 1), r] = 1.0
    return sel


# ---------------------------------------------------------------------------
# Parameter setup: raw (PyTorch-like) params + one-time kernel preparation
# ---------------------------------------------------------------------------
def init_params(key):
    convs = []
    for spec in ARCH:
        if isinstance(spec, tuple):
            cin, cout = spec
            key, k1, k2, k3, k4, k5, k6 = jax.random.split(key, 7)
            convs.append((
                0.05 * jax.random.normal(k1, (cout, cin, 3, 3), jnp.float32),  # conv W
                0.05 * jax.random.normal(k2, (cout,), jnp.float32),            # conv b
                1.0 + 0.1 * jax.random.normal(k3, (cout,), jnp.float32),       # bn gamma
                0.1 * jax.random.normal(k4, (cout,), jnp.float32),             # bn beta
                0.1 * jax.random.normal(k5, (cout,), jnp.float32),             # running mean
                jax.random.uniform(k6, (cout,), jnp.float32, 0.5, 1.5),        # running var
            ))
    in_feat = ARCH[-1][1] * 3 * 3      # 144 (see TODO at top re: declared 72)
    key, kw, kb = jax.random.split(key, 3)
    fc = (0.05 * jax.random.normal(kw, (NUM_CLASSES, in_feat), jnp.float32),
          0.05 * jax.random.normal(kb, (NUM_CLASSES,), jnp.float32))
    return {'convs': convs, 'fc': fc}


def prepare_params(params):
    """One-time prep: fold eval-mode BN into conv weights/bias, pad channels
    to CPAD, lay conv weights out for the in-kernel im2col GEMMs, and build
    the 0/1 pool/scatter selectors.  Pure layout work, outside the fwd path."""
    def fold(w_pt, b, gamma, beta, rmean, rvar):
        scale = gamma / jnp.sqrt(rvar + BN_EPS)                  # (Cout,)
        w = jnp.transpose(w_pt, (2, 3, 1, 0)) * scale            # (3,3,Cin,Cout)
        bias = beta + scale * (b - rmean)                        # (Cout,)
        return w, bias

    kp = {}
    # stage 1 (Cin=1): K=9 GEMM weights; taps on the contraction dim.
    w, bias = fold(*params['convs'][0])
    kp['w1'] = jnp.zeros((CPAD, CPAD), jnp.float32).at[:9, :].set(
        w.reshape(9, CPAD))
    kp['b1'] = bias.reshape(1, CPAD)
    # stages 2-4: (9*CPAD, CPAD) weights matching the in-kernel im2col layout.
    for i, name in zip(range(1, 4), ('2', '3', '4')):
        w, bias = fold(*params['convs'][i])
        _, _, cin, cout = w.shape
        w = jnp.pad(w, ((0, 0), (0, 0), (0, CPAD - cin), (0, CPAD - cout)))
        kp['w' + name] = w.reshape(9 * CPAD, CPAD)
        kp['b' + name] = jnp.pad(bias, (0, CPAD - cout)).reshape(1, CPAD)
        # Padded-lane invariant: zero bias in padded out-channels keeps those
        # lanes exactly 0 through LeakyReLU and all later (zero-weight) layers.
        np.testing.assert_array_equal(np.asarray(kp['b' + name])[0, cout:], 0.0)
    # fc: Flatten(N,C,H,W) + Linear == 3x3 valid conv; tap t = h*3+w, row t*128+c.
    w_fc, b_fc = params['fc']
    c_last = ARCH[-1][1]
    wfc = jnp.transpose(w_fc.reshape(NUM_CLASSES, c_last, 3, 3), (2, 3, 1, 0))
    wfc = jnp.pad(wfc, ((0, 0), (0, 0), (0, CPAD - c_last),
                        (0, CPAD - NUM_CLASSES)))
    kp['wfc'] = wfc.reshape(9 * CPAD, CPAD)
    kp['bfc'] = jnp.pad(b_fc, (0, CPAD - NUM_CLASSES)).reshape(1, CPAD)
    # 0/1 selectors (precomputed kernel inputs, per review).
    kp['sel1'] = jnp.asarray(_scatter_selector())                 # (200, 144)
    kp['sel2'] = jnp.asarray(_pool_selector(12, WP2, Q2, WP3, R3))  # (288, 168)
    kp['sel3'] = jnp.asarray(_pool_selector(6, WP3, Q3, WP4, R4))   # (128, 48)
    return kp


# ---------------------------------------------------------------------------
# Pure-JAX reference (PyTorch semantics) for verification
# ---------------------------------------------------------------------------
def cnn_reference(x_nchw, params):
    x = jnp.transpose(x_nchw, (0, 2, 3, 1)).astype(jnp.float32)
    ci = 0
    for spec in ARCH:
        if isinstance(spec, tuple):
            w_pt, b, gamma, beta, rmean, rvar = params['convs'][ci]
            ci += 1
            w_hwio = jnp.transpose(w_pt, (2, 3, 1, 0))
            y = jax.lax.conv_general_dilated(
                x, w_hwio, window_strides=(1, 1), padding=((1, 1), (1, 1)),
                dimension_numbers=('NHWC', 'HWIO', 'NHWC')) + b
            y = (y - rmean) / jnp.sqrt(rvar + BN_EPS) * gamma + beta
            x = jnp.where(y > 0, y, LEAKY_SLOPE * y)
        else:
            x = jax.lax.reduce_window(x, -jnp.inf, jax.lax.max,
                                      (1, 2, 2, 1), (1, 2, 2, 1), 'VALID')
    n = x.shape[0]
    feat = jnp.transpose(x, (0, 3, 1, 2)).reshape(n, -1)
    w_fc, b_fc = params['fc']
    return feat @ w_fc.T + b_fc


if __name__ == "__main__":
    key = jax.random.PRNGKey(0)
    kparam_key, kx = jax.random.split(key)
    params = init_params(kparam_key)
    kparams = prepare_params(params)          # once, outside the forward path
    x = jax.random.normal(kx, (2, 1, 24, 24), jnp.float32)   # NCHW like PyTorch

    fwd = jax.jit(cnn_forward)
    out = jax.block_until_ready(fwd(x, kparams))
    assert out.shape == (2, NUM_CLASSES) and out.dtype == jnp.float32

    ref = cnn_reference(x, params)
    np.testing.assert_allclose(np.asarray(out), np.asarray(ref),
                               rtol=1e-3, atol=1e-3)
    print("KERNEL_OK")
</pallas_src>

<mosaic_0001>
module attributes {stable_mosaic.version = 11 : i64} {
  func.func @_fused_cnn_kernel(%arg0: i32, %arg1: memref<1x576x128xf32, #tpu.memory_space<vmem>>, %arg2: memref<128x128xf32, #tpu.memory_space<vmem>>, %arg3: memref<1x128xf32, #tpu.memory_space<vmem>>, %arg4: memref<1152x128xf32, #tpu.memory_space<vmem>>, %arg5: memref<1x128xf32, #tpu.memory_space<vmem>>, %arg6: memref<1152x128xf32, #tpu.memory_space<vmem>>, %arg7: memref<1x128xf32, #tpu.memory_space<vmem>>, %arg8: memref<1152x128xf32, #tpu.memory_space<vmem>>, %arg9: memref<1x128xf32, #tpu.memory_space<vmem>>, %arg10: memref<1152x128xf32, #tpu.memory_space<vmem>>, %arg11: memref<1x128xf32, #tpu.memory_space<vmem>>, %arg12: memref<200x144xf32, #tpu.memory_space<vmem>>, %arg13: memref<288x168xf32, #tpu.memory_space<vmem>>, %arg14: memref<128x48xf32, #tpu.memory_space<vmem>>, %arg15: memref<1x1x128xf32, #tpu.memory_space<vmem>>, %arg16: memref<168x1152xf32, #tpu.memory_space<vmem>>, %arg17: memref<168x128xf32, #tpu.memory_space<vmem>>, %arg18: memref<200x128xf32, #tpu.memory_space<vmem>>, %arg19: memref<72x128xf32, #tpu.memory_space<vmem>>, %arg20: memref<32x128xf32, #tpu.memory_space<vmem>>) attributes {dimension_semantics = [#tpu.dimension_semantics<parallel>], iteration_bounds = array<i64: 2>, scalar_prefetch = 0 : i64, scratch_operands = 5 : i64, tpu.core_type = #tpu.core_type<tc>, window_params = [{transform_indices = @transform_0, window_bounds = array<i64: 1, 576, 128>}, {pipeline_mode = #tpu.pipeline_mode<synchronous>, transform_indices = @transform_1, window_bounds = array<i64: 128, 128>}, {pipeline_mode = #tpu.pipeline_mode<synchronous>, transform_indices = @transform_2, window_bounds = array<i64: 1, 128>}, {pipeline_mode = #tpu.pipeline_mode<synchronous>, transform_indices = @transform_3, window_bounds = array<i64: 1152, 128>}, {pipeline_mode = #tpu.pipeline_mode<synchronous>, transform_indices = @transform_4, window_bounds = array<i64: 1, 128>}, {pipeline_mode = #tpu.pipeline_mode<synchronous>, transform_indices = @transform_5, window_bounds = array<i64: 1152, 128>}, {pipeline_mode = #tpu.pipeline_mode<synchronous>, transform_indices = @transform_6, window_bounds = array<i64: 1, 128>}, {pipeline_mode = #tpu.pipeline_mode<synchronous>, transform_indices = @transform_7, window_bounds = array<i64: 1152, 128>}, {pipeline_mode = #tpu.pipeline_mode<synchronous>, transform_indices = @transform_8, window_bounds = array<i64: 1, 128>}, {pipeline_mode = #tpu.pipeline_mode<synchronous>, transform_indices = @transform_9, window_bounds = array<i64: 1152, 128>}, {pipeline_mode = #tpu.pipeline_mode<synchronous>, transform_indices = @transform_10, window_bounds = array<i64: 1, 128>}, {pipeline_mode = #tpu.pipeline_mode<synchronous>, transform_indices = @transform_11, window_bounds = array<i64: 200, 144>}, {pipeline_mode = #tpu.pipeline_mode<synchronous>, transform_indices = @transform_12, window_bounds = array<i64: 288, 168>}, {pipeline_mode = #tpu.pipeline_mode<synchronous>, transform_indices = @transform_13, window_bounds = array<i64: 128, 48>}, {transform_indices = @transform_14, window_bounds = array<i64: 1, 1, 128>}]} {
    %c0 = arith.constant 0 : index
    %c0_0 = arith.constant 0 : index
    %c0_1 = arith.constant 0 : index
    %0 = vector.load %arg1[%c0, %c0_0, %c0_1] : memref<1x576x128xf32, #tpu.memory_space<vmem>>, vector<1x144x128xf32>
    %1 = vector.shape_cast %0 : vector<1x144x128xf32> to vector<144x128xf32>
    %c0_2 = arith.constant 0 : index
    %c0_3 = arith.constant 0 : index
    %2 = vector.load %arg2[%c0_2, %c0_3] : memref<128x128xf32, #tpu.memory_space<vmem>>, vector<128x128xf32>
    %cst = arith.constant dense<0.000000e+00> : vector<144x128xf32>
    %3 = tpu.matmul %1, %2, %cst {dimension_numbers = #tpu.dot_dimension_numbers<[1], [0], [0], [1], [0, 0, 1, 1], [], []>} : vector<144x128xf32>, vector<128x128xf32>, vector<144x128xf32> -> vector<144x128xf32>
    %c0_4 = arith.constant 0 : index
    %c0_5 = arith.constant 0 : index
    %4 = vector.load %arg3[%c0_4, %c0_5] : memref<1x128xf32, #tpu.memory_space<vmem>>, vector<1x128xf32>
    %5 = vector.broadcast %4 : vector<1x128xf32> to vector<144x128xf32>
    %6 = arith.addf %3, %5 : vector<144x128xf32>
    %cst_6 = arith.constant 0.000000e+00 : f32
    %7 = vector.broadcast %cst_6 : f32 to vector<144x128xf32>
    %8 = arith.cmpf ogt, %6, %7 : vector<144x128xf32>
    %cst_7 = arith.constant 1.000000e-01 : f32
    %9 = vector.broadcast %cst_7 : f32 to vector<144x128xf32>
    %10 = arith.mulf %9, %6 : vector<144x128xf32>
    %11 = arith.select %8, %6, %10 : vector<144x128xi1>, vector<144x128xf32>
    %c0_8 = arith.constant 0 : index
    %c144 = arith.constant 144 : index
    %c0_9 = arith.constant 0 : index
    %12 = vector.load %arg1[%c0_8, %c144, %c0_9] : memref<1x576x128xf32, #tpu.memory_space<vmem>>, vector<1x144x128xf32>
    %13 = vector.shape_cast %12 : vector<1x144x128xf32> to vector<144x128xf32>
    %c0_10 = arith.constant 0 : index
    %c0_11 = arith.constant 0 : index
    %14 = vector.load %arg2[%c0_10, %c0_11] : memref<128x128xf32, #tpu.memory_space<vmem>>, vector<128x128xf32>
    %cst_12 = arith.constant dense<0.000000e+00> : vector<144x128xf32>
    %15 = tpu.matmul %13, %14, %cst_12 {dimension_numbers = #tpu.dot_dimension_numbers<[1], [0], [0], [1], [0, 0, 1, 1], [], []>} : vector<144x128xf32>, vector<128x128xf32>, vector<144x128xf32> -> vector<144x128xf32>
    %c0_13 = arith.constant 0 : index
    %c0_14 = arith.constant 0 : index
    %16 = vector.load %arg3[%c0_13, %c0_14] : memref<1x128xf32, #tpu.memory_space<vmem>>, vector<1x128xf32>
    %17 = vector.broadcast %16 : vector<1x128xf32> to vector<144x128xf32>
    %18 = arith.addf %15, %17 : vector<144x128xf32>
    %cst_15 = arith.constant 0.000000e+00 : f32
    %19 = vector.broadcast %cst_15 : f32 to vector<144x128xf32>
    %20 = arith.cmpf ogt, %18, %19 : vector<144x128xf32>
    %cst_16 = arith.constant 1.000000e-01 : f32
    %21 = vector.broadcast %cst_16 : f32 to vector<144x128xf32>
    %22 = arith.mulf %21, %18 : vector<144x128xf32>
    %23 = arith.select %20, %18, %22 : vector<144x128xi1>, vector<144x128xf32>
    %24 = arith.maximumf %11, %23 : vector<144x128xf32>
    %c0_17 = arith.constant 0 : index
    %c288 = arith.constant 288 : index
    %c0_18 = arith.constant 0 : index
    %25 = vector.load %arg1[%c0_17, %c288, %c0_18] : memref<1x576x128xf32, #tpu.memory_space<vmem>>, vector<1x144x128xf32>
    %26 = vector.shape_cast %25 : vector<1x144x128xf32> to vector<144x128xf32>
    %c0_19 = arith.constant 0 : index
    %c0_20 = arith.constant 0 : index
    %27 = vector.load %arg2[%c0_19, %c0_20] : memref<128x128xf32, #tpu.memory_space<vmem>>, vector<128x128xf32>
    %cst_21 = arith.constant dense<0.000000e+00> : vector<144x128xf32>
    %28 = tpu.matmul %26, %27, %cst_21 {dimension_numbers = #tpu.dot_dimension_numbers<[1], [0], [0], [1], [0, 0, 1, 1], [], []>} : vector<144x128xf32>, vector<128x128xf32>, vector<144x128xf32> -> vector<144x128xf32>
    %c0_22 = arith.constant 0 : index
    %c0_23 = arith.constant 0 : index
    %29 = vector.load %arg3[%c0_22, %c0_23] : memref<1x128xf32, #tpu.memory_space<vmem>>, vector<1x128xf32>
    %30 = vector.broadcast %29 : vector<1x128xf32> to vector<144x128xf32>
    %31 = arith.addf %28, %30 : vector<144x128xf32>
    %cst_24 = arith.constant 0.000000e+00 : f32
    %32 = vector.broadcast %cst_24 : f32 to vector<144x128xf32>
    %33 = arith.cmpf ogt, %31, %32 : vector<144x128xf32>
    %cst_25 = arith.constant 1.000000e-01 : f32
    %34 = vector.broadcast %cst_25 : f32 to vector<144x128xf32>
    %35 = arith.mulf %34, %31 : vector<144x128xf32>
    %36 = arith.select %33, %31, %35 : vector<144x128xi1>, vector<144x128xf32>
    %37 = arith.maximumf %24, %36 : vector<144x128xf32>
    %c0_26 = arith.constant 0 : index
    %c432 = arith.constant 432 : index
    %c0_27 = arith.constant 0 : index
    %38 = vector.load %arg1[%c0_26, %c432, %c0_27] : memref<1x576x128xf32, #tpu.memory_space<vmem>>, vector<1x144x128xf32>
    %39 = vector.shape_cast %38 : vector<1x144x128xf32> to vector<144x128xf32>
    %c0_28 = arith.constant 0 : index
    %c0_29 = arith.constant 0 : index
    %40 = vector.load %arg2[%c0_28, %c0_29] : memref<128x128xf32, #tpu.memory_space<vmem>>, vector<128x128xf32>
    %cst_30 = arith.constant dense<0.000000e+00> : vector<144x128xf32>
    %41 = tpu.matmul %39, %40, %cst_30 {dimension_numbers = #tpu.dot_dimension_numbers<[1], [0], [0], [1], [0, 0, 1, 1], [], []>} : vector<144x128xf32>, vector<128x128xf32>, vector<144x128xf32> -> vector<144x128xf32>
    %c0_31 = arith.constant 0 : index
    %c0_32 = arith.constant 0 : index
    %42 = vector.load %arg3[%c0_31, %c0_32] : memref<1x128xf32, #tpu.memory_space<vmem>>, vector<1x128xf32>
    %43 = vector.broadcast %42 : vector<1x128xf32> to vector<144x128xf32>
    %44 = arith.addf %41, %43 : vector<144x128xf32>
    %cst_33 = arith.constant 0.000000e+00 : f32
    %45 = vector.broadcast %cst_33 : f32 to vector<144x128xf32>
    %46 = arith.cmpf ogt, %44, %45 : vector<144x128xf32>
    %cst_34 = arith.constant 1.000000e-01 : f32
    %47 = vector.broadcast %cst_34 : f32 to vector<144x128xf32>
    %48 = arith.mulf %47, %44 : vector<144x128xf32>
    %49 = arith.select %46, %44, %48 : vector<144x128xi1>, vector<144x128xf32>
    %50 = arith.maximumf %37, %49 : vector<144x128xf32>
    %c0_35 = arith.constant 0 : index
    %c0_36 = arith.constant 0 : index
    %51 = vector.load %arg17[%c0_35, %c0_36] : memref<168x128xf32, #tpu.memory_space<vmem>>, vector<144x128xf32>
    tpu.vector_store %arg17[%c0_35, %c0_36], %50 {strides = array<i32>} : memref<168x128xf32, #tpu.memory_space<vmem>>, vector<144x128xf32>,
    %c0_37 = arith.constant 0 : index
    %c0_38 = arith.constant 0 : index
    %52 = vector.load %arg12[%c0_37, %c0_38] : memref<200x144xf32, #tpu.memory_space<vmem>>, vector<200x144xf32>
    %c0_39 = arith.constant 0 : index
    %c0_40 = arith.constant 0 : index
    %53 = vector.load %arg17[%c0_39, %c0_40] : memref<168x128xf32, #tpu.memory_space<vmem>>, vector<144x128xf32>
    %cst_41 = arith.constant dense<0.000000e+00> : vector<200x128xf32>
    %54 = tpu.matmul %52, %53, %cst_41 {dimension_numbers = #tpu.dot_dimension_numbers<[1], [0], [0], [1], [0, 0, 1, 1], [], []>} : vector<200x144xf32>, vector<144x128xf32>, vector<200x128xf32> -> vector<200x128xf32>
    %c0_42 = arith.constant 0 : index
    %c0_43 = arith.constant 0 : index
    %55 = vector.load %arg18[%c0_42, %c0_43] : memref<200x128xf32, #tpu.memory_space<vmem>>, vector<200x128xf32>
    tpu.vector_store %arg18[%c0_42, %c0_43], %54 {strides = array<i32>} : memref<200x128xf32, #tpu.memory_space<vmem>>, vector<200x128xf32>,
    %c0_44 = arith.constant 0 : index
    %c0_45 = arith.constant 0 : index
    %56 = vector.load %arg18[%c0_44, %c0_45] : memref<200x128xf32, #tpu.memory_space<vmem>>, vector<168x128xf32>
    %c0_46 = arith.constant 0 : index
    %c0_47 = arith.constant 0 : index
    %57 = vector.load %arg16[%c0_46, %c0_47] : memref<168x1152xf32, #tpu.memory_space<vmem>>, vector<168x128xf32>
    tpu.vector_store %arg16[%c0_46, %c0_47], %56 {strides = array<i32>} : memref<168x1152xf32, #tpu.memory_space<vmem>>, vector<168x128xf32>,
    %c1 = arith.constant 1 : index
    %c0_48 = arith.constant 0 : index
    %58 = vector.load %arg18[%c1, %c0_48] : memref<200x128xf32, #tpu.memory_space<vmem>>, vector<168x128xf32>
    %c0_49 = arith.constant 0 : index
    %c128 = arith.constant 128 : index
    %59 = vector.load %arg16[%c0_49, %c128] : memref<168x1152xf32, #tpu.memory_space<vmem>>, vector<168x128xf32>
    tpu.vector_store %arg16[%c0_49, %c128], %58 {strides = array<i32>} : memref<168x1152xf32, #tpu.memory_space<vmem>>, vector<168x128xf32>,
    %c2 = arith.constant 2 : index
    %c0_50 = arith.constant 0 : index
    %60 = vector.load %arg18[%c2, %c0_50] : memref<200x128xf32, #tpu.memory_space<vmem>>, vector<168x128xf32>
    %c0_51 = arith.constant 0 : index
    %c256 = arith.constant 256 : index
    %61 = vector.load %arg16[%c0_51, %c256] : memref<168x1152xf32, #tpu.memory_space<vmem>>, vector<168x128xf32>
    tpu.vector_store %arg16[%c0_51, %c256], %60 {strides = array<i32>} : memref<168x1152xf32, #tpu.memory_space<vmem>>, vector<168x128xf32>,
    %c14 = arith.constant 14 : index
    %c0_52 = arith.constant 0 : index
    %62 = vector.load %arg18[%c14, %c0_52] : memref<200x128xf32, #tpu.memory_space<vmem>>, vector<168x128xf32>
    %c0_53 = arith.constant 0 : index
    %c384 = arith.constant 384 : index
    %63 = vector.load %arg16[%c0_53, %c384] : memref<168x1152xf32, #tpu.memory_space<vmem>>, vector<168x128xf32>
    tpu.vector_store %arg16[%c0_53, %c384], %62 {strides = array<i32>} : memref<168x1152xf32, #tpu.memory_space<vmem>>, vector<168x128xf32>,
    %c15 = arith.constant 15 : index
    %c0_54 = arith.constant 0 : index
    %64 = vector.load %arg18[%c15, %c0_54] : memref<200x128xf32, #tpu.memory_space<vmem>>, vector<168x128xf32>
    %c0_55 = arith.constant 0 : index
    %c512 = arith.constant 512 : index
    %65 = vector.load %arg16[%c0_55, %c512] : memref<168x1152xf32, #tpu.memory_space<vmem>>, vector<168x128xf32>
    tpu.vector_store %arg16[%c0_55, %c512], %64 {strides = array<i32>} : memref<168x1152xf32, #tpu.memory_space<vmem>>, vector<168x128xf32>,
    %c16 = arith.constant 16 : index
    %c0_56 = arith.constant 0 : index
    %66 = vector.load %arg18[%c16, %c0_56] : memref<200x128xf32, #tpu.memory_space<vmem>>, vector<168x128xf32>
    %c0_57 = arith.constant 0 : index
    %c640 = arith.constant 640 : index
    %67 = vector.load %arg16[%c0_57, %c640] : memref<168x1152xf32, #tpu.memory_space<vmem>>, vector<168x128xf32>
    tpu.vector_store %arg16[%c0_57, %c640], %66 {strides = array<i32>} : memref<168x1152xf32, #tpu.memory_space<vmem>>, vector<168x128xf32>,
    %c28 = arith.constant 28 : index
    %c0_58 = arith.constant 0 : index
    %68 = vector.load %arg18[%c28, %c0_58] : memref<200x128xf32, #tpu.memory_space<vmem>>, vector<168x128xf32>
    %c0_59 = arith.constant 0 : index
    %c768 = arith.constant 768 : index
    %69 = vector.load %arg16[%c0_59, %c768] : memref<168x1152xf32, #tpu.memory_space<vmem>>, vector<168x128xf32>
    tpu.vector_store %arg16[%c0_59, %c768], %68 {strides = array<i32>} : memref<168x1152xf32, #tpu.memory_space<vmem>>, vector<168x128xf32>,
    %c29 = arith.constant 29 : index
    %c0_60 = arith.constant 0 : index
    %70 = vector.load %arg18[%c29, %c0_60] : memref<200x128xf32, #tpu.memory_space<vmem>>, vector<168x128xf32>
    %c0_61 = arith.constant 0 : index
    %c896 = arith.constant 896 : index
    %71 = vector.load %arg16[%c0_61, %c896] : memref<168x1152xf32, #tpu.memory_space<vmem>>, vector<168x128xf32>
    tpu.vector_store %arg16[%c0_61, %c896], %70 {strides = array<i32>} : memref<168x1152xf32, #tpu.memory_space<vmem>>, vector<168x128xf32>,
    %c30 = arith.constant 30 : index
    %c0_62 = arith.constant 0 : index
    %72 = vector.load %arg18[%c30, %c0_62] : memref<200x128xf32, #tpu.memory_space<vmem>>, vector<168x128xf32>
    %c0_63 = arith.constant 0 : index
    %c1024 = arith.constant 1024 : index
    %73 = vector.load %arg16[%c0_63, %c1024] : memref<168x1152xf32, #tpu.memory_space<vmem>>, vector<168x128xf32>
    tpu.vector_store %arg16[%c0_63, %c1024], %72 {strides = array<i32>} : memref<168x1152xf32, #tpu.memory_space<vmem>>, vector<168x128xf32>,
    %c0_64 = arith.constant 0 : index
    %c0_65 = arith.constant 0 : index
    %74 = vector.load %arg16[%c0_64, %c0_65] : memref<168x1152xf32, #tpu.memory_space<vmem>>, vector<168x1152xf32>
    %c0_66 = arith.constant 0 : index
    %c0_67 = arith.constant 0 : index
    %75 = vector.load %arg4[%c0_66, %c0_67] : memref<1152x128xf32, #tpu.memory_space<vmem>>, vector<1152x128xf32>
    %cst_68 = arith.constant dense<0.000000e+00> : vector<168x128xf32>
    %76 = tpu.matmul %74, %75, %cst_68 {dimension_numbers = #tpu.dot_dimension_numbers<[1], [0], [0], [1], [0, 0, 1, 1], [], []>} : vector<168x1152xf32>, vector<1152x128xf32>, vector<168x128xf32> -> vector<168x128xf32>
    %c0_69 = arith.constant 0 : index
    %c0_70 = arith.constant 0 : index
    %77 = vector.load %arg5[%c0_69, %c0_70] : memref<1x128xf32, #tpu.memory_space<vmem>>, vector<1x128xf32>
    %78 = vector.broadcast %77 : vector<1x128xf32> to vector<168x128xf32>
    %79 = arith.addf %76, %78 : vector<168x128xf32>
    %cst_71 = arith.constant 0.000000e+00 : f32
    %80 = vector.broadcast %cst_71 : f32 to vector<168x128xf32>
    %81 = arith.cmpf ogt, %79, %80 : vector<168x128xf32>
    %cst_72 = arith.constant 1.000000e-01 : f32
    %82 = vector.broadcast %cst_72 : f32 to vector<168x128xf32>
    %83 = arith.mulf %82, %79 : vector<168x128xf32>
    %84 = arith.select %81, %79, %83 : vector<168x128xi1>, vector<168x128xf32>
    %c0_73 = arith.constant 0 : index
    %c0_74 = arith.constant 0 : index
    %85 = vector.load %arg17[%c0_73, %c0_74] : memref<168x128xf32, #tpu.memory_space<vmem>>, vector<168x128xf32>
    tpu.vector_store %arg17[%c0_73, %c0_74], %84 {strides = array<i32>} : memref<168x128xf32, #tpu.memory_space<vmem>>, vector<168x128xf32>,
    %c0_75 = arith.constant 0 : index
    %c0_76 = arith.constant 0 : index
    %86 = vector.load %arg13[%c0_75, %c0_76] : memref<288x168xf32, #tpu.memory_space<vmem>>, vector<144x168xf32>
    %c0_77 = arith.constant 0 : index
    %c0_78 = arith.constant 0 : index
    %87 = vector.load %arg17[%c0_77, %c0_78] : memref<168x128xf32, #tpu.memory_space<vmem>>, vector<168x128xf32>
    %cst_79 = arith.constant dense<0.000000e+00> : vector<144x128xf32>
    %88 = tpu.matmul %86, %87, %cst_79 {dimension_numbers = #tpu.dot_dimension_numbers<[1], [0], [0], [1], [0, 0, 1, 1], [], []>} : vector<144x168xf32>, vector<168x128xf32>, vector<144x128xf32> -> vector<144x128xf32>
    %c144_80 = arith.constant 144 : index
    %c0_81 = arith.constant 0 : index
    %89 = vector.load %arg13[%c144_80, %c0_81] : memref<288x168xf32, #tpu.memory_space<vmem>>, vector<144x168xf32>
    %c0_82 = arith.constant 0 : index
    %c0_83 = arith.constant 0 : index
    %90 = vector.load %arg17[%c0_82, %c0_83] : memref<168x128xf32, #tpu.memory_space<vmem>>, vector<168x128xf32>
    %cst_84 = arith.constant dense<0.000000e+00> : vector<144x128xf32>
    %91 = tpu.matmul %89, %90, %cst_84 {dimension_numbers = #tpu.dot_dimension_numbers<[1], [0], [0], [1], [0, 0, 1, 1], [], []>} : vector<144x168xf32>, vector<168x128xf32>, vector<144x128xf32> -> vector<144x128xf32>
    %92 = vector.extract_strided_slice %88 {offsets = [0, 0], sizes = [72, 128], strides = [1, 1]} : vector<144x128xf32> to vector<72x128xf32>
    %93 = vector.extract_strided_slice %88 {offsets = [72, 0], sizes = [72, 128], strides = [1, 1]} : vector<144x128xf32> to vector<72x128xf32>
    %94 = arith.maximumf %92, %93 : vector<72x128xf32>
    %95 = vector.extract_strided_slice %91 {offsets = [0, 0], sizes = [72, 128], strides = [1, 1]} : vector<144x128xf32> to vector<72x128xf32>
    %96 = vector.extract_strided_slice %91 {offsets = [72, 0], sizes = [72, 128], strides = [1, 1]} : vector<144x128xf32> to vector<72x128xf32>
    %97 = arith.maximumf %95, %96 : vector<72x128xf32>
    %98 = arith.maximumf %94, %97 : vector<72x128xf32>
    %c0_85 = arith.constant 0 : index
    %c0_86 = arith.constant 0 : index
    %99 = vector.load %arg19[%c0_85, %c0_86] : memref<72x128xf32, #tpu.memory_space<vmem>>, vector<72x128xf32>
    tpu.vector_store %arg19[%c0_85, %c0_86], %98 {strides = array<i32>} : memref<72x128xf32, #tpu.memory_space<vmem>>, vector<72x128xf32>,
    %c0_87 = arith.constant 0 : index
    %c0_88 = arith.constant 0 : index
    %100 = vector.load %arg19[%c0_87, %c0_88] : memref<72x128xf32, #tpu.memory_space<vmem>>, vector<48x128xf32>
    %c0_89 = arith.constant 0 : index
    %c0_90 = arith.constant 0 : index
    %101 = vector.load %arg16[%c0_89, %c0_90] : memref<168x1152xf32, #tpu.memory_space<vmem>>, vector<48x128xf32>
    tpu.vector_store %arg16[%c0_89, %c0_90], %100 {strides = array<i32>} : memref<168x1152xf32, #tpu.memory_space<vmem>>, vector<48x128xf32>,
    %c1_91 = arith.constant 1 : index
    %c0_92 = arith.constant 0 : index
    %102 = vector.load %arg19[%c1_91, %c0_92] : memref<72x128xf32, #tpu.memory_space<vmem>>, vector<48x128xf32>
    %c0_93 = arith.constant 0 : index
    %c128_94 = arith.constant 128 : index
    %103 = vector.load %arg16[%c0_93, %c128_94] : memref<168x1152xf32, #tpu.memory_space<vmem>>, vector<48x128xf32>
    tpu.vector_store %arg16[%c0_93, %c128_94], %102 {strides = array<i32>} : memref<168x1152xf32, #tpu.memory_space<vmem>>, vector<48x128xf32>,
    %c2_95 = arith.constant 2 : index
    %c0_96 = arith.constant 0 : index
    %104 = vector.load %arg19[%c2_95, %c0_96] : memref<72x128xf32, #tpu.memory_space<vmem>>, vector<48x128xf32>
    %c0_97 = arith.constant 0 : index
    %c256_98 = arith.constant 256 : index
    %105 = vector.load %arg16[%c0_97, %c256_98] : memref<168x1152xf32, #tpu.memory_space<vmem>>, vector<48x128xf32>
    tpu.vector_store %arg16[%c0_97, %c256_98], %104 {strides = array<i32>} : memref<168x1152xf32, #tpu.memory_space<vmem>>, vector<48x128xf32>,
    %c8 = arith.constant 8 : index
    %c0_99 = arith.constant 0 : index
    %106 = vector.load %arg19[%c8, %c0_99] : memref<72x128xf32, #tpu.memory_space<vmem>>, vector<48x128xf32>
    %c0_100 = arith.constant 0 : index
    %c384_101 = arith.constant 384 : index
    %107 = vector.load %arg16[%c0_100, %c384_101] : memref<168x1152xf32, #tpu.memory_space<vmem>>, vector<48x128xf32>
    tpu.vector_store %arg16[%c0_100, %c384_101], %106 {strides = array<i32>} : memref<168x1152xf32, #tpu.memory_space<vmem>>, vector<48x128xf32>,
    %c9 = arith.constant 9 : index
    %c0_102 = arith.constant 0 : index
    %108 = vector.load %arg19[%c9, %c0_102] : memref<72x128xf32, #tpu.memory_space<vmem>>, vector<48x128xf32>
    %c0_103 = arith.constant 0 : index
    %c512_104 = arith.constant 512 : index
    %109 = vector.load %arg16[%c0_103, %c512_104] : memref<168x1152xf32, #tpu.memory_space<vmem>>, vector<48x128xf32>
    tpu.vector_store %arg16[%c0_103, %c512_104], %108 {strides = array<i32>} : memref<168x1152xf32, #tpu.memory_space<vmem>>, vector<48x128xf32>,
    %c10 = arith.constant 10 : index
    %c0_105 = arith.constant 0 : index
    %110 = vector.load %arg19[%c10, %c0_105] : memref<72x128xf32, #tpu.memory_space<vmem>>, vector<48x128xf32>
    %c0_106 = arith.constant 0 : index
    %c640_107 = arith.constant 640 : index
    %111 = vector.load %arg16[%c0_106, %c640_107] : memref<168x1152xf32, #tpu.memory_space<vmem>>, vector<48x128xf32>
    tpu.vector_store %arg16[%c0_106, %c640_107], %110 {strides = array<i32>} : memref<168x1152xf32, #tpu.memory_space<vmem>>, vector<48x128xf32>,
    %c16_108 = arith.constant 16 : index
    %c0_109 = arith.constant 0 : index
    %112 = vector.load %arg19[%c16_108, %c0_109] : memref<72x128xf32, #tpu.memory_space<vmem>>, vector<48x128xf32>
    %c0_110 = arith.constant 0 : index
    %c768_111 = arith.constant 768 : index
    %113 = vector.load %arg16[%c0_110, %c768_111] : memref<168x1152xf32, #tpu.memory_space<vmem>>, vector<48x128xf32>
    tpu.vector_store %arg16[%c0_110, %c768_111], %112 {strides = array<i32>} : memref<168x1152xf32, #tpu.memory_space<vmem>>, vector<48x128xf32>,
    %c17 = arith.constant 17 : index
    %c0_112 = arith.constant 0 : index
    %114 = vector.load %arg19[%c17, %c0_112] : memref<72x128xf32, #tpu.memory_space<vmem>>, vector<48x128xf32>
    %c0_113 = arith.constant 0 : index
    %c896_114 = arith.constant 896 : index
    %115 = vector.load %arg16[%c0_113, %c896_114] : memref<168x1152xf32, #tpu.memory_space<vmem>>, vector<48x128xf32>
    tpu.vector_store %arg16[%c0_113, %c896_114], %114 {strides = array<i32>} : memref<168x1152xf32, #tpu.memory_space<vmem>>, vector<48x128xf32>,
    %c18 = arith.constant 18 : index
    %c0_115 = arith.constant 0 : index
    %116 = vector.load %arg19[%c18, %c0_115] : memref<72x128xf32, #tpu.memory_space<vmem>>, vector<48x128xf32>
    %c0_116 = arith.constant 0 : index
    %c1024_117 = arith.constant 1024 : index
    %117 = vector.load %arg16[%c0_116, %c1024_117] : memref<168x1152xf32, #tpu.memory_space<vmem>>, vector<48x128xf32>
    tpu.vector_store %arg16[%c0_116, %c1024_117], %116 {strides = array<i32>} : memref<168x1152xf32, #tpu.memory_space<vmem>>, vector<48x128xf32>,
    %c0_118 = arith.constant 0 : index
    %c0_119 = arith.constant 0 : index
    %118 = vector.load %arg16[%c0_118, %c0_119] : memref<168x1152xf32, #tpu.memory_space<vmem>>, vector<48x1152xf32>
    %c0_120 = arith.constant 0 : index
    %c0_121 = arith.constant 0 : index
    %119 = vector.load %arg6[%c0_120, %c0_121] : memref<1152x128xf32, #tpu.memory_space<vmem>>, vector<1152x128xf32>
    %cst_122 = arith.constant dense<0.000000e+00> : vector<48x128xf32>
    %120 = tpu.matmul %118, %119, %cst_122 {dimension_numbers = #tpu.dot_dimension_numbers<[1], [0], [0], [1], [0, 0, 1, 1], [], []>} : vector<48x1152xf32>, vector<1152x128xf32>, vector<48x128xf32> -> vector<48x128xf32>
    %c0_123 = arith.constant 0 : index
    %c0_124 = arith.constant 0 : index
    %121 = vector.load %arg7[%c0_123, %c0_124] : memref<1x128xf32, #tpu.memory_space<vmem>>, vector<1x128xf32>
    %122 = vector.broadcast %121 : vector<1x128xf32> to vector<48x128xf32>
    %123 = arith.addf %120, %122 : vector<48x128xf32>
    %cst_125 = arith.constant 0.000000e+00 : f32
    %124 = vector.broadcast %cst_125 : f32 to vector<48x128xf32>
    %125 = arith.cmpf ogt, %123, %124 : vector<48x128xf32>
    %cst_126 = arith.constant 1.000000e-01 : f32
    %126 = vector.broadcast %cst_126 : f32 to vector<48x128xf32>
    %127 = arith.mulf %126, %123 : vector<48x128xf32>
    %128 = arith.select %125, %123, %127 : vector<48x128xi1>, vector<48x128xf32>
    %c0_127 = arith.constant 0 : index
    %c0_128 = arith.constant 0 : index
    %129 = vector.load %arg17[%c0_127, %c0_128] : memref<168x128xf32, #tpu.memory_space<vmem>>, vector<48x128xf32>
    tpu.vector_store %arg17[%c0_127, %c0_128], %128 {strides = array<i32>} : memref<168x128xf32, #tpu.memory_space<vmem>>, vector<48x128xf32>,
    %c0_129 = arith.constant 0 : index
    %c0_130 = arith.constant 0 : index
    %130 = vector.load %arg14[%c0_129, %c0_130] : memref<128x48xf32, #tpu.memory_space<vmem>>, vector<64x48xf32>
    %c0_131 = arith.constant 0 : index
    %c0_132 = arith.constant 0 : index
    %131 = vector.load %arg17[%c0_131, %c0_132] : memref<168x128xf32, #tpu.memory_space<vmem>>, vector<48x128xf32>
    %cst_133 = arith.constant dense<0.000000e+00> : vector<64x128xf32>
    %132 = tpu.matmul %130, %131, %cst_133 {dimension_numbers = #tpu.dot_dimension_numbers<[1], [0], [0], [1], [0, 0, 1, 1], [], []>} : vector<64x48xf32>, vector<48x128xf32>, vector<64x128xf32> -> vector<64x128xf32>
    %c64 = arith.constant 64 : index
    %c0_134 = arith.constant 0 : index
    %133 = vector.load %arg14[%c64, %c0_134] : memref<128x48xf32, #tpu.memory_space<vmem>>, vector<64x48xf32>
    %c0_135 = arith.constant 0 : index
    %c0_136 = arith.constant 0 : index
    %134 = vector.load %arg17[%c0_135, %c0_136] : memref<168x128xf32, #tpu.memory_space<vmem>>, vector<48x128xf32>
    %cst_137 = arith.constant dense<0.000000e+00> : vector<64x128xf32>
    %135 = tpu.matmul %133, %134, %cst_137 {dimension_numbers = #tpu.dot_dimension_numbers<[1], [0], [0], [1], [0, 0, 1, 1], [], []>} : vector<64x48xf32>, vector<48x128xf32>, vector<64x128xf32> -> vector<64x128xf32>
    %136 = vector.extract_strided_slice %132 {offsets = [0, 0], sizes = [32, 128], strides = [1, 1]} : vector<64x128xf32> to vector<32x128xf32>
    %137 = vector.extract_strided_slice %132 {offsets = [32, 0], sizes = [32, 128], strides = [1, 1]} : vector<64x128xf32> to vector<32x128xf32>
    %138 = arith.maximumf %136, %137 : vector<32x128xf32>
    %139 = vector.extract_strided_slice %135 {offsets = [0, 0], sizes = [32, 128], strides = [1, 1]} : vector<64x128xf32> to vector<32x128xf32>
    %140 = vector.extract_strided_slice %135 {offsets = [32, 0], sizes = [32, 128], strides = [1, 1]} : vector<64x128xf32> to vector<32x128xf32>
    %141 = arith.maximumf %139, %140 : vector<32x128xf32>
    %142 = arith.maximumf %138, %141 : vector<32x128xf32>
    %c0_138 = arith.constant 0 : index
    %c0_139 = arith.constant 0 : index
    %143 = vector.load %arg20[%c0_138, %c0_139] : memref<32x128xf32, #tpu.memory_space<vmem>>, vector<32x128xf32>
    tpu.vector_store %arg20[%c0_138, %c0_139], %142 {strides = array<i32>} : memref<32x128xf32, #tpu.memory_space<vmem>>, vector<32x128xf32>,
    %c0_140 = arith.constant 0 : index
    %c0_141 = arith.constant 0 : index
    %144 = vector.load %arg20[%c0_140, %c0_141] : memref<32x128xf32, #tpu.memory_space<vmem>>, vector<16x128xf32>
    %c0_142 = arith.constant 0 : index
    %c0_143 = arith.constant 0 : index
    %145 = vector.load %arg16[%c0_142, %c0_143] : memref<168x1152xf32, #tpu.memory_space<vmem>>, vector<16x128xf32>
    tpu.vector_store %arg16[%c0_142, %c0_143], %144 {strides = array<i32>} : memref<168x1152xf32, #tpu.memory_space<vmem>>, vector<16x128xf32>,
    %c1_144 = arith.constant 1 : index
    %c0_145 = arith.constant 0 : index
    %146 = vector.load %arg20[%c1_144, %c0_145] : memref<32x128xf32, #tpu.memory_space<vmem>>, vector<16x128xf32>
    %c0_146 = arith.constant 0 : index
    %c128_147 = arith.constant 128 : index
    %147 = vector.load %arg16[%c0_146, %c128_147] : memref<168x1152xf32, #tpu.memory_space<vmem>>, vector<16x128xf32>
    tpu.vector_store %arg16[%c0_146, %c128_147], %146 {strides = array<i32>} : memref<168x1152xf32, #tpu.memory_space<vmem>>, vector<16x128xf32>,
    %c2_148 = arith.constant 2 : index
    %c0_149 = arith.constant 0 : index
    %148 = vector.load %arg20[%c2_148, %c0_149] : memref<32x128xf32, #tpu.memory_space<vmem>>, vector<16x128xf32>
    %c0_150 = arith.constant 0 : index
    %c256_151 = arith.constant 256 : index
    %149 = vector.load %arg16[%c0_150, %c256_151] : memref<168x1152xf32, #tpu.memory_space<vmem>>, vector<16x128xf32>
    tpu.vector_store %arg16[%c0_150, %c256_151], %148 {strides = array<i32>} : memref<168x1152xf32, #tpu.memory_space<vmem>>, vector<16x128xf32>,
    %c5 = arith.constant 5 : index
    %c0_152 = arith.constant 0 : index
    %150 = vector.load %arg20[%c5, %c0_152] : memref<32x128xf32, #tpu.memory_space<vmem>>, vector<16x128xf32>
    %c0_153 = arith.constant 0 : index
    %c384_154 = arith.constant 384 : index
    %151 = vector.load %arg16[%c0_153, %c384_154] : memref<168x1152xf32, #tpu.memory_space<vmem>>, vector<16x128xf32>
    tpu.vector_store %arg16[%c0_153, %c384_154], %150 {strides = array<i32>} : memref<168x1152xf32, #tpu.memory_space<vmem>>, vector<16x128xf32>,
    %c6 = arith.constant 6 : index
    %c0_155 = arith.constant 0 : index
    %152 = vector.load %arg20[%c6, %c0_155] : memref<32x128xf32, #tpu.memory_space<vmem>>, vector<16x128xf32>
    %c0_156 = arith.constant 0 : index
    %c512_157 = arith.constant 512 : index
    %153 = vector.load %arg16[%c0_156, %c512_157] : memref<168x1152xf32, #tpu.memory_space<vmem>>, vector<16x128xf32>
    tpu.vector_store %arg16[%c0_156, %c512_157], %152 {strides = array<i32>} : memref<168x1152xf32, #tpu.memory_space<vmem>>, vector<16x128xf32>,
    %c7 = arith.constant 7 : index
    %c0_158 = arith.constant 0 : index
    %154 = vector.load %arg20[%c7, %c0_158] : memref<32x128xf32, #tpu.memory_space<vmem>>, vector<16x128xf32>
    %c0_159 = arith.constant 0 : index
    %c640_160 = arith.constant 640 : index
    %155 = vector.load %arg16[%c0_159, %c640_160] : memref<168x1152xf32, #tpu.memory_space<vmem>>, vector<16x128xf32>
    tpu.vector_store %arg16[%c0_159, %c640_160], %154 {strides = array<i32>} : memref<168x1152xf32, #tpu.memory_space<vmem>>, vector<16x128xf32>,
    %c10_161 = arith.constant 10 : index
    %c0_162 = arith.constant 0 : index
    %156 = vector.load %arg20[%c10_161, %c0_162] : memref<32x128xf32, #tpu.memory_space<vmem>>, vector<16x128xf32>
    %c0_163 = arith.constant 0 : index
    %c768_164 = arith.constant 768 : index
    %157 = vector.load %arg16[%c0_163, %c768_164] : memref<168x1152xf32, #tpu.memory_space<vmem>>, vector<16x128xf32>
    tpu.vector_store %arg16[%c0_163, %c768_164], %156 {strides = array<i32>} : memref<168x1152xf32, #tpu.memory_space<vmem>>, vector<16x128xf32>,
    %c11 = arith.constant 11 : index
    %c0_165 = arith.constant 0 : index
    %158 = vector.load %arg20[%c11, %c0_165] : memref<32x128xf32, #tpu.memory_space<vmem>>, vector<16x128xf32>
    %c0_166 = arith.constant 0 : index
    %c896_167 = arith.constant 896 : index
    %159 = vector.load %arg16[%c0_166, %c896_167] : memref<168x1152xf32, #tpu.memory_space<vmem>>, vector<16x128xf32>
    tpu.vector_store %arg16[%c0_166, %c896_167], %158 {strides = array<i32>} : memref<168x1152xf32, #tpu.memory_space<vmem>>, vector<16x128xf32>,
    %c12 = arith.constant 12 : index
    %c0_168 = arith.constant 0 : index
    %160 = vector.load %arg20[%c12, %c0_168] : memref<32x128xf32, #tpu.memory_space<vmem>>, vector<16x128xf32>
    %c0_169 = arith.constant 0 : index
    %c1024_170 = arith.constant 1024 : index
    %161 = vector.load %arg16[%c0_169, %c1024_170] : memref<168x1152xf32, #tpu.memory_space<vmem>>, vector<16x128xf32>
    tpu.vector_store %arg16[%c0_169, %c1024_170], %160 {strides = array<i32>} : memref<168x1152xf32, #tpu.memory_space<vmem>>, vector<16x128xf32>,
    %c0_171 = arith.constant 0 : index
    %c0_172 = arith.constant 0 : index
    %162 = vector.load %arg16[%c0_171, %c0_172] : memref<168x1152xf32, #tpu.memory_space<vmem>>, vector<16x1152xf32>
    %c0_173 = arith.constant 0 : index
    %c0_174 = arith.constant 0 : index
    %163 = vector.load %arg8[%c0_173, %c0_174] : memref<1152x128xf32, #tpu.memory_space<vmem>>, vector<1152x128xf32>
    %cst_175 = arith.constant dense<0.000000e+00> : vector<16x128xf32>
    %164 = tpu.matmul %162, %163, %cst_175 {dimension_numbers = #tpu.dot_dimension_numbers<[1], [0], [0], [1], [0, 0, 1, 1], [], []>} : vector<16x1152xf32>, vector<1152x128xf32>, vector<16x128xf32> -> vector<16x128xf32>
    %c0_176 = arith.constant 0 : index
    %c0_177 = arith.constant 0 : index
    %165 = vector.load %arg9[%c0_176, %c0_177] : memref<1x128xf32, #tpu.memory_space<vmem>>, vector<1x128xf32>
    %166 = vector.broadcast %165 : vector<1x128xf32> to vector<16x128xf32>
    %167 = arith.addf %164, %166 : vector<16x128xf32>
    %cst_178 = arith.constant 0.000000e+00 : f32
    %168 = vector.broadcast %cst_178 : f32 to vector<16x128xf32>
    %169 = arith.cmpf ogt, %167, %168 : vector<16x128xf32>
    %cst_179 = arith.constant 1.000000e-01 : f32
    %170 = vector.broadcast %cst_179 : f32 to vector<16x128xf32>
    %171 = arith.mulf %170, %167 : vector<16x128xf32>
    %172 = arith.select %169, %167, %171 : vector<16x128xi1>, vector<16x128xf32>
    %c0_180 = arith.constant 0 : index
    %c0_181 = arith.constant 0 : index
    %173 = vector.load %arg17[%c0_180, %c0_181] : memref<168x128xf32, #tpu.memory_space<vmem>>, vector<16x128xf32>
    tpu.vector_store %arg17[%c0_180, %c0_181], %172 {strides = array<i32>} : memref<168x128xf32, #tpu.memory_space<vmem>>, vector<16x128xf32>,
    %c0_182 = arith.constant 0 : index
    %c0_183 = arith.constant 0 : index
    %174 = vector.load %arg17[%c0_182, %c0_183] : memref<168x128xf32, #tpu.memory_space<vmem>>, vector<1x128xf32>
    %c0_184 = arith.constant 0 : index
    %c0_185 = arith.constant 0 : index
    %175 = vector.load %arg16[%c0_184, %c0_185] : memref<168x1152xf32, #tpu.memory_space<vmem>>, vector<1x128xf32>
    tpu.vector_store %arg16[%c0_184, %c0_185], %174 {strides = array<i32>} : memref<168x1152xf32, #tpu.memory_space<vmem>>, vector<1x128xf32>,
    %c1_186 = arith.constant 1 : index
    %c0_187 = arith.constant 0 : index
    %176 = vector.load %arg17[%c1_186, %c0_187] : memref<168x128xf32, #tpu.memory_space<vmem>>, vector<1x128xf32>
    %c0_188 = arith.constant 0 : index
    %c128_189 = arith.constant 128 : index
    %177 = vector.load %arg16[%c0_188, %c128_189] : memref<168x1152xf32, #tpu.memory_space<vmem>>, vector<1x128xf32>
    tpu.vector_store %arg16[%c0_188, %c128_189], %176 {strides = array<i32>} : memref<168x1152xf32, #tpu.memory_space<vmem>>, vector<1x128xf32>,
    %c2_190 = arith.constant 2 : index
    %c0_191 = arith.constant 0 : index
    %178 = vector.load %arg17[%c2_190, %c0_191] : memref<168x128xf32, #tpu.memory_space<vmem>>, vector<1x128xf32>
    %c0_192 = arith.constant 0 : index
    %c256_193 = arith.constant 256 : index
    %179 = vector.load %arg16[%c0_192, %c256_193] : memref<168x1152xf32, #tpu.memory_space<vmem>>, vector<1x128xf32>
    tpu.vector_store %arg16[%c0_192, %c256_193], %178 {strides = array<i32>} : memref<168x1152xf32, #tpu.memory_space<vmem>>, vector<1x128xf32>,
    %c5_194 = arith.constant 5 : index
    %c0_195 = arith.constant 0 : index
    %180 = vector.load %arg17[%c5_194, %c0_195] : memref<168x128xf32, #tpu.memory_space<vmem>>, vector<1x128xf32>
    %c0_196 = arith.constant 0 : index
    %c384_197 = arith.constant 384 : index
    %181 = vector.load %arg16[%c0_196, %c384_197] : memref<168x1152xf32, #tpu.memory_space<vmem>>, vector<1x128xf32>
    tpu.vector_store %arg16[%c0_196, %c384_197], %180 {strides = array<i32>} : memref<168x1152xf32, #tpu.memory_space<vmem>>, vector<1x128xf32>,
    %c6_198 = arith.constant 6 : index
    %c0_199 = arith.constant 0 : index
    %182 = vector.load %arg17[%c6_198, %c0_199] : memref<168x128xf32, #tpu.memory_space<vmem>>, vector<1x128xf32>
    %c0_200 = arith.constant 0 : index
    %c512_201 = arith.constant 512 : index
    %183 = vector.load %arg16[%c0_200, %c512_201] : memref<168x1152xf32, #tpu.memory_space<vmem>>, vector<1x128xf32>
    tpu.vector_store %arg16[%c0_200, %c512_201], %182 {strides = array<i32>} : memref<168x1152xf32, #tpu.memory_space<vmem>>, vector<1x128xf32>,
    %c7_202 = arith.constant 7 : index
    %c0_203 = arith.constant 0 : index
    %184 = vector.load %arg17[%c7_202, %c0_203] : memref<168x128xf32, #tpu.memory_space<vmem>>, vector<1x128xf32>
    %c0_204 = arith.constant 0 : index
    %c640_205 = arith.constant 640 : index
    %185 = vector.load %arg16[%c0_204, %c640_205] : memref<168x1152xf32, #tpu.memory_space<vmem>>, vector<1x128xf32>
    tpu.vector_store %arg16[%c0_204, %c640_205], %184 {strides = array<i32>} : memref<168x1152xf32, #tpu.memory_space<vmem>>, vector<1x128xf32>,
    %c10_206 = arith.constant 10 : index
    %c0_207 = arith.constant 0 : index
    %186 = vector.load %arg17[%c10_206, %c0_207] : memref<168x128xf32, #tpu.memory_space<vmem>>, vector<1x128xf32>
    %c0_208 = arith.constant 0 : index
    %c768_209 = arith.constant 768 : index
    %187 = vector.load %arg16[%c0_208, %c768_209] : memref<168x1152xf32, #tpu.memory_space<vmem>>, vector<1x128xf32>
    tpu.vector_store %arg16[%c0_208, %c768_209], %186 {strides = array<i32>} : memref<168x1152xf32, #tpu.memory_space<vmem>>, vector<1x128xf32>,
    %c11_210 = arith.constant 11 : index
    %c0_211 = arith.constant 0 : index
    %188 = vector.load %arg17[%c11_210, %c0_211] : memref<168x128xf32, #tpu.memory_space<vmem>>, vector<1x128xf32>
    %c0_212 = arith.constant 0 : index
    %c896_213 = arith.constant 896 : index
    %189 = vector.load %arg16[%c0_212, %c896_213] : memref<168x1152xf32, #tpu.memory_space<vmem>>, vector<1x128xf32>
    tpu.vector_store %arg16[%c0_212, %c896_213], %188 {strides = array<i32>} : memref<168x1152xf32, #tpu.memory_space<vmem>>, vector<1x128xf32>,
    %c12_214 = arith.constant 12 : index
    %c0_215 = arith.constant 0 : index
    %190 = vector.load %arg17[%c12_214, %c0_215] : memref<168x128xf32, #tpu.memory_space<vmem>>, vector<1x128xf32>
    %c0_216 = arith.constant 0 : index
    %c1024_217 = arith.constant 1024 : index
    %191 = vector.load %arg16[%c0_216, %c1024_217] : memref<168x1152xf32, #tpu.memory_space<vmem>>, vector<1x128xf32>
    tpu.vector_store %arg16[%c0_216, %c1024_217], %190 {strides = array<i32>} : memref<168x1152xf32, #tpu.memory_space<vmem>>, vector<1x128xf32>,
    %c0_218 = arith.constant 0 : index
    %c0_219 = arith.constant 0 : index
    %192 = vector.load %arg16[%c0_218, %c0_219] : memref<168x1152xf32, #tpu.memory_space<vmem>>, vector<8x1152xf32>
    %c0_220 = arith.constant 0 : index
    %c0_221 = arith.constant 0 : index
    %193 = vector.load %arg10[%c0_220, %c0_221] : memref<1152x128xf32, #tpu.memory_space<vmem>>, vector<1152x128xf32>
    %cst_222 = arith.constant dense<0.000000e+00> : vector<8x128xf32>
    %194 = tpu.matmul %192, %193, %cst_222 {dimension_numbers = #tpu.dot_dimension_numbers<[1], [0], [0], [1], [0, 0, 1, 1], [], []>} : vector<8x1152xf32>, vector<1152x128xf32>, vector<8x128xf32> -> vector<8x128xf32>
    %195 = vector.extract_strided_slice %194 {offsets = [0, 0], sizes = [1, 128], strides = [1, 1]} : vector<8x128xf32> to vector<1x128xf32>
    %c0_223 = arith.constant 0 : index
    %c0_224 = arith.constant 0 : index
    %196 = vector.load %arg11[%c0_223, %c0_224] : memref<1x128xf32, #tpu.memory_space<vmem>>, vector<1x128xf32>
    %197 = arith.addf %195, %196 : vector<1x128xf32>
    %c0_225 = arith.constant 0 : index
    %c0_226 = arith.constant 0 : index
    %c0_227 = arith.constant 0 : index
    %198 = vector.load %arg15[%c0_225, %c0_226, %c0_227] : memref<1x1x128xf32, #tpu.memory_space<vmem>>, vector<1x1x128xf32>
    %199 = vector.shape_cast %198 : vector<1x1x128xf32> to vector<1x128xf32>
    %200 = vector.shape_cast %197 : vector<1x128xf32> to vector<1x1x128xf32>
    tpu.vector_store %arg15[%c0_225, %c0_226, %c0_227], %200 {strides = array<i32>} : memref<1x1x128xf32, #tpu.memory_space<vmem>>, vector<1x1x128xf32>,
    return
  }
  func.func @transform_0(%arg0: i32) -> (i32, i32, i32) {
    %c0_i32 = arith.constant 0 : i32
    %c0_i32_0 = arith.constant 0 : i32
    %c0_i32_1 = arith.constant 0 : i32
    return %arg0, %c0_i32, %c0_i32_0 : i32, i32, i32
  }
  func.func @transform_1(%arg0: i32) -> (i32, i32) {
    %c0_i32 = arith.constant 0 : i32
    %c0_i32_0 = arith.constant 0 : i32
    %c0_i32_1 = arith.constant 0 : i32
    return %c0_i32, %c0_i32_0 : i32, i32
  }
  func.func @transform_2(%arg0: i32) -> (i32, i32) {
    %c0_i32 = arith.constant 0 : i32
    %c0_i32_0 = arith.constant 0 : i32
    %c0_i32_1 = arith.constant 0 : i32
    return %c0_i32, %c0_i32_0 : i32, i32
  }
  func.func @transform_3(%arg0: i32) -> (i32, i32) {
    %c0_i32 = arith.constant 0 : i32
    %c0_i32_0 = arith.constant 0 : i32
    %c0_i32_1 = arith.constant 0 : i32
    return %c0_i32, %c0_i32_0 : i32, i32
  }
  func.func @transform_4(%arg0: i32) -> (i32, i32) {
    %c0_i32 = arith.constant 0 : i32
    %c0_i32_0 = arith.constant 0 : i32
    %c0_i32_1 = arith.constant 0 : i32
    return %c0_i32, %c0_i32_0 : i32, i32
  }
  func.func @transform_5(%arg0: i32) -> (i32, i32) {
    %c0_i32 = arith.constant 0 : i32
    %c0_i32_0 = arith.constant 0 : i32
    %c0_i32_1 = arith.constant 0 : i32
    return %c0_i32, %c0_i32_0 : i32, i32
  }
  func.func @transform_6(%arg0: i32) -> (i32, i32) {
    %c0_i32 = arith.constant 0 : i32
    %c0_i32_0 = arith.constant 0 : i32
    %c0_i32_1 = arith.constant 0 : i32
    return %c0_i32, %c0_i32_0 : i32, i32
  }
  func.func @transform_7(%arg0: i32) -> (i32, i32) {
    %c0_i32 = arith.constant 0 : i32
    %c0_i32_0 = arith.constant 0 : i32
    %c0_i32_1 = arith.constant 0 : i32
    return %c0_i32, %c0_i32_0 : i32, i32
  }
  func.func @transform_8(%arg0: i32) -> (i32, i32) {
    %c0_i32 = arith.constant 0 : i32
    %c0_i32_0 = arith.constant 0 : i32
    %c0_i32_1 = arith.constant 0 : i32
    return %c0_i32, %c0_i32_0 : i32, i32
  }
  func.func @transform_9(%arg0: i32) -> (i32, i32) {
    %c0_i32 = arith.constant 0 : i32
    %c0_i32_0 = arith.constant 0 : i32
    %c0_i32_1 = arith.constant 0 : i32
    return %c0_i32, %c0_i32_0 : i32, i32
  }
  func.func @transform_10(%arg0: i32) -> (i32, i32) {
    %c0_i32 = arith.constant 0 : i32
    %c0_i32_0 = arith.constant 0 : i32
    %c0_i32_1 = arith.constant 0 : i32
    return %c0_i32, %c0_i32_0 : i32, i32
  }
  func.func @transform_11(%arg0: i32) -> (i32, i32) {
    %c0_i32 = arith.constant 0 : i32
    %c0_i32_0 = arith.constant 0 : i32
    %c0_i32_1 = arith.constant 0 : i32
    return %c0_i32, %c0_i32_0 : i32, i32
  }
  func.func @transform_12(%arg0: i32) -> (i32, i32) {
    %c0_i32 = arith.constant 0 : i32
    %c0_i32_0 = arith.constant 0 : i32
    %c0_i32_1 = arith.constant 0 : i32
    return %c0_i32, %c0_i32_0 : i32, i32
  }
  func.func @transform_13(%arg0: i32) -> (i32, i32) {
    %c0_i32 = arith.constant 0 : i32
    %c0_i32_0 = arith.constant 0 : i32
    %c0_i32_1 = arith.constant 0 : i32
    return %c0_i32, %c0_i32_0 : i32, i32
  }
  func.func @transform_14(%arg0: i32) -> (i32, i32, i32) {
    %c0_i32 = arith.constant 0 : i32
    %c0_i32_0 = arith.constant 0 : i32
    %c0_i32_1 = arith.constant 0 : i32
    return %arg0, %c0_i32, %c0_i32_0 : i32, i32, i32
  }
}

</mosaic_0001>

<bundles_post_ra>
// kernel: cnn_forward.1
= control target key start
LH: loop header
LB: loop body
LE: loop exit
PB: predicated region body
PF: predicated region fallthrough
CT: control target
= control target key end

     0   :  { %s12564_s0 = inlined_call_operand.vmem [shape: f32[2,576,128], index: 0, kind: input, shape index: {}]   ;;  %s12565_s1 = inlined_call_operand.vmem [shape: f32[128,128], index: 1, kind: input, shape index: {}]   ;;  %s12566_s2 = inlined_call_operand.vmem [shape: f32[1,128], index: 2, kind: input, shape index: {}]   ;;  %s12567_s3 = inlined_call_operand.vmem [shape: f32[1152,128], index: 3, kind: input, shape index: {}]   ;;  %s12568_s4 = inlined_call_operand.vmem [shape: f32[1,128], index: 4, kind: input, shape index: {}]   ;;  %s12569_s5 = inlined_call_operand.vmem [shape: f32[1152,128], index: 5, kind: input, shape index: {}]   ;;  %s12570_s6 = inlined_call_operand.vmem [shape: f32[1,128], index: 6, kind: input, shape index: {}]   ;;  %s12571_s7 = inlined_call_operand.vmem [shape: f32[1152,128], index: 7, kind: input, shape index: {}]   ;;  %s12572_s8 = inlined_call_operand.vmem [shape: f32[1,128], index: 8, kind: input, shape index: {}]   ;;  %s12573_s9 = inlined_call_operand.vmem [shape: f32[1152,128], index: 9, kind: input, shape index: {}]   ;;  %s12574_s10 = inlined_call_operand.vmem [shape: f32[1,128], index: 10, kind: input, shape index: {}]   ;;  %s12575_s11 = inlined_call_operand.vmem [shape: f32[200,144], index: 11, kind: input, shape index: {}]   ;;  %s12576_s12 = inlined_call_operand.vmem [shape: f32[288,168], index: 12, kind: input, shape index: {}]   ;;  %s12577_s13 = inlined_call_operand.vmem [shape: f32[128,48], index: 13, kind: input, shape index: {}]   ;;  %s12578_s14 = inlined_call_operand.hbm [shape: f32[2,1,128], index: 14, kind: output, shape index: {}]  }
   0x1   :  { %12584 = sst [smem:[#allocation14_spill]] %s12564_s0 }
   0x2   :  { %12585 = sst [smem:[#allocation15_spill]] %s12565_s1 }
   0x3   :  { %12586 = sst [smem:[#allocation16_spill]] %s12566_s2 }
   0x4   :  { %19 = vsyncpa [#allocation8], 0 }
   0x5   :  { %21 = vsyncpa [#allocation8 + $0x1], 0  ;;  %s8947_s29 = smov 0   ;;  %s8949_s30 = smov 0  }
   0x6   :  { %s8951_s15 = smov 0   ;;  %s8953_s16 = smov 0  }
   0x7 LB: > { %12587 = sst [smem:[#allocation10_spill]] %s8862_s15  ;;  %s8968_s17 = sadd.s32 4294967295, %s8866_s16   ;;  %s8866_s16 = sphi %s8953_s16, %s12625_s16   ;;  %s8862_s15 = sphi %s8951_s15, %s12622_s15   ;;  %s8858_s30 = sphi %s8949_s30, %s12624_s30   ;;  %s8854_s29 = sphi %s8947_s29, %s12623_s29  }
   0x8   : > { %s6316_s18 = sadd.s32 4294967294, %s8866_s16   ;;  %s8972_s19 = sadd.s32 1, %s8866_s16  }
   0x9   : > { %s333_s20 = sadd.s32 1, %s8862_s15  ;;  %s330_s21 = ssub.s32 %s8866_s16, %s8972_s19 }
   0xa   : > { %p343_p0 = scmp.ne.s32.totalorder %s8862_s15, %s8858_s30  ;;  %p331_p1 = scmp.eq.s32.totalorder %s330_s21, 0 }
   0xb   : > { %p344_p2 = scmp.eq.s32.totalorder %s8968_s17, 1  ;;  %p349_p3 = scmp.ne.s32.totalorder %s8858_s30, %s8854_s29 }
   0xc   : > { %p350_p4 = scmp.eq.s32.totalorder %s6316_s18, 1  ;;  %p6319_p7 = scmp.ge.s32.totalorder %s8866_s16, 1 }
   0xd   : > { %s8983_s22 = scalar_select %p331_p1, %s8862_s15, %s333_s20  }
   0xe   : > { %p8985_p5 = por %p344_p2, %p343_p0  ;;  %p8989_p6 = por %p350_p4, %p349_p3 }
   0xf   : > { %12588 = sst [smem:[#allocation11_spill]] %s8983_s22  ;;  %p415_p8 = scmp.lt.s32.totalorder %s8866_s16, 3 }
  0x11   : > { %p416_p9 = pnand %p6319_p7, %p415_p8 }
  0x13   : > { %419 = sbr.rel (%p416_p9) target bundleno = 2799 (0xaef), region = 76 }
  0x1a   : > { %s12591_s1 = sld [smem:[#allocation15_spill]]  ;;  %p460_p10 = scmp.lt.s32.totalorder %s8968_s17, 1  ;;  %vm1536_vm0 = vcmask 130048  }
  0x1b   : > { %s12592_s0 = sld [smem:[#allocation14_spill]]  ;;  %s12593_s2 = sld [smem:[#allocation16_spill]] }
  0x1c   : > { %s461_s28 = scalar_select %p460_p10, %s8968_s17, 1 }
  0x1e   : > { %s8761_s22 = smul.u32 576, %s461_s28 }
  0x20   : > { %v483_v0 = vld [vmem:[%s12591_s1] sm:$0xff]  ;;  %v484_v1 = vld [vmem:[%s12591_s1 + $0x8] sm:$0xff]  ;;  %v485_v2 = vld [vmem:[%s12591_s1 + $0x10] sm:$0xff] }
  0x21   : > { %v9005_v3 = vpack.c.bf16 %v484_v1, %v483_v0  ;;  %v486_v4 = vld [vmem:[%s12591_s1 + $0x18] sm:$0xff]  ;;  %v487_v6 = vld [vmem:[%s12591_s1 + $0x20] sm:$0xff]  ;;  %v488_v7 = vld [vmem:[%s12591_s1 + $0x28] sm:$0xff]  ;;  %s9036_s27 = scalar_lea.vmem %s12592_s0, %s8761_s22  ;;  %s458_s22 = sand.u32 1, %s8858_s30  }
  0x22   : > { %v9010_v5 = vpack.c.bf16 %v486_v4, %v485_v2  ;;  %v9025_v8 = vpack.c.bf16 %v488_v7, %v487_v6  ;;  %v489_v9 = vld [vmem:[%s12591_s1 + $0x30] sm:$0xff]  ;;  %v490_v10 = vld [vmem:[%s12591_s1 + $0x38] sm:$0xff]  ;;  %v465_v11 = vld [vmem:[%s9036_s27] sm:$0xff]  ;;  %s459_s15 = scalar_lea.vmem [#allocation7], %s458_s22  ;;  %s6249_s28 = scalar_lea.sflag [#allocation8], %s458_s22 }
  0x23   : > { %7646 = vmatprep.subr.bf16.mxu0 %v9005_v3  ;;  %7678 = vmatprep.subr.bf16.mxu1 %v9005_v3  ;;  %v715_v12 = vld [vmem:[%s9036_s27 + $0x90] sm:$0xff]  ;;  %v9044_v13 = vpack.c.bf16 %v490_v10, %v489_v9  ;;  %v491_v14 = vld [vmem:[%s12591_s1 + $0x40] sm:$0xff]  ;;  %v492_v15 = vld [vmem:[%s12591_s1 + $0x48] sm:$0xff]  ;;  %s6261_s21 = sshll.u32 %s459_s15, 4  ;;  %s12524_s21 = int_to_ptr.vmem [resolvable:$true] %s6261_s21 }
  0x24   : > { %7648 = vmatpush3.bf16.msra.mxu0 %v9005_v3  ;;  %7680 = vmatpush3.bf16.msra.mxu1 %v9005_v3  ;;  %v9056_v16 = vpack.c.bf16 %v492_v15, %v491_v14  ;;  %v493_v17 = vld [vmem:[%s12591_s1 + $0x50] sm:$0xff]  ;;  %v494_v18 = vld [vmem:[%s12591_s1 + $0x58] sm:$0xff]  ;;  %v495_v20 = vld [vmem:[%s12591_s1 + $0x60] sm:$0xff]  ;;  %s8804_s18 = scalar_lea.vmem %s12524_s21, 16 }
  0x25   : > { %7650 = vmatprep.subr.bf16.mxu0 %v9010_v5  ;;  %7682 = vmatprep.subr.bf16.mxu1 %v9010_v5  ;;  %v9068_v19 = vpack.c.bf16 %v494_v18, %v493_v17  ;;  %v496_v21 = vld [vmem:[%s12591_s1 + $0x68] sm:$0xff]  ;;  %v497_v23 = vld [vmem:[%s12591_s1 + $0x70] sm:$0xff]  ;;  %v498_v24 = vld [vmem:[%s12591_s1 + $0x78] sm:$0xff]  ;;  %p8805_p11 = scmp.ne.s32.totalorder %s12524_s21, %s8804_s18 }
  0x26   : > { %7187 = vmatprep.mubr.f32.mxu0 %v465_v11  ;;  %7246 = vmatprep.mubr.f32.mxu1 %v715_v12  ;;  %v9080_v22 = vpack.c.bf16 %v496_v21, %v495_v20  ;;  %v9092_v25 = vpack.c.bf16 %v498_v24, %v497_v23  ;;  %v466_v26 = vld [vmem:[%s9036_s27 + $0x8] sm:$0xff]  ;;  %v716_v27 = vld [vmem:[%s9036_s27 + $0x98] sm:$0xff]  ;;  %v467_v28 = vld [vmem:[%s9036_s27 + $0x10] sm:$0xff] }
  0x27   : > { %v717_v29 = vld [vmem:[%s9036_s27 + $0xa0] sm:$0xff]  ;;  %v468_v30 = vld [vmem:[%s9036_s27 + $0x18] sm:$0xff]  ;;  %v718_v31 = vld [vmem:[%s9036_s27 + $0xa8] sm:$0xff]  ;;  %p8806_p12 = pnand %p8805_p11, %p8985_p5 }
  0x28   : > { %7652 = vmatpush3.bf16.msra.mxu0 %v9010_v5  ;;  %7684 = vmatpush3.bf16.msra.mxu1 %v9010_v5  ;;  %v469_v32 = vld [vmem:[%s9036_s27 + $0x20] sm:$0xff]  ;;  %v719_v33 = vld [vmem:[%s9036_s27 + $0xb0] sm:$0xff]  ;;  %v470_v34 = vld [vmem:[%s9036_s27 + $0x28] sm:$0xff] }
  0x29   : > { %7654 = vmatprep.subr.bf16.mxu0 %v9025_v8  ;;  %7686 = vmatprep.subr.bf16.mxu1 %v9025_v8  ;;  %v720_v35 = vld [vmem:[%s9036_s27 + $0xb8] sm:$0xff]  ;;  %v471_v36 = vld [vmem:[%s9036_s27 + $0x30] sm:$0xff]  ;;  %v721_v37 = vld [vmem:[%s9036_s27 + $0xc0] sm:$0xff]  ;;  %p8807_p13 = pneg %p8806_p12 }
  0x2a   : > { %v472_v38 = vld [vmem:[%s9036_s27 + $0x38] sm:$0xff]  ;;  %v722_v39 = vld [vmem:[%s9036_s27 + $0xc8] sm:$0xff]  ;;  %v473_v40 = vld [vmem:[%s9036_s27 + $0x40] sm:$0xff] }
  0x2b   : > { %v723_v41 = vld [vmem:[%s9036_s27 + $0xd0] sm:$0xff]  ;;  %v474_v42 = vld [vmem:[%s9036_s27 + $0x48] sm:$0xff]  ;;  %v724_v43 = vld [vmem:[%s9036_s27 + $0xd8] sm:$0xff] }
  0x2c   : > { %7656 = vmatpush3.bf16.msra.mxu0 %v9025_v8  ;;  %7688 = vmatpush3.bf16.msra.mxu1 %v9025_v8  ;;  %v475_v44 = vld [vmem:[%s9036_s27 + $0x50] sm:$0xff]  ;;  %v725_v45 = vld [vmem:[%s9036_s27 + $0xe0] sm:$0xff]  ;;  %v476_v46 = vld [vmem:[%s9036_s27 + $0x58] sm:$0xff] }
  0x2d   : > { %7658 = vmatprep.subr.bf16.mxu0 %v9044_v13  ;;  %7690 = vmatprep.subr.bf16.mxu1 %v9044_v13  ;;  %v726_v47 = vld [vmem:[%s9036_s27 + $0xe8] sm:$0xff]  ;;  %v477_v48 = vld [vmem:[%s9036_s27 + $0x60] sm:$0xff]  ;;  %v727_v49 = vld [vmem:[%s9036_s27 + $0xf0] sm:$0xff] }
  0x2e   : > { %v478_v50 = vld [vmem:[%s9036_s27 + $0x68] sm:$0xff]  ;;  %v728_v51 = vld [vmem:[%s9036_s27 + $0xf8] sm:$0xff]  ;;  %v479_v52 = vld [vmem:[%s9036_s27 + $0x70] sm:$0xff] }
  0x2f   : > { %v729_v53 = vld [vmem:[%s9036_s27 + $0x100] sm:$0xff]  ;;  %v480_v54 = vld [vmem:[%s9036_s27 + $0x78] sm:$0xff]  ;;  %v730_v55 = vld [vmem:[%s9036_s27 + $0x108] sm:$0xff] }
  0x30   : > { %7660 = vmatpush3.bf16.msra.mxu0 %v9044_v13  ;;  %7692 = vmatpush3.bf16.msra.mxu1 %v9044_v13  ;;  %v481_v56 = vld [vmem:[%s9036_s27 + $0x80] sm:$0xff]  ;;  %v731_v57 = vld [vmem:[%s9036_s27 + $0x110] sm:$0xff]  ;;  %v482_v58 = vld [vmem:[%s9036_s27 + $0x88] sm:$0xff] }
  0x31   : > { %7662 = vmatprep.subr.bf16.mxu0 %v9056_v16  ;;  %7694 = vmatprep.subr.bf16.mxu1 %v9056_v16  ;;  %v732_v59 = vld [vmem:[%s9036_s27 + $0x118] sm:$0xff]  ;;  %v960_v60 = vld [vmem:[%s9036_s27 + $0x120] sm:$0xff]  ;;  %v1205_v61 = vld [vmem:[%s9036_s27 + $0x1b0] sm:$0xff] }
  0x32   : > { %v961_v62 = vld [vmem:[%s9036_s27 + $0x128] sm:$0xff]  ;;  %v1206_v63 = vld [vmem:[%s9036_s27 + $0x1b8] sm:$0xff]  ;;  %v962_v0 = vld [vmem:[%s9036_s27 + $0x130] sm:$0xff] }
  0x33   : > { %v1207_v1 = vld [vmem:[%s9036_s27 + $0x1c0] sm:$0xff]  ;;  %v963_v2 = vld [vmem:[%s9036_s27 + $0x138] sm:$0xff]  ;;  %v965_v6 = vld [vmem:[%s9036_s27 + $0x148] sm:$0xff] }
  0x34   : > { %7664 = vmatpush3.bf16.msra.mxu0 %v9056_v16  ;;  %7696 = vmatpush3.bf16.msra.mxu1 %v9056_v16  ;;  %v964_v4 = vld [vmem:[%s9036_s27 + $0x140] sm:$0xff]  ;;  %v1210_v7 = vld [vmem:[%s9036_s27 + $0x1d8] sm:$0xff]  ;;  %v1212_v11 = vld [vmem:[%s9036_s27 + $0x1e8] sm:$0xff] }
  0x35   : > { %7666 = vmatprep.subr.bf16.mxu0 %v9068_v19  ;;  %7698 = vmatprep.subr.bf16.mxu1 %v9068_v19  ;;  %v1211_v9 = vld [vmem:[%s9036_s27 + $0x1e0] sm:$0xff]  ;;  %v967_v10 = vld [vmem:[%s9036_s27 + $0x158] sm:$0xff]  ;;  %v969_v14 = vld [vmem:[%s9036_s27 + $0x168] sm:$0xff] }
  0x36   : > { %v968_v12 = vld [vmem:[%s9036_s27 + $0x160] sm:$0xff]  ;;  %v1214_v15 = vld [vmem:[%s9036_s27 + $0x1f8] sm:$0xff]  ;;  %v1217_v21 = vld [vmem:[%s9036_s27 + $0x210] sm:$0xff] }
  0x37   : > { %v1215_v17 = vld [vmem:[%s9036_s27 + $0x200] sm:$0xff]  ;;  %v971_v18 = vld [vmem:[%s9036_s27 + $0x178] sm:$0xff]  ;;  %v974_v24 = vld [vmem:[%s9036_s27 + $0x190] sm:$0xff] }
  0x38   : > { %7668 = vmatpush3.bf16.msra.mxu0 %v9068_v19  ;;  %7700 = vmatpush3.bf16.msra.mxu1 %v9068_v19  ;;  %v972_v20 = vld [vmem:[%s9036_s27 + $0x180] sm:$0xff]  ;;  %v1218_v23 = vld [vmem:[%s9036_s27 + $0x218] sm:$0xff] }
  0x39   : > { %7670 = vmatprep.subr.bf16.mxu0 %v9080_v22  ;;  %7702 = vmatprep.subr.bf16.mxu1 %v9080_v22 }
  0x3c   : > { %7672 = vmatpush3.bf16.msra.mxu0 %v9080_v22  ;;  %7704 = vmatpush3.bf16.msra.mxu1 %v9080_v22 }
  0x3d   : > { %7674 = vmatprep.subr.bf16.mxu0 %v9092_v25  ;;  %7706 = vmatprep.subr.bf16.mxu1 %v9092_v25 }
  0x40   : > { %7676 = vmatpush3.bf16.msra.mxu0 %v9092_v25  ;;  %7708 = vmatpush3.bf16.msra.mxu1 %v9092_v25 }
  0x41   : > { %7710 = vmatprep.subr.bf16.mxu0 %v9005_v3  ;;  %7742 = vmatprep.subr.bf16.mxu1 %v9005_v3 }
  0x43   : > { %7188 = vmatmul.mubr.f32.vlgmr.msra.gmra.mrb[0].mxu0 %v466_v26  ;;  %7247 = vmatmul.mubr.f32.vlgmr.msra.gmra.mrb[0].mxu1 %v716_v27  ;;  %v975_v26 = vld [vmem:[%s9036_s27 + $0x198] sm:$0xff]  ;;  %v1220_v27 = vld [vmem:[%s9036_s27 + $0x228] sm:$0xff] }
  0x44   : > { %7190 = vmatprep.mubr.f32.mxu0 %v467_v28  ;;  %7249 = vmatprep.mubr.f32.mxu1 %v717_v29  ;;  %v976_v28 = vld [vmem:[%s9036_s27 + $0x1a0] sm:$0xff]  ;;  %v1221_v29 = vld [vmem:[%s9036_s27 + $0x230] sm:$0xff] }
  0x45   : > { %7712 = vmatpush3.bf16.msra.mxu0 %v9005_v3  ;;  %7744 = vmatpush3.bf16.msra.mxu1 %v9005_v3  ;;  %v1208_v3 = vld [vmem:[%s9036_s27 + $0x1c8] sm:$0xff] }
  0x46   : > { %7714 = vmatprep.subr.bf16.mxu0 %v9010_v5  ;;  %7746 = vmatprep.subr.bf16.mxu1 %v9010_v5 }
  0x47   : > { %7191 = vmatmul.mubr.f32.gmra.mrb[2].mxu0 %v468_v30  ;;  %7250 = vmatmul.mubr.f32.gmra.mrb[2].mxu1 %v718_v31  ;;  %v977_v30 = vld [vmem:[%s9036_s27 + $0x1a8] sm:$0xff]  ;;  %v1222_v31 = vld [vmem:[%s9036_s27 + $0x238] sm:$0xff] }
  0x48   : > { %7193 = vmatprep.mubr.f32.mxu0 %v469_v32  ;;  %7252 = vmatprep.mubr.f32.mxu1 %v719_v33  ;;  %v12580_v32 = vmov 0.0|0.0   ;;  %v1469_v33 = vld [vmem:[%s12575_s11 + $0x8] sm:$0xff] }
  0x49   : > { %7716 = vmatpush3.bf16.msra.mxu0 %v9010_v5  ;;  %7748 = vmatpush3.bf16.msra.mxu1 %v9010_v5  ;;  %v1209_v5 = vld [vmem:[%s9036_s27 + $0x1d0] sm:$0xff] }
  0x4a   : > { %7718 = vmatprep.subr.bf16.mxu0 %v9025_v8  ;;  %7750 = vmatprep.subr.bf16.mxu1 %v9025_v8 }
  0x4b   : > { %7194 = vmatmul.mubr.f32.gmra.mrb[4].mxu0 %v470_v34  ;;  %7253 = vmatmul.mubr.f32.gmra.mrb[4].mxu1 %v720_v35  ;;  %v9211_v34 = vld [vmem:[%s12593_s2] ss:$0 sm:$0xff] }
  0x4c   : > { %7196 = vmatprep.mubr.f32.mxu0 %v471_v36  ;;  %7255 = vmatprep.mubr.f32.mxu1 %v721_v37 }
  0x4d   : > { %7720 = vmatpush3.bf16.msra.mxu0 %v9025_v8  ;;  %7752 = vmatpush3.bf16.msra.mxu1 %v9025_v8  ;;  %v966_v8 = vld [vmem:[%s9036_s27 + $0x150] sm:$0xff] }
  0x4e   : > { %7722 = vmatprep.subr.bf16.mxu0 %v9044_v13  ;;  %7754 = vmatprep.subr.bf16.mxu1 %v9044_v13 }
  0x4f   : > { %7197 = vmatmul.mubr.f32.gmra.mrb[6].mxu0 %v472_v38  ;;  %7256 = vmatmul.mubr.f32.gmra.mrb[6].mxu1 %v722_v39 }
  0x50   : > { %7199 = vmatprep.mubr.f32.mxu0 %v473_v40  ;;  %7258 = vmatprep.mubr.f32.mxu1 %v723_v41 }
  0x51   : > { %7724 = vmatpush3.bf16.msra.mxu0 %v9044_v13  ;;  %7756 = vmatpush3.bf16.msra.mxu1 %v9044_v13  ;;  %v1213_v13 = vld [vmem:[%s9036_s27 + $0x1f0] sm:$0xff] }
  0x52   : > { %7726 = vmatprep.subr.bf16.mxu0 %v9056_v16  ;;  %7758 = vmatprep.subr.bf16.mxu1 %v9056_v16 }
  0x53   : > { %7200 = vmatmul.mubr.f32.gmra.mrb[8].mxu0 %v474_v42  ;;  %7259 = vmatmul.mubr.f32.gmra.mrb[8].mxu1 %v724_v43 }
  0x54   : > { %7202 = vmatprep.mubr.f32.mxu0 %v475_v44  ;;  %7261 = vmatprep.mubr.f32.mxu1 %v725_v45 }
  0x55   : > { %7728 = vmatpush3.bf16.msra.mxu0 %v9056_v16  ;;  %7760 = vmatpush3.bf16.msra.mxu1 %v9056_v16  ;;  %v970_v16 = vld [vmem:[%s9036_s27 + $0x170] sm:$0xff] }
  0x56   : > { %7730 = vmatprep.subr.bf16.mxu0 %v9068_v19  ;;  %7762 = vmatprep.subr.bf16.mxu1 %v9068_v19 }
  0x57   : > { %7203 = vmatmul.mubr.f32.gmra.mrb[10].mxu0 %v476_v46  ;;  %7262 = vmatmul.mubr.f32.gmra.mrb[10].mxu1 %v726_v47 }
  0x58   : > { %7205 = vmatprep.mubr.f32.mxu0 %v477_v48  ;;  %7264 = vmatprep.mubr.f32.mxu1 %v727_v49 }
  0x59   : > { %7732 = vmatpush3.bf16.msra.mxu0 %v9068_v19  ;;  %7764 = vmatpush3.bf16.msra.mxu1 %v9068_v19  ;;  %v1216_v19 = vld [vmem:[%s9036_s27 + $0x208] sm:$0xff] }
  0x5a   : > { %7734 = vmatprep.subr.bf16.mxu0 %v9080_v22  ;;  %7766 = vmatprep.subr.bf16.mxu1 %v9080_v22 }
  0x5b   : > { %7206 = vmatmul.mubr.f32.gmra.mrb[12].mxu0 %v478_v50  ;;  %7265 = vmatmul.mubr.f32.gmra.mrb[12].mxu1 %v728_v51 }
  0x5c   : > { %7208 = vmatprep.mubr.f32.mxu0 %v479_v52  ;;  %7267 = vmatprep.mubr.f32.mxu1 %v729_v53 }
  0x5d   : > { %7736 = vmatpush3.bf16.msra.mxu0 %v9080_v22  ;;  %7768 = vmatpush3.bf16.msra.mxu1 %v9080_v22  ;;  %v973_v22 = vld [vmem:[%s9036_s27 + $0x188] sm:$0xff] }
  0x5e   : > { %7738 = vmatprep.subr.bf16.mxu0 %v9092_v25  ;;  %7770 = vmatprep.subr.bf16.mxu1 %v9092_v25 }
  0x5f   : > { %7209 = vmatmul.mubr.f32.gmra.mrb[14].mxu0 %v480_v54  ;;  %7268 = vmatmul.mubr.f32.gmra.mrb[14].mxu1 %v730_v55 }
  0x60   : > { %7211 = vmatprep.mubr.f32.mxu0 %v481_v56  ;;  %7270 = vmatprep.mubr.f32.mxu1 %v731_v57 }
  0x61   : > { %7740 = vmatpush3.bf16.msra.mxu0 %v9092_v25  ;;  %7772 = vmatpush3.bf16.msra.mxu1 %v9092_v25  ;;  %v1219_v25 = vld [vmem:[%s9036_s27 + $0x220] sm:$0xff]  ;;  %s6402_s27 = sshll.u32 %s8968_s17, 4  ;;  %s8871_s17 = smov [#allocation7]  }
  0x62   : > { %7773 = vmatprep.subr.bf16.mxu0 %v12580_v32  ;;  %7800 = vmatprep.subr.bf16.mxu1 %v12580_v32  ;;  %s12522_s0 = scalar_lea.hbm %s12578_s14, %s6402_s27  ;;  %s8808_s1 = sshll.u32 %s8871_s17, 4  ;;  %s8809_s1 = int_to_ptr.vmem [resolvable:$false] %s8808_s1 }
  0x63   : > { %7212 = vmatmul.mubr.f32.gmra.mrb[16].mxu0 %v482_v58  ;;  %7271 = vmatmul.mubr.f32.gmra.mrb[16].mxu1 %v732_v59  ;;  %s8810_s20 = scalar_lea.vmem %s8809_s1, 32  ;;  %p8811_p0 = scmp.lt.s32.totalorder %s12524_s21, %s8809_s1 }
  0x64   : > { %7305 = vmatprep.mubr.f32.mxu0 %v960_v60  ;;  %7364 = vmatprep.mubr.f32.mxu1 %v1205_v61  ;;  %p8812_p1 = scmp.lt.s32.totalorder %s8810_s20, %s8804_s18 }
  0x66   : > { %p8813_p2 = por %p8812_p1, %p8811_p0 }
  0x67   : > { %7306 = vmatmul.mubr.f32.vlgmr.msra.gmra.mrb[18].mxu0 %v961_v62  ;;  %7365 = vmatmul.mubr.f32.vlgmr.msra.gmra.mrb[18].mxu1 %v1206_v63 }
  0x68   : > { %7308 = vmatprep.mubr.f32.mxu0 %v962_v0  ;;  %7367 = vmatprep.mubr.f32.mxu1 %v1207_v1  ;;  %p8814_p3 = pnand %p8813_p2, %p8807_p13 }
  0x6b   : > { %7309 = vmatmul.mubr.f32.gmra.mrb[20].mxu0 %v963_v2  ;;  %7368 = vmatmul.mubr.f32.gmra.mrb[20].mxu1 %v1208_v3 }
  0x6c   : > { %7311 = vmatprep.mubr.f32.mxu0 %v964_v4  ;;  %7370 = vmatprep.mubr.f32.mxu1 %v1209_v5 }
  0x6f   : > { %7312 = vmatmul.mubr.f32.gmra.mrb[22].mxu0 %v965_v6  ;;  %7371 = vmatmul.mubr.f32.gmra.mrb[22].mxu1 %v1210_v7 }
  0x70   : > { %7314 = vmatprep.mubr.f32.mxu0 %v966_v8  ;;  %7373 = vmatprep.mubr.f32.mxu1 %v1211_v9 }
  0x73   : > { %7315 = vmatmul.mubr.f32.gmra.mrb[24].mxu0 %v967_v10  ;;  %7374 = vmatmul.mubr.f32.gmra.mrb[24].mxu1 %v1212_v11 }
  0x74   : > { %7317 = vmatprep.mubr.f32.mxu0 %v968_v12  ;;  %7376 = vmatprep.mubr.f32.mxu1 %v1213_v13 }
  0x77   : > { %7318 = vmatmul.mubr.f32.gmra.mrb[26].mxu0 %v969_v14  ;;  %7377 = vmatmul.mubr.f32.gmra.mrb[26].mxu1 %v1214_v15 }
  0x78   : > { %7320 = vmatprep.mubr.f32.mxu0 %v970_v16  ;;  %7379 = vmatprep.mubr.f32.mxu1 %v1215_v17 }
  0x7b   : > { %7321 = vmatmul.mubr.f32.gmra.mrb[28].mxu0 %v971_v18  ;;  %7380 = vmatmul.mubr.f32.gmra.mrb[28].mxu1 %v1216_v19 }
  0x7c   : > { %7323 = vmatprep.mubr.f32.mxu0 %v972_v20  ;;  %7382 = vmatprep.mubr.f32.mxu1 %v1217_v21 }
  0x7f   : > { %7324 = vmatmul.mubr.f32.gmra.mrb[30].mxu0 %v973_v22  ;;  %7383 = vmatmul.mubr.f32.gmra.mrb[30].mxu1 %v1218_v23 }
  0x80   : > { %7326 = vmatprep.mubr.f32.mxu0 %v974_v24  ;;  %7385 = vmatprep.mubr.f32.mxu1 %v1219_v25 }
  0x83   : > { %7327 = vmatmul.mubr.f32.gmra.mrb[32].mxu0 %v975_v26  ;;  %7386 = vmatmul.mubr.f32.gmra.mrb[32].mxu1 %v1220_v27 }
  0x84   : > { %7329 = vmatprep.mubr.f32.mxu0 %v976_v28  ;;  %7388 = vmatprep.mubr.f32.mxu1 %v1221_v29 }
  0x87   : > { %7330 = vmatmul.mubr.f32.gmra.mrb[34].mxu0 %v977_v30  ;;  %7389 = vmatmul.mubr.f32.gmra.mrb[34].mxu1 %v1222_v31 }
  0x88   : > { %6322 = vmatprep.mubr.msk.f32.mxu0 %vm1536_vm0, %v1469_v33 }
 0x116   : > { %v7189_v35 = vpop.f32.mrb[0].mxu0  ;;  %v7248_v36 = vpop.f32.mrb[0].mxu1 }
 0x117   : > { %v578_v37 = vadd.f32 %v7189_v35, %v9211_v34  ;;  %v805_v38 = vadd.f32 %v7248_v36, %v9211_v34  ;;  %v572_v39 = vpop.f32.mrb[1].mxu0  ;;  %v799_v40 = vpop.f32.mrb[1].mxu1 }
 0x118   : > { %v573_v41 = vadd.f32 %v9211_v34, %v572_v39  ;;  %v800_v42 = vadd.f32 %v9211_v34, %v799_v40 }
 0x119   : > { %vm662_vm1 = vcmp.gt.f32.partialorder %v578_v37, 0.0  ;;  %v680_v43 = vmul.f32 0.1, %v578_v37  ;;  %vm889_vm2 = vcmp.gt.f32.partialorder %v805_v38, 0.0  ;;  %v907_v44 = vmul.f32 0.1, %v805_v38 }
 0x11a   : > { %vm661_vm3 = vcmp.gt.f32.partialorder %v573_v41, 0.0  ;;  %v679_v45 = vmul.f32 0.1, %v573_v41  ;;  %vm888_vm4 = vcmp.gt.f32.partialorder %v800_v42, 0.0  ;;  %v906_v46 = vmul.f32 0.1, %v800_v42 }
 0x11b   : > { %v9217_v47 = vsel %vm662_vm1, %v578_v37, %v680_v43  ;;  %v9219_v48 = vsel %vm889_vm2, %v805_v38, %v907_v44  ;;  %v7192_v49 = vpop.f32.mrb[2].mxu0  ;;  %v7251_v50 = vpop.f32.mrb[2].mxu1 }
 0x11c   : > { %v943_v51 = vmax.f32 %v9217_v47, %v9219_v48  ;;  %v9223_v52 = vsel %vm661_vm3, %v573_v41, %v679_v45  ;;  %v9225_v53 = vsel %vm888_vm4, %v800_v42, %v906_v46  ;;  %v588_v54 = vadd.f32 %v7192_v49, %v9211_v34  ;;  %v582_v55 = vpop.f32.mrb[3].mxu0  ;;  %v809_v56 = vpop.f32.mrb[3].mxu1 }
 0x11d   : > { %v942_v57 = vmax.f32 %v9223_v52, %v9225_v53  ;;  %v815_v58 = vadd.f32 %v7251_v50, %v9211_v34  ;;  %v583_v59 = vadd.f32 %v9211_v34, %v582_v55  ;;  %v810_v60 = vadd.f32 %v9211_v34, %v809_v56 }
 0x11e   : > { %vm664_vm5 = vcmp.gt.f32.partialorder %v588_v54, 0.0  ;;  %v682_v61 = vmul.f32 0.1, %v588_v54  ;;  %v7195_v62 = vpop.f32.mrb[4].mxu0  ;;  %v7254_v63 = vpop.f32.mrb[4].mxu1 }
 0x11f   : > { %vm891_vm6 = vcmp.gt.f32.partialorder %v815_v58, 0.0  ;;  %v909_v0 = vmul.f32 0.1, %v815_v58  ;;  %vm663_vm7 = vcmp.gt.f32.partialorder %v583_v59, 0.0  ;;  %v681_v1 = vmul.f32 0.1, %v583_v59 }
 0x120   : > { %v9233_v2 = vsel %vm664_vm5, %v588_v54, %v682_v61  ;;  %vm890_vm8 = vcmp.gt.f32.partialorder %v810_v60, 0.0  ;;  %v908_v3 = vmul.f32 0.1, %v810_v60  ;;  %v598_v4 = vadd.f32 %v7195_v62, %v9211_v34  ;;  %v592_v5 = vpop.f32.mrb[5].mxu0  ;;  %v819_v6 = vpop.f32.mrb[5].mxu1 }
 0x121   : > { %v9236_v7 = vsel %vm891_vm6, %v815_v58, %v909_v0  ;;  %v9238_v8 = vsel %vm663_vm7, %v583_v59, %v681_v1  ;;  %v825_v9 = vadd.f32 %v7254_v63, %v9211_v34  ;;  %v593_v10 = vadd.f32 %v9211_v34, %v592_v5 }
 0x122   : > { %v945_v11 = vmax.f32 %v9233_v2, %v9236_v7  ;;  %v9244_v12 = vsel %vm890_vm8, %v810_v60, %v908_v3  ;;  %vm666_vm9 = vcmp.gt.f32.partialorder %v598_v4, 0.0  ;;  %v684_v13 = vmul.f32 0.1, %v598_v4  ;;  %v7198_v14 = vpop.f32.mrb[6].mxu0  ;;  %v7257_v15 = vpop.f32.mrb[6].mxu1 }
 0x123   : > { %v944_v16 = vmax.f32 %v9238_v8, %v9244_v12  ;;  %vm893_vm10 = vcmp.gt.f32.partialorder %v825_v9, 0.0  ;;  %v911_v17 = vmul.f32 0.1, %v825_v9  ;;  %vm665_vm11 = vcmp.gt.f32.partialorder %v593_v10, 0.0  ;;  %v602_v18 = vpop.f32.mrb[7].mxu0  ;;  %v829_v19 = vpop.f32.mrb[7].mxu1 }
 0x124   : > { %v9248_v20 = vsel %vm666_vm9, %v598_v4, %v684_v13  ;;  %v683_v21 = vmul.f32 0.1, %v593_v10  ;;  %v820_v22 = vadd.f32 %v9211_v34, %v819_v6  ;;  %v608_v23 = vadd.f32 %v7198_v14, %v9211_v34 }
 0x125   : > { %v9252_v24 = vsel %vm893_vm10, %v825_v9, %v911_v17  ;;  %v835_v25 = vadd.f32 %v7257_v15, %v9211_v34  ;;  %v603_v26 = vadd.f32 %v9211_v34, %v602_v18  ;;  %v830_v27 = vadd.f32 %v9211_v34, %v829_v19 }
 0x126   : > { %v9259_v29 = vsel %vm665_vm11, %v593_v10, %v683_v21  ;;  %vm892_vm12 = vcmp.gt.f32.partialorder %v820_v22, 0.0  ;;  %v910_v30 = vmul.f32 0.1, %v820_v22  ;;  %v7201_v31 = vpop.f32.mrb[8].mxu0  ;;  %v7260_v33 = vpop.f32.mrb[8].mxu1  ;;  %vm668_vm13 = vcmp.gt.f32.partialorder %v608_v23, 0.0 }
 0x127   : > { %v686_v35 = vmul.f32 0.1, %v608_v23  ;;  %vm895_vm14 = vcmp.gt.f32.partialorder %v835_v25, 0.0  ;;  %v913_v36 = vmul.f32 0.1, %v835_v25  ;;  %vm667_vm15 = vcmp.gt.f32.partialorder %v603_v26, 0.0 }
 0x128   : > { %v9261_v37 = vsel %vm892_vm12, %v820_v22, %v910_v30  ;;  %v685_v38 = vmul.f32 0.1, %v603_v26  ;;  %vm894_vm1 = vcmp.gt.f32.partialorder %v830_v27, 0.0  ;;  %v612_v39 = vpop.f32.mrb[9].mxu0  ;;  %v839_v40 = vpop.f32.mrb[9].mxu1  ;;  %v618_v49 = vadd.f32 %v7201_v31, %v9211_v34 }
 0x129   : > { %v9265_v42 = vsel %vm668_vm13, %v608_v23, %v686_v35  ;;  %v9267_v43 = vsel %vm895_vm14, %v835_v25, %v913_v36  ;;  %v912_v44 = vmul.f32 0.1, %v830_v27  ;;  %v845_v50 = vadd.f32 %v7260_v33, %v9211_v34 }
 0x12a   : > { %v9271_v46 = vsel %vm667_vm15, %v603_v26, %v685_v38  ;;  %v7204_v54 = vpop.f32.mrb[10].mxu0  ;;  %v7263_v55 = vpop.f32.mrb[10].mxu1  ;;  %v613_v58 = vadd.f32 %v9211_v34, %v612_v39  ;;  %v840_v59 = vadd.f32 %v9211_v34, %v839_v40  ;;  %vm670_vm2 = vcmp.gt.f32.partialorder %v618_v49, 0.0 }
 0x12b   : > { %v9275_v56 = vsel %vm894_vm1, %v830_v27, %v912_v44  ;;  %v628_v60 = vadd.f32 %v7204_v54, %v9211_v34  ;;  %v622_v61 = vpop.f32.mrb[11].mxu0  ;;  %v849_v62 = vpop.f32.mrb[11].mxu1  ;;  %v688_v0 = vmul.f32 0.1, %v618_v49  ;;  %vm897_vm3 = vcmp.gt.f32.partialorder %v845_v50, 0.0 }
 0x12c   : > { %v915_v1 = vmul.f32 0.1, %v845_v50  ;;  %vm669_vm4 = vcmp.gt.f32.partialorder %v613_v58, 0.0  ;;  %v687_v3 = vmul.f32 0.1, %v613_v58  ;;  %vm896_vm5 = vcmp.gt.f32.partialorder %v840_v59, 0.0 }
 0x12d   : > { %v9282_v4 = vsel %vm670_vm2, %v618_v49, %v688_v0  ;;  %v914_v5 = vmul.f32 0.1, %v840_v59  ;;  %vm672_vm6 = vcmp.gt.f32.partialorder %v628_v60, 0.0  ;;  %v690_v6 = vmul.f32 0.1, %v628_v60 }
 0x12e   : > { %v7207_v9 = vpop.f32.mrb[12].mxu0  ;;  %v9284_v10 = vsel %vm897_vm3, %v845_v50, %v915_v1  ;;  %v9286_v13 = vsel %vm669_vm4, %v613_v58, %v687_v3  ;;  %v855_v14 = vadd.f32 %v7263_v55, %v9211_v34  ;;  %v623_v15 = vadd.f32 %v9211_v34, %v622_v61  ;;  %v7266_v17 = vpop.f32.mrb[12].mxu1 }
 0x12f   : > { %v632_v18 = vpop.f32.mrb[13].mxu0  ;;  %v9292_v21 = vsel %vm896_vm5, %v840_v59, %v914_v5  ;;  %v9294_v22 = vsel %vm672_vm6, %v628_v60, %v690_v6  ;;  %v850_v23 = vadd.f32 %v9211_v34, %v849_v62  ;;  %v859_v25 = vpop.f32.mrb[13].mxu1  ;;  %v638_v33 = vadd.f32 %v7207_v9, %v9211_v34 }
 0x130   : > { %vm899_vm7 = vcmp.gt.f32.partialorder %v855_v14, 0.0  ;;  %v917_v27 = vmul.f32 0.1, %v855_v14  ;;  %vm671_vm8 = vcmp.gt.f32.partialorder %v623_v15, 0.0  ;;  %v689_v30 = vmul.f32 0.1, %v623_v15 }
 0x131   : > { %vm898_vm9 = vcmp.gt.f32.partialorder %v850_v23, 0.0  ;;  %v916_v31 = vmul.f32 0.1, %v850_v23  ;;  %v865_v38 = vadd.f32 %v7266_v17, %v9211_v34  ;;  %v633_v39 = vadd.f32 %v9211_v34, %v632_v18 }
 0x132   : > { %v7210_v35 = vpop.f32.mrb[14].mxu0  ;;  %v9300_v36 = vsel %vm899_vm7, %v855_v14, %v917_v27  ;;  %v860_v40 = vadd.f32 %v9211_v34, %v859_v25  ;;  %v7269_v44 = vpop.f32.mrb[14].mxu1  ;;  %v9307_v54 = vsel %vm671_vm8, %v623_v15, %v689_v30  ;;  %vm674_vm10 = vcmp.gt.f32.partialorder %v638_v33, 0.0 }
 0x133   : > { %v642_v49 = vpop.f32.mrb[15].mxu0  ;;  %v9309_v55 = vsel %vm898_vm9, %v850_v23, %v916_v31  ;;  %v869_v58 = vpop.f32.mrb[15].mxu1  ;;  %v692_v60 = vmul.f32 0.1, %v638_v33  ;;  %vm901_vm11 = vcmp.gt.f32.partialorder %v865_v38, 0.0  ;;  %vm673_vm12 = vcmp.gt.f32.partialorder %v633_v39, 0.0 }
 0x134   : > { %v919_v61 = vmul.f32 0.1, %v865_v38  ;;  %v691_v62 = vmul.f32 0.1, %v633_v39  ;;  %vm900_vm13 = vcmp.gt.f32.partialorder %v860_v40, 0.0  ;;  %v648_v5 = vadd.f32 %v7210_v35, %v9211_v34 }
 0x135   : > { %v918_v0 = vmul.f32 0.1, %v860_v40  ;;  %v9313_v1 = vsel %vm674_vm10, %v638_v33, %v692_v60  ;;  %v875_v6 = vadd.f32 %v7269_v44, %v9211_v34  ;;  %v643_v23 = vadd.f32 %v9211_v34, %v642_v49 }
 0x136   : > { %v9315_v3 = vsel %vm901_vm11, %v865_v38, %v919_v61  ;;  %v7213_v9 = vpop.f32.mrb[16].mxu0  ;;  %v7272_v14 = vpop.f32.mrb[16].mxu1  ;;  %v9321_v17 = vsel %vm673_vm12, %v633_v39, %v691_v62  ;;  %vm676_vm14 = vcmp.gt.f32.partialorder %v648_v5, 0.0  ;;  %v694_v31 = vmul.f32 0.1, %v648_v5 }
 0x137   : > { %v9323_v18 = vsel %vm900_vm13, %v860_v40, %v918_v0  ;;  %v652_v25 = vpop.f32.mrb[17].mxu0  ;;  %v879_v27 = vpop.f32.mrb[17].mxu1  ;;  %vm903_vm15 = vcmp.gt.f32.partialorder %v875_v6, 0.0  ;;  %v921_v33 = vmul.f32 0.1, %v875_v6  ;;  %vm675_vm1 = vcmp.gt.f32.partialorder %v643_v23, 0.0 }
 0x138   : > { %v693_v35 = vmul.f32 0.1, %v643_v23  ;;  %v870_v38 = vadd.f32 %v9211_v34, %v869_v58  ;;  %v9329_v39 = vsel %vm676_vm14, %v648_v5, %v694_v31  ;;  %v658_v40 = vadd.f32 %v7213_v9, %v9211_v34 }
 0x139   : > { %v885_v49 = vadd.f32 %v7272_v14, %v9211_v34  ;;  %v653_v60 = vadd.f32 %v9211_v34, %v652_v25  ;;  %v9334_v0 = vsel %vm903_vm15, %v875_v6, %v921_v33  ;;  %v880_v33 = vadd.f32 %v9211_v34, %v879_v27 }
 0x13a   : > { %v7307_v44 = vpop.f32.mrb[18].mxu0  ;;  %v7366_v61 = vpop.f32.mrb[18].mxu1  ;;  %v9336_v30 = vsel %vm675_vm1, %v643_v23, %v693_v35  ;;  %vm902_vm2 = vcmp.gt.f32.partialorder %v870_v38, 0.0  ;;  %v920_v15 = vmul.f32 0.1, %v870_v38  ;;  %vm678_vm3 = vcmp.gt.f32.partialorder %v658_v40, 0.0 }
 0x13b   : > { %v1044_v62 = vpop.f32.mrb[19].mxu0  ;;  %v1289_v32 = vpop.f32.mrb[19].mxu1  ;;  %v696_v5 = vmul.f32 0.1, %v658_v40  ;;  %vm905_vm4 = vcmp.gt.f32.partialorder %v885_v49, 0.0  ;;  %vm677_vm5 = vcmp.gt.f32.partialorder %v653_v60, 0.0  ;;  %v1050_v35 = vadd.f32 %v7307_v44, %v9211_v34 }
 0x13c   : > { %v9340_v9 = vsel %vm902_vm2, %v870_v38, %v920_v15  ;;  %v923_v14 = vmul.f32 0.1, %v885_v49  ;;  %v695_v25 = vmul.f32 0.1, %v653_v60  ;;  %v1295_v15 = vadd.f32 %v7366_v61, %v9211_v34 }
 0x13d   : > { %v9344_v23 = vsel %vm678_vm3, %v658_v40, %v696_v5  ;;  %v1045_v38 = vadd.f32 %v9211_v34, %v1044_v62  ;;  %vm904_vm6 = vcmp.gt.f32.partialorder %v880_v33, 0.0  ;;  %v922_v40 = vmul.f32 0.1, %v880_v33 }
 0x13e   : > { %v7310_v31 = vpop.f32.mrb[20].mxu0  ;;  %v7369_v59 = vpop.f32.mrb[20].mxu1  ;;  %v9348_v50 = vsel %vm905_vm4, %v885_v49, %v923_v14  ;;  %v9350_v26 = vsel %vm677_vm5, %v653_v60, %v695_v25  ;;  %vm1134_vm7 = vcmp.gt.f32.partialorder %v1050_v35, 0.0  ;;  %v1152_v27 = vmul.f32 0.1, %v1050_v35 }
 0x13f   : > { %v1054_v58 = vpop.f32.mrb[21].mxu0  ;;  %12594 = vst [vmem:[#allocation12_spill] sm:$0xff] %v9350_v26  ;;  %v1299_v19 = vpop.f32.mrb[21].mxu1  ;;  %vm1379_vm8 = vcmp.gt.f32.partialorder %v1295_v15, 0.0  ;;  %v1397_v44 = vmul.f32 0.1, %v1295_v15  ;;  %v9356_v5 = vsel %vm904_vm6, %v880_v33, %v922_v40  ;;  %v1290_v60 = vadd.f32 %v9211_v34, %v1289_v32 }
 0x140   : > { %vm1133_vm9 = vcmp.gt.f32.partialorder %v1045_v38, 0.0  ;;  %12595 = vst [vmem:[#allocation13_spill] sm:$0xff] %v9356_v5  ;;  %v1151_v49 = vmul.f32 0.1, %v1045_v38  ;;  %v1060_v61 = vadd.f32 %v7310_v31, %v9211_v34  ;;  %v1170_v6 = vsel %vm1134_vm7, %v1050_v35, %v1152_v27 }
 0x141   : > { %v9362_v63 = vsel %vm1379_vm8, %v1295_v15, %v1397_v44  ;;  %v1305_v45 = vadd.f32 %v7369_v59, %v9211_v34  ;;  %v9368_v33 = vmax.f32 %v943_v51, %v1170_v6  ;;  %vm1378_vm10 = vcmp.gt.f32.partialorder %v1290_v60, 0.0 }
 0x142   : > { %v7313_v14 = vpop.f32.mrb[22].mxu0  ;;  %v7372_v62 = vpop.f32.mrb[22].mxu1  ;;  %v1169_v32 = vsel %vm1133_vm9, %v1045_v38, %v1151_v49  ;;  %v1396_v31 = vmul.f32 0.1, %v1290_v60  ;;  %vm1136_vm11 = vcmp.gt.f32.partialorder %v1060_v61, 0.0  ;;  %v1055_v48 = vadd.f32 %v9211_v34, %v1054_v58 }
 0x143   : > { %v1064_v41 = vpop.f32.mrb[23].mxu0  ;;  %v1309_v28 = vpop.f32.mrb[23].mxu1  ;;  %v9373_v40 = vmax.f32 %v942_v57, %v1169_v32  ;;  %v1154_v35 = vmul.f32 0.1, %v1060_v61  ;;  %vm1381_vm12 = vcmp.gt.f32.partialorder %v1305_v45, 0.0  ;;  %v1300_v57 = vadd.f32 %v9211_v34, %v1299_v19 }
 0x144   : > { %v9377_v44 = vsel %vm1378_vm10, %v1290_v60, %v1396_v31  ;;  %v1399_v47 = vmul.f32 0.1, %v1305_v45  ;;  %v1070_v38 = vadd.f32 %v7313_v14, %v9211_v34  ;;  %vm1135_vm13 = vcmp.gt.f32.partialorder %v1055_v48, 0.0 }
 0x145   : > { %v1172_v53 = vsel %vm1136_vm11, %v1060_v61, %v1154_v35  ;;  %v1153_v32 = vmul.f32 0.1, %v1055_v48  ;;  %vm1380_vm14 = vcmp.gt.f32.partialorder %v1300_v57, 0.0  ;;  %v1398_v58 = vmul.f32 0.1, %v1300_v57 }
 0x146   : > { %v7316_v15 = vpop.f32.mrb[24].mxu0  ;;  %v7375_v59 = vpop.f32.mrb[24].mxu1  ;;  %v9387_v49 = vmax.f32 %v945_v11, %v1172_v53  ;;  %v9389_v60 = vsel %vm1381_vm12, %v1305_v45, %v1399_v47  ;;  %vm1138_vm15 = vcmp.gt.f32.partialorder %v1070_v38, 0.0  ;;  %v1156_v31 = vmul.f32 0.1, %v1070_v38 }
 0x147   : > { %v1074_v51 = vpop.f32.mrb[25].mxu0  ;;  %v1319_v6 = vpop.f32.mrb[25].mxu1  ;;  %v1171_v35 = vsel %vm1135_vm13, %v1055_v48, %v1153_v32  ;;  %v1315_v19 = vadd.f32 %v7372_v62, %v9211_v34  ;;  %v1065_v14 = vadd.f32 %v9211_v34, %v1064_v41  ;;  %v9400_v11 = vsel %vm1380_vm14, %v1300_v57, %v1398_v58 }
 0x148   : > { %v9398_v7 = vmax.f32 %v944_v16, %v1171_v35  ;;  %v1174_v45 = vsel %vm1138_vm15, %v1070_v38, %v1156_v31  ;;  %v1310_v47 = vadd.f32 %v9211_v34, %v1309_v28  ;;  %v12596_v48 = vmax.f32 %v9248_v20, %v9252_v24 }
 0x149   : > { %vm1383_vm1 = vcmp.gt.f32.partialorder %v1315_v19, 0.0  ;;  %v1401_v41 = vmul.f32 0.1, %v1315_v19  ;;  %vm1137_vm2 = vcmp.gt.f32.partialorder %v1065_v14, 0.0  ;;  %v1155_v12 = vmul.f32 0.1, %v1065_v14 }
 0x14a   : > { %v7319_v25 = vpop.f32.mrb[26].mxu0  ;;  %v7378_v2 = vpop.f32.mrb[26].mxu1  ;;  %v9406_v62 = vmax.f32 %v12596_v48, %v1174_v45  ;;  %vm1382_vm3 = vcmp.gt.f32.partialorder %v1310_v47, 0.0  ;;  %v1400_v16 = vmul.f32 0.1, %v1310_v47  ;;  %v1080_v28 = vadd.f32 %v7316_v15, %v9211_v34 }
 0x14b   : > { %v1084_v53 = vpop.f32.mrb[27].mxu0  ;;  %v1329_v27 = vpop.f32.mrb[27].mxu1  ;;  %v9410_v38 = vsel %vm1383_vm1, %v1315_v19, %v1401_v41  ;;  %v1325_v32 = vadd.f32 %v7375_v59, %v9211_v34  ;;  %v1075_v20 = vadd.f32 %v9211_v34, %v1074_v51  ;;  %v1173_v35 = vsel %vm1137_vm2, %v1065_v14, %v1155_v12 }
 0x14c   : > { %v9417_v45 = vsel %vm1382_vm3, %v1310_v47, %v1400_v16  ;;  %v1320_v48 = vadd.f32 %v9211_v34, %v1319_v6  ;;  %v12597_v19 = vmax.f32 %v9259_v29, %v9261_v37  ;;  %vm1140_vm4 = vcmp.gt.f32.partialorder %v1080_v28, 0.0 }
 0x14d   : > { %v1158_v15 = vmul.f32 0.1, %v1080_v28  ;;  %vm1385_vm5 = vcmp.gt.f32.partialorder %v1325_v32, 0.0  ;;  %v1403_v59 = vmul.f32 0.1, %v1325_v32  ;;  %vm1139_vm6 = vcmp.gt.f32.partialorder %v1075_v20, 0.0 }
 0x14e   : > { %v7322_v57 = vpop.f32.mrb[28].mxu0  ;;  %v7381_v24 = vpop.f32.mrb[28].mxu1  ;;  %v9423_v41 = vmax.f32 %v12597_v19, %v1173_v35  ;;  %v1157_v51 = vmul.f32 0.1, %v1075_v20  ;;  %vm1384_vm7 = vcmp.gt.f32.partialorder %v1320_v48, 0.0  ;;  %v1090_v6 = vadd.f32 %v7319_v25, %v9211_v34 }
 0x14f   : > { %v1094_v58 = vpop.f32.mrb[29].mxu0  ;;  %v1339_v61 = vpop.f32.mrb[29].mxu1  ;;  %v1176_v47 = vsel %vm1140_vm4, %v1080_v28, %v1158_v15  ;;  %v1402_v12 = vmul.f32 0.1, %v1320_v48  ;;  %v12598_v29 = vmax.f32 %v9265_v42, %v9267_v43  ;;  %v9433_v35 = vsel %vm1385_vm5, %v1325_v32, %v1403_v59 }
 0x150   : > { %v1175_v19 = vsel %vm1139_vm6, %v1075_v20, %v1157_v51  ;;  %v1335_v8 = vadd.f32 %v7378_v2, %v9211_v34  ;;  %v12599_v28 = vmax.f32 %v9271_v46, %v9275_v56  ;;  %vm1142_vm8 = vcmp.gt.f32.partialorder %v1090_v6, 0.0 }
 0x151   : > { %v9431_v37 = vmax.f32 %v12598_v29, %v1176_v47  ;;  %v9441_v25 = vsel %vm1384_vm7, %v1320_v48, %v1402_v12  ;;  %v1160_v14 = vmul.f32 0.1, %v1090_v6  ;;  %v1085_v32 = vadd.f32 %v9211_v34, %v1084_v53 }
 0x152   : > { %v7325_v16 = vpop.f32.mrb[30].mxu0  ;;  %v7384_v31 = vpop.f32.mrb[30].mxu1  ;;  %v9439_v15 = vmax.f32 %v12599_v28, %v1175_v19  ;;  %vm1387_vm9 = vcmp.gt.f32.partialorder %v1335_v8, 0.0  ;;  %v1405_v43 = vmul.f32 0.1, %v1335_v8  ;;  %v1330_v56 = vadd.f32 %v9211_v34, %v1329_v27 }
 0x153   : > { %v1104_v52 = vpop.f32.mrb[31].mxu0  ;;  %v1349_v5 = vpop.f32.mrb[31].mxu1  ;;  %v1178_v46 = vsel %vm1142_vm8, %v1090_v6, %v1160_v14  ;;  %v1100_v48 = vadd.f32 %v7322_v57, %v9211_v34  ;;  %v12600_v12 = vmax.f32 %v9282_v4, %v9284_v10  ;;  %vm1141_vm10 = vcmp.gt.f32.partialorder %v1085_v32, 0.0 }
 0x154   : > { %v9461_v53 = vsel %vm1387_vm9, %v1335_v8, %v1405_v43  ;;  %v1159_v19 = vmul.f32 0.1, %v1085_v32  ;;  %vm1386_vm11 = vcmp.gt.f32.partialorder %v1330_v56, 0.0  ;;  %v1404_v28 = vmul.f32 0.1, %v1330_v56 }
 0x155   : > { %v9459_v29 = vmax.f32 %v12600_v12, %v1178_v46  ;;  %vm1144_vm12 = vcmp.gt.f32.partialorder %v1100_v48, 0.0  ;;  %v1162_v14 = vmul.f32 0.1, %v1100_v48  ;;  %v1345_v6 = vadd.f32 %v7381_v24, %v9211_v34 }
 0x156   : > { %v7328_v20 = vpop.f32.mrb[32].mxu0  ;;  %v9446_v2 = vpop.f32.mrb[32].mxu1  ;;  %v1177_v57 = vsel %vm1141_vm10, %v1085_v32, %v1159_v19  ;;  %v1095_v42 = vadd.f32 %v9211_v34, %v1094_v58  ;;  %v12601_v10 = vmax.f32 %v9286_v13, %v9292_v21  ;;  %v9474_v43 = vsel %vm1386_vm11, %v1330_v56, %v1404_v28 }
 0x157   : > { %v9452_v51 = vpop.f32.mrb[33].mxu0  ;;  %v9454_v47 = vpop.f32.mrb[33].mxu1  ;;  %v1441_v27 = vmax.f32 %v9459_v29, %v9461_v53  ;;  %v1180_v46 = vsel %vm1144_vm12, %v1100_v48, %v1162_v14  ;;  %v1340_v12 = vadd.f32 %v9211_v34, %v1339_v61  ;;  %v12602_v24 = vmax.f32 %v9294_v22, %v9300_v36 }
 0x158   : > { %v9472_v8 = vmax.f32 %v12601_v10, %v1177_v57  ;;  %vm1389_vm13 = vcmp.gt.f32.partialorder %v1345_v6, 0.0  ;;  %v1407_v19 = vmul.f32 0.1, %v1345_v6  ;;  %vm1143_vm14 = vcmp.gt.f32.partialorder %v1095_v42, 0.0 }
 0x159   : > { %v9484_v58 = vmax.f32 %v12602_v24, %v1180_v46  ;;  %v1161_v21 = vmul.f32 0.1, %v1095_v42  ;;  %vm1388_vm15 = vcmp.gt.f32.partialorder %v1340_v12, 0.0  ;;  %v1406_v56 = vmul.f32 0.1, %v1340_v12 }
 0x15a   : > { %v7331_v59 = vpop.f32.mrb[34].mxu0  ;;  %v9467_v4 = vpop.f32.mrb[34].mxu1  ;;  %v1440_v13 = vmax.f32 %v9472_v8, %v9474_v43  ;;  %v9488_v48 = vsel %vm1389_vm13, %v1345_v6, %v1407_v19  ;;  %v12603_v61 = vmax.f32 %v9373_v40, %v9377_v44  ;;  %v12604_v28 = vmax.f32 %v9368_v33, %v9362_v63  ;;  %v2396_v43 = vld [vmem:[%s12567_s3 + $0x10] sm:$0xff] }
 0x15b   : > { %v9477_v26 = vpop.f32.mrb[35].mxu0  ;;  %v9479_v32 = vpop.f32.mrb[35].mxu1  ;;  %v1110_v36 = vadd.f32 %v7325_v16, %v9211_v34  ;;  %v1355_v14 = vadd.f32 %v7384_v31, %v9211_v34  ;;  %v1443_v57 = vmax.f32 %v9484_v58, %v9488_v48  ;;  %v1179_v10 = vsel %vm1143_vm14, %v1095_v42, %v1161_v21  ;;  %v2398_v48 = vld [vmem:[%s12567_s3 + $0x20] sm:$0xff] }
 0x15c   : > { %v7774_v22 = vpack.c.bf16 %v12604_v28, %v12603_v61  ;;  %v9500_v46 = vsel %vm1388_vm15, %v1340_v12, %v1406_v56  ;;  %v1105_v6 = vadd.f32 %v9211_v34, %v1104_v52  ;;  %v12605_v24 = vmax.f32 %v9307_v54, %v9309_v55 }
 0x15d   : > { %vm1146_vm1 = vcmp.gt.f32.partialorder %v1110_v36, 0.0  ;;  %v1164_v63 = vmul.f32 0.1, %v1110_v36  ;;  %vm1391_vm2 = vcmp.gt.f32.partialorder %v1355_v14, 0.0  ;;  %v1409_v33 = vmul.f32 0.1, %v1355_v14 }
 0x15e   : > { %v9506_v40 = vmax.f32 %v12605_v24, %v1179_v10  ;;  %7775 = vmatpush1.bf16.msra.mxu0 %v7774_v22  ;;  %v12606_v44 = vmov 0.0|0.0   ;;  %vm1145_vm3 = vcmp.gt.f32.partialorder %v1105_v6, 0.0  ;;  %v1163_v31 = vmul.f32 0.1, %v1105_v6 }
 0x15f   : > { %7776 = vmatprep.subr.bf16.mxu0 %v12606_v44  ;;  %v1350_v16 = vadd.f32 %v9211_v34, %v1349_v5  ;;  %v1182_v52 = vsel %vm1146_vm1, %v1110_v36, %v1164_v63  ;;  %v12607_v54 = vmax.f32 %v9398_v7, %v9400_v11  ;;  %v12608_v55 = vmax.f32 %v9387_v49, %v9389_v60 }
 0x160   : > { %v1442_v42 = vmax.f32 %v9506_v40, %v9500_v46  ;;  %v1120_v19 = vadd.f32 %v7328_v20, %v9211_v34  ;;  %v12609_v21 = vmax.f32 %v9313_v1, %v9315_v3  ;;  %v1427_v61 = vsel %vm1391_vm2, %v1355_v14, %v1409_v33 }
 0x161   : > { %v7777_v12 = vpack.c.bf16 %v12608_v55, %v12607_v54  ;;  %v1181_v28 = vsel %vm1145_vm3, %v1105_v6, %v1163_v31  ;;  %vm1390_vm4 = vcmp.gt.f32.partialorder %v1350_v16, 0.0  ;;  %v12610_v5 = vmax.f32 %v9321_v17, %v9323_v18 }
 0x162   : > { %v1200_v56 = vmax.f32 %v12609_v21, %v1182_v52  ;;  %v1408_v36 = vmul.f32 0.1, %v1350_v16  ;;  %vm1148_vm5 = vcmp.gt.f32.partialorder %v1120_v19, 0.0  ;;  %v1166_v7 = vmul.f32 0.1, %v1120_v19 }
 0x163   : > { %v1199_v22 = vmax.f32 %v12610_v5, %v1181_v28  ;;  %7778 = vmatpush1.bf16.msra.mxu0 %v7777_v12  ;;  %v1365_v49 = vadd.f32 %v9446_v2, %v9211_v34  ;;  %v1115_v1 = vadd.f32 %v9211_v34, %v9452_v51  ;;  %v1360_v3 = vadd.f32 %v9211_v34, %v9454_v47  ;;  %v2400_v5 = vld [vmem:[%s12567_s3 + $0x30] sm:$0xff] }
 0x164   : > { %v1445_v11 = vmax.f32 %v1200_v56, %v1427_v61  ;;  %7779 = vmatprep.subr.bf16.mxu0 %v12606_v44  ;;  %v1426_v60 = vsel %vm1390_vm4, %v1350_v16, %v1408_v36  ;;  %v1184_v20 = vsel %vm1148_vm5, %v1120_v19, %v1166_v7  ;;  %v12611_v17 = vmax.f32 %v9423_v41, %v9417_v45  ;;  %v2402_v7 = vld [vmem:[%s12567_s3 + $0x40] sm:$0xff] }
 0x165   : > { %v12612_v18 = vmax.f32 %v9406_v62, %v9410_v38  ;;  %v1130_v10 = vadd.f32 %v7331_v59, %v9211_v34  ;;  %v1444_v2 = vmax.f32 %v1199_v22, %v1426_v60  ;;  %v12613_v46 = vmax.f32 %v9329_v39, %v9334_v0  ;;  %v2401_v22 = vld [vmem:[%s12567_s3 + $0x38] sm:$0xff] }
 0x166   : > { %vm1393_vm6 = vcmp.gt.f32.partialorder %v1365_v49, 0.0  ;;  %v1411_v51 = vmul.f32 0.1, %v1365_v49  ;;  %vm1147_vm7 = vcmp.gt.f32.partialorder %v1115_v1, 0.0  ;;  %v1165_v47 = vmul.f32 0.1, %v1115_v1 }
 0x167   : > { %v7780_v14 = vpack.c.bf16 %v12612_v18, %v12611_v17  ;;  %v1202_v6 = vmax.f32 %v12613_v46, %v1184_v20  ;;  %vm1392_vm8 = vcmp.gt.f32.partialorder %v1360_v3, 0.0  ;;  %v1410_v24 = vmul.f32 0.1, %v1360_v3  ;;  %v1468_v20 = vld [vmem:[%s12575_s11] sm:$0xff]  ;;  %v2407_v18 = vld [vmem:[%s12567_s3 + $0x68] sm:$0xff]  ;;  %v2408_v46 = vld [vmem:[%s12567_s3 + $0x70] sm:$0xff] }
 0x168   : > { %v1429_v40 = vsel %vm1393_vm6, %v1365_v49, %v1411_v51  ;;  %vm1150_vm9 = vcmp.gt.f32.partialorder %v1130_v10, 0.0  ;;  %v1168_v45 = vmul.f32 0.1, %v1130_v10  ;;  %v1375_v62 = vadd.f32 %v9467_v4, %v9211_v34  ;;  %v2406_v17 = vld [vmem:[%s12567_s3 + $0x60] sm:$0xff]  ;;  %v1473_v51 = vld [vmem:[%s12575_s11 + $0x28] sm:$0xff] }
 0x169   : > { %7781 = vmatpush1.bf16.msra.mxu0 %v7780_v14  ;;  %v1447_v38 = vmax.f32 %v1202_v6, %v1429_v40  ;;  %v1183_v41 = vsel %vm1147_vm7, %v1115_v1, %v1165_v47  ;;  %v1428_v59 = vsel %vm1392_vm8, %v1360_v3, %v1410_v24  ;;  %v1125_v39 = vadd.f32 %v9211_v34, %v9477_v26  ;;  %v2404_v1 = vld [vmem:[%s12567_s3 + $0x50] sm:$0xff]  ;;  %v2405_v3 = vld [vmem:[%s12567_s3 + $0x58] sm:$0xff]  ;;  %v1472_v24 = vld [vmem:[%s12575_s11 + $0x20] sm:$0xff] }
 0x16a   : > { %7782 = vmatprep.subr.bf16.mxu0 %v12606_v44  ;;  %v12614_v0 = vmax.f32 %v9336_v30, %v9340_v9  ;;  %v1186_v33 = vsel %vm1150_vm9, %v1130_v10, %v1168_v45  ;;  %vm1395_vm10 = vcmp.gt.f32.partialorder %v1375_v62, 0.0  ;;  %v1413_v31 = vmul.f32 0.1, %v1375_v62  ;;  %v1471_v14 = vld [vmem:[%s12575_s11 + $0x18] sm:$0xff]  ;;  %v2410_v40 = vld [vmem:[%s12567_s3 + $0x80] sm:$0xff]  ;;  %v2411_v45 = vld [vmem:[%s12567_s3 + $0x88] sm:$0xff] }
 0x16b   : > { %v12615_v16 = vmax.f32 %v9344_v23, %v9348_v50  ;;  %vm1149_vm11 = vcmp.gt.f32.partialorder %v1125_v39, 0.0  ;;  %v1167_v4 = vmul.f32 0.1, %v1125_v39  ;;  %v1370_v54 = vadd.f32 %v9211_v34, %v9479_v32  ;;  %v2394_v34 = vld [vmem:[%s12567_s3] sm:$0xff]  ;;  %v2395_v23 = vld [vmem:[%s12567_s3 + $0x8] sm:$0xff]  ;;  %v2409_v6 = vld [vmem:[%s12567_s3 + $0x78] sm:$0xff] }
 0x16c   : > { %v1201_v63 = vmax.f32 %v12614_v0, %v1183_v41  ;;  %v1431_v12 = vsel %vm1395_vm10, %v1375_v62, %v1413_v31  ;;  %v12616_v26 = vmax.f32 %v9439_v15, %v9441_v25  ;;  %v12617_v30 = vmax.f32 %v9431_v37, %v9433_v35  ;;  %v12618_v35 = vld [vmem:[#allocation12_spill] sm:$0xff]  ;;  %v12619_v32 = vld [vmem:[#allocation13_spill] sm:$0xff]  ;;  %v1475_v62 = vld [vmem:[%s12575_s11 + $0x38] sm:$0xff] }
 0x16d   : > { %v1204_v52 = vmax.f32 %v12615_v16, %v1186_v33  ;;  %v7786_v50 = vpack.c.bf16 %v1441_v27, %v1440_v13  ;;  %v1185_v25 = vsel %vm1149_vm11, %v1125_v39, %v1167_v4  ;;  %vm1394_vm12 = vcmp.gt.f32.partialorder %v1370_v54, 0.0  ;;  %v2397_v13 = vld [vmem:[%s12567_s3 + $0x18] sm:$0xff]  ;;  %v1474_v41 = vld [vmem:[%s12575_s11 + $0x30] sm:$0xff]  ;;  %v1477_v0 = vld [vmem:[%s12575_s11 + $0x48] sm:$0xff] }
 0x16e   : > { %v1446_v55 = vmax.f32 %v1201_v63, %v1428_v59  ;;  %v7783_v9 = vpack.c.bf16 %v12617_v30, %v12616_v26  ;;  %v1412_v37 = vmul.f32 0.1, %v1370_v54  ;;  %v12620_v19 = vmax.f32 %v12618_v35, %v12619_v32  ;;  %v2412_v59 = vld [vmem:[%s12567_s3 + $0x90] sm:$0xff]  ;;  %v2413_v39 = vld [vmem:[%s12567_s3 + $0x98] sm:$0xff]  ;;  %v1476_v33 = vld [vmem:[%s12575_s11 + $0x40] sm:$0xff] }
 0x16f   : > { %v1449_v15 = vmax.f32 %v1204_v52, %v1431_v12  ;;  %v7789_v29 = vpack.c.bf16 %v1443_v57, %v1442_v42  ;;  %v7792_v53 = vpack.c.bf16 %v1445_v11, %v1444_v2  ;;  %v7801_v56 = vpack.c.bf16 %v2395_v23, %v2394_v34  ;;  %v2399_v57 = vld [vmem:[%s12567_s3 + $0x28] sm:$0xff]  ;;  %v1470_v2 = vld [vmem:[%s12575_s11 + $0x10] sm:$0xff]  ;;  %v2414_v31 = vld [vmem:[%s12567_s3 + $0xa0] sm:$0xff] }
 0x170   : > { %v1203_v8 = vmax.f32 %v12620_v19, %v1185_v25  ;;  %7784 = vmatpush1.bf16.msra.mxu0 %v7783_v9  ;;  %v7795_v27 = vpack.c.bf16 %v1447_v38, %v1446_v55  ;;  %v1430_v21 = vsel %vm1394_vm12, %v1370_v54, %v1412_v37  ;;  %v7804_v28 = vpack.c.bf16 %v2397_v13, %v2396_v43  ;;  %v2403_v11 = vld [vmem:[%s12567_s3 + $0x48] sm:$0xff]  ;;  %v1479_v52 = vld [vmem:[%s12575_s11 + $0x58] sm:$0xff]  ;;  %v1478_v54 = vld [vmem:[%s12575_s11 + $0x50] sm:$0xff] }
 0x171   : > { %7785 = vmatprep.subr.bf16.mxu0 %v12606_v44  ;;  %7802 = vmatpush1.bf16.msra.mxu1 %v7801_v56  ;;  %v7807_v42 = vpack.c.bf16 %v2399_v57, %v2398_v48  ;;  %v7810_v36 = vpack.c.bf16 %v2401_v22, %v2400_v5  ;;  %v7813_v49 = vpack.c.bf16 %v2403_v11, %v2402_v7  ;;  %v2415_v16 = vld [vmem:[%s12567_s3 + $0xa8] sm:$0xff]  ;;  %v1480_v12 = vld [vmem:[%s12575_s11 + $0x60] sm:$0xff]  ;;  %v1483_v26 = vld [vmem:[%s12575_s11 + $0x78] sm:$0xff]  ;;  %vm3536_vm13 = vcmask 326656  }
 0x172   : > { %v1448_v61 = vmax.f32 %v1203_v8, %v1430_v21  ;;  %7803 = vmatprep.subr.bf16.mxu1 %v12606_v44  ;;  %v7816_v60 = vpack.c.bf16 %v2405_v3, %v2404_v1  ;;  %v7819_v10 = vpack.c.bf16 %v2407_v18, %v2406_v17  ;;  %v7822_v47 = vpack.c.bf16 %v2409_v6, %v2408_v46  ;;  %v1481_v55 = vld [vmem:[%s12575_s11 + $0x68] sm:$0xff]  ;;  %v1482_v30 = vld [vmem:[%s12575_s11 + $0x70] sm:$0xff]  ;;  %v1487_v34 = vld [vmem:[%s12575_s11 + $0x98] sm:$0xff] }
 0x173   : > { %v7825_v38 = vpack.c.bf16 %v2411_v45, %v2410_v40  ;;  %v7828_v63 = vpack.c.bf16 %v2413_v39, %v2412_v59  ;;  %v7831_v4 = vpack.c.bf16 %v2415_v16, %v2414_v31  ;;  %v1485_v9 = vld [vmem:[%s12575_s11 + $0x88] sm:$0xff]  ;;  %v1486_v23 = vld [vmem:[%s12575_s11 + $0x90] sm:$0xff]  ;;  %v1488_v25 = vld [vmem:[%s12575_s11 + $0xa0] sm:$0xff] }
 0x174   : > { %7787 = vmatpush1.bf16.msra.mxu0 %v7786_v50  ;;  %v7798_v58 = vpack.c.bf16 %v1449_v15, %v1448_v61  ;;  %v1484_v50 = vld [vmem:[%s12575_s11 + $0x80] sm:$0xff]  ;;  %v1489_v15 = vld [vmem:[%s12575_s11 + $0xa8] sm:$0xff]  ;;  %v1491_v37 = vld [vmem:[%s12575_s11 + $0xb8] sm:$0xff] }
 0x175   : > { %7788 = vmatprep.subr.bf16.mxu0 %v12606_v44  ;;  %7805 = vmatpush1.bf16.msra.mxu1 %v7804_v28  ;;  %v1490_v35 = vld [vmem:[%s12575_s11 + $0xb0] sm:$0xff]  ;;  %v1493_v32 = vld [vmem:[%s12575_s11 + $0xc8] sm:$0xff]  ;;  %v1492_v19 = vld [vmem:[%s12575_s11 + $0xc0] sm:$0xff] }
 0x176   : > { %7806 = vmatprep.subr.bf16.mxu1 %v12606_v44  ;;  %v1495_v8 = vld [vmem:[%s12575_s11 + $0xd8] sm:$0xff]  ;;  %v1498_v13 = vld [vmem:[%s12575_s11 + $0xf0] sm:$0xff]  ;;  %v1501_v21 = vld [vmem:[%s12575_s11 + $0x108] sm:$0xff] }
 0x177   : > { %v1499_v43 = vld [vmem:[%s12575_s11 + $0xf8] sm:$0xff]  ;;  %v1500_v56 = vld [vmem:[%s12575_s11 + $0x100] sm:$0xff]  ;;  %v1502_v28 = vld [vmem:[%s12575_s11 + $0x110] sm:$0xff] }
 0x178   : > { %7790 = vmatpush1.bf16.msra.mxu0 %v7789_v29  ;;  %v1494_v29 = vld [vmem:[%s12575_s11 + $0xd0] sm:$0xff]  ;;  %v1503_v61 = vld [vmem:[%s12575_s11 + $0x118] sm:$0xff]  ;;  %v1504_v48 = vld [vmem:[%s12575_s11 + $0x120] sm:$0xff] }
 0x179   : > { %7791 = vmatprep.subr.bf16.mxu0 %v12606_v44  ;;  %7808 = vmatpush1.bf16.msra.mxu1 %v7807_v42  ;;  %v1507_v57 = vld [vmem:[%s12575_s11 + $0x138] sm:$0xff]  ;;  %v1506_v42 = vld [vmem:[%s12575_s11 + $0x130] sm:$0xff]  ;;  %v1509_v5 = vld [vmem:[%s12575_s11 + $0x148] sm:$0xff] }
 0x17a   : > { %7809 = vmatprep.subr.bf16.mxu1 %v12606_v44  ;;  %v2416_v22 = vld [vmem:[%s12567_s3 + $0xb0] sm:$0xff]  ;;  %v1508_v11 = vld [vmem:[%s12575_s11 + $0x140] sm:$0xff]  ;;  %v2419_v3 = vld [vmem:[%s12567_s3 + $0xc8] sm:$0xff] }
 0x17b   : > { %v2418_v1 = vld [vmem:[%s12567_s3 + $0xc0] sm:$0xff]  ;;  %v1513_v17 = vld [vmem:[%s12575_s11 + $0x168] sm:$0xff]  ;;  %v2420_v18 = vld [vmem:[%s12567_s3 + $0xd0] sm:$0xff] }
 0x17c   : > { %7793 = vmatpush1.bf16.msra.mxu0 %v7792_v53  ;;  %v1497_v53 = vld [vmem:[%s12575_s11 + $0xe8] sm:$0xff]  ;;  %v1515_v46 = vld [vmem:[%s12575_s11 + $0x178] sm:$0xff]  ;;  %v2422_v6 = vld [vmem:[%s12567_s3 + $0xe0] sm:$0xff] }
 0x17d   : > { %7794 = vmatprep.subr.bf16.mxu0 %v12606_v44  ;;  %7811 = vmatpush1.bf16.msra.mxu1 %v7810_v36  ;;  %v2417_v36 = vld [vmem:[%s12567_s3 + $0xb8] sm:$0xff]  ;;  %v2424_v40 = vld [vmem:[%s12567_s3 + $0xf0] sm:$0xff]  ;;  %v2426_v31 = vld [vmem:[%s12567_s3 + $0x100] sm:$0xff] }
 0x17e   : > { %7812 = vmatprep.subr.bf16.mxu1 %v12606_v44  ;;  %v7834_v7 = vpack.c.bf16 %v2417_v36, %v2416_v22  ;;  %v2425_v45 = vld [vmem:[%s12567_s3 + $0xf8] sm:$0xff]  ;;  %v2427_v16 = vld [vmem:[%s12567_s3 + $0x108] sm:$0xff] }
 0x180   : > { %7796 = vmatpush1.bf16.msra.mxu0 %v7795_v27  ;;  %v1496_v27 = vld [vmem:[%s12575_s11 + $0xe0] sm:$0xff] }
 0x181   : > { %7797 = vmatprep.subr.bf16.mxu0 %v12606_v44  ;;  %7814 = vmatpush1.bf16.msra.mxu1 %v7813_v49  ;;  %v1511_v49 = vld [vmem:[%s12575_s11 + $0x158] sm:$0xff] }
 0x182   : > { %7815 = vmatprep.subr.bf16.mxu1 %v12606_v44 }
 0x184   : > { %7799 = vmatpush1.bf16.msra.mxu0 %v7798_v58  ;;  %v1505_v58 = vld [vmem:[%s12575_s11 + $0x128] sm:$0xff] }
 0x185   : > { %8016 = vmatprep.subr.bf16.mxu0 %v12606_v44  ;;  %7817 = vmatpush1.bf16.msra.mxu1 %v7816_v60  ;;  %v7837_v60 = vpack.c.bf16 %v2419_v3, %v2418_v1  ;;  %v2436_v3 = vld [vmem:[%s12567_s3 + $0x150] sm:$0xff] }
 0x186   : > { %7818 = vmatprep.subr.bf16.mxu1 %v12606_v44 }
 0x187   : > { %1677 = vmatmul.mubr.f32.vlgmr.msra.gmra.mrb[36].mxu0 %v1468_v20  ;;  %v1510_v20 = vld [vmem:[%s12575_s11 + $0x150] sm:$0xff] }
 0x188   : > { %6323 = vmatprep.mubr.msk.f32.mxu0 %vm1536_vm0, %v1471_v14  ;;  %v2421_v14 = vld [vmem:[%s12567_s3 + $0xd8] sm:$0xff] }
 0x189   : > { %7820 = vmatpush1.bf16.msra.mxu1 %v7819_v10  ;;  %v1512_v10 = vld [vmem:[%s12575_s11 + $0x160] sm:$0xff] }
 0x18a   : > { %7821 = vmatprep.subr.bf16.mxu1 %v12606_v44 }
 0x18b   : > { %1682 = vmatmul.mubr.f32.gmra.mrb[38].mxu0 %v1470_v2  ;;  %v7840_v2 = vpack.c.bf16 %v2421_v14, %v2420_v18 }
 0x18c   : > { %6324 = vmatprep.mubr.msk.f32.mxu0 %vm1536_vm0, %v1473_v51  ;;  %v2423_v51 = vld [vmem:[%s12567_s3 + $0xe8] sm:$0xff] }
 0x18d   : > { %7823 = vmatpush1.bf16.msra.mxu1 %v7822_v47  ;;  %v1514_v47 = vld [vmem:[%s12575_s11 + $0x170] sm:$0xff] }
 0x18e   : > { %7824 = vmatprep.subr.bf16.mxu1 %v12606_v44 }
 0x18f   : > { %1687 = vmatmul.mubr.f32.gmra.mrb[40].mxu0 %v1472_v24  ;;  %v7843_v24 = vpack.c.bf16 %v2423_v51, %v2422_v6 }
 0x190   : > { %6325 = vmatprep.mubr.msk.f32.mxu0 %vm1536_vm0, %v1475_v62  ;;  %v7846_v62 = vpack.c.bf16 %v2425_v45, %v2424_v40 }
 0x191   : > { %7826 = vmatpush1.bf16.msra.mxu1 %v7825_v38  ;;  %v1517_v38 = vld [vmem:[%s12575_s11 + $0x188] sm:$0xff] }
 0x192   : > { %7827 = vmatprep.subr.bf16.mxu1 %v12606_v44 }
 0x193   : > { %1692 = vmatmul.mubr.f32.gmra.mrb[42].mxu0 %v1474_v41  ;;  %v1516_v41 = vld [vmem:[%s12575_s11 + $0x180] sm:$0xff] }
 0x194   : > { %6326 = vmatprep.mubr.msk.f32.mxu0 %vm1536_vm0, %v1477_v0 }
 0x195   : > { %7829 = vmatpush1.bf16.msra.mxu1 %v7828_v63 }
 0x196   : > { %7830 = vmatprep.subr.bf16.mxu1 %v12606_v44 }
 0x197   : > { %1697 = vmatmul.mubr.f32.gmra.mrb[44].mxu0 %v1476_v33 }
 0x198   : > { %6327 = vmatprep.mubr.msk.f32.mxu0 %vm1536_vm0, %v1479_v52 }
 0x199   : > { %7832 = vmatpush1.bf16.msra.mxu1 %v7831_v4  ;;  %v7849_v4 = vpack.c.bf16 %v2427_v16, %v2426_v31  ;;  %v2441_v31 = vld [vmem:[%s12567_s3 + $0x178] sm:$0xff] }
 0x19a   : > { %7833 = vmatprep.subr.bf16.mxu1 %v12606_v44 }
 0x19b   : > { %1702 = vmatmul.mubr.f32.gmra.mrb[46].mxu0 %v1478_v54  ;;  %v2428_v54 = vld [vmem:[%s12567_s3 + $0x110] sm:$0xff] }
 0x19c   : > { %6328 = vmatprep.mubr.msk.f32.mxu0 %vm1536_vm0, %v1481_v55 }
 0x19d   : > { %7835 = vmatpush1.bf16.msra.mxu1 %v7834_v7 }
 0x19e   : > { %7836 = vmatprep.subr.bf16.mxu1 %v12606_v44 }
 0x19f   : > { %1707 = vmatmul.mubr.f32.gmra.mrb[48].mxu0 %v1480_v12 }
 0x1a0   : > { %6329 = vmatprep.mubr.msk.f32.mxu0 %vm1536_vm0, %v1483_v26 }
 0x1a1   : > { %7838 = vmatpush1.bf16.msra.mxu1 %v7837_v60  ;;  %v2437_v60 = vld [vmem:[%s12567_s3 + $0x158] sm:$0xff] }
 0x1a2   : > { %7839 = vmatprep.subr.bf16.mxu1 %v12606_v44  ;;  %v7864_v51 = vpack.c.bf16 %v2437_v60, %v2436_v3 }
 0x1a3   : > { %1712 = vmatmul.mubr.f32.gmra.mrb[50].mxu0 %v1482_v30  ;;  %v2429_v30 = vld [vmem:[%s12567_s3 + $0x118] sm:$0xff] }
 0x1a4   : > { %6330 = vmatprep.mubr.msk.f32.mxu0 %vm1536_vm0, %v1485_v9 }
 0x1a5   : > { %7841 = vmatpush1.bf16.msra.mxu1 %v7840_v2 }
 0x1a6   : > { %7842 = vmatprep.subr.bf16.mxu1 %v12606_v44 }
 0x1a7   : > { %1717 = vmatmul.mubr.f32.gmra.mrb[52].mxu0 %v1484_v50  ;;  %v7852_v50 = vpack.c.bf16 %v2429_v30, %v2428_v54 }
 0x1a8   : > { %6331 = vmatprep.mubr.msk.f32.mxu0 %vm1536_vm0, %v1487_v34  ;;  %v2430_v34 = vld [vmem:[%s12567_s3 + $0x120] sm:$0xff] }
 0x1a9   : > { %7844 = vmatpush1.bf16.msra.mxu1 %v7843_v24  ;;  %v2439_v24 = vld [vmem:[%s12567_s3 + $0x168] sm:$0xff] }
 0x1aa   : > { %7845 = vmatprep.subr.bf16.mxu1 %v12606_v44 }
 0x1ab   : > { %1722 = vmatmul.mubr.f32.gmra.mrb[54].mxu0 %v1486_v23  ;;  %v2431_v23 = vld [vmem:[%s12567_s3 + $0x128] sm:$0xff] }
 0x1ac   : > { %6332 = vmatprep.mubr.msk.f32.mxu0 %vm1536_vm0, %v1489_v15 }
 0x1ad   : > { %7847 = vmatpush1.bf16.msra.mxu1 %v7846_v62 }
 0x1ae   : > { %7848 = vmatprep.subr.bf16.mxu1 %v12606_v44 }
 0x1af   : > { %1727 = vmatmul.mubr.f32.gmra.mrb[56].mxu0 %v1488_v25 }
 0x1b0   : > { %6333 = vmatprep.mubr.msk.f32.mxu0 %vm1536_vm0, %v1491_v37 }
 0x1b3   : > { %1732 = vmatmul.mubr.f32.gmra.mrb[58].mxu0 %v1490_v35 }
 0x1b4   : > { %6334 = vmatprep.mubr.msk.f32.mxu0 %vm1536_vm0, %v1493_v32 }
 0x1b7   : > { %1737 = vmatmul.mubr.f32.gmra.mrb[60].mxu0 %v1492_v19 }
 0x1b8   : > { %6335 = vmatprep.mubr.msk.f32.mxu0 %vm1536_vm0, %v1495_v8  ;;  %v7855_v8 = vpack.c.bf16 %v2431_v23, %v2430_v34  ;;  %v2443_v34 = vld [vmem:[%s12567_s3 + $0x188] sm:$0xff] }
 0x1bb   : > { %1742 = vmatmul.mubr.f32.gmra.mrb[62].mxu0 %v1494_v29  ;;  %v2432_v29 = vld [vmem:[%s12567_s3 + $0x130] sm:$0xff] }
 0x1bc   : > { %6336 = vmatprep.mubr.msk.f32.mxu0 %vm1536_vm0, %v1497_v53  ;;  %v2433_v53 = vld [vmem:[%s12567_s3 + $0x138] sm:$0xff] }
 0x1bf   : > { %1747 = vmatmul.mubr.f32.gmra.mrb[64].mxu0 %v1496_v27 }
 0x1c0   : > { %6337 = vmatprep.mubr.msk.f32.mxu0 %vm1536_vm0, %v1499_v43 }
 0x1c3   : > { %1752 = vmatmul.mubr.f32.gmra.mrb[66].mxu0 %v1498_v13 }
 0x1c4   : > { %6338 = vmatprep.mubr.msk.f32.mxu0 %vm1536_vm0, %v1501_v21 }
 0x1c7   : > { %1757 = vmatmul.mubr.f32.gmra.mrb[68].mxu0 %v1500_v56 }
 0x1c8   : > { %6339 = vmatprep.mubr.msk.f32.mxu0 %vm1536_vm0, %v1503_v61 }
 0x1cb   : > { %1762 = vmatmul.mubr.f32.gmra.mrb[70].mxu0 %v1502_v28  ;;  %v7858_v28 = vpack.c.bf16 %v2433_v53, %v2432_v29  ;;  %v2444_v53 = vld [vmem:[%s12567_s3 + $0x190] sm:$0xff] }
 0x1cc   : > { %6340 = vmatprep.mubr.msk.f32.mxu0 %vm1536_vm0, %v1505_v58  ;;  %v2434_v58 = vld [vmem:[%s12567_s3 + $0x140] sm:$0xff] }
 0x1cf   : > { %1767 = vmatmul.mubr.f32.gmra.mrb[72].mxu0 %v1504_v48  ;;  %v2435_v48 = vld [vmem:[%s12567_s3 + $0x148] sm:$0xff] }
 0x1d0   : > { %6341 = vmatprep.mubr.msk.f32.mxu0 %vm1536_vm0, %v1507_v57  ;;  %v7861_v1 = vpack.c.bf16 %v2435_v48, %v2434_v58 }
 0x1d3   : > { %1772 = vmatmul.mubr.f32.gmra.mrb[74].mxu0 %v1506_v42 }
 0x1d4   : > { %6342 = vmatprep.mubr.msk.f32.mxu0 %vm1536_vm0, %v1509_v5 }
 0x1d7   : > { %1777 = vmatmul.mubr.f32.gmra.mrb[76].mxu0 %v1508_v11 }
 0x1d8   : > { %6343 = vmatprep.mubr.msk.f32.mxu0 %vm1536_vm0, %v1511_v49 }
 0x1db   : > { %1782 = vmatmul.mubr.f32.gmra.mrb[78].mxu0 %v1510_v20 }
 0x1dc   : > { %6344 = vmatprep.mubr.msk.f32.mxu0 %vm1536_vm0, %v1513_v17 }
 0x1df   : > { %1787 = vmatmul.mubr.f32.gmra.mrb[80].mxu0 %v1512_v10 }
 0x1e0   : > { %6345 = vmatprep.mubr.msk.f32.mxu0 %vm1536_vm0, %v1515_v46 }
 0x1e3   : > { %1792 = vmatmul.mubr.f32.gmra.mrb[82].mxu0 %v1514_v47  ;;  %v2438_v47 = vld [vmem:[%s12567_s3 + $0x160] sm:$0xff] }
 0x1e4   : > { %6346 = vmatprep.mubr.msk.f32.mxu0 %vm1536_vm0, %v1517_v38  ;;  %vm8869_vm0 = vmmov 0  }
 0x1e7   : > { %1797 = vmatmul.mubr.f32.gmra.mrb[84].mxu0 %v1516_v41 }
 0x25a   : > { %v1678_v59 = vpop.f32.mrb[36].mxu0 }
 0x25b   : > { %1802 = vst [vmem:[#allocation4] sm:$0xff] %v1678_v59  ;;  %v1680_v39 = vpop.f32.mrb[37].mxu0 }
 0x25e   : > { %v1683_v0 = vpop.f32.mrb[38].mxu0 }
 0x25f   : > { %1803 = vst [vmem:[#allocation4 + $0x8] sm:$0xff] %v1683_v0  ;;  %v1685_v63 = vpop.f32.mrb[39].mxu0 }
 0x260   : > { %v7867_v63 = vpack.c.bf16 %v2439_v24, %v2438_v47 }
 0x262   : > { %v1688_v33 = vpop.f32.mrb[40].mxu0 }
 0x263   : > { %1804 = vst [vmem:[#allocation4 + $0x10] sm:$0xff] %v1688_v33  ;;  %2058 = vst [vmem:[#allocation2 + $0x28] sm:$0xff] %v1688_v33  ;;  %v1690_v52 = vpop.f32.mrb[41].mxu0 }
 0x266   : > { %v1869_v55 = vld [vmem:[#allocation4 + $0x1] sm:$0xff]  ;;  %v9871_v26 = vpop.f32.mrb[42].mxu0 }
 0x267   : > { %v1911_v12 = vld [vmem:[#allocation4 + $0x2] sm:$0xff]  ;;  %1805 = vst [vmem:[#allocation4 + $0x18] sm:$0xff] %v9871_v26  ;;  %2059 = vst [vmem:[#allocation2 + $0x70] sm:$0xff] %v9871_v26  ;;  %v1695_v9 = vpop.f32.mrb[43].mxu0  ;;  %2609 = vmatprep.mubr.f32.mxu1 %v1869_v55 }
 0x268   : > { %1932 = vst [vmem:[#allocation2 + $0x10] sm:$0xff] %v1911_v12  ;;  %2610 = vmatmul.mubr.f32.vlgmr.msra.gmra.mrb[36].mxu1 %v1678_v59 }
 0x269   : > { %7850 = vmatpush1.bf16.msra.mxu1 %v7849_v4 }
 0x26a   : > { %v1870_v15 = vld [vmem:[#allocation4 + $0x9] sm:$0xff]  ;;  %v9884_v35 = vpop.f32.mrb[44].mxu0  ;;  %7851 = vmatprep.subr.bf16.mxu1 %v12606_v44 }
 0x26b   : > { %v1912_v25 = vld [vmem:[#allocation4 + $0xa] sm:$0xff]  ;;  %1806 = vst [vmem:[#allocation4 + $0x20] sm:$0xff] %v9884_v35  ;;  %2060 = vst [vmem:[#allocation2 + $0xb8] sm:$0xff] %v9884_v35  ;;  %v1700_v19 = vpop.f32.mrb[45].mxu0  ;;  %2614 = vmatprep.mubr.f32.mxu1 %v1870_v15 }
 0x26c   : > { %v1953_v37 = vld [vmem:[#allocation4 + $0xe] sm:$0xff]  ;;  %1933 = vst [vmem:[#allocation2 + $0x58] sm:$0xff] %v1912_v25  ;;  %2615 = vmatmul.mubr.f32.gmra.mrb[38].mxu1 %v1683_v0 }
 0x26d   : > { %1974 = vst [vmem:[#allocation2 + $0x18] sm:$0xff] %v1953_v37  ;;  %v1995_v32 = vld [vmem:[#allocation4 + $0xf] sm:$0xff]  ;;  %7853 = vmatpush1.bf16.msra.mxu1 %v7852_v50 }
 0x26e   : > { %2016 = vst [vmem:[#allocation2 + $0x20] sm:$0xff] %v1995_v32  ;;  %v1871_v27 = vld [vmem:[#allocation4 + $0x11] sm:$0xff]  ;;  %v9895_v21 = vpop.f32.mrb[46].mxu0  ;;  %7854 = vmatprep.subr.bf16.mxu1 %v12606_v44 }
 0x26f   : > { %v1913_v43 = vld [vmem:[#allocation4 + $0x12] sm:$0xff]  ;;  %1807 = vst [vmem:[#allocation4 + $0x28] sm:$0xff] %v9895_v21  ;;  %2061 = vst [vmem:[#allocation2 + $0x100] sm:$0xff] %v9895_v21  ;;  %v1705_v61 = vpop.f32.mrb[47].mxu0  ;;  %2619 = vmatprep.mubr.f32.mxu1 %v1871_v27  ;;  %v2445_v27 = vld [vmem:[%s12567_s3 + $0x198] sm:$0xff] }
 0x270   : > { %v1954_v13 = vld [vmem:[#allocation4 + $0x16] sm:$0xff]  ;;  %1934 = vst [vmem:[#allocation2 + $0xa0] sm:$0xff] %v1913_v43  ;;  %2620 = vmatmul.mubr.f32.gmra.mrb[40].mxu1 %v1688_v33  ;;  %v2440_v33 = vld [vmem:[%s12567_s3 + $0x170] sm:$0xff] }
 0x271   : > { %1975 = vst [vmem:[#allocation2 + $0x60] sm:$0xff] %v1954_v13  ;;  %v1996_v56 = vld [vmem:[#allocation4 + $0x17] sm:$0xff]  ;;  %7856 = vmatpush1.bf16.msra.mxu1 %v7855_v8  ;;  %v7870_v9 = vpack.c.bf16 %v2441_v31, %v2440_v33 }
 0x272   : > { %2017 = vst [vmem:[#allocation2 + $0x68] sm:$0xff] %v1996_v56  ;;  %v1872_v57 = vld [vmem:[#allocation4 + $0x19] sm:$0xff]  ;;  %v9906_v22 = vpop.f32.mrb[48].mxu0  ;;  %7857 = vmatprep.subr.bf16.mxu1 %v12606_v44  ;;  %v2442_v50 = vld [vmem:[%s12567_s3 + $0x180] sm:$0xff] }
 0x273   : > { %v1914_v42 = vld [vmem:[#allocation4 + $0x1a] sm:$0xff]  ;;  %1808 = vst [vmem:[#allocation4 + $0x30] sm:$0xff] %v9906_v22  ;;  %2062 = vst [vmem:[#allocation2 + $0x148] sm:$0xff] %v9906_v22  ;;  %v1710_v49 = vpop.f32.mrb[49].mxu0  ;;  %2624 = vmatprep.mubr.f32.mxu1 %v1872_v57  ;;  %v7873_v29 = vpack.c.bf16 %v2443_v34, %v2442_v50  ;;  %v7876_v57 = vpack.c.bf16 %v2445_v27, %v2444_v53 }
 0x274   : > { %v1955_v5 = vld [vmem:[#allocation4 + $0x1e] sm:$0xff]  ;;  %1935 = vst [vmem:[#allocation2 + $0xe8] sm:$0xff] %v1914_v42  ;;  %2625 = vmatmul.mubr.f32.gmra.mrb[42].mxu1 %v9871_v26  ;;  %v2446_v42 = vld [vmem:[%s12567_s3 + $0x1a0] sm:$0xff] }
 0x275   : > { %1976 = vst [vmem:[#allocation2 + $0xa8] sm:$0xff] %v1955_v5  ;;  %v1997_v36 = vld [vmem:[#allocation4 + $0x1f] sm:$0xff]  ;;  %2184 = vst [vmem:[#allocation2 + $0x40] sm:$0xff] %v1955_v5  ;;  %7859 = vmatpush1.bf16.msra.mxu1 %v7858_v28 }
 0x276   : > { %v2079_v7 = vld [vmem:[#allocation4 + $0x1c] sm:$0xff]  ;;  %2018 = vst [vmem:[#allocation2 + $0xb0] sm:$0xff] %v1997_v36  ;;  %v1956_v18 = vld [vmem:[#allocation4 + $0x26] sm:$0xff]  ;;  %v9918_v14 = vpop.f32.mrb[50].mxu0  ;;  %7860 = vmatprep.subr.bf16.mxu1 %v12606_v44 }
 0x277   : > { %v2121_v11 = vld [vmem:[#allocation4 + $0x1d] sm:$0xff]  ;;  %2100 = vst [vmem:[#allocation2 + $0x30] sm:$0xff] %v2079_v7  ;;  %1977 = vst [vmem:[#allocation2 + $0xf0] sm:$0xff] %v1956_v18  ;;  %v1998_v10 = vld [vmem:[#allocation4 + $0x27] sm:$0xff]  ;;  %v1715_v6 = vpop.f32.mrb[51].mxu0 }
 0x278   : > { %2142 = vst [vmem:[#allocation2 + $0x38] sm:$0xff] %v2121_v11  ;;  %v1873_v20 = vld [vmem:[#allocation4 + $0x21] sm:$0xff]  ;;  %2185 = vst [vmem:[#allocation2 + $0x88] sm:$0xff] %v1956_v18  ;;  %v2447_v5 = vld [vmem:[%s12567_s3 + $0x1a8] sm:$0xff] }
 0x279   : > { %v1915_v17 = vld [vmem:[#allocation4 + $0x22] sm:$0xff]  ;;  %1809 = vst [vmem:[#allocation4 + $0x38] sm:$0xff] %v9918_v14  ;;  %2063 = vst [vmem:[#allocation2 + $0x190] sm:$0xff] %v9918_v14  ;;  %2629 = vmatprep.mubr.f32.mxu1 %v1873_v20  ;;  %7862 = vmatpush1.bf16.msra.mxu1 %v7861_v1  ;;  %v7879_v20 = vpack.c.bf16 %v2447_v5, %v2446_v42 }
 0x27a   : > { %1936 = vst [vmem:[#allocation2 + $0x130] sm:$0xff] %v1915_v17  ;;  %v2080_v2 = vld [vmem:[#allocation4 + $0x24] sm:$0xff]  ;;  %2019 = vst [vmem:[#allocation2 + $0xf8] sm:$0xff] %v1998_v10  ;;  %2630 = vmatmul.mubr.f32.gmra.mrb[44].mxu1 %v9884_v35  ;;  %v1957_v62 = vld [vmem:[#allocation4 + $0x2e] sm:$0xff]  ;;  %v9930_v38 = vpop.f32.mrb[52].mxu0  ;;  %7863 = vmatprep.subr.bf16.mxu1 %v12606_v44 }
 0x27b   : > { %v2122_v46 = vld [vmem:[#allocation4 + $0x25] sm:$0xff]  ;;  %2101 = vst [vmem:[#allocation2 + $0x78] sm:$0xff] %v2080_v2  ;;  %1978 = vst [vmem:[#allocation2 + $0x138] sm:$0xff] %v1957_v62  ;;  %v1999_v41 = vld [vmem:[#allocation4 + $0x2f] sm:$0xff]  ;;  %v1720_v0 = vpop.f32.mrb[53].mxu0 }
 0x27c   : > { %2143 = vst [vmem:[#allocation2 + $0x80] sm:$0xff] %v2122_v46  ;;  %v1874_v40 = vld [vmem:[#allocation4 + $0x29] sm:$0xff]  ;;  %2186 = vst [vmem:[#allocation2 + $0xd0] sm:$0xff] %v1957_v62  ;;  %v2448_v17 = vld [vmem:[%s12567_s3 + $0x1b0] sm:$0xff] }
 0x27d   : > { %v1916_v45 = vld [vmem:[#allocation4 + $0x2a] sm:$0xff]  ;;  %1810 = vst [vmem:[#allocation4 + $0x40] sm:$0xff] %v9930_v38  ;;  %2064 = vst [vmem:[#allocation2 + $0x1d8] sm:$0xff] %v9930_v38  ;;  %2634 = vmatprep.mubr.f32.mxu1 %v1874_v40  ;;  %7865 = vmatpush1.bf16.msra.mxu1 %v7864_v51  ;;  %v2451_v62 = vld [vmem:[%s12567_s3 + $0x1c8] sm:$0xff] }
 0x27e   : > { %1937 = vst [vmem:[#allocation2 + $0x178] sm:$0xff] %v1916_v45  ;;  %v2081_v59 = vld [vmem:[#allocation4 + $0x2c] sm:$0xff]  ;;  %2020 = vst [vmem:[#allocation2 + $0x140] sm:$0xff] %v1999_v41  ;;  %2635 = vmatmul.mubr.f32.gmra.mrb[46].mxu1 %v9895_v21  ;;  %v9946_v54 = vpop.f32.mrb[54].mxu0  ;;  %7866 = vmatprep.subr.bf16.mxu1 %v12606_v44 }
 0x27f   : > { %v2123_v39 = vld [vmem:[#allocation4 + $0x2d] sm:$0xff]  ;;  %2102 = vst [vmem:[#allocation2 + $0xc0] sm:$0xff] %v2081_v59  ;;  %1811 = vst [vmem:[#allocation4 + $0x48] sm:$0xff] %v9946_v54  ;;  %v1725_v30 = vpop.f32.mrb[55].mxu0 }
 0x280   : > { %2144 = vst [vmem:[#allocation2 + $0xc8] sm:$0xff] %v2123_v39  ;;  %v1875_v16 = vld [vmem:[#allocation4 + $0x31] sm:$0xff]  ;;  %2065 = vst [vmem:[#allocation2 + $0x220] sm:$0xff] %v9946_v54  ;;  %v2449_v18 = vld [vmem:[%s12567_s3 + $0x1b8] sm:$0xff] }
 0x281   : > { %v9942_v52 = vld [vmem:[#allocation4 + $0x32] sm:$0xff]  ;;  %2639 = vmatprep.mubr.f32.mxu1 %v1875_v16  ;;  %7868 = vmatpush1.bf16.msra.mxu1 %v7867_v63  ;;  %v7882_v40 = vpack.c.bf16 %v2449_v18, %v2448_v17 }
 0x282   : > { %v9944_v4 = vld [vmem:[#allocation4 + $0x36] sm:$0xff]  ;;  %2640 = vmatmul.mubr.f32.gmra.mrb[48].mxu1 %v9906_v22  ;;  %v9963_v37 = vpop.f32.mrb[56].mxu0  ;;  %7869 = vmatprep.subr.bf16.mxu1 %v12606_v44 }
 0x283   : > { %v2000_v55 = vld [vmem:[#allocation4 + $0x37] sm:$0xff]  ;;  %2187 = vst [vmem:[#allocation2 + $0x118] sm:$0xff] %v9944_v4  ;;  %1812 = vst [vmem:[#allocation4 + $0x50] sm:$0xff] %v9963_v37  ;;  %v1730_v8 = vpop.f32.mrb[57].mxu0 }
 0x284   : > { %v2082_v12 = vld [vmem:[#allocation4 + $0x34] sm:$0xff]  ;;  %2021 = vst [vmem:[#allocation2 + $0x188] sm:$0xff] %v2000_v55  ;;  %v9961_v25 = vld [vmem:[#allocation4 + $0x3e] sm:$0xff]  ;;  %2066 = vst [vmem:[#allocation2 + $0x268] sm:$0xff] %v9963_v37 }
 0x285   : > { %v2124_v26 = vld [vmem:[#allocation4 + $0x35] sm:$0xff]  ;;  %2103 = vst [vmem:[#allocation2 + $0x108] sm:$0xff] %v2082_v12  ;;  %v2001_v35 = vld [vmem:[#allocation4 + $0x3f] sm:$0xff]  ;;  %2188 = vst [vmem:[#allocation2 + $0x160] sm:$0xff] %v9961_v25  ;;  %7871 = vmatpush1.bf16.msra.mxu1 %v7870_v9 }
 0x286   : > { %2145 = vst [vmem:[#allocation2 + $0x110] sm:$0xff] %v2124_v26  ;;  %v1876_v23 = vld [vmem:[#allocation4 + $0x39] sm:$0xff]  ;;  %2022 = vst [vmem:[#allocation2 + $0x1d0] sm:$0xff] %v2001_v35  ;;  %v1877_v43 = vld [vmem:[#allocation4 + $0x41] sm:$0xff]  ;;  %v9980_v56 = vpop.f32.mrb[58].mxu0  ;;  %7872 = vmatprep.subr.bf16.mxu1 %v12606_v44 }
 0x287   : > { %v9959_v15 = vld [vmem:[#allocation4 + $0x3a] sm:$0xff]  ;;  %2644 = vmatprep.mubr.f32.mxu1 %v1876_v23  ;;  %v9976_v13 = vld [vmem:[#allocation4 + $0x42] sm:$0xff]  ;;  %1813 = vst [vmem:[#allocation4 + $0x58] sm:$0xff] %v9980_v56  ;;  %2067 = vst [vmem:[#allocation2 + $0x2b0] sm:$0xff] %v9980_v56  ;;  %v1735_v48 = vpop.f32.mrb[59].mxu0 }
 0x288   : > { %v2083_v32 = vld [vmem:[#allocation4 + $0x3c] sm:$0xff]  ;;  %2645 = vmatmul.mubr.f32.gmra.mrb[50].mxu1 %v9918_v14  ;;  %v9978_v21 = vld [vmem:[#allocation4 + $0x46] sm:$0xff]  ;;  %v2450_v45 = vld [vmem:[%s12567_s3 + $0x1c0] sm:$0xff] }
 0x289   : > { %v2125_v19 = vld [vmem:[#allocation4 + $0x3d] sm:$0xff]  ;;  %2104 = vst [vmem:[#allocation2 + $0x150] sm:$0xff] %v2083_v32  ;;  %v2002_v61 = vld [vmem:[#allocation4 + $0x47] sm:$0xff]  ;;  %2189 = vst [vmem:[#allocation2 + $0x1a8] sm:$0xff] %v9978_v21  ;;  %2649 = vmatprep.mubr.f32.mxu1 %v1877_v43  ;;  %7874 = vmatpush1.bf16.msra.mxu1 %v7873_v29  ;;  %v7885_v16 = vpack.c.bf16 %v2451_v62, %v2450_v45 }
 0x28a   : > { %2146 = vst [vmem:[#allocation2 + $0x158] sm:$0xff] %v2125_v19  ;;  %v2084_v28 = vld [vmem:[#allocation4 + $0x44] sm:$0xff]  ;;  %2023 = vst [vmem:[#allocation2 + $0x218] sm:$0xff] %v2002_v61  ;;  %v9995_v7 = vld [vmem:[#allocation4 + $0x4e] sm:$0xff]  ;;  %v9997_v11 = vpop.f32.mrb[60].mxu0  ;;  %7875 = vmatprep.subr.bf16.mxu1 %v12606_v44 }
 0x28b   : > { %v2126_v58 = vld [vmem:[#allocation4 + $0x45] sm:$0xff]  ;;  %2105 = vst [vmem:[#allocation2 + $0x198] sm:$0xff] %v2084_v28  ;;  %v2003_v49 = vld [vmem:[#allocation4 + $0x4f] sm:$0xff]  ;;  %2190 = vst [vmem:[#allocation2 + $0x1f0] sm:$0xff] %v9995_v7  ;;  %v1740_v60 = vpop.f32.mrb[61].mxu0 }
 0x28c   : > { %2147 = vst [vmem:[#allocation2 + $0x1a0] sm:$0xff] %v2126_v58  ;;  %2650 = vmatmul.mubr.f32.gmra.mrb[52].mxu1 %v9930_v38  ;;  %v1878_v22 = vld [vmem:[#allocation4 + $0x49] sm:$0xff]  ;;  %1814 = vst [vmem:[#allocation4 + $0x60] sm:$0xff] %v9997_v11  ;;  %v2455_v19 = vld [vmem:[%s12567_s3 + $0x1e8] sm:$0xff] }
 0x28d   : > { %v9993_v36 = vld [vmem:[#allocation4 + $0x4a] sm:$0xff]  ;;  %2068 = vst [vmem:[#allocation2 + $0x2f8] sm:$0xff] %v9997_v11  ;;  %2654 = vmatprep.mubr.f32.mxu1 %v1878_v22  ;;  %2024 = vst [vmem:[#allocation2 + $0x260] sm:$0xff] %v2003_v49  ;;  %7877 = vmatpush1.bf16.msra.mxu1 %v7876_v57  ;;  %v2456_v48 = vld [vmem:[%s12567_s3 + $0x1f0] sm:$0xff] }
 0x28e   : > { %v2085_v1 = vld [vmem:[#allocation4 + $0x4c] sm:$0xff]  ;;  %v10012_v2 = vld [vmem:[#allocation4 + $0x56] sm:$0xff]  ;;  %v10014_v46 = vpop.f32.mrb[62].mxu0  ;;  %7878 = vmatprep.subr.bf16.mxu1 %v12606_v44 }
 0x28f   : > { %v2127_v3 = vld [vmem:[#allocation4 + $0x4d] sm:$0xff]  ;;  %2106 = vst [vmem:[#allocation2 + $0x1e0] sm:$0xff] %v2085_v1  ;;  %v2004_v6 = vld [vmem:[#allocation4 + $0x57] sm:$0xff]  ;;  %2191 = vst [vmem:[#allocation2 + $0x238] sm:$0xff] %v10012_v2  ;;  %v1745_v24 = vpop.f32.mrb[63].mxu0 }
 0x290   : > { %2148 = vst [vmem:[#allocation2 + $0x1e8] sm:$0xff] %v2127_v3  ;;  %2655 = vmatmul.mubr.f32.gmra.mrb[54].mxu1 %v9946_v54  ;;  %v1879_v14 = vld [vmem:[#allocation4 + $0x51] sm:$0xff]  ;;  %1815 = vst [vmem:[#allocation4 + $0x68] sm:$0xff] %v10014_v46  ;;  %v2452_v54 = vld [vmem:[%s12567_s3 + $0x1d0] sm:$0xff] }
 0x291   : > { %v10010_v10 = vld [vmem:[#allocation4 + $0x52] sm:$0xff]  ;;  %2069 = vst [vmem:[#allocation2 + $0x340] sm:$0xff] %v10014_v46  ;;  %2659 = vmatprep.mubr.f32.mxu1 %v1879_v14  ;;  %2025 = vst [vmem:[#allocation2 + $0x2a8] sm:$0xff] %v2004_v6  ;;  %7880 = vmatpush1.bf16.msra.mxu1 %v7879_v20  ;;  %v2453_v55 = vld [vmem:[%s12567_s3 + $0x1d8] sm:$0xff] }
 0x292   : > { %v2086_v51 = vld [vmem:[#allocation4 + $0x54] sm:$0xff]  ;;  %v10031_v39 = vpop.f32.mrb[64].mxu0  ;;  %7881 = vmatprep.subr.bf16.mxu1 %v12606_v44  ;;  %v7888_v35 = vpack.c.bf16 %v2453_v55, %v2452_v54  ;;  %v2457_v57 = vld [vmem:[%s12567_s3 + $0x1f8] sm:$0xff] }
 0x293   : > { %v2128_v47 = vld [vmem:[#allocation4 + $0x55] sm:$0xff]  ;;  %2107 = vst [vmem:[#allocation2 + $0x228] sm:$0xff] %v2086_v51  ;;  %v10029_v59 = vld [vmem:[#allocation4 + $0x5e] sm:$0xff]  ;;  %1816 = vst [vmem:[#allocation4 + $0x70] sm:$0xff] %v10031_v39  ;;  %v1750_v31 = vpop.f32.mrb[65].mxu0  ;;  %v7894_v20 = vpack.c.bf16 %v2457_v57, %v2456_v48 }
 0x294   : > { %2149 = vst [vmem:[#allocation2 + $0x230] sm:$0xff] %v2128_v47  ;;  %2660 = vmatmul.mubr.f32.gmra.mrb[56].mxu1 %v9963_v37  ;;  %v1880_v38 = vld [vmem:[#allocation4 + $0x59] sm:$0xff]  ;;  %2192 = vst [vmem:[#allocation2 + $0x280] sm:$0xff] %v10029_v59  ;;  %v2454_v32 = vld [vmem:[%s12567_s3 + $0x1e0] sm:$0xff] }
 0x295   : > { %v10027_v41 = vld [vmem:[#allocation4 + $0x5a] sm:$0xff]  ;;  %2070 = vst [vmem:[#allocation2 + $0x388] sm:$0xff] %v10031_v39  ;;  %2664 = vmatprep.mubr.f32.mxu1 %v1880_v38  ;;  %7883 = vmatpush1.bf16.msra.mxu1 %v7882_v40  ;;  %v7891_v58 = vpack.c.bf16 %v2455_v19, %v2454_v32 }
 0x296   : > { %v2005_v0 = vld [vmem:[#allocation4 + $0x5f] sm:$0xff]  ;;  %v10048_v9 = vpop.f32.mrb[66].mxu0  ;;  %7884 = vmatprep.subr.bf16.mxu1 %v12606_v44 }
 0x297   : > { %v2087_v63 = vld [vmem:[#allocation4 + $0x5c] sm:$0xff]  ;;  %2026 = vst [vmem:[#allocation2 + $0x2f0] sm:$0xff] %v2005_v0  ;;  %v10046_v30 = vld [vmem:[#allocation4 + $0x66] sm:$0xff]  ;;  %1817 = vst [vmem:[#allocation4 + $0x78] sm:$0xff] %v10048_v9  ;;  %v1755_v37 = vpop.f32.mrb[67].mxu0 }
 0x298   : > { %v2129_v33 = vld [vmem:[#allocation4 + $0x5d] sm:$0xff]  ;;  %2108 = vst [vmem:[#allocation2 + $0x270] sm:$0xff] %v2087_v63  ;;  %2665 = vmatmul.mubr.f32.gmra.mrb[58].mxu1 %v9980_v56  ;;  %v2006_v50 = vld [vmem:[#allocation4 + $0x67] sm:$0xff]  ;;  %2193 = vst [vmem:[#allocation2 + $0x2c8] sm:$0xff] %v10046_v30 }
 0x299   : > { %2150 = vst [vmem:[#allocation2 + $0x278] sm:$0xff] %v2129_v33  ;;  %v1881_v12 = vld [vmem:[#allocation4 + $0x61] sm:$0xff]  ;;  %2027 = vst [vmem:[#allocation2 + $0x338] sm:$0xff] %v2006_v50  ;;  %7886 = vmatpush1.bf16.msra.mxu1 %v7885_v16 }
 0x29a   : > { %v10044_v26 = vld [vmem:[#allocation4 + $0x62] sm:$0xff]  ;;  %2669 = vmatprep.mubr.f32.mxu1 %v1881_v12  ;;  %v10060_v29 = vld [vmem:[#allocation4 + $0x6a] sm:$0xff]  ;;  %v10064_v27 = vpop.f32.mrb[68].mxu0  ;;  %7887 = vmatprep.subr.bf16.mxu1 %v12606_v44 }
 0x29b   : > { %v2088_v34 = vld [vmem:[#allocation4 + $0x64] sm:$0xff]  ;;  %v10062_v53 = vld [vmem:[#allocation4 + $0x6e] sm:$0xff]  ;;  %1818 = vst [vmem:[#allocation4 + $0x80] sm:$0xff] %v10064_v27  ;;  %v1760_v28 = vpop.f32.mrb[69].mxu0 }
 0x29c   : > { %v2130_v23 = vld [vmem:[#allocation4 + $0x65] sm:$0xff]  ;;  %2109 = vst [vmem:[#allocation2 + $0x2b8] sm:$0xff] %v2088_v34  ;;  %2670 = vmatmul.mubr.f32.gmra.mrb[60].mxu1 %v9997_v11  ;;  %v2007_v43 = vld [vmem:[#allocation4 + $0x6f] sm:$0xff]  ;;  %2194 = vst [vmem:[#allocation2 + $0x310] sm:$0xff] %v10062_v53 }
 0x29d   : > { %2151 = vst [vmem:[#allocation2 + $0x2c0] sm:$0xff] %v2130_v23  ;;  %v1882_v8 = vld [vmem:[#allocation4 + $0x69] sm:$0xff]  ;;  %2028 = vst [vmem:[#allocation2 + $0x380] sm:$0xff] %v2007_v43  ;;  %7889 = vmatpush1.bf16.msra.mxu1 %v7888_v35 }
 0x29e   : > { %v2089_v56 = vld [vmem:[#allocation4 + $0x6c] sm:$0xff]  ;;  %2674 = vmatprep.mubr.f32.mxu1 %v1882_v8  ;;  %v10078_v22 = vld [vmem:[#allocation4 + $0x76] sm:$0xff]  ;;  %v10080_v11 = vpop.f32.mrb[70].mxu0  ;;  %7890 = vmatprep.subr.bf16.mxu1 %v12606_v44 }
 0x29f   : > { %v2131_v61 = vld [vmem:[#allocation4 + $0x6d] sm:$0xff]  ;;  %2110 = vst [vmem:[#allocation2 + $0x300] sm:$0xff] %v2089_v56  ;;  %v2008_v49 = vld [vmem:[#allocation4 + $0x77] sm:$0xff]  ;;  %2195 = vst [vmem:[#allocation2 + $0x358] sm:$0xff] %v10078_v22  ;;  %v1765_v60 = vpop.f32.mrb[71].mxu0 }
 0x2a0   : > { %2152 = vst [vmem:[#allocation2 + $0x308] sm:$0xff] %v2131_v61  ;;  %2675 = vmatmul.mubr.f32.gmra.mrb[62].mxu1 %v10014_v46  ;;  %v1883_v42 = vld [vmem:[#allocation4 + $0x71] sm:$0xff]  ;;  %1819 = vst [vmem:[#allocation4 + $0x88] sm:$0xff] %v10080_v11 }
 0x2a1   : > { %v10076_v5 = vld [vmem:[#allocation4 + $0x72] sm:$0xff]  ;;  %2679 = vmatprep.mubr.f32.mxu1 %v1883_v42  ;;  %2029 = vst [vmem:[#allocation2 + $0x3c8] sm:$0xff] %v2008_v49  ;;  %7892 = vmatpush1.bf16.msra.mxu1 %v7891_v58 }
 0x2a2   : > { %v2090_v1 = vld [vmem:[#allocation4 + $0x74] sm:$0xff]  ;;  %v10088_v14 = vld [vmem:[#allocation4 + $0x7e] sm:$0xff]  ;;  %v10090_v46 = vpop.f32.mrb[72].mxu0  ;;  %7893 = vmatprep.subr.bf16.mxu1 %v12606_v44 }
 0x2a3   : > { %v2132_v3 = vld [vmem:[#allocation4 + $0x75] sm:$0xff]  ;;  %2111 = vst [vmem:[#allocation2 + $0x348] sm:$0xff] %v2090_v1  ;;  %v10093_v6 = vld [vmem:[#allocation4 + $0x7f] sm:$0xff]  ;;  %2196 = vst [vmem:[#allocation2 + $0x3a0] sm:$0xff] %v10088_v14  ;;  %v1770_v24 = vpop.f32.mrb[73].mxu0 }
 0x2a4   : > { %2153 = vst [vmem:[#allocation2 + $0x350] sm:$0xff] %v2132_v3  ;;  %2680 = vmatmul.mubr.f32.gmra.mrb[64].mxu1 %v10031_v39  ;;  %v1884_v17 = vld [vmem:[#allocation4 + $0x79] sm:$0xff]  ;;  %1820 = vst [vmem:[#allocation4 + $0x90] sm:$0xff] %v10090_v46  ;;  %v2458_v60 = vld [vmem:[%s12567_s3 + $0x200] sm:$0xff] }
 0x2a5   : > { %v10086_v18 = vld [vmem:[#allocation4 + $0x7a] sm:$0xff]  ;;  %2684 = vmatprep.mubr.f32.mxu1 %v1884_v17  ;;  %7895 = vmatpush1.bf16.msra.mxu1 %v7894_v20 }
 0x2a6   : > { %v2091_v51 = vld [vmem:[#allocation4 + $0x7c] sm:$0xff]  ;;  %v10102_v38 = vpop.f32.mrb[74].mxu0  ;;  %7896 = vmatprep.subr.bf16.mxu1 %v12606_v44 }
 0x2a7   : > { %v2133_v47 = vld [vmem:[#allocation4 + $0x7d] sm:$0xff]  ;;  %2112 = vst [vmem:[#allocation2 + $0x390] sm:$0xff] %v2091_v51  ;;  %v10100_v62 = vld [vmem:[#allocation4 + $0x86] sm:$0xff]  ;;  %1821 = vst [vmem:[#allocation4 + $0x98] sm:$0xff] %v10102_v38  ;;  %v1775_v33 = vpop.f32.mrb[75].mxu0 }
 0x2a8   : > { %2154 = vst [vmem:[#allocation2 + $0x398] sm:$0xff] %v2133_v47  ;;  %2685 = vmatmul.mubr.f32.gmra.mrb[66].mxu1 %v10048_v9  ;;  %v1885_v40 = vld [vmem:[#allocation4 + $0x81] sm:$0xff]  ;;  %2197 = vst [vmem:[#allocation2 + $0x3e8] sm:$0xff] %v10100_v62  ;;  %v2459_v20 = vld [vmem:[%s12567_s3 + $0x208] sm:$0xff] }
 0x2a9   : > { %v10098_v45 = vld [vmem:[#allocation4 + $0x82] sm:$0xff]  ;;  %2689 = vmatprep.mubr.f32.mxu1 %v1885_v40 }
 0x2aa   : > { %v10105_v39 = vld [vmem:[#allocation4 + $0x87] sm:$0xff]  ;;  %v10114_v55 = vpop.f32.mrb[76].mxu0 }
 0x2ab   : > { %v2092_v0 = vld [vmem:[#allocation4 + $0x84] sm:$0xff]  ;;  %v10112_v54 = vld [vmem:[#allocation4 + $0x8e] sm:$0xff]  ;;  %1822 = vst [vmem:[#allocation4 + $0xa0] sm:$0xff] %v10114_v55  ;;  %v1780_v23 = vpop.f32.mrb[77].mxu0 }
 0x2ac   : > { %v2134_v63 = vld [vmem:[#allocation4 + $0x85] sm:$0xff]  ;;  %2113 = vst [vmem:[#allocation2 + $0x3d8] sm:$0xff] %v2092_v0  ;;  %2690 = vmatmul.mubr.f32.gmra.mrb[68].mxu1 %v10064_v27  ;;  %v10116_v12 = vld [vmem:[#allocation4 + $0x8f] sm:$0xff]  ;;  %2198 = vst [vmem:[#allocation2 + $0x430] sm:$0xff] %v10112_v54 }
 0x2ad   : > { %2155 = vst [vmem:[#allocation2 + $0x3e0] sm:$0xff] %v2134_v63  ;;  %v1886_v31 = vld [vmem:[#allocation4 + $0x89] sm:$0xff] }
 0x2ae   : > { %v10110_v16 = vld [vmem:[#allocation4 + $0x8a] sm:$0xff]  ;;  %2694 = vmatprep.mubr.f32.mxu1 %v1886_v31  ;;  %v10121_v35 = vld [vmem:[#allocation4 + $0x92] sm:$0xff]  ;;  %v10125_v19 = vpop.f32.mrb[78].mxu0 }
 0x2af   : > { %v2093_v50 = vld [vmem:[#allocation4 + $0x8c] sm:$0xff]  ;;  %v10123_v32 = vld [vmem:[#allocation4 + $0x96] sm:$0xff]  ;;  %1823 = vst [vmem:[#allocation4 + $0xa8] sm:$0xff] %v10125_v19  ;;  %v1785_v61 = vpop.f32.mrb[79].mxu0 }
 0x2b0   : > { %v2135_v34 = vld [vmem:[#allocation4 + $0x8d] sm:$0xff]  ;;  %2114 = vst [vmem:[#allocation2 + $0x420] sm:$0xff] %v2093_v50  ;;  %2695 = vmatmul.mubr.f32.gmra.mrb[70].mxu1 %v10080_v11  ;;  %v10127_v8 = vld [vmem:[#allocation4 + $0x97] sm:$0xff]  ;;  %2199 = vst [vmem:[#allocation2 + $0x478] sm:$0xff] %v10123_v32  ;;  %v7897_v50 = vpack.c.bf16 %v2459_v20, %v2458_v60 }
 0x2b1   : > { %2156 = vst [vmem:[#allocation2 + $0x428] sm:$0xff] %v2135_v34  ;;  %v1887_v37 = vld [vmem:[#allocation4 + $0x91] sm:$0xff]  ;;  %v2208_v31 = vld [vmem:[#allocation2 + $0x18] sm:$0xff]  ;;  %v2460_v34 = vld [vmem:[%s12567_s3 + $0x210] sm:$0xff] }
 0x2b2   : > { %v2094_v43 = vld [vmem:[#allocation4 + $0x94] sm:$0xff]  ;;  %2699 = vmatprep.mubr.f32.mxu1 %v1887_v37  ;;  %v10134_v48 = vld [vmem:[#allocation4 + $0x9e] sm:$0xff]  ;;  %v10136_v57 = vpop.f32.mrb[80].mxu0  ;;  %v2461_v23 = vld [vmem:[%s12567_s3 + $0x218] sm:$0xff] }
 0x2b3   : > { %v2136_v56 = vld [vmem:[#allocation4 + $0x95] sm:$0xff]  ;;  %2115 = vst [vmem:[#allocation2 + $0x468] sm:$0xff] %v2094_v43  ;;  %v10138_v42 = vld [vmem:[#allocation4 + $0x9f] sm:$0xff]  ;;  %2200 = vst [vmem:[#allocation2 + $0x4c0] sm:$0xff] %v10134_v48  ;;  %v1790_v3 = vpop.f32.mrb[81].mxu0 }
 0x2b4   : > { %2157 = vst [vmem:[#allocation2 + $0x470] sm:$0xff] %v2136_v56  ;;  %2700 = vmatmul.mubr.f32.gmra.mrb[72].mxu1 %v10090_v46  ;;  %v1888_v28 = vld [vmem:[#allocation4 + $0x99] sm:$0xff]  ;;  %1824 = vst [vmem:[#allocation4 + $0xb0] sm:$0xff] %v10136_v57  ;;  %v2462_v3 = vld [vmem:[%s12567_s3 + $0x220] sm:$0xff] }
 0x2b5   : > { %v10132_v58 = vld [vmem:[#allocation4 + $0x9a] sm:$0xff]  ;;  %2704 = vmatprep.mubr.f32.mxu1 %v1888_v28 }
 0x2b6   : > { %v2095_v49 = vld [vmem:[#allocation4 + $0x9c] sm:$0xff]  ;;  %v10151_v47 = vld [vmem:[#allocation4 + $0xa6] sm:$0xff]  ;;  %v1793_v24 = vpop.f32.mrb[82].mxu0 }
 0x2b7   : > { %v2137_v1 = vld [vmem:[#allocation4 + $0x9d] sm:$0xff]  ;;  %2116 = vst [vmem:[#allocation2 + $0x4b0] sm:$0xff] %v2095_v49  ;;  %v10153_v40 = vld [vmem:[#allocation4 + $0xa7] sm:$0xff]  ;;  %2201 = vst [vmem:[#allocation2 + $0x508] sm:$0xff] %v10151_v47  ;;  %v1795_v33 = vpop.f32.mrb[83].mxu0 }
 0x2b8   : > { %2158 = vst [vmem:[#allocation2 + $0x4b8] sm:$0xff] %v2137_v1  ;;  %2705 = vmatmul.mubr.f32.gmra.mrb[74].mxu1 %v10102_v38  ;;  %v1889_v17 = vld [vmem:[#allocation4 + $0xa1] sm:$0xff]  ;;  %1825 = vst [vmem:[#allocation4 + $0xb8] sm:$0xff] %v1793_v24  ;;  %v2217_v49 = vld [vmem:[#allocation2 + $0x60] sm:$0xff]  ;;  %v7900_v1 = vpack.c.bf16 %v2461_v23, %v2460_v34 }
 0x2b9   : > { %v10149_v51 = vld [vmem:[#allocation4 + $0xa2] sm:$0xff]  ;;  %2709 = vmatprep.mubr.f32.mxu1 %v1889_v17  ;;  %v2463_v60 = vld [vmem:[%s12567_s3 + $0x228] sm:$0xff] }
 0x2ba   : > { %v10155_v0 = vld [vmem:[#allocation4 + $0xa4] sm:$0xff] }
 0x2bb   : > { %v10157_v63 = vld [vmem:[#allocation4 + $0xa5] sm:$0xff]  ;;  %v10167_v37 = vld [vmem:[#allocation4 + $0xae] sm:$0xff] }
 0x2bc   : > { %2710 = vmatmul.mubr.f32.gmra.mrb[76].mxu1 %v10114_v55  ;;  %v10169_v43 = vld [vmem:[#allocation4 + $0xaf] sm:$0xff]  ;;  %2202 = vst [vmem:[#allocation2 + $0x550] sm:$0xff] %v10167_v37  ;;  %v2207_v28 = vld [vmem:[#allocation2 + $0x10] sm:$0xff] }
 0x2bd   : > { %2779 = vmatprep.mubr.f32.mxu1 %v2208_v31  ;;  %v10171_v56 = vld [vmem:[#allocation4 + $0xac] sm:$0xff]  ;;  %v2226_v31 = vld [vmem:[#allocation2 + $0xa8] sm:$0xff]  ;;  %v2464_v34 = vld [vmem:[%s12567_s3 + $0x230] sm:$0xff] }
 0x2be   : > { %v10173_v61 = vld [vmem:[#allocation4 + $0xad] sm:$0xff] }
 0x2bf   : > { %v10183_v20 = vld [vmem:[#allocation4 + $0xb4] sm:$0xff]  ;;  %v2216_v33 = vld [vmem:[#allocation2 + $0x58] sm:$0xff] }
 0x2c0   : > { %2780 = vmatmul.mubr.f32.vlgmr.msra.gmra.mrb[36].mxu1 %v2207_v28  ;;  %v10185_v17 = vld [vmem:[#allocation4 + $0xb5] sm:$0xff]  ;;  %v2465_v23 = vld [vmem:[%s12567_s3 + $0x238] sm:$0xff] }
 0x2c1   : > { %2784 = vmatprep.mubr.f32.mxu1 %v2217_v49  ;;  %7898 = vmatpush1.bf16.msra.mxu1 %v7897_v50  ;;  %v10187_v24 = vld [vmem:[#allocation4 + $0xb6] sm:$0xff]  ;;  %v7903_v50 = vpack.c.bf16 %v2463_v60, %v2462_v3  ;;  %v2235_v49 = vld [vmem:[#allocation2 + $0xf0] sm:$0xff] }
 0x2c2   : > { %7899 = vmatprep.subr.bf16.mxu1 %v12606_v44  ;;  %v2225_v28 = vld [vmem:[#allocation2 + $0xa0] sm:$0xff]  ;;  %v2467_v3 = vld [vmem:[%s12567_s3 + $0x248] sm:$0xff] }
 0x2c3   : > { %v2234_v60 = vld [vmem:[#allocation2 + $0xe8] sm:$0xff] }
 0x2c4   : > { %2785 = vmatmul.mubr.f32.gmra.mrb[38].mxu1 %v2216_v33  ;;  %v7906_v33 = vpack.c.bf16 %v2465_v23, %v2464_v34  ;;  %v2469_v34 = vld [vmem:[%s12567_s3 + $0x258] sm:$0xff]  ;;  %v2243_v23 = vld [vmem:[#allocation2 + $0x130] sm:$0xff] }
 0x2c5   : > { %2789 = vmatprep.mubr.f32.mxu1 %v2226_v31  ;;  %7901 = vmatpush1.bf16.msra.mxu1 %v7900_v1  ;;  %v2466_v1 = vld [vmem:[%s12567_s3 + $0x240] sm:$0xff]  ;;  %v2244_v31 = vld [vmem:[#allocation2 + $0x138] sm:$0xff] }
 0x2c6   : > { %7902 = vmatprep.subr.bf16.mxu1 %v12606_v44 }
 0x2c8   : > { %2790 = vmatmul.mubr.f32.gmra.mrb[40].mxu1 %v2225_v28  ;;  %v7909_v28 = vpack.c.bf16 %v2467_v3, %v2466_v1  ;;  %v2471_v1 = vld [vmem:[%s12567_s3 + $0x268] sm:$0xff]  ;;  %v2252_v3 = vld [vmem:[#allocation2 + $0x178] sm:$0xff] }
 0x2c9   : > { %2794 = vmatprep.mubr.f32.mxu1 %v2235_v49  ;;  %7904 = vmatpush1.bf16.msra.mxu1 %v7903_v50  ;;  %v2468_v50 = vld [vmem:[%s12567_s3 + $0x250] sm:$0xff] }
 0x2ca   : > { %7905 = vmatprep.subr.bf16.mxu1 %v12606_v44  ;;  %v7912_v49 = vpack.c.bf16 %v2469_v34, %v2468_v50  ;;  %v2475_v50 = vld [vmem:[%s12567_s3 + $0x288] sm:$0xff]  ;;  %v2477_v34 = vld [vmem:[%s12567_s3 + $0x298] sm:$0xff] }
 0x2cc   : > { %2795 = vmatmul.mubr.f32.gmra.mrb[42].mxu1 %v2234_v60 }
 0x2cd   : > { %2799 = vmatprep.mubr.f32.mxu1 %v2244_v31  ;;  %7907 = vmatpush1.bf16.msra.mxu1 %v7906_v33  ;;  %v2470_v33 = vld [vmem:[%s12567_s3 + $0x260] sm:$0xff]  ;;  %v2473_v31 = vld [vmem:[%s12567_s3 + $0x278] sm:$0xff] }
 0x2ce   : > { %7908 = vmatprep.subr.bf16.mxu1 %v12606_v44  ;;  %v7915_v60 = vpack.c.bf16 %v2471_v1, %v2470_v33  ;;  %v2483_v33 = vld [vmem:[%s12567_s3 + $0x2c8] sm:$0xff]  ;;  %v2485_v1 = vld [vmem:[%s12567_s3 + $0x2d8] sm:$0xff] }
 0x2d0   : > { %2800 = vmatmul.mubr.f32.gmra.mrb[44].mxu1 %v2243_v23  ;;  %v2479_v23 = vld [vmem:[%s12567_s3 + $0x2a8] sm:$0xff] }
 0x2d1   : > { %2804 = vmatprep.mubr.f32.mxu1 %v9944_v4  ;;  %7910 = vmatpush1.bf16.msra.mxu1 %v7909_v28  ;;  %v2472_v4 = vld [vmem:[%s12567_s3 + $0x270] sm:$0xff] }
 0x2d2   : > { %7911 = vmatprep.subr.bf16.mxu1 %v12606_v44  ;;  %v7918_v28 = vpack.c.bf16 %v2473_v31, %v2472_v4  ;;  %v2496_v4 = vld [vmem:[%s12567_s3 + $0x330] sm:$0xff]  ;;  %v2497_v31 = vld [vmem:[%s12567_s3 + $0x338] sm:$0xff] }
 0x2d4   : > { %2805 = vmatmul.mubr.f32.gmra.mrb[46].mxu1 %v2252_v3  ;;  %v2487_v3 = vld [vmem:[%s12567_s3 + $0x2e8] sm:$0xff] }
 0x2d5   : > { %2809 = vmatprep.mubr.f32.mxu1 %v9961_v25  ;;  %7913 = vmatpush1.bf16.msra.mxu1 %v7912_v49  ;;  %v2474_v25 = vld [vmem:[%s12567_s3 + $0x280] sm:$0xff]  ;;  %v2481_v49 = vld [vmem:[%s12567_s3 + $0x2b8] sm:$0xff] }
 0x2d6   : > { %7914 = vmatprep.subr.bf16.mxu1 %v12606_v44 }
 0x2d8   : > { %2810 = vmatmul.mubr.f32.gmra.mrb[48].mxu1 %v9942_v52  ;;  %v7921_v52 = vpack.c.bf16 %v2475_v50, %v2474_v25  ;;  %v2237_v25 = vld [vmem:[#allocation2 + $0x100] sm:$0xff]  ;;  %v7954_v50 = vpack.c.bf16 %v2497_v31, %v2496_v4  ;;  %v2511_v4 = vld [vmem:[%s12567_s3 + $0x3a8] sm:$0xff] }
 0x2d9   : > { %2814 = vmatprep.mubr.f32.mxu1 %v9978_v21  ;;  %7916 = vmatpush1.bf16.msra.mxu1 %v7915_v60  ;;  %v2476_v21 = vld [vmem:[%s12567_s3 + $0x290] sm:$0xff]  ;;  %v2489_v60 = vld [vmem:[%s12567_s3 + $0x2f8] sm:$0xff]  ;;  %v2290_v31 = vld [vmem:[#allocation2 + $0x2a8] sm:$0xff] }
 0x2da   : > { %7917 = vmatprep.subr.bf16.mxu1 %v12606_v44 }
 0x2dc   : > { %2815 = vmatmul.mubr.f32.gmra.mrb[50].mxu1 %v9959_v15  ;;  %v7924_v15 = vpack.c.bf16 %v2477_v34, %v2476_v21  ;;  %v2499_v21 = vld [vmem:[%s12567_s3 + $0x348] sm:$0xff]  ;;  %v2236_v34 = vld [vmem:[#allocation2 + $0xf8] sm:$0xff] }
 0x2dd   : > { %2819 = vmatprep.mubr.f32.mxu1 %v9995_v7  ;;  %7919 = vmatpush1.bf16.msra.mxu1 %v7918_v28  ;;  %v2478_v7 = vld [vmem:[%s12567_s3 + $0x2a0] sm:$0xff]  ;;  %v2227_v28 = vld [vmem:[#allocation2 + $0xb0] sm:$0xff] }
 0x2de   : > { %7920 = vmatprep.subr.bf16.mxu1 %v12606_v44 }
 0x2e0   : > { %2820 = vmatmul.mubr.f32.gmra.mrb[52].mxu1 %v9976_v13  ;;  %v7927_v13 = vpack.c.bf16 %v2479_v23, %v2478_v7  ;;  %v2500_v23 = vld [vmem:[%s12567_s3 + $0x350] sm:$0xff] }
 0x2e1   : > { %2824 = vmatprep.mubr.f32.mxu1 %v10012_v2  ;;  %7922 = vmatpush1.bf16.msra.mxu1 %v7921_v52  ;;  %v2480_v2 = vld [vmem:[%s12567_s3 + $0x2b0] sm:$0xff]  ;;  %v2498_v52 = vld [vmem:[%s12567_s3 + $0x340] sm:$0xff] }
 0x2e2   : > { %7923 = vmatprep.subr.bf16.mxu1 %v12606_v44  ;;  %v7957_v7 = vpack.c.bf16 %v2499_v21, %v2498_v52  ;;  %v2513_v52 = vld [vmem:[%s12567_s3 + $0x3b8] sm:$0xff]  ;;  %v2299_v21 = vld [vmem:[#allocation2 + $0x2f0] sm:$0xff] }
 0x2e4   : > { %2825 = vmatmul.mubr.f32.gmra.mrb[54].mxu1 %v9993_v36  ;;  %v7930_v36 = vpack.c.bf16 %v2481_v49, %v2480_v2  ;;  %v1798_v2 = vpop.f32.mrb[84].mxu0  ;;  %v2245_v49 = vld [vmem:[#allocation2 + $0x140] sm:$0xff] }
 0x2e5   : > { %2829 = vmatprep.mubr.f32.mxu1 %v10029_v59  ;;  %7925 = vmatpush1.bf16.msra.mxu1 %v7924_v15  ;;  %v2482_v59 = vld [vmem:[%s12567_s3 + $0x2c0] sm:$0xff]  ;;  %v2246_v15 = vld [vmem:[#allocation2 + $0x148] sm:$0xff]  ;;  %1826 = vst [vmem:[#allocation4 + $0xc0] sm:$0xff] %v1798_v2 }
 0x2e6   : > { %7926 = vmatprep.subr.bf16.mxu1 %v12606_v44  ;;  %v2318_v2 = vld [vmem:[#allocation2 + $0x388] sm:$0xff] }
 0x2e8   : > { %2830 = vmatmul.mubr.f32.gmra.mrb[56].mxu1 %v10010_v10  ;;  %v7933_v10 = vpack.c.bf16 %v2483_v33, %v2482_v59  ;;  %v2255_v59 = vld [vmem:[#allocation2 + $0x190] sm:$0xff] }
 0x2e9   : > { %2834 = vmatprep.mubr.f32.mxu1 %v10046_v30  ;;  %7928 = vmatpush1.bf16.msra.mxu1 %v7927_v13  ;;  %v2484_v30 = vld [vmem:[%s12567_s3 + $0x2d0] sm:$0xff]  ;;  %v2501_v13 = vld [vmem:[%s12567_s3 + $0x358] sm:$0xff] }
 0x2ea   : > { %7929 = vmatprep.subr.bf16.mxu1 %v12606_v44  ;;  %v7960_v33 = vpack.c.bf16 %v2501_v13, %v2500_v23  ;;  %v2515_v23 = vld [vmem:[%s12567_s3 + $0x3c8] sm:$0xff]  ;;  %v2308_v13 = vld [vmem:[#allocation2 + $0x338] sm:$0xff] }
 0x2ec   : > { %2835 = vmatmul.mubr.f32.gmra.mrb[58].mxu1 %v10027_v41  ;;  %v7936_v41 = vpack.c.bf16 %v2485_v1, %v2484_v30  ;;  %v2503_v30 = vld [vmem:[%s12567_s3 + $0x368] sm:$0xff] }
 0x2ed   : > { %2839 = vmatprep.mubr.f32.mxu1 %v10062_v53  ;;  %7931 = vmatpush1.bf16.msra.mxu1 %v7930_v36  ;;  %v2486_v53 = vld [vmem:[%s12567_s3 + $0x2e0] sm:$0xff]  ;;  %v1800_v36 = vpop.f32.mrb[85].mxu0  ;;  %v2254_v1 = vld [vmem:[#allocation2 + $0x188] sm:$0xff] }
 0x2ee   : > { %7932 = vmatprep.subr.bf16.mxu1 %v12606_v44  ;;  %v2516_v36 = vld [vmem:[%s12567_s3 + $0x3d0] sm:$0xff] }
 0x2f0   : > { %2840 = vmatmul.mubr.f32.gmra.mrb[60].mxu1 %v10044_v26  ;;  %v7939_v26 = vpack.c.bf16 %v2487_v3, %v2486_v53  ;;  %v2504_v3 = vld [vmem:[%s12567_s3 + $0x370] sm:$0xff] }
 0x2f1   : > { %2844 = vmatprep.mubr.f32.mxu1 %v10078_v22  ;;  %7934 = vmatpush1.bf16.msra.mxu1 %v7933_v10  ;;  %v2488_v22 = vld [vmem:[%s12567_s3 + $0x2f0] sm:$0xff]  ;;  %v2502_v10 = vld [vmem:[%s12567_s3 + $0x360] sm:$0xff] }
 0x2f2   : > { %7935 = vmatprep.subr.bf16.mxu1 %v12606_v44  ;;  %v7963_v53 = vpack.c.bf16 %v2503_v30, %v2502_v10  ;;  %v2518_v30 = vld [vmem:[%s12567_s3 + $0x3e0] sm:$0xff] }
 0x2f4   : > { %2845 = vmatmul.mubr.f32.gmra.mrb[62].mxu1 %v10060_v29  ;;  %v7942_v29 = vpack.c.bf16 %v2489_v60, %v2488_v22  ;;  %v10367_v22 = vld [vmem:[#allocation4 + $0xbc] sm:$0xff] }
 0x2f5   : > { %2849 = vmatprep.mubr.f32.mxu1 %v10088_v14  ;;  %7937 = vmatpush1.bf16.msra.mxu1 %v7936_v41  ;;  %v2210_v14 = vld [vmem:[#allocation2 + $0x28] sm:$0xff]  ;;  %v2264_v41 = vld [vmem:[#allocation2 + $0x1d8] sm:$0xff] }
 0x2f6   : > { %7938 = vmatprep.subr.bf16.mxu1 %v12606_v44  ;;  %v10369_v60 = vld [vmem:[#allocation4 + $0xbd] sm:$0xff] }
 0x2f8   : > { %2850 = vmatmul.mubr.f32.gmra.mrb[64].mxu1 %v10076_v5  ;;  %v2490_v5 = vld [vmem:[%s12567_s3 + $0x300] sm:$0xff] }
 0x2f9   : > { %2854 = vmatprep.mubr.f32.mxu1 %v10100_v62  ;;  %7940 = vmatpush1.bf16.msra.mxu1 %v7939_v26  ;;  %v2492_v62 = vld [vmem:[%s12567_s3 + $0x310] sm:$0xff]  ;;  %v2505_v26 = vld [vmem:[%s12567_s3 + $0x378] sm:$0xff] }
 0x2fa   : > { %7941 = vmatprep.subr.bf16.mxu1 %v12606_v44 }
 0x2fc   : > { %2855 = vmatmul.mubr.f32.gmra.mrb[66].mxu1 %v10086_v18  ;;  %v2491_v18 = vld [vmem:[%s12567_s3 + $0x308] sm:$0xff] }
 0x2fd   : > { %2859 = vmatprep.mubr.f32.mxu1 %v10112_v54  ;;  %7943 = vmatpush1.bf16.msra.mxu1 %v7942_v29  ;;  %v2209_v54 = vld [vmem:[#allocation2 + $0x20] sm:$0xff]  ;;  %v10371_v29 = vld [vmem:[#allocation4 + $0xbe] sm:$0xff] }
 0x2fe   : > { %7944 = vmatprep.subr.bf16.mxu1 %v12606_v44 }
 0x300   : > { %2860 = vmatmul.mubr.f32.gmra.mrb[68].mxu1 %v10098_v45  ;;  %v7945_v45 = vpack.c.bf16 %v2491_v18, %v2490_v5  ;;  %v2263_v5 = vld [vmem:[#allocation2 + $0x1d0] sm:$0xff]  ;;  %v2273_v18 = vld [vmem:[#allocation2 + $0x220] sm:$0xff] }
 0x301   : > { %2864 = vmatprep.mubr.f32.mxu1 %v10123_v32 }
 0x304   : > { %2865 = vmatmul.mubr.f32.gmra.mrb[70].mxu1 %v10110_v16  ;;  %v2493_v16 = vld [vmem:[%s12567_s3 + $0x318] sm:$0xff] }
 0x305   : > { %2869 = vmatprep.mubr.f32.mxu1 %v10134_v48  ;;  %v7948_v32 = vpack.c.bf16 %v2493_v16, %v2492_v62  ;;  %v2495_v48 = vld [vmem:[%s12567_s3 + $0x328] sm:$0xff]  ;;  %v2272_v16 = vld [vmem:[#allocation2 + $0x218] sm:$0xff] }
 0x306   : > { %v2507_v62 = vld [vmem:[%s12567_s3 + $0x388] sm:$0xff] }
 0x308   : > { %2870 = vmatmul.mubr.f32.gmra.mrb[72].mxu1 %v10121_v35  ;;  %v2219_v35 = vld [vmem:[#allocation2 + $0x70] sm:$0xff] }
 0x309   : > { %2874 = vmatprep.mubr.f32.mxu1 %v10151_v47  ;;  %v2228_v47 = vld [vmem:[#allocation2 + $0xb8] sm:$0xff] }
 0x30c   : > { %2875 = vmatmul.mubr.f32.gmra.mrb[74].mxu1 %v10132_v58  ;;  %v2494_v58 = vld [vmem:[%s12567_s3 + $0x320] sm:$0xff] }
 0x30d   : > { %2879 = vmatprep.mubr.f32.mxu1 %v10167_v37  ;;  %v7951_v37 = vpack.c.bf16 %v2495_v48, %v2494_v58  ;;  %v2509_v58 = vld [vmem:[%s12567_s3 + $0x398] sm:$0xff]  ;;  %v2281_v48 = vld [vmem:[#allocation2 + $0x260] sm:$0xff] }
 0x310   : > { %2880 = vmatmul.mubr.f32.gmra.mrb[76].mxu1 %v10149_v51  ;;  %v2218_v51 = vld [vmem:[#allocation2 + $0x68] sm:$0xff] }
 0x311   : > { %2949 = vmatprep.mubr.f32.mxu1 %v2210_v14  ;;  %v7966_v14 = vpack.c.bf16 %v2505_v26, %v2504_v3  ;;  %v2521_v3 = vld [vmem:[%s12567_s3 + $0x3f8] sm:$0xff] }
 0x314   : > { %2950 = vmatmul.mubr.f32.vlgmr.msra.gmra.mrb[36].mxu1 %v2209_v54  ;;  %v2282_v54 = vld [vmem:[#allocation2 + $0x268] sm:$0xff] }
 0x315   : > { %2954 = vmatprep.mubr.f32.mxu1 %v2219_v35  ;;  %7946 = vmatpush1.bf16.msra.mxu1 %v7945_v45  ;;  %v2506_v45 = vld [vmem:[%s12567_s3 + $0x380] sm:$0xff] }
 0x316   : > { %7947 = vmatprep.subr.bf16.mxu1 %v12606_v44  ;;  %v7969_v35 = vpack.c.bf16 %v2507_v62, %v2506_v45  ;;  %v2239_v45 = vld [vmem:[#allocation2 + $0x110] sm:$0xff] }
 0x318   : > { %2955 = vmatmul.mubr.f32.gmra.mrb[38].mxu1 %v2218_v51  ;;  %v2291_v51 = vld [vmem:[#allocation2 + $0x2b0] sm:$0xff] }
 0x319   : > { %2959 = vmatprep.mubr.f32.mxu1 %v2228_v47  ;;  %7949 = vmatpush1.bf16.msra.mxu1 %v7948_v32  ;;  %v2508_v32 = vld [vmem:[%s12567_s3 + $0x390] sm:$0xff] }
 0x31a   : > { %7950 = vmatprep.subr.bf16.mxu1 %v12606_v44  ;;  %v7972_v47 = vpack.c.bf16 %v2509_v58, %v2508_v32  ;;  %v2248_v32 = vld [vmem:[#allocation2 + $0x158] sm:$0xff] }
 0x31c   : > { %2960 = vmatmul.mubr.f32.gmra.mrb[40].mxu1 %v2227_v28  ;;  %v2300_v28 = vld [vmem:[#allocation2 + $0x2f8] sm:$0xff] }
 0x31d   : > { %2964 = vmatprep.mubr.f32.mxu1 %v2237_v25  ;;  %7952 = vmatpush1.bf16.msra.mxu1 %v7951_v37  ;;  %v2510_v37 = vld [vmem:[%s12567_s3 + $0x3a0] sm:$0xff] }
 0x31e   : > { %7953 = vmatprep.subr.bf16.mxu1 %v12606_v44  ;;  %v7975_v25 = vpack.c.bf16 %v2511_v4, %v2510_v37  ;;  %v2257_v37 = vld [vmem:[#allocation2 + $0x1a0] sm:$0xff] }
 0x320   : > { %2965 = vmatmul.mubr.f32.gmra.mrb[42].mxu1 %v2236_v34  ;;  %v2309_v34 = vld [vmem:[#allocation2 + $0x340] sm:$0xff] }
 0x321   : > { %2969 = vmatprep.mubr.f32.mxu1 %v2246_v15  ;;  %7955 = vmatpush1.bf16.msra.mxu1 %v7954_v50  ;;  %v2512_v50 = vld [vmem:[%s12567_s3 + $0x3b0] sm:$0xff] }
 0x322   : > { %7956 = vmatprep.subr.bf16.mxu1 %v12606_v44  ;;  %v7978_v15 = vpack.c.bf16 %v2513_v52, %v2512_v50  ;;  %v2266_v50 = vld [vmem:[#allocation2 + $0x1e8] sm:$0xff] }
 0x324   : > { %2970 = vmatmul.mubr.f32.gmra.mrb[44].mxu1 %v2245_v49 }
 0x325   : > { %2974 = vmatprep.mubr.f32.mxu1 %v2255_v59  ;;  %7958 = vmatpush1.bf16.msra.mxu1 %v7957_v7  ;;  %v2514_v7 = vld [vmem:[%s12567_s3 + $0x3c0] sm:$0xff]  ;;  %v2517_v59 = vld [vmem:[%s12567_s3 + $0x3d8] sm:$0xff] }
 0x326   : > { %7959 = vmatprep.subr.bf16.mxu1 %v12606_v44  ;;  %v7981_v49 = vpack.c.bf16 %v2515_v23, %v2514_v7  ;;  %v7984_v10 = vpack.c.bf16 %v2517_v59, %v2516_v36  ;;  %v2275_v7 = vld [vmem:[#allocation2 + $0x230] sm:$0xff]  ;;  %v2293_v36 = vld [vmem:[#allocation2 + $0x2c0] sm:$0xff]  ;;  %v2292_v59 = vld [vmem:[#allocation2 + $0x2b8] sm:$0xff] }
 0x328   : > { %2975 = vmatmul.mubr.f32.gmra.mrb[46].mxu1 %v2254_v1  ;;  %v2519_v1 = vld [vmem:[%s12567_s3 + $0x3e8] sm:$0xff] }
 0x329   : > { %2979 = vmatprep.mubr.f32.mxu1 %v2264_v41  ;;  %7961 = vmatpush1.bf16.msra.mxu1 %v7960_v33  ;;  %v2317_v33 = vld [vmem:[#allocation2 + $0x380] sm:$0xff]  ;;  %v2326_v41 = vld [vmem:[#allocation2 + $0x3c8] sm:$0xff] }
 0x32a   : > { %7962 = vmatprep.subr.bf16.mxu1 %v12606_v44 }
 0x32c   : > { %2980 = vmatmul.mubr.f32.gmra.mrb[48].mxu1 %v2263_v5  ;;  %v2528_v5 = vld [vmem:[%s12567_s3 + $0x430] sm:$0xff] }
 0x32d   : > { %2984 = vmatprep.mubr.f32.mxu1 %v2273_v18  ;;  %7964 = vmatpush1.bf16.msra.mxu1 %v7963_v53  ;;  %v7987_v53 = vpack.c.bf16 %v2519_v1, %v2518_v30  ;;  %v2529_v18 = vld [vmem:[%s12567_s3 + $0x438] sm:$0xff]  ;;  %v2311_v30 = vld [vmem:[#allocation2 + $0x350] sm:$0xff]  ;;  %v2310_v1 = vld [vmem:[#allocation2 + $0x348] sm:$0xff] }
 0x32e   : > { %7965 = vmatprep.subr.bf16.mxu1 %v12606_v44  ;;  %v8002_v62 = vpack.c.bf16 %v2529_v18, %v2528_v5  ;;  %v2357_v5 = vld [vmem:[#allocation2 + $0x4c0] sm:$0xff]  ;;  %v2366_v18 = vld [vmem:[#allocation2 + $0x508] sm:$0xff] }
 0x330   : > { %2985 = vmatmul.mubr.f32.gmra.mrb[50].mxu1 %v2272_v16  ;;  %v2530_v16 = vld [vmem:[%s12567_s3 + $0x440] sm:$0xff] }
 0x331   : > { %2989 = vmatprep.mubr.f32.mxu1 %v2282_v54  ;;  %7967 = vmatpush1.bf16.msra.mxu1 %v7966_v14  ;;  %v2229_v14 = vld [vmem:[#allocation2 + $0xc0] sm:$0xff]  ;;  %v2531_v54 = vld [vmem:[%s12567_s3 + $0x448] sm:$0xff] }
 0x332   : > { %7968 = vmatprep.subr.bf16.mxu1 %v12606_v44  ;;  %v8005_v58 = vpack.c.bf16 %v2531_v54, %v2530_v16 }
 0x334   : > { %2990 = vmatmul.mubr.f32.gmra.mrb[52].mxu1 %v2281_v48  ;;  %v2532_v48 = vld [vmem:[%s12567_s3 + $0x450] sm:$0xff] }
 0x335   : > { %2994 = vmatprep.mubr.f32.mxu1 %v2291_v51  ;;  %7970 = vmatpush1.bf16.msra.mxu1 %v7969_v35  ;;  %v2238_v35 = vld [vmem:[#allocation2 + $0x108] sm:$0xff]  ;;  %v2533_v51 = vld [vmem:[%s12567_s3 + $0x458] sm:$0xff] }
 0x336   : > { %7971 = vmatprep.subr.bf16.mxu1 %v12606_v44  ;;  %v8008_v4 = vpack.c.bf16 %v2533_v51, %v2532_v48 }
 0x338   : > { %2995 = vmatmul.mubr.f32.gmra.mrb[54].mxu1 %v2290_v31  ;;  %v2534_v31 = vld [vmem:[%s12567_s3 + $0x460] sm:$0xff] }
 0x339   : > { %2999 = vmatprep.mubr.f32.mxu1 %v2300_v28  ;;  %7973 = vmatpush1.bf16.msra.mxu1 %v7972_v47  ;;  %v2247_v47 = vld [vmem:[#allocation2 + $0x150] sm:$0xff]  ;;  %v2535_v28 = vld [vmem:[%s12567_s3 + $0x468] sm:$0xff] }
 0x33a   : > { %7974 = vmatprep.subr.bf16.mxu1 %v12606_v44  ;;  %v8011_v52 = vpack.c.bf16 %v2535_v28, %v2534_v31 }
 0x33c   : > { %3000 = vmatmul.mubr.f32.gmra.mrb[56].mxu1 %v2299_v21  ;;  %v2536_v21 = vld [vmem:[%s12567_s3 + $0x470] sm:$0xff] }
 0x33d   : > { %3004 = vmatprep.mubr.f32.mxu1 %v2309_v34  ;;  %7976 = vmatpush1.bf16.msra.mxu1 %v7975_v25  ;;  %v2256_v25 = vld [vmem:[#allocation2 + $0x198] sm:$0xff] }
 0x33e   : > { %7977 = vmatprep.subr.bf16.mxu1 %v12606_v44  ;;  %v2537_v34 = vld [vmem:[%s12567_s3 + $0x478] sm:$0xff] }
 0x33f   : > { %v8014_v23 = vpack.c.bf16 %v2537_v34, %v2536_v21 }
 0x340   : > { %3005 = vmatmul.mubr.f32.gmra.mrb[58].mxu1 %v2308_v13  ;;  %v2274_v13 = vld [vmem:[#allocation2 + $0x228] sm:$0xff] }
 0x341   : > { %3009 = vmatprep.mubr.f32.mxu1 %v2318_v2  ;;  %7979 = vmatpush1.bf16.msra.mxu1 %v7978_v15  ;;  %v2265_v15 = vld [vmem:[#allocation2 + $0x1e0] sm:$0xff]  ;;  %v2284_v2 = vld [vmem:[#allocation2 + $0x278] sm:$0xff] }
 0x342   : > { %7980 = vmatprep.subr.bf16.mxu1 %v12606_v44 }
 0x344   : > { %3010 = vmatmul.mubr.f32.gmra.mrb[60].mxu1 %v2317_v33  ;;  %v2302_v33 = vld [vmem:[#allocation2 + $0x308] sm:$0xff] }
 0x345   : > { %3014 = vmatprep.mubr.f32.mxu1 %v10048_v9  ;;  %7982 = vmatpush1.bf16.msra.mxu1 %v7981_v49  ;;  %v2520_v9 = vld [vmem:[%s12567_s3 + $0x3f0] sm:$0xff] }
 0x346   : > { %7983 = vmatprep.subr.bf16.mxu1 %v12606_v44  ;;  %v7990_v26 = vpack.c.bf16 %v2521_v3, %v2520_v9  ;;  %v2283_v49 = vld [vmem:[#allocation2 + $0x270] sm:$0xff]  ;;  %v2329_v9 = vld [vmem:[#allocation2 + $0x3e0] sm:$0xff]  ;;  %v2328_v3 = vld [vmem:[#allocation2 + $0x3d8] sm:$0xff] }
 0x348   : > { %3015 = vmatmul.mubr.f32.gmra.mrb[62].mxu1 %v2326_v41  ;;  %v2320_v41 = vld [vmem:[#allocation2 + $0x398] sm:$0xff] }
 0x349   : > { %3019 = vmatprep.mubr.f32.mxu1 %v10064_v27  ;;  %7985 = vmatpush1.bf16.msra.mxu1 %v7984_v10  ;;  %v2522_v27 = vld [vmem:[%s12567_s3 + $0x400] sm:$0xff] }
 0x34a   : > { %7986 = vmatprep.subr.bf16.mxu1 %v12606_v44  ;;  %v2301_v10 = vld [vmem:[#allocation2 + $0x300] sm:$0xff] }
 0x34c   : > { %3020 = vmatmul.mubr.f32.gmra.mrb[64].mxu1 %v10093_v6 }
 0x34d   : > { %3024 = vmatprep.mubr.f32.mxu1 %v10080_v11  ;;  %7988 = vmatpush1.bf16.msra.mxu1 %v7987_v53  ;;  %v2523_v11 = vld [vmem:[%s12567_s3 + $0x408] sm:$0xff]  ;;  %v2319_v53 = vld [vmem:[#allocation2 + $0x390] sm:$0xff] }
 0x34e   : > { %7989 = vmatprep.subr.bf16.mxu1 %v12606_v44  ;;  %v7993_v6 = vpack.c.bf16 %v2523_v11, %v2522_v27  ;;  %v2337_v27 = vld [vmem:[#allocation2 + $0x420] sm:$0xff]  ;;  %v2347_v11 = vld [vmem:[#allocation2 + $0x470] sm:$0xff] }
 0x350   : > { %3025 = vmatmul.mubr.f32.gmra.mrb[66].mxu1 %v10105_v39  ;;  %v2525_v39 = vld [vmem:[%s12567_s3 + $0x418] sm:$0xff] }
 0x351   : > { %3029 = vmatprep.mubr.f32.mxu1 %v10090_v46  ;;  %7991 = vmatpush1.bf16.msra.mxu1 %v7990_v26  ;;  %v2212_v46 = vld [vmem:[#allocation2 + $0x38] sm:$0xff]  ;;  %v2338_v26 = vld [vmem:[#allocation2 + $0x428] sm:$0xff] }
 0x352   : > { %7992 = vmatprep.subr.bf16.mxu1 %v12606_v44 }
 0x354   : > { %3030 = vmatmul.mubr.f32.gmra.mrb[68].mxu1 %v10116_v12  ;;  %v2221_v12 = vld [vmem:[#allocation2 + $0x80] sm:$0xff] }
 0x355   : > { %3034 = vmatprep.mubr.f32.mxu1 %v10102_v38  ;;  %v2524_v38 = vld [vmem:[%s12567_s3 + $0x410] sm:$0xff] }
 0x358   : > { %3035 = vmatmul.mubr.f32.gmra.mrb[70].mxu1 %v10127_v8  ;;  %v2526_v8 = vld [vmem:[%s12567_s3 + $0x420] sm:$0xff] }
 0x359   : > { %3039 = vmatprep.mubr.f32.mxu1 %v10114_v55  ;;  %v2211_v55 = vld [vmem:[#allocation2 + $0x30] sm:$0xff] }
 0x35c   : > { %3040 = vmatmul.mubr.f32.gmra.mrb[72].mxu1 %v10138_v42  ;;  %v2220_v42 = vld [vmem:[#allocation2 + $0x78] sm:$0xff] }
 0x35d   : > { %3044 = vmatprep.mubr.f32.mxu1 %v10125_v19  ;;  %v7996_v19 = vpack.c.bf16 %v2525_v39, %v2524_v38  ;;  %v2355_v38 = vld [vmem:[#allocation2 + $0x4b0] sm:$0xff]  ;;  %v8870_v39 = vmov 0.0  }
 0x360   : > { %3045 = vmatmul.mubr.f32.gmra.mrb[74].mxu1 %v10153_v40  ;;  %v2230_v40 = vld [vmem:[#allocation2 + $0xc8] sm:$0xff] }
 0x361   : > { %3049 = vmatprep.mubr.f32.mxu1 %v10136_v57  ;;  %v2527_v57 = vld [vmem:[%s12567_s3 + $0x428] sm:$0xff] }
 0x364   : > { %3050 = vmatmul.mubr.f32.gmra.mrb[76].mxu1 %v10169_v43  ;;  %v7999_v43 = vpack.c.bf16 %v2527_v57, %v2526_v8  ;;  %v2312_v8 = vld [vmem:[#allocation2 + $0x358] sm:$0xff]  ;;  %v2321_v57 = vld [vmem:[#allocation2 + $0x3a0] sm:$0xff] }
 0x365   : > { %3119 = vmatprep.mubr.f32.mxu1 %v2212_v46  ;;  %v2346_v46 = vld [vmem:[#allocation2 + $0x468] sm:$0xff] }
 0x368   : > { %3120 = vmatmul.mubr.f32.vlgmr.msra.gmra.mrb[36].mxu1 %v2211_v55  ;;  %v2285_v55 = vld [vmem:[#allocation2 + $0x280] sm:$0xff] }
 0x369   : > { %3124 = vmatprep.mubr.f32.mxu1 %v2221_v12  ;;  %7994 = vmatpush3.bf16.msra.mxu1 %v7993_v6  ;;  %v2356_v6 = vld [vmem:[#allocation2 + $0x4b8] sm:$0xff]  ;;  %v2294_v12 = vld [vmem:[#allocation2 + $0x2c8] sm:$0xff] }
 0x36a   : > { %7995 = vmatprep.subr.bf16.mxu1 %v12606_v44 }
 0x36c   : > { %3125 = vmatmul.mubr.f32.gmra.mrb[38].mxu1 %v2220_v42  ;;  %v2330_v42 = vld [vmem:[#allocation2 + $0x3e8] sm:$0xff] }
 0x36d   : > { %3129 = vmatprep.mubr.f32.mxu1 %v2230_v40  ;;  %7997 = vmatpush3.bf16.msra.mxu1 %v7996_v19  ;;  %v2303_v19 = vld [vmem:[#allocation2 + $0x310] sm:$0xff] }
 0x36e   : > { %7998 = vmatprep.subr.bf16.mxu1 %v12606_v44  ;;  %v2339_v40 = vld [vmem:[#allocation2 + $0x430] sm:$0xff] }
 0x370   : > { %3130 = vmatmul.mubr.f32.gmra.mrb[40].mxu1 %v2229_v14  ;;  %v2375_v14 = vld [vmem:[#allocation2 + $0x550] sm:$0xff] }
 0x371   : > { %3134 = vmatprep.mubr.f32.mxu1 %v2239_v45  ;;  %8000 = vmatpush3.bf16.msra.mxu1 %v7999_v43  ;;  %v2348_v43 = vld [vmem:[#allocation2 + $0x478] sm:$0xff]  ;;  %v3480_v45 = vld [vmem:[%s12576_s12 + $0x8] sm:$0xff] }
 0x372   : > { %8001 = vmatprep.subr.bf16.mxu1 %v12606_v44  ;;  %6348 = vmatprep.mubr.msk.f32.mxu0 %vm3536_vm13, %v3480_v45 }
 0x374   : > { %3135 = vmatmul.mubr.f32.gmra.mrb[42].mxu1 %v2238_v35 }
 0x375   : > { %3139 = vmatprep.mubr.f32.mxu1 %v2248_v32  ;;  %8003 = vmatpush3.bf16.msra.mxu1 %v8002_v62  ;;  %v10560_v62 = vld [vmem:[%s12568_s4] ss:$0 sm:$0xff] }
 0x376   : > { %8004 = vmatprep.subr.bf16.mxu1 %v12606_v44 }
 0x378   : > { %3140 = vmatmul.mubr.f32.gmra.mrb[44].mxu1 %v2247_v47 }
 0x379   : > { %3144 = vmatprep.mubr.f32.mxu1 %v2257_v37  ;;  %8006 = vmatpush3.bf16.msra.mxu1 %v8005_v58 }
 0x37a   : > { %8007 = vmatprep.subr.bf16.mxu1 %v12606_v44 }
 0x37c   : > { %3145 = vmatmul.mubr.f32.gmra.mrb[46].mxu1 %v2256_v25 }
 0x37d   : > { %3149 = vmatprep.mubr.f32.mxu1 %v2266_v50  ;;  %8009 = vmatpush3.bf16.msra.mxu1 %v8008_v4 }
 0x37e   : > { %8010 = vmatprep.subr.bf16.mxu1 %v12606_v44 }
 0x380   : > { %3150 = vmatmul.mubr.f32.gmra.mrb[48].mxu1 %v2265_v15 }
 0x381   : > { %3154 = vmatprep.mubr.f32.mxu1 %v2275_v7  ;;  %8012 = vmatpush3.bf16.msra.mxu1 %v8011_v52 }
 0x382   : > { %8013 = vmatprep.subr.bf16.mxu1 %v12606_v44 }
 0x384   : > { %3155 = vmatmul.mubr.f32.gmra.mrb[50].mxu1 %v2274_v13 }
 0x385   : > { %3159 = vmatprep.mubr.f32.mxu1 %v2284_v2  ;;  %8015 = vmatpush3.bf16.msra.mxu1 %v8014_v23 }
 0x388   : > { %3160 = vmatmul.mubr.f32.gmra.mrb[52].mxu1 %v2283_v49 }
 0x389   : > { %3164 = vmatprep.mubr.f32.mxu1 %v2293_v36 }
 0x38c   : > { %3165 = vmatmul.mubr.f32.gmra.mrb[54].mxu1 %v2292_v59 }
 0x38d   : > { %3169 = vmatprep.mubr.f32.mxu1 %v2302_v33 }
 0x390   : > { %3170 = vmatmul.mubr.f32.gmra.mrb[56].mxu1 %v2301_v10 }
 0x391   : > { %3174 = vmatprep.mubr.f32.mxu1 %v2311_v30 }
 0x394   : > { %3175 = vmatmul.mubr.f32.gmra.mrb[58].mxu1 %v2310_v1 }
 0x395   : > { %3179 = vmatprep.mubr.f32.mxu1 %v2320_v41 }
 0x398   : > { %3180 = vmatmul.mubr.f32.gmra.mrb[60].mxu1 %v2319_v53 }
 0x399   : > { %3184 = vmatprep.mubr.f32.mxu1 %v2329_v9 }
 0x39c   : > { %3185 = vmatmul.mubr.f32.gmra.mrb[62].mxu1 %v2328_v3 }
 0x39d   : > { %3189 = vmatprep.mubr.f32.mxu1 %v2338_v26 }
 0x3a0   : > { %3190 = vmatmul.mubr.f32.gmra.mrb[64].mxu1 %v2337_v27 }
 0x3a1   : > { %3194 = vmatprep.mubr.f32.mxu1 %v2347_v11 }
 0x3a4   : > { %3195 = vmatmul.mubr.f32.gmra.mrb[66].mxu1 %v2346_v46 }
 0x3a5   : > { %3199 = vmatprep.mubr.f32.mxu1 %v2356_v6 }
 0x3a8   : > { %3200 = vmatmul.mubr.f32.gmra.mrb[68].mxu1 %v2355_v38 }
 0x3a9   : > { %3204 = vmatprep.mubr.f32.mxu1 %v10157_v63  ;;  %v2213_v63 = vld [vmem:[#allocation2 + $0x40] sm:$0xff] }
 0x3ac   : > { %3205 = vmatmul.mubr.f32.gmra.mrb[70].mxu1 %v10155_v0  ;;  %v2222_v0 = vld [vmem:[#allocation2 + $0x88] sm:$0xff] }
 0x3ad   : > { %3209 = vmatprep.mubr.f32.mxu1 %v10173_v61  ;;  %v2240_v61 = vld [vmem:[#allocation2 + $0x118] sm:$0xff] }
 0x3b0   : > { %3210 = vmatmul.mubr.f32.gmra.mrb[72].mxu1 %v10171_v56  ;;  %v2231_v56 = vld [vmem:[#allocation2 + $0xd0] sm:$0xff] }
 0x3b1   : > { %3214 = vmatprep.mubr.f32.mxu1 %v10185_v17  ;;  %v2258_v17 = vld [vmem:[#allocation2 + $0x1a8] sm:$0xff] }
 0x3b4   : > { %3215 = vmatmul.mubr.f32.gmra.mrb[74].mxu1 %v10183_v20  ;;  %v2249_v20 = vld [vmem:[#allocation2 + $0x160] sm:$0xff] }
 0x3b5   : > { %3219 = vmatprep.mubr.f32.mxu1 %v10369_v60  ;;  %v2276_v60 = vld [vmem:[#allocation2 + $0x238] sm:$0xff] }
 0x3b8   : > { %3220 = vmatmul.mubr.f32.gmra.mrb[76].mxu1 %v10367_v22  ;;  %v2267_v22 = vld [vmem:[#allocation2 + $0x1f0] sm:$0xff] }
 0x3b9   : > { %7423 = vmatprep.mubr.msk.f32.mxu1 %vm8869_vm0, %v8870_v39 }
 0x3bc   : > { %7424 = vmatmul.mubr.f32.vlgmr.msra.gmra.mrb[36].mxu1 %v2213_v63 }
 0x3bd   : > { %7426 = vmatprep.mubr.msk.f32.mxu1 %vm8869_vm0, %v8870_v39 }
 0x3c0   : > { %7427 = vmatmul.mubr.f32.gmra.mrb[38].mxu1 %v2222_v0 }
 0x3c1   : > { %7429 = vmatprep.mubr.msk.f32.mxu1 %vm8869_vm0, %v8870_v39 }
 0x3c4   : > { %7430 = vmatmul.mubr.f32.gmra.mrb[40].mxu1 %v2231_v56 }
 0x3c5   : > { %7432 = vmatprep.mubr.msk.f32.mxu1 %vm8869_vm0, %v8870_v39 }
 0x3c8   : > { %7433 = vmatmul.mubr.f32.gmra.mrb[42].mxu1 %v2240_v61 }
 0x3c9   : > { %7435 = vmatprep.mubr.msk.f32.mxu1 %vm8869_vm0, %v8870_v39 }
 0x3cc   : > { %7436 = vmatmul.mubr.f32.gmra.mrb[44].mxu1 %v2249_v20 }
 0x3cd   : > { %7438 = vmatprep.mubr.msk.f32.mxu1 %vm8869_vm0, %v8870_v39 }
 0x3d0   : > { %7439 = vmatmul.mubr.f32.gmra.mrb[46].mxu1 %v2258_v17 }
 0x3d1   : > { %7441 = vmatprep.mubr.msk.f32.mxu1 %vm8869_vm0, %v8870_v39 }
 0x3d4   : > { %7442 = vmatmul.mubr.f32.gmra.mrb[48].mxu1 %v2267_v22 }
 0x3d5   : > { %7444 = vmatprep.mubr.msk.f32.mxu1 %vm8869_vm0, %v8870_v39 }
 0x3d8   : > { %7445 = vmatmul.mubr.f32.gmra.mrb[50].mxu1 %v2276_v60 }
 0x3d9   : > { %7447 = vmatprep.mubr.msk.f32.mxu1 %vm8869_vm0, %v8870_v39 }
 0x3dc   : > { %7448 = vmatmul.mubr.f32.gmra.mrb[52].mxu1 %v2285_v55 }
 0x3dd   : > { %7450 = vmatprep.mubr.msk.f32.mxu1 %vm8869_vm0, %v8870_v39 }
 0x3e0   : > { %7451 = vmatmul.mubr.f32.gmra.mrb[54].mxu1 %v2294_v12 }
 0x3e1   : > { %7453 = vmatprep.mubr.msk.f32.mxu1 %vm8869_vm0, %v8870_v39 }
 0x3e4   : > { %7454 = vmatmul.mubr.f32.gmra.mrb[56].mxu1 %v2303_v19 }
 0x3e5   : > { %7456 = vmatprep.mubr.msk.f32.mxu1 %vm8869_vm0, %v8870_v39 }
 0x3e8   : > { %7457 = vmatmul.mubr.f32.gmra.mrb[58].mxu1 %v2312_v8 }
 0x3e9   : > { %7459 = vmatprep.mubr.msk.f32.mxu1 %vm8869_vm0, %v8870_v39 }
 0x3ec   : > { %7460 = vmatmul.mubr.f32.gmra.mrb[60].mxu1 %v2321_v57 }
 0x3ed   : > { %7462 = vmatprep.mubr.msk.f32.mxu1 %vm8869_vm0, %v8870_v39 }
 0x3f0   : > { %7463 = vmatmul.mubr.f32.gmra.mrb[62].mxu1 %v2330_v42 }
 0x3f1   : > { %7465 = vmatprep.mubr.msk.f32.mxu1 %vm8869_vm0, %v8870_v39 }
 0x3f4   : > { %7466 = vmatmul.mubr.f32.gmra.mrb[64].mxu1 %v2339_v40 }
 0x3f5   : > { %7468 = vmatprep.mubr.msk.f32.mxu1 %vm8869_vm0, %v8870_v39 }
 0x3f8   : > { %7469 = vmatmul.mubr.f32.gmra.mrb[66].mxu1 %v2348_v43 }
 0x3f9   : > { %7471 = vmatprep.mubr.msk.f32.mxu1 %vm8869_vm0, %v8870_v39 }
 0x3fc   : > { %7472 = vmatmul.mubr.f32.gmra.mrb[68].mxu1 %v2357_v5 }
 0x3fd   : > { %7474 = vmatprep.mubr.msk.f32.mxu1 %vm8869_vm0, %v8870_v39 }
 0x400   : > { %7475 = vmatmul.mubr.f32.gmra.mrb[70].mxu1 %v2366_v18 }
 0x401   : > { %7477 = vmatprep.mubr.msk.f32.mxu1 %vm8869_vm0, %v8870_v39 }
 0x404   : > { %7478 = vmatmul.mubr.f32.gmra.mrb[72].mxu1 %v2375_v14 }
 0x405   : > { %7480 = vmatprep.mubr.msk.f32.mxu1 %vm8869_vm0, %v8870_v39 }
 0x408   : > { %7481 = vmatmul.mubr.f32.gmra.mrb[74].mxu1 %v10187_v24 }
 0x409   : > { %7483 = vmatprep.mubr.msk.f32.mxu1 %vm8869_vm0, %v8870_v39 }
 0x40c   : > { %7484 = vmatmul.mubr.f32.gmra.mrb[76].mxu1 %v10371_v29 }
 0x48f   : > { %v3291_v16 = vpop.f32.mrb[36].mxu1 }
 0x490   : > { %v8572_v24 = vadd.f32 %v10560_v62, %v3291_v16  ;;  %v7425_v54 = vpop.f32.mrb[37].mxu1 }
 0x492   : > { %v3416_v32 = vmul.f32 0.1, %v8572_v24  ;;  %vm3395_vm14 = vcmp.gt.f32.partialorder %v8572_v24, 0.0 }
 0x493   : > { %v3296_v35 = vpop.f32.mrb[38].mxu1 }
 0x494   : > { %v8573_v29 = vadd.f32 %v10560_v62, %v3296_v35  ;;  %v7428_v58 = vpop.f32.mrb[39].mxu1  ;;  %v3437_v47 = vsel %vm3395_vm14, %v8572_v24, %v3416_v32 }
 0x496   : > { %vm3396_vm15 = vcmp.gt.f32.partialorder %v8573_v29, 0.0  ;;  %v3417_v48 = vmul.f32 0.1, %v8573_v29 }
 0x497   : > { %v3301_v51 = vpop.f32.mrb[40].mxu1 }
 0x498   : > { %v3438_v37 = vsel %vm3396_vm15, %v8573_v29, %v3417_v48  ;;  %v8574_v4 = vadd.f32 %v10560_v62, %v3301_v51  ;;  %v7431_v31 = vpop.f32.mrb[41].mxu1 }
 0x499   : > { %v10565_v28 = vpack.c.bf16 %v3438_v37, %v3437_v47 }
 0x49a   : > { %v3418_v50 = vmul.f32 0.1, %v8574_v4  ;;  %vm3397_vm1 = vcmp.gt.f32.partialorder %v8574_v4, 0.0 }
 0x49b   : > { %v3306_v25 = vpop.f32.mrb[42].mxu1  ;;  %8018 = vmatpush1.bf16.msra.mxu0 %v10565_v28 }
 0x49c   : > { %v8575_v52 = vadd.f32 %v10560_v62, %v3306_v25  ;;  %v7434_v21 = vpop.f32.mrb[43].mxu1  ;;  %8019 = vmatprep.subr.bf16.mxu0 %v12606_v44  ;;  %v3439_v7 = vsel %vm3397_vm1, %v8574_v4, %v3418_v50 }
 0x49e   : > { %vm3398_vm2 = vcmp.gt.f32.partialorder %v8575_v52, 0.0  ;;  %v3419_v34 = vmul.f32 0.1, %v8575_v52 }
 0x49f   : > { %v3311_v15 = vpop.f32.mrb[44].mxu1 }
 0x4a0   : > { %v3440_v23 = vsel %vm3398_vm2, %v8575_v52, %v3419_v34  ;;  %v8576_v13 = vadd.f32 %v10560_v62, %v3311_v15  ;;  %v7437_v2 = vpop.f32.mrb[45].mxu1 }
 0x4a1   : > { %v10571_v49 = vpack.c.bf16 %v3440_v23, %v3439_v7 }
 0x4a2   : > { %v3420_v59 = vmul.f32 0.1, %v8576_v13  ;;  %vm3399_vm3 = vcmp.gt.f32.partialorder %v8576_v13, 0.0 }
 0x4a3   : > { %v3316_v36 = vpop.f32.mrb[46].mxu1  ;;  %8021 = vmatpush1.bf16.msra.mxu0 %v10571_v49 }
 0x4a4   : > { %v8577_v33 = vadd.f32 %v10560_v62, %v3316_v36  ;;  %v7440_v10 = vpop.f32.mrb[47].mxu1  ;;  %8022 = vmatprep.subr.bf16.mxu0 %v12606_v44  ;;  %v3441_v41 = vsel %vm3399_vm3, %v8576_v13, %v3420_v59 }
 0x4a6   : > { %vm3400_vm4 = vcmp.gt.f32.partialorder %v8577_v33, 0.0  ;;  %v3421_v30 = vmul.f32 0.1, %v8577_v33 }
 0x4a7   : > { %v3321_v1 = vpop.f32.mrb[48].mxu1 }
 0x4a8   : > { %v3442_v53 = vsel %vm3400_vm4, %v8577_v33, %v3421_v30  ;;  %v8578_v9 = vadd.f32 %v10560_v62, %v3321_v1  ;;  %v7443_v3 = vpop.f32.mrb[49].mxu1 }
 0x4a9   : > { %v10577_v26 = vpack.c.bf16 %v3442_v53, %v3441_v41 }
 0x4aa   : > { %vm3401_vm5 = vcmp.gt.f32.partialorder %v8578_v9, 0.0  ;;  %v3422_v27 = vmul.f32 0.1, %v8578_v9 }
 0x4ab   : > { %v3326_v11 = vpop.f32.mrb[50].mxu1  ;;  %8024 = vmatpush1.bf16.msra.mxu0 %v10577_v26 }
 0x4ac   : > { %v3443_v46 = vsel %vm3401_vm5, %v8578_v9, %v3422_v27  ;;  %v8579_v6 = vadd.f32 %v10560_v62, %v3326_v11  ;;  %v7446_v38 = vpop.f32.mrb[51].mxu1  ;;  %8025 = vmatprep.subr.bf16.mxu0 %v12606_v44 }
 0x4ae   : > { %vm3402_vm6 = vcmp.gt.f32.partialorder %v8579_v6, 0.0  ;;  %v3423_v63 = vmul.f32 0.1, %v8579_v6 }
 0x4af   : > { %v3331_v0 = vpop.f32.mrb[52].mxu1 }
 0x4b0   : > { %v3444_v56 = vsel %vm3402_vm6, %v8579_v6, %v3423_v63  ;;  %v8580_v61 = vadd.f32 %v10560_v62, %v3331_v0  ;;  %v7449_v20 = vpop.f32.mrb[53].mxu1 }
 0x4b1   : > { %v10583_v17 = vpack.c.bf16 %v3444_v56, %v3443_v46 }
 0x4b2   : > { %vm3403_vm7 = vcmp.gt.f32.partialorder %v8580_v61, 0.0  ;;  %v3424_v22 = vmul.f32 0.1, %v8580_v61 }
 0x4b3   : > { %v3336_v60 = vpop.f32.mrb[54].mxu1  ;;  %8027 = vmatpush1.bf16.msra.mxu0 %v10583_v17 }
 0x4b4   : > { %v3445_v55 = vsel %vm3403_vm7, %v8580_v61, %v3424_v22  ;;  %v8581_v12 = vadd.f32 %v10560_v62, %v3336_v60  ;;  %v7452_v19 = vpop.f32.mrb[55].mxu1  ;;  %8028 = vmatprep.subr.bf16.mxu0 %v12606_v44 }
 0x4b6   : > { %vm3404_vm8 = vcmp.gt.f32.partialorder %v8581_v12, 0.0  ;;  %v3425_v8 = vmul.f32 0.1, %v8581_v12 }
 0x4b7   : > { %v3341_v57 = vpop.f32.mrb[56].mxu1 }
 0x4b8   : > { %v3446_v42 = vsel %vm3404_vm8, %v8581_v12, %v3425_v8  ;;  %v8582_v40 = vadd.f32 %v10560_v62, %v3341_v57  ;;  %v7455_v43 = vpop.f32.mrb[57].mxu1 }
 0x4b9   : > { %v10589_v5 = vpack.c.bf16 %v3446_v42, %v3445_v55 }
 0x4ba   : > { %vm3405_vm9 = vcmp.gt.f32.partialorder %v8582_v40, 0.0  ;;  %v3426_v18 = vmul.f32 0.1, %v8582_v40 }
 0x4bb   : > { %v3346_v14 = vpop.f32.mrb[58].mxu1  ;;  %8030 = vmatpush1.bf16.msra.mxu0 %v10589_v5 }
 0x4bc   : > { %v3447_v45 = vsel %vm3405_vm9, %v8582_v40, %v3426_v18  ;;  %v8583_v16 = vadd.f32 %v10560_v62, %v3346_v14  ;;  %v7458_v24 = vpop.f32.mrb[59].mxu1  ;;  %8031 = vmatprep.subr.bf16.mxu0 %v12606_v44  ;;  %v3479_v14 = vld [vmem:[%s12576_s12] sm:$0xff] }
 0x4bd   : > { %v3486_v24 = vld [vmem:[%s12576_s12 + $0x38] sm:$0xff] }
 0x4be   : > { %vm3406_vm10 = vcmp.gt.f32.partialorder %v8583_v16, 0.0  ;;  %v3427_v54 = vmul.f32 0.1, %v8583_v16 }
 0x4bf   : > { %v3351_v35 = vpop.f32.mrb[60].mxu1 }
 0x4c0   : > { %v3448_v32 = vsel %vm3406_vm10, %v8583_v16, %v3427_v54  ;;  %v8584_v29 = vadd.f32 %v10560_v62, %v3351_v35  ;;  %v7461_v58 = vpop.f32.mrb[61].mxu1  ;;  %v3484_v16 = vld [vmem:[%s12576_s12 + $0x28] sm:$0xff]  ;;  %v3490_v35 = vld [vmem:[%s12576_s12 + $0x58] sm:$0xff] }
 0x4c1   : > { %v10595_v48 = vpack.c.bf16 %v3448_v32, %v3447_v45  ;;  %v3482_v45 = vld [vmem:[%s12576_s12 + $0x18] sm:$0xff]  ;;  %v3488_v54 = vld [vmem:[%s12576_s12 + $0x48] sm:$0xff]  ;;  %v3493_v58 = vld [vmem:[%s12576_s12 + $0x70] sm:$0xff] }
 0x4c2   : > { %vm3407_vm11 = vcmp.gt.f32.partialorder %v8584_v29, 0.0  ;;  %v3428_v51 = vmul.f32 0.1, %v8584_v29  ;;  %v3492_v32 = vld [vmem:[%s12576_s12 + $0x68] sm:$0xff] }
 0x4c3   : > { %v3356_v47 = vpop.f32.mrb[62].mxu1  ;;  %8033 = vmatpush1.bf16.msra.mxu0 %v10595_v48 }
 0x4c4   : > { %v3449_v37 = vsel %vm3407_vm11, %v8584_v29, %v3428_v51  ;;  %v8585_v4 = vadd.f32 %v10560_v62, %v3356_v47  ;;  %v7464_v31 = vpop.f32.mrb[63].mxu1  ;;  %8034 = vmatprep.subr.bf16.mxu0 %v12606_v44  ;;  %v3494_v29 = vld [vmem:[%s12576_s12 + $0x78] sm:$0xff]  ;;  %v3495_v51 = vld [vmem:[%s12576_s12 + $0x80] sm:$0xff] }
 0x4c5   : > { %v3498_v47 = vld [vmem:[%s12576_s12 + $0x98] sm:$0xff]  ;;  %v3499_v31 = vld [vmem:[%s12576_s12 + $0xa0] sm:$0xff] }
 0x4c6   : > { %vm3408_vm12 = vcmp.gt.f32.partialorder %v8585_v4, 0.0  ;;  %v3429_v25 = vmul.f32 0.1, %v8585_v4 }
 0x4c7   : > { %v3361_v50 = vpop.f32.mrb[64].mxu1 }
 0x4c8   : > { %v3450_v52 = vsel %vm3408_vm12, %v8585_v4, %v3429_v25  ;;  %v8586_v21 = vadd.f32 %v10560_v62, %v3361_v50  ;;  %v7467_v34 = vpop.f32.mrb[65].mxu1  ;;  %v3500_v4 = vld [vmem:[%s12576_s12 + $0xa8] sm:$0xff]  ;;  %v3502_v25 = vld [vmem:[%s12576_s12 + $0xb8] sm:$0xff]  ;;  %v3501_v50 = vld [vmem:[%s12576_s12 + $0xb0] sm:$0xff] }
 0x4c9   : > { %v10601_v15 = vpack.c.bf16 %v3450_v52, %v3449_v37  ;;  %v3497_v37 = vld [vmem:[%s12576_s12 + $0x90] sm:$0xff]  ;;  %v3504_v52 = vld [vmem:[%s12576_s12 + $0xc8] sm:$0xff]  ;;  %v3506_v34 = vld [vmem:[%s12576_s12 + $0xd8] sm:$0xff] }
 0x4ca   : > { %vm3409_vm14 = vcmp.gt.f32.partialorder %v8586_v21, 0.0  ;;  %v3430_v7 = vmul.f32 0.1, %v8586_v21 }
 0x4cb   : > { %v3366_v23 = vpop.f32.mrb[66].mxu1  ;;  %8036 = vmatpush1.bf16.msra.mxu0 %v10601_v15 }
 0x4cc   : > { %v3451_v13 = vsel %vm3409_vm14, %v8586_v21, %v3430_v7  ;;  %v8587_v2 = vadd.f32 %v10560_v62, %v3366_v23  ;;  %v7470_v36 = vpop.f32.mrb[67].mxu1  ;;  %8037 = vmatprep.subr.bf16.mxu0 %v12606_v44  ;;  %v3503_v21 = vld [vmem:[%s12576_s12 + $0xc0] sm:$0xff]  ;;  %v3508_v7 = vld [vmem:[%s12576_s12 + $0xe8] sm:$0xff] }
 0x4cd   : > { %v3507_v23 = vld [vmem:[%s12576_s12 + $0xe0] sm:$0xff]  ;;  %v3512_v36 = vld [vmem:[%s12576_s12 + $0x108] sm:$0xff] }
 0x4ce   : > { %vm3410_vm15 = vcmp.gt.f32.partialorder %v8587_v2, 0.0  ;;  %v3431_v59 = vmul.f32 0.1, %v8587_v2 }
 0x4cf   : > { %v3371_v33 = vpop.f32.mrb[68].mxu1 }
 0x4d0   : > { %v3452_v10 = vsel %vm3410_vm15, %v8587_v2, %v3431_v59  ;;  %v8588_v30 = vadd.f32 %v10560_v62, %v3371_v33  ;;  %v7473_v1 = vpop.f32.mrb[69].mxu1  ;;  %v3509_v2 = vld [vmem:[%s12576_s12 + $0xf0] sm:$0xff]  ;;  %v3511_v59 = vld [vmem:[%s12576_s12 + $0x100] sm:$0xff]  ;;  %v3514_v33 = vld [vmem:[%s12576_s12 + $0x118] sm:$0xff] }
 0x4d1   : > { %v10607_v41 = vpack.c.bf16 %v3452_v10, %v3451_v13  ;;  %v3510_v13 = vld [vmem:[%s12576_s12 + $0xf8] sm:$0xff]  ;;  %v3513_v10 = vld [vmem:[%s12576_s12 + $0x110] sm:$0xff]  ;;  %v3746_v1 = vld [vmem:[%s12576_s12 + $0x120] sm:$0xff] }
 0x4d2   : > { %vm3411_vm1 = vcmp.gt.f32.partialorder %v8588_v30, 0.0  ;;  %v3432_v53 = vmul.f32 0.1, %v8588_v30 }
 0x4d3   : > { %v3376_v9 = vpop.f32.mrb[70].mxu1  ;;  %8039 = vmatpush1.bf16.msra.mxu0 %v10607_v41 }
 0x4d4   : > { %v3453_v3 = vsel %vm3411_vm1, %v8588_v30, %v3432_v53  ;;  %v8589_v27 = vadd.f32 %v10560_v62, %v3376_v9  ;;  %v7476_v11 = vpop.f32.mrb[71].mxu1  ;;  %8040 = vmatprep.subr.bf16.mxu0 %v12606_v44  ;;  %v3747_v30 = vld [vmem:[%s12576_s12 + $0x128] sm:$0xff]  ;;  %v3748_v53 = vld [vmem:[%s12576_s12 + $0x130] sm:$0xff] }
 0x4d5   : > { %v3751_v9 = vld [vmem:[%s12576_s12 + $0x148] sm:$0xff]  ;;  %v3752_v11 = vld [vmem:[%s12576_s12 + $0x150] sm:$0xff] }
 0x4d6   : > { %vm3412_vm2 = vcmp.gt.f32.partialorder %v8589_v27, 0.0  ;;  %v3433_v46 = vmul.f32 0.1, %v8589_v27 }
 0x4d7   : > { %v3381_v6 = vpop.f32.mrb[72].mxu1 }
 0x4d8   : > { %v3454_v38 = vsel %vm3412_vm2, %v8589_v27, %v3433_v46  ;;  %v8590_v63 = vadd.f32 %v10560_v62, %v3381_v6  ;;  %v7479_v0 = vpop.f32.mrb[73].mxu1  ;;  %v3753_v27 = vld [vmem:[%s12576_s12 + $0x158] sm:$0xff]  ;;  %v3755_v46 = vld [vmem:[%s12576_s12 + $0x168] sm:$0xff]  ;;  %v3754_v6 = vld [vmem:[%s12576_s12 + $0x160] sm:$0xff] }
 0x4d9   : > { %v10613_v56 = vpack.c.bf16 %v3454_v38, %v3453_v3  ;;  %v3750_v3 = vld [vmem:[%s12576_s12 + $0x140] sm:$0xff]  ;;  %v3757_v38 = vld [vmem:[%s12576_s12 + $0x178] sm:$0xff]  ;;  %v3759_v0 = vld [vmem:[%s12576_s12 + $0x188] sm:$0xff] }
 0x4da   : > { %vm3413_vm3 = vcmp.gt.f32.partialorder %v8590_v63, 0.0  ;;  %v3434_v61 = vmul.f32 0.1, %v8590_v63 }
 0x4db   : > { %v3386_v20 = vpop.f32.mrb[74].mxu1  ;;  %8042 = vmatpush1.bf16.msra.mxu0 %v10613_v56 }
 0x4dc   : > { %v3455_v22 = vsel %vm3413_vm3, %v8590_v63, %v3434_v61  ;;  %v8591_v60 = vadd.f32 %v10560_v62, %v3386_v20  ;;  %v7482_v55 = vpop.f32.mrb[75].mxu1  ;;  %8043 = vmatprep.subr.bf16.mxu0 %v12606_v44  ;;  %v3756_v63 = vld [vmem:[%s12576_s12 + $0x170] sm:$0xff]  ;;  %v3761_v61 = vld [vmem:[%s12576_s12 + $0x198] sm:$0xff] }
 0x4dd   : > { %v3760_v20 = vld [vmem:[%s12576_s12 + $0x190] sm:$0xff]  ;;  %v3765_v55 = vld [vmem:[%s12576_s12 + $0x1b8] sm:$0xff] }
 0x4de   : > { %vm3414_vm4 = vcmp.gt.f32.partialorder %v8591_v60, 0.0  ;;  %v3435_v12 = vmul.f32 0.1, %v8591_v60 }
 0x4df   : > { %v3391_v19 = vpop.f32.mrb[76].mxu1 }
 0x4e0   : > { %v3456_v8 = vsel %vm3414_vm4, %v8591_v60, %v3435_v12  ;;  %v8592_v57 = vadd.f32 %v10560_v62, %v3391_v19  ;;  %v7485_v42 = vpop.f32.mrb[77].mxu1  ;;  %v3481_v62 = vld [vmem:[%s12576_s12 + $0x10] sm:$0xff]  ;;  %v3762_v60 = vld [vmem:[%s12576_s12 + $0x1a0] sm:$0xff]  ;;  %v3767_v19 = vld [vmem:[%s12576_s12 + $0x1c8] sm:$0xff] }
 0x4e1   : > { %v10619_v40 = vpack.c.bf16 %v3456_v8, %v3455_v22  ;;  %v3763_v22 = vld [vmem:[%s12576_s12 + $0x1a8] sm:$0xff]  ;;  %v3764_v12 = vld [vmem:[%s12576_s12 + $0x1b0] sm:$0xff]  ;;  %v3766_v8 = vld [vmem:[%s12576_s12 + $0x1c0] sm:$0xff] }
 0x4e2   : > { %vm3415_vm5 = vcmp.gt.f32.partialorder %v8592_v57, 0.0  ;;  %v3436_v43 = vmul.f32 0.1, %v8592_v57  ;;  %v3768_v42 = vld [vmem:[%s12576_s12 + $0x1d0] sm:$0xff] }
 0x4e3   : > { %8045 = vmatpush1.bf16.msra.mxu0 %v10619_v40 }
 0x4e4   : > { %v10622_v18 = vsel %vm3415_vm5, %v8592_v57, %v3436_v43  ;;  %3631 = vmatprep.subr.mxu0 %v8870_v39  ;;  %v3769_v57 = vld [vmem:[%s12576_s12 + $0x1d8] sm:$0xff]  ;;  %v3770_v43 = vld [vmem:[%s12576_s12 + $0x1e0] sm:$0xff] }
 0x4e7   : > { %3632 = vmatpush1.msra.mxu0 %v10622_v18 }
 0x4e8   : > { %3656 = vmatmul.mubr.f32.vlgmr.msra.gmra.mrb[86].mxu0 %v3479_v14  ;;  %8046 = vmatprep.subr.bf16.mxu0 %v12606_v44  ;;  %v3772_v14 = vld [vmem:[%s12576_s12 + $0x1f0] sm:$0xff] }
 0x4e9   : > { %8048 = vmatpush1.bf16.msra.mxu0 %v10565_v28  ;;  %6349 = vmatprep.mubr.msk.f32.mxu0 %vm3536_vm13, %v3482_v45  ;;  %v3483_v28 = vld [vmem:[%s12576_s12 + $0x20] sm:$0xff]  ;;  %v3775_v45 = vld [vmem:[%s12576_s12 + $0x208] sm:$0xff] }
 0x4ea   : > { %8049 = vmatprep.subr.bf16.mxu0 %v12606_v44 }
 0x4ec   : > { %3661 = vmatmul.mubr.f32.gmra.mrb[88].mxu0 %v3481_v62  ;;  %v3774_v62 = vld [vmem:[%s12576_s12 + $0x200] sm:$0xff] }
 0x4ed   : > { %8051 = vmatpush1.bf16.msra.mxu0 %v10571_v49  ;;  %6350 = vmatprep.mubr.msk.f32.mxu0 %vm3536_vm13, %v3484_v16  ;;  %v3485_v49 = vld [vmem:[%s12576_s12 + $0x30] sm:$0xff]  ;;  %v3777_v16 = vld [vmem:[%s12576_s12 + $0x218] sm:$0xff] }
 0x4ee   : > { %8052 = vmatprep.subr.bf16.mxu0 %v12606_v44 }
 0x4f0   : > { %3666 = vmatmul.mubr.f32.gmra.mrb[90].mxu0 %v3483_v28  ;;  %v3776_v28 = vld [vmem:[%s12576_s12 + $0x210] sm:$0xff] }
 0x4f1   : > { %8054 = vmatpush1.bf16.msra.mxu0 %v10577_v26  ;;  %6351 = vmatprep.mubr.msk.f32.mxu0 %vm3536_vm13, %v3486_v24  ;;  %v3487_v26 = vld [vmem:[%s12576_s12 + $0x40] sm:$0xff]  ;;  %v3779_v24 = vld [vmem:[%s12576_s12 + $0x228] sm:$0xff] }
 0x4f2   : > { %8055 = vmatprep.subr.bf16.mxu0 %v12606_v44 }
 0x4f4   : > { %3671 = vmatmul.mubr.f32.gmra.mrb[92].mxu0 %v3485_v49  ;;  %v3778_v49 = vld [vmem:[%s12576_s12 + $0x220] sm:$0xff] }
 0x4f5   : > { %8057 = vmatpush1.bf16.msra.mxu0 %v10583_v17  ;;  %6352 = vmatprep.mubr.msk.f32.mxu0 %vm3536_vm13, %v3488_v54  ;;  %v3489_v17 = vld [vmem:[%s12576_s12 + $0x50] sm:$0xff]  ;;  %v3781_v54 = vld [vmem:[%s12576_s12 + $0x238] sm:$0xff] }
 0x4f6   : > { %8058 = vmatprep.subr.bf16.mxu0 %v12606_v44 }
 0x4f8   : > { %3676 = vmatmul.mubr.f32.gmra.mrb[94].mxu0 %v3487_v26  ;;  %v3780_v26 = vld [vmem:[%s12576_s12 + $0x230] sm:$0xff] }
 0x4f9   : > { %8060 = vmatpush1.bf16.msra.mxu0 %v10589_v5  ;;  %6353 = vmatprep.mubr.msk.f32.mxu0 %vm3536_vm13, %v3490_v35  ;;  %v3491_v5 = vld [vmem:[%s12576_s12 + $0x60] sm:$0xff] }
 0x4fa   : > { %8061 = vmatprep.subr.bf16.mxu0 %v12606_v44  ;;  %v4205_v35 = vld [vmem:[%s12569_s5 + $0x80] sm:$0xff] }
 0x4fc   : > { %3681 = vmatmul.mubr.f32.gmra.mrb[96].mxu0 %v3489_v17  ;;  %v4206_v17 = vld [vmem:[%s12569_s5 + $0x88] sm:$0xff] }
 0x4fd   : > { %8063 = vmatpush1.bf16.msra.mxu0 %v10595_v48  ;;  %6354 = vmatprep.mubr.msk.f32.mxu0 %vm3536_vm13, %v3492_v32  ;;  %v3496_v48 = vld [vmem:[%s12576_s12 + $0x88] sm:$0xff]  ;;  %v4189_v32 = vld [vmem:[%s12569_s5] sm:$0xff] }
 0x4fe   : > { %8064 = vmatprep.subr.bf16.mxu0 %v12606_v44 }
 0x500   : > { %3686 = vmatmul.mubr.f32.gmra.mrb[98].mxu0 %v3491_v5  ;;  %v8076_v5 = vpack.c.bf16 %v4206_v17, %v4205_v35 }
 0x501   : > { %8066 = vmatpush1.bf16.msra.mxu0 %v10601_v15  ;;  %6355 = vmatprep.mubr.msk.f32.mxu0 %vm3536_vm13, %v3494_v29  ;;  %v3505_v15 = vld [vmem:[%s12576_s12 + $0xd0] sm:$0xff]  ;;  %v4190_v29 = vld [vmem:[%s12569_s5 + $0x8] sm:$0xff] }
 0x502   : > { %8067 = vmatprep.subr.bf16.mxu0 %v12606_v44 }
 0x504   : > { %3691 = vmatmul.mubr.f32.gmra.mrb[100].mxu0 %v3493_v58  ;;  %v8078_v58 = vpack.c.bf16 %v4190_v29, %v4189_v32 }
 0x505   : > { %8069 = vmatpush1.bf16.msra.mxu0 %v10607_v41  ;;  %6356 = vmatprep.mubr.msk.f32.mxu0 %vm3536_vm13, %v3496_v48  ;;  %v3749_v41 = vld [vmem:[%s12576_s12 + $0x138] sm:$0xff]  ;;  %v4207_v48 = vld [vmem:[%s12569_s5 + $0x90] sm:$0xff] }
 0x506   : > { %8070 = vmatprep.subr.bf16.mxu0 %v12606_v44 }
 0x508   : > { %3696 = vmatmul.mubr.f32.gmra.mrb[102].mxu0 %v3495_v51  ;;  %v4208_v51 = vld [vmem:[%s12569_s5 + $0x98] sm:$0xff] }
 0x509   : > { %8072 = vmatpush1.bf16.msra.mxu0 %v10613_v56  ;;  %6357 = vmatprep.mubr.msk.f32.mxu0 %vm3536_vm13, %v3498_v47  ;;  %v3758_v56 = vld [vmem:[%s12576_s12 + $0x180] sm:$0xff]  ;;  %v8080_v47 = vpack.c.bf16 %v4208_v51, %v4207_v48 }
 0x50a   : > { %8073 = vmatprep.subr.bf16.mxu0 %v12606_v44 }
 0x50c   : > { %3701 = vmatmul.mubr.f32.gmra.mrb[104].mxu0 %v3497_v37  ;;  %v4191_v37 = vld [vmem:[%s12569_s5 + $0x10] sm:$0xff] }
 0x50d   : > { %8075 = vmatpush1.bf16.msra.mxu0 %v10619_v40  ;;  %6358 = vmatprep.mubr.msk.f32.mxu0 %vm3536_vm13, %v3500_v4  ;;  %v3771_v40 = vld [vmem:[%s12576_s12 + $0x1e8] sm:$0xff]  ;;  %v4192_v4 = vld [vmem:[%s12569_s5 + $0x18] sm:$0xff] }
 0x50e   : > { %3876 = vmatprep.subr.mxu0 %v8870_v39 }
 0x510   : > { %3706 = vmatmul.mubr.f32.gmra.mrb[106].mxu0 %v3499_v31  ;;  %v8082_v31 = vpack.c.bf16 %v4192_v4, %v4191_v37 }
 0x511   : > { %3877 = vmatpush1.msra.mxu0 %v10622_v18  ;;  %6359 = vmatprep.mubr.msk.f32.mxu0 %vm3536_vm13, %v3502_v25  ;;  %v3773_v18 = vld [vmem:[%s12576_s12 + $0x1f8] sm:$0xff]  ;;  %v4209_v25 = vld [vmem:[%s12569_s5 + $0xa0] sm:$0xff] }
 0x512   : > { %8077 = vmatprep.subr.bf16.mxu0 %v8076_v5 }
 0x514   : > { %3711 = vmatmul.mubr.f32.gmra.mrb[108].mxu0 %v3501_v50  ;;  %v4210_v50 = vld [vmem:[%s12569_s5 + $0xa8] sm:$0xff] }
 0x515   : > { %6360 = vmatprep.mubr.msk.f32.mxu0 %vm3536_vm13, %v3504_v52  ;;  %v8084_v52 = vpack.c.bf16 %v4210_v50, %v4209_v25 }
 0x518   : > { %3716 = vmatmul.mubr.f32.gmra.mrb[110].mxu0 %v3503_v21  ;;  %v4193_v21 = vld [vmem:[%s12569_s5 + $0x20] sm:$0xff] }
 0x519   : > { %6361 = vmatprep.mubr.msk.f32.mxu0 %vm3536_vm13, %v3506_v34  ;;  %v4194_v34 = vld [vmem:[%s12569_s5 + $0x28] sm:$0xff] }
 0x51c   : > { %3721 = vmatmul.mubr.f32.gmra.mrb[112].mxu0 %v3505_v15  ;;  %v8086_v15 = vpack.c.bf16 %v4194_v34, %v4193_v21 }
 0x51d   : > { %6362 = vmatprep.mubr.msk.f32.mxu0 %vm3536_vm13, %v3508_v7  ;;  %v4211_v7 = vld [vmem:[%s12569_s5 + $0xb0] sm:$0xff] }
 0x520   : > { %3726 = vmatmul.mubr.f32.gmra.mrb[114].mxu0 %v3507_v23  ;;  %v4212_v23 = vld [vmem:[%s12569_s5 + $0xb8] sm:$0xff] }
 0x521   : > { %6363 = vmatprep.mubr.msk.f32.mxu0 %vm3536_vm13, %v3510_v13  ;;  %v8088_v13 = vpack.c.bf16 %v4212_v23, %v4211_v7 }
 0x524   : > { %3731 = vmatmul.mubr.f32.gmra.mrb[116].mxu0 %v3509_v2  ;;  %v4195_v2 = vld [vmem:[%s12569_s5 + $0x30] sm:$0xff] }
 0x525   : > { %6364 = vmatprep.mubr.msk.f32.mxu0 %vm3536_vm13, %v3512_v36  ;;  %v4196_v36 = vld [vmem:[%s12569_s5 + $0x38] sm:$0xff] }
 0x528   : > { %3736 = vmatmul.mubr.f32.gmra.mrb[118].mxu0 %v3511_v59  ;;  %v8090_v59 = vpack.c.bf16 %v4196_v36, %v4195_v2 }
 0x529   : > { %6365 = vmatprep.mubr.msk.f32.mxu0 %vm3536_vm13, %v3514_v33 }
 0x52c   : > { %3741 = vmatmul.mubr.f32.gmra.mrb[120].mxu0 %v3513_v10  ;;  %v4213_v10 = vld [vmem:[%s12569_s5 + $0xc0] sm:$0xff] }
 0x52d   : > { %6366 = vmatprep.mubr.msk.f32.mxu0 %vm3536_vm13, %v3747_v30  ;;  %v4214_v30 = vld [vmem:[%s12569_s5 + $0xc8] sm:$0xff] }
 0x530   : > { %3901 = vmatmul.mubr.f32.vlgmr.msra.gmra.mrb[122].mxu0 %v3746_v1  ;;  %v4197_v1 = vld [vmem:[%s12569_s5 + $0x40] sm:$0xff] }
 0x531   : > { %6367 = vmatprep.mubr.msk.f32.mxu0 %vm3536_vm13, %v3749_v41  ;;  %8079 = vmatpush3.bf16.msra.mxu0 %v8078_v58 }
 0x532   : > { %8081 = vmatprep.subr.bf16.mxu0 %v8080_v47 }
 0x534   : > { %3906 = vmatmul.mubr.f32.gmra.mrb[124].mxu0 %v3748_v53  ;;  %v8092_v53 = vpack.c.bf16 %v4214_v30, %v4213_v10 }
 0x535   : > { %6368 = vmatprep.mubr.msk.f32.mxu0 %vm3536_vm13, %v3751_v9  ;;  %8083 = vmatpush3.bf16.msra.mxu0 %v8082_v31  ;;  %v4198_v9 = vld [vmem:[%s12569_s5 + $0x48] sm:$0xff] }
 0x536   : > { %8085 = vmatprep.subr.bf16.mxu0 %v8084_v52 }
 0x538   : > { %3911 = vmatmul.mubr.f32.gmra.mrb[126].mxu0 %v3750_v3  ;;  %v8094_v3 = vpack.c.bf16 %v4198_v9, %v4197_v1 }
 0x539   : > { %6369 = vmatprep.mubr.msk.f32.mxu0 %vm3536_vm13, %v3753_v27  ;;  %8087 = vmatpush3.bf16.msra.mxu0 %v8086_v15 }
 0x53a   : > { %8089 = vmatprep.subr.bf16.mxu0 %v8088_v13 }
 0x53c   : > { %3916 = vmatmul.mubr.f32.gmra.mrb[128].mxu0 %v3752_v11 }
 0x53d   : > { %6370 = vmatprep.mubr.msk.f32.mxu0 %vm3536_vm13, %v3755_v46  ;;  %8091 = vmatpush3.bf16.msra.mxu0 %v8090_v59  ;;  %v4215_v46 = vld [vmem:[%s12569_s5 + $0xd0] sm:$0xff] }
 0x53e   : > { %8093 = vmatprep.subr.bf16.mxu0 %v8092_v53 }
 0x540   : > { %3921 = vmatmul.mubr.f32.gmra.mrb[130].mxu0 %v3754_v6  ;;  %v4216_v6 = vld [vmem:[%s12569_s5 + $0xd8] sm:$0xff] }
 0x541   : > { %6371 = vmatprep.mubr.msk.f32.mxu0 %vm3536_vm13, %v3757_v38  ;;  %8095 = vmatpush3.bf16.msra.mxu0 %v8094_v3  ;;  %v4199_v38 = vld [vmem:[%s12569_s5 + $0x50] sm:$0xff] }
 0x544   : > { %3926 = vmatmul.mubr.f32.gmra.mrb[132].mxu0 %v3756_v63  ;;  %v8096_v63 = vpack.c.bf16 %v4216_v6, %v4215_v46 }
 0x545   : > { %6372 = vmatprep.mubr.msk.f32.mxu0 %vm3536_vm13, %v3759_v0  ;;  %v4200_v0 = vld [vmem:[%s12569_s5 + $0x58] sm:$0xff] }
 0x546   : > { %8097 = vmatprep.subr.bf16.mxu0 %v8096_v63 }
 0x548   : > { %3931 = vmatmul.mubr.f32.gmra.mrb[134].mxu0 %v3758_v56  ;;  %v8098_v56 = vpack.c.bf16 %v4200_v0, %v4199_v38 }
 0x549   : > { %6373 = vmatprep.mubr.msk.f32.mxu0 %vm3536_vm13, %v3761_v61 }
 0x54a   : > { %8099 = vmatpush3.bf16.msra.mxu0 %v8098_v56 }
 0x54c   : > { %3936 = vmatmul.mubr.f32.gmra.mrb[136].mxu0 %v3760_v20 }
 0x54d   : > { %6374 = vmatprep.mubr.msk.f32.mxu0 %vm3536_vm13, %v3763_v22  ;;  %v4217_v22 = vld [vmem:[%s12569_s5 + $0xe0] sm:$0xff] }
 0x550   : > { %3941 = vmatmul.mubr.f32.gmra.mrb[138].mxu0 %v3762_v60  ;;  %v4218_v60 = vld [vmem:[%s12569_s5 + $0xe8] sm:$0xff] }
 0x551   : > { %6375 = vmatprep.mubr.msk.f32.mxu0 %vm3536_vm13, %v3765_v55  ;;  %v4201_v55 = vld [vmem:[%s12569_s5 + $0x60] sm:$0xff] }
 0x554   : > { %3946 = vmatmul.mubr.f32.gmra.mrb[140].mxu0 %v3764_v12  ;;  %v8100_v12 = vpack.c.bf16 %v4218_v60, %v4217_v22 }
 0x555   : > { %6376 = vmatprep.mubr.msk.f32.mxu0 %vm3536_vm13, %v3767_v19  ;;  %v4202_v19 = vld [vmem:[%s12569_s5 + $0x68] sm:$0xff] }
 0x556   : > { %8101 = vmatprep.subr.bf16.mxu0 %v8100_v12 }
 0x558   : > { %3951 = vmatmul.mubr.f32.gmra.mrb[142].mxu0 %v3766_v8  ;;  %v8102_v8 = vpack.c.bf16 %v4202_v19, %v4201_v55 }
 0x559   : > { %6377 = vmatprep.mubr.msk.f32.mxu0 %vm3536_vm13, %v3769_v57 }
 0x55a   : > { %8103 = vmatpush3.bf16.msra.mxu0 %v8102_v8 }
 0x55c   : > { %3956 = vmatmul.mubr.f32.gmra.mrb[144].mxu0 %v3768_v42 }
 0x55d   : > { %6378 = vmatprep.mubr.msk.f32.mxu0 %vm3536_vm13, %v3771_v40  ;;  %v4219_v40 = vld [vmem:[%s12569_s5 + $0xf0] sm:$0xff] }
 0x560   : > { %3961 = vmatmul.mubr.f32.gmra.mrb[146].mxu0 %v3770_v43  ;;  %v4220_v43 = vld [vmem:[%s12569_s5 + $0xf8] sm:$0xff] }
 0x561   : > { %6379 = vmatprep.mubr.msk.f32.mxu0 %vm3536_vm13, %v3773_v18  ;;  %v4203_v18 = vld [vmem:[%s12569_s5 + $0x70] sm:$0xff] }
 0x564   : > { %3966 = vmatmul.mubr.f32.gmra.mrb[148].mxu0 %v3772_v14  ;;  %v8104_v14 = vpack.c.bf16 %v4220_v43, %v4219_v40 }
 0x565   : > { %6380 = vmatprep.mubr.msk.f32.mxu0 %vm3536_vm13, %v3775_v45  ;;  %v4204_v45 = vld [vmem:[%s12569_s5 + $0x78] sm:$0xff] }
 0x566   : > { %8105 = vmatprep.subr.bf16.mxu0 %v8104_v14 }
 0x568   : > { %3971 = vmatmul.mubr.f32.gmra.mrb[150].mxu0 %v3774_v62  ;;  %v8106_v62 = vpack.c.bf16 %v4204_v45, %v4203_v18 }
 0x569   : > { %6381 = vmatprep.mubr.msk.f32.mxu0 %vm3536_vm13, %v3777_v16 }
 0x56a   : > { %8107 = vmatpush3.bf16.msra.mxu0 %v8106_v62 }
 0x56c   : > { %3976 = vmatmul.mubr.f32.gmra.mrb[152].mxu0 %v3776_v28 }
 0x56d   : > { %6382 = vmatprep.mubr.msk.f32.mxu0 %vm3536_vm13, %v3779_v24  ;;  %v4237_v24 = vld [vmem:[%s12569_s5 + $0x180] sm:$0xff] }
 0x570   : > { %3981 = vmatmul.mubr.f32.gmra.mrb[154].mxu0 %v3778_v49  ;;  %v4238_v49 = vld [vmem:[%s12569_s5 + $0x188] sm:$0xff] }
 0x571   : > { %6383 = vmatprep.mubr.msk.f32.mxu0 %vm3536_vm13, %v3781_v54  ;;  %v8108_v54 = vpack.c.bf16 %v4238_v49, %v4237_v24  ;;  %vm4853_vm13 = vcmask 392192  }
 0x573   : > { %8109 = vmatprep.subr.bf16.mxu0 %v8108_v54 }
 0x574   : > { %3986 = vmatmul.mubr.f32.gmra.mrb[156].mxu0 %v3780_v26 }
 0x5bb   : > { %v10944_v33 = vpop.f32.mrb[86].mxu0 }
 0x5bc   : > { %v3659_v41 = vpop.f32.mrb[87].mxu0 }
 0x5bf   : > { %v10958_v27 = vpop.f32.mrb[88].mxu0 }
 0x5c0   : > { %v3664_v11 = vpop.f32.mrb[89].mxu0 }
 0x5c3   : > { %v10972_v61 = vpop.f32.mrb[90].mxu0 }
 0x5c4   : > { %v3669_v20 = vpop.f32.mrb[91].mxu0 }
 0x5c7   : > { %v10986_v57 = vpop.f32.mrb[92].mxu0 }
 0x5c8   : > { %v3674_v42 = vpop.f32.mrb[93].mxu0 }
 0x5cb   : > { %v11000_v16 = vpop.f32.mrb[94].mxu0 }
 0x5cc   : > { %v3679_v28 = vpop.f32.mrb[95].mxu0 }
 0x5cf   : > { %v11008_v26 = vpop.f32.mrb[96].mxu0 }
 0x5d0   : > { %v3684_v35 = vpop.f32.mrb[97].mxu0 }
 0x5d3   : > { %v11010_v17 = vpop.f32.mrb[98].mxu0 }
 0x5d4   : > { %v3689_v32 = vpop.f32.mrb[99].mxu0 }
 0x5d7   : > { %v11012_v5 = vpop.f32.mrb[100].mxu0 }
 0x5d8   : > { %v3694_v29 = vpop.f32.mrb[101].mxu0 }
 0x5db   : > { %v11014_v58 = vpop.f32.mrb[102].mxu0 }
 0x5dc   : > { %v3699_v48 = vpop.f32.mrb[103].mxu0 }
 0x5df   : > { %v3702_v51 = vpop.f32.mrb[104].mxu0 }
 0x5e0   : > { %v3991_v47 = vmax.f32 %v10944_v33, %v3702_v51  ;;  %v3704_v37 = vpop.f32.mrb[105].mxu0 }
 0x5e1   : > { %v4221_v37 = vld [vmem:[%s12569_s5 + $0x100] sm:$0xff] }
 0x5e3   : > { %v3707_v4 = vpop.f32.mrb[106].mxu0 }
 0x5e4   : > { %v3992_v31 = vmax.f32 %v10958_v27, %v3707_v4  ;;  %v3709_v25 = vpop.f32.mrb[107].mxu0 }
 0x5e5   : > { %v4239_v25 = vld [vmem:[%s12569_s5 + $0x190] sm:$0xff] }
 0x5e7   : > { %v3712_v50 = vpop.f32.mrb[108].mxu0 }
 0x5e8   : > { %v3993_v52 = vmax.f32 %v10972_v61, %v3712_v50  ;;  %v3714_v21 = vpop.f32.mrb[109].mxu0  ;;  %v4240_v50 = vld [vmem:[%s12569_s5 + $0x198] sm:$0xff] }
 0x5eb   : > { %v3717_v34 = vpop.f32.mrb[110].mxu0 }
 0x5ec   : > { %v3994_v15 = vmax.f32 %v10986_v57, %v3717_v34  ;;  %v3719_v7 = vpop.f32.mrb[111].mxu0 }
 0x5ef   : > { %v11020_v23 = vpop.f32.mrb[112].mxu0 }
 0x5f0   : > { %v3995_v13 = vmax.f32 %v11000_v16, %v11020_v23  ;;  %v3724_v2 = vpop.f32.mrb[113].mxu0 }
 0x5f1   : > { %v8112_v2 = vpack.c.bf16 %v4240_v50, %v4239_v25 }
 0x5f3   : > { %v11024_v36 = vpop.f32.mrb[114].mxu0 }
 0x5f4   : > { %v3996_v59 = vmax.f32 %v11008_v26, %v11024_v36  ;;  %v3729_v33 = vpop.f32.mrb[115].mxu0 }
 0x5f5   : > { %v4223_v33 = vld [vmem:[%s12569_s5 + $0x110] sm:$0xff] }
 0x5f7   : > { %v11028_v10 = vpop.f32.mrb[116].mxu0 }
 0x5f8   : > { %v3997_v30 = vmax.f32 %v11010_v17, %v11028_v10  ;;  %v3734_v1 = vpop.f32.mrb[117].mxu0 }
 0x5f9   : > { %v4224_v1 = vld [vmem:[%s12569_s5 + $0x118] sm:$0xff] }
 0x5fb   : > { %v11032_v41 = vpop.f32.mrb[118].mxu0 }
 0x5fc   : > { %v3998_v53 = vmax.f32 %v11012_v5, %v11032_v41  ;;  %v3739_v9 = vpop.f32.mrb[119].mxu0  ;;  %v4249_v41 = vld [vmem:[%s12569_s5 + $0x1e0] sm:$0xff] }
 0x5ff   : > { %v11036_v3 = vpop.f32.mrb[120].mxu0 }
 0x600   : > { %v3999_v27 = vmax.f32 %v11014_v58, %v11036_v3  ;;  %v3744_v11 = vpop.f32.mrb[121].mxu0  ;;  %v4251_v58 = vld [vmem:[%s12569_s5 + $0x1f0] sm:$0xff]  ;;  %v4252_v3 = vld [vmem:[%s12569_s5 + $0x1f8] sm:$0xff] }
 0x603   : > { %v3902_v46 = vpop.f32.mrb[122].mxu0 }
 0x604   : > { %v3904_v6 = vpop.f32.mrb[123].mxu0 }
 0x607   : > { %v3907_v38 = vpop.f32.mrb[124].mxu0 }
 0x608   : > { %v3909_v63 = vpop.f32.mrb[125].mxu0 }
 0x60b   : > { %v3912_v0 = vpop.f32.mrb[126].mxu0 }
 0x60c   : > { %v3914_v56 = vpop.f32.mrb[127].mxu0 }
 0x60f   : > { %v3917_v61 = vpop.f32.mrb[128].mxu0 }
 0x610   : > { %v3919_v20 = vpop.f32.mrb[129].mxu0 }
 0x611   : > { %v4226_v20 = vld [vmem:[%s12569_s5 + $0x128] sm:$0xff] }
 0x613   : > { %v3922_v22 = vpop.f32.mrb[130].mxu0 }
 0x614   : > { %v3924_v60 = vpop.f32.mrb[131].mxu0 }
 0x617   : > { %v11040_v55 = vpop.f32.mrb[132].mxu0 }
 0x618   : > { %v3929_v12 = vpop.f32.mrb[133].mxu0 }
 0x619   : > { %v4227_v12 = vld [vmem:[%s12569_s5 + $0x130] sm:$0xff] }
 0x61b   : > { %v11042_v19 = vpop.f32.mrb[134].mxu0 }
 0x61c   : > { %v3934_v8 = vpop.f32.mrb[135].mxu0 }
 0x61f   : > { %v11044_v57 = vpop.f32.mrb[136].mxu0 }
 0x620   : > { %v3939_v42 = vpop.f32.mrb[137].mxu0 }
 0x623   : > { %v11046_v40 = vpop.f32.mrb[138].mxu0 }
 0x624   : > { %v3944_v43 = vpop.f32.mrb[139].mxu0 }
 0x627   : > { %v3947_v18 = vpop.f32.mrb[140].mxu0 }
 0x628   : > { %v4000_v14 = vmax.f32 %v3902_v46, %v3947_v18  ;;  %v3949_v45 = vpop.f32.mrb[141].mxu0  ;;  %v4242_v46 = vld [vmem:[%s12569_s5 + $0x1a8] sm:$0xff] }
 0x629   : > { %v4246_v45 = vld [vmem:[%s12569_s5 + $0x1c8] sm:$0xff] }
 0x62a   : > { %v4009_v62 = vmax.f32 %v3991_v47, %v4000_v14  ;;  %v4222_v47 = vld [vmem:[%s12569_s5 + $0x108] sm:$0xff]  ;;  %v4228_v14 = vld [vmem:[%s12569_s5 + $0x138] sm:$0xff] }
 0x62b   : > { %v3952_v28 = vpop.f32.mrb[142].mxu0  ;;  %v8110_v21 = vpack.c.bf16 %v4222_v47, %v4221_v37  ;;  %v4231_v47 = vld [vmem:[%s12569_s5 + $0x150] sm:$0xff] }
 0x62c   : > { %4018 = vst [vmem:[#allocation5] sm:$0xff] %v4009_v62  ;;  %v4001_v24 = vmax.f32 %v3907_v38, %v3952_v28  ;;  %v3954_v49 = vpop.f32.mrb[143].mxu0  ;;  %v8114_v38 = vpack.c.bf16 %v4224_v1, %v4223_v33  ;;  %v4229_v28 = vld [vmem:[%s12569_s5 + $0x140] sm:$0xff] }
 0x62e   : > { %v11048_v54 = vmax.f32 %v3992_v31, %v4001_v24 }
 0x62f   : > { %v3957_v35 = vpop.f32.mrb[144].mxu0 }
 0x630   : > { %4019 = vst [vmem:[#allocation5 + $0x8] sm:$0xff] %v11048_v54  ;;  %v4002_v32 = vmax.f32 %v3912_v0, %v3957_v35  ;;  %v3959_v29 = vpop.f32.mrb[145].mxu0 }
 0x631   : > { %v4230_v29 = vld [vmem:[%s12569_s5 + $0x148] sm:$0xff] }
 0x632   : > { %v11051_v48 = vmax.f32 %v3993_v52, %v4002_v32 }
 0x633   : > { %v3962_v51 = vpop.f32.mrb[146].mxu0 }
 0x634   : > { %4020 = vst [vmem:[#allocation5 + $0x10] sm:$0xff] %v11051_v48  ;;  %v4003_v4 = vmax.f32 %v3917_v61, %v3962_v51  ;;  %v3964_v31 = vpop.f32.mrb[147].mxu0  ;;  %v4225_v61 = vld [vmem:[%s12569_s5 + $0x120] sm:$0xff]  ;;  %v4248_v51 = vld [vmem:[%s12569_s5 + $0x1d8] sm:$0xff] }
 0x636   : > { %v11066_v52 = vmax.f32 %v3994_v15, %v4003_v4  ;;  %v4241_v15 = vld [vmem:[%s12569_s5 + $0x1a0] sm:$0xff] }
 0x637   : > { %v4039_v34 = vld [vmem:[#allocation5 + $0x1] sm:$0xff]  ;;  %v3967_v7 = vpop.f32.mrb[148].mxu0  ;;  %v8116_v56 = vpack.c.bf16 %v4242_v46, %v4241_v15  ;;  %v4235_v15 = vld [vmem:[%s12569_s5 + $0x170] sm:$0xff] }
 0x638   : > { %4021 = vst [vmem:[#allocation5 + $0x18] sm:$0xff] %v11066_v52  ;;  %4071 = vst [vmem:[#allocation2 + $0xa8] sm:$0xff] %v11066_v52  ;;  %v4004_v9 = vmax.f32 %v3922_v22, %v3967_v7  ;;  %v3969_v11 = vpop.f32.mrb[149].mxu0  ;;  %4404 = vmatprep.mubr.f32.mxu0 %v4039_v34  ;;  %v4244_v22 = vld [vmem:[%s12569_s5 + $0x1b8] sm:$0xff] }
 0x639   : > { %4405 = vmatmul.mubr.f32.vlgmr.msra.gmra.mrb[158].mxu0 %v4009_v62  ;;  %v4234_v11 = vld [vmem:[%s12569_s5 + $0x168] sm:$0xff] }
 0x63a   : > { %v11085_v6 = vmax.f32 %v3995_v13, %v4004_v9  ;;  %8111 = vmatpush3.bf16.msra.mxu0 %v8110_v21  ;;  %v4243_v13 = vld [vmem:[%s12569_s5 + $0x1b0] sm:$0xff]  ;;  %v4232_v21 = vld [vmem:[%s12569_s5 + $0x158] sm:$0xff] }
 0x63b   : > { %v11087_v63 = vld [vmem:[#allocation5 + $0x9] sm:$0xff]  ;;  %v3972_v0 = vpop.f32.mrb[150].mxu0  ;;  %8113 = vmatprep.subr.bf16.mxu0 %v8112_v2  ;;  %v8120_v18 = vpack.c.bf16 %v4244_v22, %v4243_v13  ;;  %v8130_v2 = vpack.c.bf16 %v4232_v21, %v4231_v47  ;;  %v4259_v47 = vld [vmem:[%s12569_s5 + $0x230] sm:$0xff] }
 0x63c   : > { %4022 = vst [vmem:[#allocation5 + $0x20] sm:$0xff] %v11085_v6  ;;  %4072 = vst [vmem:[#allocation2 + $0xf0] sm:$0xff] %v11085_v6  ;;  %v4005_v16 = vmax.f32 %v11040_v55, %v3972_v0  ;;  %v3974_v23 = vpop.f32.mrb[151].mxu0  ;;  %4409 = vmatprep.mubr.f32.mxu0 %v11087_v63  ;;  %v8118_v55 = vpack.c.bf16 %v4226_v20, %v4225_v61  ;;  %v8136_v0 = vpack.c.bf16 %v4252_v3, %v4251_v58  ;;  %v4270_v61 = vld [vmem:[%s12569_s5 + $0x288] sm:$0xff]  ;;  %v4264_v58 = vld [vmem:[%s12569_s5 + $0x258] sm:$0xff] }
 0x63d   : > { %4107 = vst [vmem:[#allocation2 + $0xc0] sm:$0xff] %v11085_v6  ;;  %4410 = vmatmul.mubr.f32.gmra.mrb[160].mxu0 %v11048_v54  ;;  %v4278_v21 = vld [vmem:[%s12569_s5 + $0x2c8] sm:$0xff]  ;;  %v4281_v3 = vld [vmem:[%s12569_s5 + $0x2e0] sm:$0xff] }
 0x63e   : > { %v11110_v60 = vmax.f32 %v3996_v59, %v4005_v16  ;;  %8115 = vmatpush3.bf16.msra.mxu0 %v8114_v38  ;;  %v4245_v59 = vld [vmem:[%s12569_s5 + $0x1c0] sm:$0xff] }
 0x63f   : > { %v11115_v8 = vld [vmem:[#allocation5 + $0x11] sm:$0xff]  ;;  %v3977_v43 = vpop.f32.mrb[152].mxu0  ;;  %8117 = vmatprep.subr.bf16.mxu0 %v8116_v56  ;;  %v8124_v32 = vpack.c.bf16 %v4246_v45, %v4245_v59  ;;  %v4236_v56 = vld [vmem:[%s12569_s5 + $0x178] sm:$0xff]  ;;  %v4253_v16 = vld [vmem:[%s12569_s5 + $0x200] sm:$0xff] }
 0x640   : > { %v11117_v42 = vld [vmem:[#allocation5 + $0x12] sm:$0xff]  ;;  %4023 = vst [vmem:[#allocation5 + $0x28] sm:$0xff] %v11110_v60  ;;  %4073 = vst [vmem:[#allocation2 + $0x138] sm:$0xff] %v11110_v60  ;;  %v4006_v26 = vmax.f32 %v11042_v19, %v3977_v43  ;;  %v3979_v36 = vpop.f32.mrb[153].mxu0  ;;  %4414 = vmatprep.mubr.f32.mxu0 %v11115_v8  ;;  %v8122_v19 = vpack.c.bf16 %v4228_v14, %v4227_v12  ;;  %v8138_v20 = vpack.c.bf16 %v4236_v56, %v4235_v15  ;;  %v4272_v43 = vld [vmem:[%s12569_s5 + $0x298] sm:$0xff] }
 0x641   : > { %4059 = vst [vmem:[#allocation2 + $0xa0] sm:$0xff] %v11117_v42  ;;  %4108 = vst [vmem:[#allocation2 + $0x108] sm:$0xff] %v11110_v60  ;;  %4415 = vmatmul.mubr.f32.gmra.mrb[162].mxu0 %v11051_v48  ;;  %v4271_v12 = vld [vmem:[%s12569_s5 + $0x290] sm:$0xff]  ;;  %v4256_v36 = vld [vmem:[%s12569_s5 + $0x218] sm:$0xff] }
 0x642   : > { %v11138_v62 = vmax.f32 %v3997_v30, %v4006_v26  ;;  %8119 = vmatpush3.bf16.msra.mxu0 %v8118_v55  ;;  %v4247_v30 = vld [vmem:[%s12569_s5 + $0x1d0] sm:$0xff]  ;;  %v4254_v55 = vld [vmem:[%s12569_s5 + $0x208] sm:$0xff]  ;;  %v8144_v14 = vpack.c.bf16 %v4272_v43, %v4271_v12  ;;  %v4051_v59 = vld [vmem:[#allocation5 + $0x2] sm:$0xff] }
 0x643   : > { %v11143_v24 = vld [vmem:[#allocation5 + $0x19] sm:$0xff]  ;;  %v3982_v35 = vpop.f32.mrb[154].mxu0  ;;  %8121 = vmatprep.subr.bf16.mxu0 %v8120_v18  ;;  %v8128_v50 = vpack.c.bf16 %v4248_v51, %v4247_v30  ;;  %v8142_v18 = vpack.c.bf16 %v4254_v55, %v4253_v16  ;;  %v4273_v45 = vld [vmem:[%s12569_s5 + $0x2a0] sm:$0xff] }
 0x644   : > { %v11145_v49 = vld [vmem:[#allocation5 + $0x1a] sm:$0xff]  ;;  %4083 = vst [vmem:[#allocation2 + $0xb0] sm:$0xff] %v11143_v24  ;;  %4024 = vst [vmem:[#allocation5 + $0x30] sm:$0xff] %v11138_v62  ;;  %v4007_v17 = vmax.f32 %v11044_v57, %v3982_v35  ;;  %v3984_v10 = vpop.f32.mrb[155].mxu0  ;;  %4419 = vmatprep.mubr.f32.mxu0 %v11143_v24  ;;  %v8126_v57 = vpack.c.bf16 %v4230_v29, %v4229_v28  ;;  %v4258_v29 = vld [vmem:[%s12569_s5 + $0x228] sm:$0xff] }
 0x645   : > { %4060 = vst [vmem:[#allocation2 + $0xe8] sm:$0xff] %v11145_v49  ;;  %4095 = vst [vmem:[#allocation2 + $0xb8] sm:$0xff] %v11145_v49  ;;  %4420 = vmatmul.mubr.f32.gmra.mrb[164].mxu0 %v11066_v52  ;;  %v4255_v26 = vld [vmem:[%s12569_s5 + $0x210] sm:$0xff]  ;;  %v4276_v30 = vld [vmem:[%s12569_s5 + $0x2b8] sm:$0xff] }
 0x646   : > { %4109 = vst [vmem:[#allocation2 + $0x150] sm:$0xff] %v11138_v62  ;;  %v11167_v37 = vmax.f32 %v3998_v53, %v4007_v17  ;;  %8123 = vmatpush3.bf16.msra.mxu0 %v8122_v19  ;;  %v4250_v53 = vld [vmem:[%s12569_s5 + $0x1e8] sm:$0xff]  ;;  %v8146_v28 = vpack.c.bf16 %v4256_v36, %v4255_v26  ;;  %v4275_v10 = vld [vmem:[%s12569_s5 + $0x2b0] sm:$0xff]  ;;  %v4265_v56 = vld [vmem:[%s12569_s5 + $0x260] sm:$0xff] }
 0x647   : > { %v11172_v4 = vld [vmem:[#allocation5 + $0x21] sm:$0xff]  ;;  %v3987_v25 = vpop.f32.mrb[156].mxu0  ;;  %8125 = vmatprep.subr.bf16.mxu0 %v8124_v32  ;;  %v8132_v9 = vpack.c.bf16 %v4250_v53, %v4249_v41  ;;  %v4274_v19 = vld [vmem:[%s12569_s5 + $0x2a8] sm:$0xff]  ;;  %v4267_v55 = vld [vmem:[%s12569_s5 + $0x270] sm:$0xff] }
 0x648   : > { %v11174_v31 = vld [vmem:[#allocation5 + $0x22] sm:$0xff]  ;;  %4084 = vst [vmem:[#allocation2 + $0xf8] sm:$0xff] %v11172_v4  ;;  %4119 = vst [vmem:[#allocation2 + $0xc8] sm:$0xff] %v11172_v4  ;;  %v4008_v5 = vmax.f32 %v11046_v40, %v3987_v25  ;;  %4424 = vmatprep.mubr.f32.mxu0 %v11172_v4  ;;  %v3989_v34 = vpop.f32.mrb[157].mxu0  ;;  %v8148_v35 = vpack.c.bf16 %v4274_v19, %v4273_v45  ;;  %v4052_v17 = vld [vmem:[#allocation5 + $0xa] sm:$0xff] }
 0x649   : > { %4061 = vst [vmem:[#allocation2 + $0x130] sm:$0xff] %v11174_v31  ;;  %4096 = vst [vmem:[#allocation2 + $0x100] sm:$0xff] %v11174_v31  ;;  %4425 = vmatmul.mubr.f32.gmra.mrb[166].mxu0 %v11085_v6  ;;  %v4233_v40 = vld [vmem:[%s12569_s5 + $0x160] sm:$0xff]  ;;  %v4260_v25 = vld [vmem:[%s12569_s5 + $0x238] sm:$0xff] }
 0x64a   : > { %4131 = vst [vmem:[#allocation2 + $0xd0] sm:$0xff] %v11174_v31  ;;  %4025 = vst [vmem:[#allocation5 + $0x38] sm:$0xff] %v11167_v37  ;;  %v4017_v7 = vmax.f32 %v3999_v27, %v4008_v5  ;;  %8127 = vmatpush3.bf16.msra.mxu0 %v8126_v57  ;;  %v8134_v27 = vpack.c.bf16 %v4234_v11, %v4233_v40  ;;  %v4257_v32 = vld [vmem:[%s12569_s5 + $0x220] sm:$0xff]  ;;  %v8152_v57 = vpack.c.bf16 %v4276_v30, %v4275_v10  ;;  %v4262_v34 = vld [vmem:[%s12569_s5 + $0x248] sm:$0xff] }
 0x64b   : > { %4110 = vst [vmem:[#allocation2 + $0x198] sm:$0xff] %v11167_v37  ;;  %v11201_v33 = vld [vmem:[#allocation5 + $0x29] sm:$0xff]  ;;  %8129 = vmatprep.subr.bf16.mxu0 %v8128_v50  ;;  %v8150_v51 = vpack.c.bf16 %v4258_v29, %v4257_v32  ;;  %v8154_v5 = vpack.c.bf16 %v4260_v25, %v4259_v47  ;;  %v4263_v11 = vld [vmem:[%s12569_s5 + $0x250] sm:$0xff]  ;;  %v4268_v12 = vld [vmem:[%s12569_s5 + $0x278] sm:$0xff] }
 0x64c   : > { %v11203_v1 = vld [vmem:[#allocation5 + $0x2a] sm:$0xff]  ;;  %4085 = vst [vmem:[#allocation2 + $0x140] sm:$0xff] %v11201_v33  ;;  %4120 = vst [vmem:[#allocation2 + $0x110] sm:$0xff] %v11201_v33  ;;  %4429 = vmatprep.mubr.f32.mxu0 %v11201_v33  ;;  %v8162_v15 = vpack.c.bf16 %v4264_v58, %v4263_v11  ;;  %v4303_v45 = vld [vmem:[%s12569_s5 + $0x390] sm:$0xff] }
 0x64d   : > { %4062 = vst [vmem:[#allocation2 + $0x178] sm:$0xff] %v11203_v1  ;;  %4097 = vst [vmem:[#allocation2 + $0x148] sm:$0xff] %v11203_v1  ;;  %4430 = vmatmul.mubr.f32.gmra.mrb[168].mxu0 %v11110_v60  ;;  %v4277_v50 = vld [vmem:[%s12569_s5 + $0x2c0] sm:$0xff]  ;;  %v4304_v19 = vld [vmem:[%s12569_s5 + $0x398] sm:$0xff] }
 0x64e   : > { %4132 = vst [vmem:[#allocation2 + $0x118] sm:$0xff] %v11203_v1  ;;  %4026 = vst [vmem:[#allocation5 + $0x40] sm:$0xff] %v4017_v7  ;;  %8131 = vmatpush3.bf16.msra.mxu0 %v8130_v2  ;;  %4499 = vmatprep.mubr.f32.mxu0 %v11048_v54  ;;  %v4269_v54 = vld [vmem:[%s12569_s5 + $0x280] sm:$0xff]  ;;  %v8156_v41 = vpack.c.bf16 %v4278_v21, %v4277_v50  ;;  %v4279_v7 = vld [vmem:[%s12569_s5 + $0x2d0] sm:$0xff] }
 0x64f   : > { %8133 = vmatprep.subr.bf16.mxu0 %v8132_v9  ;;  %v8140_v22 = vpack.c.bf16 %v4270_v61, %v4269_v54  ;;  %v4261_v53 = vld [vmem:[%s12569_s5 + $0x240] sm:$0xff]  ;;  %v4280_v2 = vld [vmem:[%s12569_s5 + $0x2d8] sm:$0xff]  ;;  %v4266_v54 = vld [vmem:[%s12569_s5 + $0x268] sm:$0xff] }
 0x650   : > { %v8158_v40 = vpack.c.bf16 %v4262_v34, %v4261_v53  ;;  %v8160_v9 = vpack.c.bf16 %v4280_v2, %v4279_v7  ;;  %v4283_v61 = vld [vmem:[%s12569_s5 + $0x2f0] sm:$0xff]  ;;  %v8166_v16 = vpack.c.bf16 %v4266_v54, %v4265_v56  ;;  %v4301_v43 = vld [vmem:[%s12569_s5 + $0x380] sm:$0xff]  ;;  %v4288_v29 = vld [vmem:[%s12569_s5 + $0x318] sm:$0xff] }
 0x651   : > { %v11225_v46 = vld [vmem:[#allocation5 + $0x31] sm:$0xff]  ;;  %v4285_v36 = vld [vmem:[%s12569_s5 + $0x300] sm:$0xff]  ;;  %v4312_v58 = vld [vmem:[%s12569_s5 + $0x3d8] sm:$0xff] }
 0x652   : > { %v11227_v38 = vld [vmem:[#allocation5 + $0x32] sm:$0xff]  ;;  %4086 = vst [vmem:[#allocation2 + $0x188] sm:$0xff] %v11225_v46  ;;  %4121 = vst [vmem:[#allocation2 + $0x158] sm:$0xff] %v11225_v46  ;;  %8135 = vmatpush3.bf16.msra.mxu0 %v8134_v27  ;;  %v4309_v53 = vld [vmem:[%s12569_s5 + $0x3c0] sm:$0xff] }
 0x653   : > { %4098 = vst [vmem:[#allocation2 + $0x190] sm:$0xff] %v11227_v38  ;;  %4133 = vst [vmem:[#allocation2 + $0x160] sm:$0xff] %v11227_v38  ;;  %8137 = vmatprep.subr.bf16.mxu0 %v8136_v0  ;;  %v4282_v27 = vld [vmem:[%s12569_s5 + $0x2e8] sm:$0xff]  ;;  %v4287_v32 = vld [vmem:[%s12569_s5 + $0x310] sm:$0xff] }
 0x654   : > { %v8164_v0 = vpack.c.bf16 %v4282_v27, %v4281_v3  ;;  %v4306_v10 = vld [vmem:[%s12569_s5 + $0x3a8] sm:$0xff]  ;;  %v8178_v30 = vpack.c.bf16 %v4288_v29, %v4287_v32  ;;  %v4307_v25 = vld [vmem:[%s12569_s5 + $0x3b0] sm:$0xff]  ;;  %v4313_v56 = vld [vmem:[%s12569_s5 + $0x3e0] sm:$0xff] }
 0x655   : > { %v11245_v23 = vld [vmem:[#allocation5 + $0x39] sm:$0xff]  ;;  %v4290_v47 = vld [vmem:[%s12569_s5 + $0x328] sm:$0xff]  ;;  %v4321_v32 = vld [vmem:[%s12569_s5 + $0x420] sm:$0xff] }
 0x656   : > { %v11247_v13 = vld [vmem:[#allocation5 + $0x3a] sm:$0xff]  ;;  %4122 = vst [vmem:[#allocation2 + $0x1a0] sm:$0xff] %v11245_v23  ;;  %8139 = vmatpush3.bf16.msra.mxu0 %v8138_v20  ;;  %v4310_v34 = vld [vmem:[%s12569_s5 + $0x3c8] sm:$0xff] }
 0x657   : > { %4134 = vst [vmem:[#allocation2 + $0x1a8] sm:$0xff] %v11247_v13  ;;  %8141 = vmatprep.subr.bf16.mxu0 %v8140_v22  ;;  %v4284_v20 = vld [vmem:[%s12569_s5 + $0x2f8] sm:$0xff]  ;;  %v8188_v2 = vpack.c.bf16 %v4310_v34, %v4309_v53  ;;  %v4311_v11 = vld [vmem:[%s12569_s5 + $0x3d0] sm:$0xff]  ;;  %v4314_v54 = vld [vmem:[%s12569_s5 + $0x3e8] sm:$0xff] }
 0x658   : > { %v8168_v22 = vpack.c.bf16 %v4284_v20, %v4283_v61  ;;  %v8192_v27 = vpack.c.bf16 %v4312_v58, %v4311_v11  ;;  %v8196_v20 = vpack.c.bf16 %v4314_v54, %v4313_v56  ;;  %v4322_v29 = vld [vmem:[%s12569_s5 + $0x428] sm:$0xff]  ;;  %v6384_v11 = vld [vmem:[%s12570_s6] ss:$0 sm:$0xff] }
 0x659   : > { %4500 = vmatmul.mubr.f32.vlgmr.msra.gmra.mrb[170].mxu0 %v4051_v59  ;;  %v4286_v59 = vld [vmem:[%s12569_s5 + $0x308] sm:$0xff] }
 0x65a   : > { %4504 = vmatprep.mubr.f32.mxu0 %v11051_v48  ;;  %8143 = vmatpush3.bf16.msra.mxu0 %v8142_v18  ;;  %v4302_v18 = vld [vmem:[%s12569_s5 + $0x388] sm:$0xff] }
 0x65b   : > { %8145 = vmatprep.subr.bf16.mxu0 %v8144_v14  ;;  %v8170_v14 = vpack.c.bf16 %v4268_v12, %v4267_v55  ;;  %v8172_v26 = vpack.c.bf16 %v4302_v18, %v4301_v43  ;;  %v4315_v55 = vld [vmem:[%s12569_s5 + $0x3f0] sm:$0xff]  ;;  %v4316_v12 = vld [vmem:[%s12569_s5 + $0x3f8] sm:$0xff] }
 0x65c   : > { %v8200_v18 = vpack.c.bf16 %v4316_v12, %v4315_v55 }
 0x65d   : > { %4505 = vmatmul.mubr.f32.gmra.mrb[172].mxu0 %v4052_v17 }
 0x65e   : > { %4509 = vmatprep.mubr.f32.mxu0 %v11066_v52  ;;  %8147 = vmatpush3.bf16.msra.mxu0 %v8146_v28  ;;  %v8174_v28 = vpack.c.bf16 %v4286_v59, %v4285_v36  ;;  %v4317_v36 = vld [vmem:[%s12569_s5 + $0x400] sm:$0xff]  ;;  %v4318_v59 = vld [vmem:[%s12569_s5 + $0x408] sm:$0xff] }
 0x65f   : > { %8149 = vmatprep.subr.bf16.mxu0 %v8148_v35  ;;  %v8176_v35 = vpack.c.bf16 %v4304_v19, %v4303_v45  ;;  %v8204_v45 = vpack.c.bf16 %v4318_v59, %v4317_v36  ;;  %v4319_v19 = vld [vmem:[%s12569_s5 + $0x410] sm:$0xff] }
 0x661   : > { %4510 = vmatmul.mubr.f32.gmra.mrb[174].mxu0 %v11117_v42 }
 0x662   : > { %4514 = vmatprep.mubr.f32.mxu0 %v11085_v6  ;;  %8151 = vmatpush3.bf16.msra.mxu0 %v8150_v51 }
 0x663   : > { %8153 = vmatprep.subr.bf16.mxu0 %v8152_v57  ;;  %v4289_v57 = vld [vmem:[%s12569_s5 + $0x320] sm:$0xff] }
 0x664   : > { %v8182_v50 = vpack.c.bf16 %v4290_v47, %v4289_v57  ;;  %v4328_v57 = vld [vmem:[%s12569_s5 + $0x458] sm:$0xff]  ;;  %v4330_v47 = vld [vmem:[%s12569_s5 + $0x468] sm:$0xff] }
 0x665   : > { %4515 = vmatmul.mubr.f32.gmra.mrb[176].mxu0 %v11145_v49 }
 0x666   : > { %4519 = vmatprep.mubr.f32.mxu0 %v11110_v60  ;;  %8155 = vmatpush3.bf16.msra.mxu0 %v8154_v5  ;;  %v4291_v5 = vld [vmem:[%s12569_s5 + $0x330] sm:$0xff] }
 0x667   : > { %8157 = vmatprep.subr.bf16.mxu0 %v8156_v41  ;;  %v4292_v41 = vld [vmem:[%s12569_s5 + $0x338] sm:$0xff] }
 0x668   : > { %v8186_v7 = vpack.c.bf16 %v4292_v41, %v4291_v5 }
 0x669   : > { %4520 = vmatmul.mubr.f32.gmra.mrb[178].mxu0 %v11174_v31 }
 0x66a   : > { %4524 = vmatprep.mubr.f32.mxu0 %v11138_v62  ;;  %8159 = vmatpush3.bf16.msra.mxu0 %v8158_v40  ;;  %v4293_v40 = vld [vmem:[%s12569_s5 + $0x340] sm:$0xff] }
 0x66b   : > { %8161 = vmatprep.subr.bf16.mxu0 %v8160_v9  ;;  %v4294_v9 = vld [vmem:[%s12569_s5 + $0x348] sm:$0xff] }
 0x66c   : > { %v8190_v3 = vpack.c.bf16 %v4294_v9, %v4293_v40 }
 0x66d   : > { %4525 = vmatmul.mubr.f32.gmra.mrb[180].mxu0 %v11203_v1 }
 0x66e   : > { %8163 = vmatpush3.bf16.msra.mxu0 %v8162_v15  ;;  %4594 = vmatprep.mubr.f32.mxu0 %v4052_v17  ;;  %v4305_v17 = vld [vmem:[%s12569_s5 + $0x3a0] sm:$0xff]  ;;  %v4295_v15 = vld [vmem:[%s12569_s5 + $0x350] sm:$0xff] }
 0x66f   : > { %8165 = vmatprep.subr.bf16.mxu0 %v8164_v0  ;;  %v8180_v51 = vpack.c.bf16 %v4306_v10, %v4305_v17  ;;  %v4296_v0 = vld [vmem:[%s12569_s5 + $0x358] sm:$0xff]  ;;  %v8212_v17 = vpack.c.bf16 %v4322_v29, %v4321_v32  ;;  %v4323_v10 = vld [vmem:[%s12569_s5 + $0x430] sm:$0xff] }
 0x670   : > { %v8194_v61 = vpack.c.bf16 %v4296_v0, %v4295_v15 }
 0x672   : > { %8167 = vmatpush3.bf16.msra.mxu0 %v8166_v16  ;;  %v4297_v16 = vld [vmem:[%s12569_s5 + $0x360] sm:$0xff] }
 0x673   : > { %8169 = vmatprep.subr.bf16.mxu0 %v8168_v22  ;;  %v4298_v22 = vld [vmem:[%s12569_s5 + $0x368] sm:$0xff] }
 0x674   : > { %v8198_v43 = vpack.c.bf16 %v4298_v22, %v4297_v16 }
 0x676   : > { %8171 = vmatpush3.bf16.msra.mxu0 %v8170_v14  ;;  %v4299_v14 = vld [vmem:[%s12569_s5 + $0x370] sm:$0xff] }
 0x677   : > { %8173 = vmatprep.subr.bf16.mxu0 %v8172_v26  ;;  %v4300_v26 = vld [vmem:[%s12569_s5 + $0x378] sm:$0xff] }
 0x679   : > { %4595 = vmatmul.mubr.f32.vlgmr.msra.gmra.mrb[182].mxu0 %v11087_v63  ;;  %v4308_v63 = vld [vmem:[%s12569_s5 + $0x3b8] sm:$0xff] }
 0x67a   : > { %4599 = vmatprep.mubr.f32.mxu0 %v11117_v42  ;;  %8175 = vmatpush3.bf16.msra.mxu0 %v8174_v28  ;;  %v8184_v21 = vpack.c.bf16 %v4308_v63, %v4307_v25  ;;  %v4320_v28 = vld [vmem:[%s12569_s5 + $0x418] sm:$0xff] }
 0x67b   : > { %8177 = vmatprep.subr.bf16.mxu0 %v8176_v35  ;;  %v8208_v35 = vpack.c.bf16 %v4320_v28, %v4319_v19  ;;  %v4332_v25 = vld [vmem:[%s12569_s5 + $0x478] sm:$0xff] }
 0x67d   : > { %4600 = vmatmul.mubr.f32.gmra.mrb[184].mxu0 %v11115_v8 }
 0x67e   : > { %4604 = vmatprep.mubr.f32.mxu0 %v11145_v49  ;;  %8179 = vmatpush3.bf16.msra.mxu0 %v8178_v30  ;;  %v4324_v30 = vld [vmem:[%s12569_s5 + $0x438] sm:$0xff] }
 0x67f   : > { %8181 = vmatprep.subr.bf16.mxu0 %v8180_v51  ;;  %v4326_v51 = vld [vmem:[%s12569_s5 + $0x448] sm:$0xff] }
 0x681   : > { %4605 = vmatmul.mubr.f32.gmra.mrb[186].mxu0 %v11143_v24 }
 0x682   : > { %4609 = vmatprep.mubr.f32.mxu0 %v11174_v31  ;;  %8183 = vmatpush3.bf16.msra.mxu0 %v8182_v50 }
 0x683   : > { %8185 = vmatprep.subr.bf16.mxu0 %v8184_v21 }
 0x685   : > { %4610 = vmatmul.mubr.f32.gmra.mrb[188].mxu0 %v11172_v4 }
 0x686   : > { %4614 = vmatprep.mubr.f32.mxu0 %v11203_v1  ;;  %8187 = vmatpush3.bf16.msra.mxu0 %v8186_v7 }
 0x687   : > { %8189 = vmatprep.subr.bf16.mxu0 %v8188_v2 }
 0x689   : > { %4615 = vmatmul.mubr.f32.gmra.mrb[190].mxu0 %v11201_v33 }
 0x68a   : > { %4619 = vmatprep.mubr.f32.mxu0 %v11227_v38  ;;  %8191 = vmatpush3.bf16.msra.mxu0 %v8190_v3 }
 0x68b   : > { %8193 = vmatprep.subr.bf16.mxu0 %v8192_v27 }
 0x68d   : > { %4620 = vmatmul.mubr.f32.gmra.mrb[192].mxu0 %v11225_v46 }
 0x68e   : > { %8195 = vmatpush3.bf16.msra.mxu0 %v8194_v61  ;;  %4689 = vmatprep.mubr.f32.mxu0 %v11115_v8  ;;  %v8202_v8 = vpack.c.bf16 %v4300_v26, %v4299_v14 }
 0x68f   : > { %8197 = vmatprep.subr.bf16.mxu0 %v8196_v20 }
 0x692   : > { %8199 = vmatpush3.bf16.msra.mxu0 %v8198_v43 }
 0x693   : > { %8201 = vmatprep.subr.bf16.mxu0 %v8200_v18 }
 0x696   : > { %8203 = vmatpush3.bf16.msra.mxu0 %v8202_v8 }
 0x697   : > { %8205 = vmatprep.subr.bf16.mxu0 %v8204_v45 }
 0x699   : > { %4690 = vmatmul.mubr.f32.vlgmr.msra.gmra.mrb[194].mxu0 %v11051_v48  ;;  %v8216_v48 = vpack.c.bf16 %v4324_v30, %v4323_v10 }
 0x69a   : > { %4694 = vmatprep.mubr.f32.mxu0 %v11143_v24  ;;  %8207 = vmatpush3.bf16.msra.mxu0 %v8204_v45  ;;  %v4325_v24 = vld [vmem:[%s12569_s5 + $0x440] sm:$0xff] }
 0x69b   : > { %8209 = vmatprep.subr.bf16.mxu0 %v8208_v35 }
 0x69d   : > { %4695 = vmatmul.mubr.f32.gmra.mrb[196].mxu0 %v11066_v52  ;;  %v8220_v52 = vpack.c.bf16 %v4326_v51, %v4325_v24 }
 0x69e   : > { %4699 = vmatprep.mubr.f32.mxu0 %v11172_v4  ;;  %8211 = vmatpush3.bf16.msra.mxu0 %v8208_v35  ;;  %v4327_v4 = vld [vmem:[%s12569_s5 + $0x450] sm:$0xff] }
 0x69f   : > { %8213 = vmatprep.subr.bf16.mxu0 %v8212_v17 }
 0x6a1   : > { %4700 = vmatmul.mubr.f32.gmra.mrb[198].mxu0 %v11085_v6  ;;  %v8224_v6 = vpack.c.bf16 %v4328_v57, %v4327_v4 }
 0x6a2   : > { %4704 = vmatprep.mubr.f32.mxu0 %v11201_v33  ;;  %8215 = vmatpush3.bf16.msra.mxu0 %v8212_v17  ;;  %v4329_v33 = vld [vmem:[%s12569_s5 + $0x460] sm:$0xff] }
 0x6a3   : > { %8217 = vmatprep.subr.bf16.mxu0 %v8216_v48 }
 0x6a5   : > { %4705 = vmatmul.mubr.f32.gmra.mrb[200].mxu0 %v11110_v60  ;;  %v8228_v60 = vpack.c.bf16 %v4330_v47, %v4329_v33 }
 0x6a6   : > { %4709 = vmatprep.mubr.f32.mxu0 %v11225_v46  ;;  %8219 = vmatpush3.bf16.msra.mxu0 %v8216_v48  ;;  %v4331_v46 = vld [vmem:[%s12569_s5 + $0x470] sm:$0xff] }
 0x6a7   : > { %8221 = vmatprep.subr.bf16.mxu0 %v8220_v52 }
 0x6a9   : > { %4710 = vmatmul.mubr.f32.gmra.mrb[202].mxu0 %v11138_v62  ;;  %v8232_v62 = vpack.c.bf16 %v4332_v25, %v4331_v46 }
 0x6aa   : > { %4714 = vmatprep.mubr.f32.mxu0 %v11245_v23  ;;  %8223 = vmatpush3.bf16.msra.mxu0 %v8220_v52 }
 0x6ab   : > { %8225 = vmatprep.subr.bf16.mxu0 %v8224_v6 }
 0x6ad   : > { %4715 = vmatmul.mubr.f32.gmra.mrb[204].mxu0 %v11167_v37 }
 0x6ae   : > { %8227 = vmatpush3.bf16.msra.mxu0 %v8224_v6  ;;  %7518 = vmatprep.mubr.f32.mxu0 %v11117_v42 }
 0x6af   : > { %8229 = vmatprep.subr.bf16.mxu0 %v8228_v60 }
 0x6b2   : > { %8231 = vmatpush3.bf16.msra.mxu0 %v8228_v60 }
 0x6b3   : > { %8233 = vmatprep.subr.bf16.mxu0 %v8232_v62 }
 0x6b6   : > { %8235 = vmatpush3.bf16.msra.mxu0 %v8232_v62 }
 0x6b9   : > { %7519 = vmatmul.mubr.f32.vlgmr.msra.gmra.mrb[206].mxu0 %v11145_v49 }
 0x6ba   : > { %7521 = vmatprep.mubr.f32.mxu0 %v11174_v31 }
 0x6bd   : > { %7522 = vmatmul.mubr.f32.gmra.mrb[208].mxu0 %v11203_v1  ;;  %v4839_v1 = vld [vmem:[%s12577_s13] sm:$0xff] }
 0x6be   : > { %7524 = vmatprep.mubr.f32.mxu0 %v11227_v38 }
 0x6c1   : > { %7525 = vmatmul.mubr.f32.gmra.mrb[210].mxu0 %v11247_v13 }
 0x6c2   : > { %7539 = vmatprep.mubr.msk.f32.mxu0 %vm4853_vm13, %v4839_v1 }
 0x70c   : > { %v6610_v23 = vpop.f32.mrb[158].mxu0 }
 0x70d   : > { %v6611_v37 = vpop.f32.mrb[159].mxu0 }
 0x70e   : > { %v6612_v63 = vadd.f32 %v6611_v37, %v6610_v23 }
 0x710   : > { %v6613_v50 = vpop.f32.mrb[160].mxu0  ;;  %v4407_v27 = vadd.f32 %v6612_v63, %v6384_v11 }
 0x711   : > { %v6614_v42 = vpop.f32.mrb[161].mxu0 }
 0x712   : > { %v6615_v21 = vadd.f32 %v6614_v42, %v6613_v50 }
 0x714   : > { %v6616_v5 = vpop.f32.mrb[162].mxu0  ;;  %v4412_v61 = vadd.f32 %v6615_v21, %v6384_v11 }
 0x715   : > { %v6617_v41 = vpop.f32.mrb[163].mxu0 }
 0x716   : > { %v6618_v53 = vadd.f32 %v6617_v41, %v6616_v5 }
 0x718   : > { %v6619_v34 = vpop.f32.mrb[164].mxu0  ;;  %v4417_v12 = vadd.f32 %v6618_v53, %v6384_v11 }
 0x719   : > { %v6620_v7 = vpop.f32.mrb[165].mxu0 }
 0x71a   : > { %v6621_v49 = vadd.f32 %v6620_v7, %v6619_v34 }
 0x71c   : > { %v6622_v2 = vpop.f32.mrb[166].mxu0  ;;  %v4422_v36 = vadd.f32 %v6621_v49, %v6384_v11 }
 0x71d   : > { %v6623_v31 = vpop.f32.mrb[167].mxu0 }
 0x71e   : > { %v6624_v40 = vadd.f32 %v6623_v31, %v6622_v2 }
 0x720   : > { %v6625_v38 = vpop.f32.mrb[168].mxu0  ;;  %v4427_v28 = vadd.f32 %v6624_v40, %v6384_v11 }
 0x721   : > { %v6626_v13 = vpop.f32.mrb[169].mxu0 }
 0x722   : > { %v6627_v9 = vadd.f32 %v6626_v13, %v6625_v38 }
 0x724   : > { %v4432_v10 = vadd.f32 %v6627_v9, %v6384_v11 }
 0x72c   : > { %v6660_v58 = vpop.f32.mrb[170].mxu0 }
 0x72d   : > { %v6661_v3 = vpop.f32.mrb[171].mxu0 }
 0x72e   : > { %v6662_v15 = vadd.f32 %v6661_v3, %v6660_v58 }
 0x730   : > { %v4502_v0 = vadd.f32 %v6662_v15, %v4407_v27  ;;  %v6663_v56 = vpop.f32.mrb[172].mxu0 }
 0x731   : > { %v6664_v54 = vpop.f32.mrb[173].mxu0 }
 0x732   : > { %v6665_v20 = vadd.f32 %v6664_v54, %v6663_v56 }
 0x734   : > { %v4507_v16 = vadd.f32 %v6665_v20, %v4412_v61  ;;  %v6666_v22 = vpop.f32.mrb[174].mxu0 }
 0x735   : > { %v6667_v55 = vpop.f32.mrb[175].mxu0 }
 0x736   : > { %v6668_v43 = vadd.f32 %v6667_v55, %v6666_v22 }
 0x738   : > { %v4512_v18 = vadd.f32 %v6668_v43, %v4417_v12  ;;  %v6669_v14 = vpop.f32.mrb[176].mxu0 }
 0x739   : > { %v6670_v26 = vpop.f32.mrb[177].mxu0 }
 0x73a   : > { %v6671_v59 = vadd.f32 %v6670_v26, %v6669_v14 }
 0x73c   : > { %v4517_v8 = vadd.f32 %v6671_v59, %v4422_v36  ;;  %v6672_v45 = vpop.f32.mrb[178].mxu0 }
 0x73d   : > { %v6673_v19 = vpop.f32.mrb[179].mxu0 }
 0x73e   : > { %v6674_v35 = vadd.f32 %v6673_v19, %v6672_v45 }
 0x740   : > { %v4522_v32 = vadd.f32 %v6674_v35, %v4427_v28  ;;  %v6675_v29 = vpop.f32.mrb[180].mxu0 }
 0x741   : > { %v6676_v17 = vpop.f32.mrb[181].mxu0 }
 0x742   : > { %v6677_v30 = vadd.f32 %v6676_v17, %v6675_v29 }
 0x744   : > { %v4527_v48 = vadd.f32 %v6677_v30, %v4432_v10 }
 0x74c   : > { %v6710_v24 = vpop.f32.mrb[182].mxu0 }
 0x74d   : > { %v6711_v51 = vpop.f32.mrb[183].mxu0 }
 0x74e   : > { %v6712_v52 = vadd.f32 %v6711_v51, %v6710_v24 }
 0x750   : > { %v4597_v4 = vadd.f32 %v6712_v52, %v4502_v0  ;;  %v6713_v57 = vpop.f32.mrb[184].mxu0 }
 0x751   : > { %v6714_v6 = vpop.f32.mrb[185].mxu0 }
 0x752   : > { %v6715_v33 = vadd.f32 %v6714_v6, %v6713_v57 }
 0x754   : > { %v4602_v47 = vadd.f32 %v6715_v33, %v4507_v16  ;;  %v6716_v60 = vpop.f32.mrb[186].mxu0 }
 0x755   : > { %v6717_v46 = vpop.f32.mrb[187].mxu0 }
 0x756   : > { %v6718_v25 = vadd.f32 %v6717_v46, %v6716_v60 }
 0x758   : > { %v4607_v62 = vadd.f32 %v6718_v25, %v4512_v18  ;;  %v6719_v23 = vpop.f32.mrb[188].mxu0 }
 0x759   : > { %v6720_v37 = vpop.f32.mrb[189].mxu0 }
 0x75a   : > { %v6721_v63 = vadd.f32 %v6720_v37, %v6719_v23  ;;  %v4840_v37 = vld [vmem:[%s12577_s13 + $0x8] sm:$0xff] }
 0x75c   : > { %v4612_v50 = vadd.f32 %v6721_v63, %v4517_v8  ;;  %v6722_v42 = vpop.f32.mrb[190].mxu0  ;;  %v4841_v63 = vld [vmem:[%s12577_s13 + $0x10] sm:$0xff] }
 0x75d   : > { %v6723_v21 = vpop.f32.mrb[191].mxu0 }
 0x75e   : > { %v6724_v5 = vadd.f32 %v6723_v21, %v6722_v42  ;;  %v4843_v42 = vld [vmem:[%s12577_s13 + $0x20] sm:$0xff]  ;;  %v4844_v21 = vld [vmem:[%s12577_s13 + $0x28] sm:$0xff] }
 0x760   : > { %v4617_v41 = vadd.f32 %v6724_v5, %v4522_v32  ;;  %v6725_v53 = vpop.f32.mrb[192].mxu0  ;;  %v4845_v5 = vld [vmem:[%s12577_s13 + $0x30] sm:$0xff] }
 0x761   : > { %v6726_v34 = vpop.f32.mrb[193].mxu0 }
 0x762   : > { %v6727_v7 = vadd.f32 %v6726_v34, %v6725_v53  ;;  %v4983_v53 = vld [vmem:[%s12577_s13 + $0x40] sm:$0xff]  ;;  %v4984_v34 = vld [vmem:[%s12577_s13 + $0x48] sm:$0xff] }
 0x764   : > { %v4622_v49 = vadd.f32 %v6727_v7, %v4527_v48  ;;  %v4985_v7 = vld [vmem:[%s12577_s13 + $0x50] sm:$0xff] }
 0x76c   : > { %v6760_v2 = vpop.f32.mrb[194].mxu0 }
 0x76d   : > { %v6761_v31 = vpop.f32.mrb[195].mxu0 }
 0x76e   : > { %v6762_v40 = vadd.f32 %v6761_v31, %v6760_v2  ;;  %v4987_v2 = vld [vmem:[%s12577_s13 + $0x60] sm:$0xff]  ;;  %v4988_v31 = vld [vmem:[%s12577_s13 + $0x68] sm:$0xff] }
 0x770   : > { %v6763_v1 = vpop.f32.mrb[196].mxu0  ;;  %v4692_v38 = vadd.f32 %v6762_v40, %v4597_v4  ;;  %v4989_v40 = vld [vmem:[%s12577_s13 + $0x70] sm:$0xff] }
 0x771   : > { %v6764_v13 = vpop.f32.mrb[197].mxu0 }
 0x772   : > { %v6765_v9 = vadd.f32 %v6764_v13, %v6763_v1  ;;  %v4990_v1 = vld [vmem:[%s12577_s13 + $0x78] sm:$0xff]  ;;  %v5239_v13 = vld [vmem:[%s12571_s7 + $0x188] sm:$0xff] }
 0x774   : > { %v6766_v11 = vpop.f32.mrb[198].mxu0  ;;  %v4697_v58 = vadd.f32 %v6765_v9, %v4602_v47 }
 0x775   : > { %v6767_v3 = vpop.f32.mrb[199].mxu0 }
 0x776   : > { %v6768_v27 = vadd.f32 %v6767_v3, %v6766_v11  ;;  %v5206_v11 = vld [vmem:[%s12571_s7 + $0x80] sm:$0xff] }
 0x777   : > { %v5222_v3 = vld [vmem:[%s12571_s7 + $0x100] sm:$0xff] }
 0x778   : > { %v6769_v15 = vpop.f32.mrb[200].mxu0  ;;  %v4702_v0 = vadd.f32 %v6768_v27, %v4607_v62 }
 0x779   : > { %v6770_v56 = vpop.f32.mrb[201].mxu0 }
 0x77a   : > { %v6771_v54 = vadd.f32 %v6770_v56, %v6769_v15  ;;  %v5223_v15 = vld [vmem:[%s12571_s7 + $0x108] sm:$0xff] }
 0x77b   : > { %v5191_v56 = vld [vmem:[%s12571_s7 + $0x8] sm:$0xff] }
 0x77c   : > { %v6772_v61 = vpop.f32.mrb[202].mxu0  ;;  %v4707_v20 = vadd.f32 %v6771_v54, %v4612_v50  ;;  %v4842_v50 = vld [vmem:[%s12577_s13 + $0x18] sm:$0xff]  ;;  %v8294_v54 = vpack.c.bf16 %v5223_v15, %v5222_v3 }
 0x77d   : > { %v6773_v16 = vpop.f32.mrb[203].mxu0  ;;  %v5201_v3 = vld [vmem:[%s12571_s7 + $0x58] sm:$0xff] }
 0x77e   : > { %v6774_v22 = vadd.f32 %v6773_v16, %v6772_v61  ;;  %v5209_v16 = vld [vmem:[%s12571_s7 + $0x98] sm:$0xff] }
 0x780   : > { %v6775_v55 = vpop.f32.mrb[204].mxu0  ;;  %v4712_v12 = vadd.f32 %v6774_v22, %v4617_v41  ;;  %v4846_v41 = vld [vmem:[%s12577_s13 + $0x38] sm:$0xff]  ;;  %v5240_v22 = vld [vmem:[%s12571_s7 + $0x190] sm:$0xff] }
 0x781   : > { %v6776_v43 = vpop.f32.mrb[205].mxu0 }
 0x782   : > { %v6777_v18 = vadd.f32 %v6776_v43, %v6775_v55  ;;  %v5192_v43 = vld [vmem:[%s12571_s7 + $0x10] sm:$0xff] }
 0x784   : > { %v4717_v14 = vadd.f32 %v6777_v18, %v4622_v49  ;;  %v4986_v49 = vld [vmem:[%s12577_s13 + $0x58] sm:$0xff] }
 0x785   : > { %v5193_v18 = vld [vmem:[%s12571_s7 + $0x18] sm:$0xff] }
 0x78c   : > { %v7520_v26 = vpop.f32.mrb[206].mxu0 }
 0x78d   : > { %v4792_v36 = vadd.f32 %v7520_v26, %v4697_v58  ;;  %v4786_v59 = vpop.f32.mrb[207].mxu0  ;;  %v5207_v58 = vld [vmem:[%s12571_s7 + $0x88] sm:$0xff]  ;;  %v8266_v26 = vpack.c.bf16 %v5193_v18, %v5192_v43  ;;  %v5234_v18 = vld [vmem:[%s12571_s7 + $0x160] sm:$0xff] }
 0x78e   : > { %v4787_v8 = vadd.f32 %v4786_v59, %v4692_v38  ;;  %v5238_v38 = vld [vmem:[%s12571_s7 + $0x180] sm:$0xff]  ;;  %v8260_v27 = vpack.c.bf16 %v5207_v58, %v5206_v11  ;;  %v5225_v59 = vld [vmem:[%s12571_s7 + $0x118] sm:$0xff]  ;;  %v5200_v58 = vld [vmem:[%s12571_s7 + $0x50] sm:$0xff] }
 0x78f   : > { %vm4816_vm6 = vcmp.gt.f32.partialorder %v4792_v36, 0.0  ;;  %v4822_v45 = vmul.f32 0.1, %v4792_v36  ;;  %v8292_v9 = vpack.c.bf16 %v5239_v13, %v5238_v38  ;;  %v5248_v38 = vld [vmem:[%s12571_s7 + $0x1d0] sm:$0xff]  ;;  %v5249_v13 = vld [vmem:[%s12571_s7 + $0x1d8] sm:$0xff]  ;;  %v8282_v15 = vpack.c.bf16 %v5201_v3, %v5200_v58  ;;  %v5203_v43 = vld [vmem:[%s12571_s7 + $0x68] sm:$0xff] }
 0x790   : > { %vm4815_vm7 = vcmp.gt.f32.partialorder %v4787_v8, 0.0  ;;  %v4821_v19 = vmul.f32 0.1, %v4787_v8  ;;  %v7523_v28 = vpop.f32.mrb[208].mxu0  ;;  %v8312_v11 = vpack.c.bf16 %v5249_v13, %v5248_v38 }
 0x791   : > { %v4828_v35 = vsel %vm4816_vm6, %v4792_v36, %v4822_v45  ;;  %v4802_v32 = vadd.f32 %v7523_v28, %v4707_v20  ;;  %v4796_v29 = vpop.f32.mrb[209].mxu0  ;;  %8293 = vmatprep.subr.bf16.mxu1 %v8292_v9  ;;  %v5208_v20 = vld [vmem:[%s12571_s7 + $0x90] sm:$0xff]  ;;  %v5210_v45 = vld [vmem:[%s12571_s7 + $0xa0] sm:$0xff] }
 0x792   : > { %v4827_v17 = vsel %vm4815_vm7, %v4787_v8, %v4821_v19  ;;  %v4797_v10 = vadd.f32 %v4796_v29, %v4702_v0  ;;  %v5190_v0 = vld [vmem:[%s12571_s7] sm:$0xff]  ;;  %8295 = vmatpush3.bf16.msra.mxu1 %v8294_v54  ;;  %v8264_v55 = vpack.c.bf16 %v5209_v16, %v5208_v20  ;;  %v5224_v36 = vld [vmem:[%s12571_s7 + $0x110] sm:$0xff]  ;;  %v5211_v19 = vld [vmem:[%s12571_s7 + $0xa8] sm:$0xff] }
 0x793   : > { %vm4818_vm8 = vcmp.gt.f32.partialorder %v4802_v32, 0.0  ;;  %v4824_v30 = vmul.f32 0.1, %v4802_v32  ;;  %v8236_v48 = vpack.c.bf16 %v4828_v35, %v4827_v17  ;;  %v8262_v61 = vpack.c.bf16 %v5191_v56, %v5190_v0  ;;  %v5242_v28 = vld [vmem:[%s12571_s7 + $0x1a0] sm:$0xff]  ;;  %v5195_v17 = vld [vmem:[%s12571_s7 + $0x28] sm:$0xff]  ;;  %v5233_v0 = vld [vmem:[%s12571_s7 + $0x158] sm:$0xff] }
 0x794   : > { %vm4817_vm9 = vcmp.gt.f32.partialorder %v4797_v10, 0.0  ;;  %v4823_v24 = vmul.f32 0.1, %v4797_v10  ;;  %v7526_v51 = vpop.f32.mrb[210].mxu0  ;;  %v8298_v8 = vpack.c.bf16 %v5225_v59, %v5224_v36  ;;  %v8268_v35 = vpack.c.bf16 %v5211_v19, %v5210_v45  ;;  %v5194_v29 = vld [vmem:[%s12571_s7 + $0x20] sm:$0xff]  ;;  %v5219_v54 = vld [vmem:[%s12571_s7 + $0xe8] sm:$0xff] }
 0x795   : > { %v4830_v52 = vsel %vm4818_vm8, %v4802_v32, %v4824_v30  ;;  %v4812_v4 = vadd.f32 %v7526_v51, %v4717_v14  ;;  %v4806_v57 = vpop.f32.mrb[211].mxu0  ;;  %8237 = vmatprep.subr.bf16.mxu0 %v8236_v48  ;;  %v5243_v32 = vld [vmem:[%s12571_s7 + $0x1a8] sm:$0xff]  ;;  %v8270_v30 = vpack.c.bf16 %v5195_v17, %v5194_v29  ;;  %v5218_v56 = vld [vmem:[%s12571_s7 + $0xe0] sm:$0xff]  ;;  %v5220_v36 = vld [vmem:[%s12571_s7 + $0xf0] sm:$0xff] }
 0x796   : > { %v4829_v6 = vsel %vm4817_vm9, %v4797_v10, %v4823_v24  ;;  %v4807_v33 = vadd.f32 %v4806_v57, %v4712_v12  ;;  %8239 = vmatpush3.bf16.msra.mxu0 %v8236_v48  ;;  %v5241_v12 = vld [vmem:[%s12571_s7 + $0x198] sm:$0xff]  ;;  %v8300_v10 = vpack.c.bf16 %v5243_v32, %v5242_v28  ;;  %v5227_v24 = vld [vmem:[%s12571_s7 + $0x128] sm:$0xff]  ;;  %v5244_v57 = vld [vmem:[%s12571_s7 + $0x1b0] sm:$0xff]  ;;  %v8284_v20 = vpack.c.bf16 %v5219_v54, %v5218_v56 }
 0x797   : > { %vm4820_vm10 = vcmp.gt.f32.partialorder %v4812_v4, 0.0  ;;  %v4826_v47 = vmul.f32 0.1, %v4812_v4  ;;  %v8240_v60 = vpack.c.bf16 %v4830_v52, %v4829_v6  ;;  %v8296_v14 = vpack.c.bf16 %v5241_v12, %v5240_v22  ;;  %v5212_v52 = vld [vmem:[%s12571_s7 + $0xb0] sm:$0xff]  ;;  %v5250_v16 = vld [vmem:[%s12571_s7 + $0x1e0] sm:$0xff]  ;;  %v5251_v22 = vld [vmem:[%s12571_s7 + $0x1e8] sm:$0xff] }
 0x798   : > { %vm4819_vm11 = vcmp.gt.f32.partialorder %v4807_v33, 0.0  ;;  %v4825_v46 = vmul.f32 0.1, %v4807_v33  ;;  %v8316_v12 = vpack.c.bf16 %v5251_v22, %v5250_v16  ;;  %v5221_v59 = vld [vmem:[%s12571_s7 + $0xf8] sm:$0xff]  ;;  %v5236_v17 = vld [vmem:[%s12571_s7 + $0x170] sm:$0xff]  ;;  %v5287_v56 = vld [vmem:[%s12571_s7 + $0x308] sm:$0xff] }
 0x799   : > { %v4832_v25 = vsel %vm4820_vm10, %v4812_v4, %v4826_v47  ;;  %8241 = vmatprep.subr.bf16.mxu0 %v8240_v60  ;;  %8297 = vmatprep.subr.bf16.mxu1 %v8296_v14  ;;  %v5213_v4 = vld [vmem:[%s12571_s7 + $0xb8] sm:$0xff]  ;;  %v5196_v47 = vld [vmem:[%s12571_s7 + $0x30] sm:$0xff]  ;;  %v5235_v14 = vld [vmem:[%s12571_s7 + $0x168] sm:$0xff]  ;;  %v8288_v19 = vpack.c.bf16 %v5221_v59, %v5220_v36 }
 0x79a   : > { %v4831_v62 = vsel %vm4819_vm11, %v4807_v33, %v4825_v46  ;;  %8243 = vmatpush3.bf16.msra.mxu0 %v8240_v60  ;;  %8299 = vmatpush3.bf16.msra.mxu1 %v8298_v8  ;;  %v8272_v6 = vpack.c.bf16 %v5213_v4, %v5212_v52  ;;  %v5245_v33 = vld [vmem:[%s12571_s7 + $0x1b8] sm:$0xff]  ;;  %v5252_v8 = vld [vmem:[%s12571_s7 + $0x1f0] sm:$0xff]  ;;  %v8318_v45 = vpack.c.bf16 %v5235_v14, %v5234_v18 }
 0x79b   : > { %v8244_v23 = vpack.c.bf16 %v4832_v25, %v4831_v62  ;;  %8301 = vmatprep.subr.bf16.mxu1 %v8300_v10  ;;  %v8304_v46 = vpack.c.bf16 %v5245_v33, %v5244_v57  ;;  %v5228_v62 = vld [vmem:[%s12571_s7 + $0x130] sm:$0xff]  ;;  %v5253_v28 = vld [vmem:[%s12571_s7 + $0x1f8] sm:$0xff] }
 0x79c   : > { %v5205_v32 = vld [vmem:[%s12571_s7 + $0x78] sm:$0xff]  ;;  %v8320_v29 = vpack.c.bf16 %v5253_v28, %v5252_v8  ;;  %v5272_v54 = vld [vmem:[%s12571_s7 + $0x290] sm:$0xff]  ;;  %v11840_v28 = vld [vmem:[%s12571_s7 + $0x2a8] sm:$0xff] }
 0x79d   : > { %8245 = vmatprep.subr.bf16.mxu0 %v8244_v23  ;;  %v5237_v10 = vld [vmem:[%s12571_s7 + $0x178] sm:$0xff]  ;;  %v11821_v22 = vld [vmem:[%s12571_s7 + $0x210] sm:$0xff] }
 0x79e   : > { %8247 = vmatpush3.bf16.msra.mxu0 %v8244_v23  ;;  %v8322_v4 = vpack.c.bf16 %v5237_v10, %v5236_v17  ;;  %v5305_v16 = vld [vmem:[%s12571_s7 + $0x398] sm:$0xff]  ;;  %v5288_v18 = vld [vmem:[%s12571_s7 + $0x310] sm:$0xff]  ;;  %v5307_v17 = vld [vmem:[%s12571_s7 + $0x3a8] sm:$0xff] }
 0x79f   : > { %8249 = vmatprep.subr.bf16.mxu0 %v8236_v48  ;;  %v5289_v14 = vld [vmem:[%s12571_s7 + $0x318] sm:$0xff]  ;;  %v5258_v10 = vld [vmem:[%s12571_s7 + $0x220] sm:$0xff] }
 0x7a1   : > { %7540 = vmatmul.mubr.msk.f32.vlgmr.msra.gmra.mrb[212].mxu0 %vm4853_vm13, %v4840_v37 }
 0x7a2   : > { %8251 = vmatpush3.bf16.msra.mxu0 %v8236_v48  ;;  %7542 = vmatprep.mubr.msk.f32.mxu0 %vm4853_vm13, %v4841_v63  ;;  %v5226_v48 = vld [vmem:[%s12571_s7 + $0x120] sm:$0xff] }
 0x7a3   : > { %8253 = vmatprep.subr.bf16.mxu0 %v8240_v60  ;;  %v8302_v51 = vpack.c.bf16 %v5227_v24, %v5226_v48  ;;  %v5214_v63 = vld [vmem:[%s12571_s7 + $0xc0] sm:$0xff]  ;;  %v5271_v48 = vld [vmem:[%s12571_s7 + $0x288] sm:$0xff] }
 0x7a4   : > { %v5302_v24 = vld [vmem:[%s12571_s7 + $0x380] sm:$0xff] }
 0x7a5   : > { %7543 = vmatmul.mubr.msk.f32.gmra.mrb[214].mxu0 %vm4853_vm13, %v4842_v50  ;;  %8303 = vmatpush3.bf16.msra.mxu1 %v8302_v51  ;;  %v5215_v50 = vld [vmem:[%s12571_s7 + $0xc8] sm:$0xff] }
 0x7a6   : > { %8255 = vmatpush3.bf16.msra.mxu0 %v8240_v60  ;;  %7545 = vmatprep.mubr.msk.f32.mxu0 %vm4853_vm13, %v4843_v42  ;;  %v5197_v60 = vld [vmem:[%s12571_s7 + $0x38] sm:$0xff]  ;;  %v5246_v42 = vld [vmem:[%s12571_s7 + $0x1c0] sm:$0xff]  ;;  %v5303_v51 = vld [vmem:[%s12571_s7 + $0x388] sm:$0xff] }
 0x7a7   : > { %8257 = vmatprep.subr.bf16.mxu0 %v8244_v23  ;;  %v8274_v25 = vpack.c.bf16 %v5197_v60, %v5196_v47  ;;  %8305 = vmatprep.subr.bf16.mxu1 %v8304_v46 }
 0x7a9   : > { %7546 = vmatmul.mubr.msk.f32.gmra.mrb[216].mxu0 %vm4853_vm13, %v4844_v21  ;;  %v8276_v21 = vpack.c.bf16 %v5215_v50, %v5214_v63 }
 0x7aa   : > { %8259 = vmatpush3.bf16.msra.mxu0 %v8244_v23  ;;  %7548 = vmatprep.mubr.msk.f32.mxu0 %vm4853_vm13, %v4845_v5  ;;  %v5229_v23 = vld [vmem:[%s12571_s7 + $0x138] sm:$0xff]  ;;  %v5247_v5 = vld [vmem:[%s12571_s7 + $0x1c8] sm:$0xff] }
 0x7ab   : > { %8261 = vmatprep.subr.bf16.mxu0 %v8260_v27  ;;  %v8306_v37 = vpack.c.bf16 %v5229_v23, %v5228_v62  ;;  %v5232_v27 = vld [vmem:[%s12571_s7 + $0x150] sm:$0xff] }
 0x7ad   : > { %7549 = vmatmul.mubr.msk.f32.gmra.mrb[218].mxu0 %vm4853_vm13, %v4846_v41  ;;  %8307 = vmatpush3.bf16.msra.mxu1 %v8306_v37  ;;  %v5198_v41 = vld [vmem:[%s12571_s7 + $0x40] sm:$0xff] }
 0x7ae   : > { %7563 = vmatprep.mubr.msk.f32.mxu0 %vm4853_vm13, %v4983_v53  ;;  %v5199_v53 = vld [vmem:[%s12571_s7 + $0x48] sm:$0xff] }
 0x7b1   : > { %7564 = vmatmul.mubr.msk.f32.vlgmr.msra.gmra.mrb[220].mxu0 %vm4853_vm13, %v4984_v34  ;;  %v8308_v34 = vpack.c.bf16 %v5247_v5, %v5246_v42 }
 0x7b2   : > { %7566 = vmatprep.mubr.msk.f32.mxu0 %vm4853_vm13, %v4985_v7  ;;  %8263 = vmatpush3.bf16.msra.mxu0 %v8262_v61  ;;  %v8278_v7 = vpack.c.bf16 %v5199_v53, %v5198_v41  ;;  %v8314_v61 = vpack.c.bf16 %v5233_v0, %v5232_v27  ;;  %v5254_v27 = vld [vmem:[%s12571_s7 + $0x200] sm:$0xff] }
 0x7b3   : > { %8265 = vmatprep.subr.bf16.mxu0 %v8264_v55  ;;  %8309 = vmatprep.subr.bf16.mxu1 %v8308_v34  ;;  %v5202_v55 = vld [vmem:[%s12571_s7 + $0x60] sm:$0xff] }
 0x7b4   : > { %v5286_v0 = vld [vmem:[%s12571_s7 + $0x300] sm:$0xff] }
 0x7b5   : > { %7567 = vmatmul.mubr.msk.f32.gmra.mrb[222].mxu0 %vm4853_vm13, %v4986_v49  ;;  %v5230_v49 = vld [vmem:[%s12571_s7 + $0x140] sm:$0xff] }
 0x7b6   : > { %7569 = vmatprep.mubr.msk.f32.mxu0 %vm4853_vm13, %v4987_v2  ;;  %8267 = vmatpush3.bf16.msra.mxu0 %v8266_v26  ;;  %v5231_v2 = vld [vmem:[%s12571_s7 + $0x148] sm:$0xff]  ;;  %v8286_v26 = vpack.c.bf16 %v5203_v43, %v5202_v55  ;;  %v5257_v43 = vld [vmem:[%s12571_s7 + $0x218] sm:$0xff] }
 0x7b7   : > { %8269 = vmatprep.subr.bf16.mxu0 %v8268_v35  ;;  %v5204_v35 = vld [vmem:[%s12571_s7 + $0x70] sm:$0xff] }
 0x7b8   : > { %v8290_v52 = vpack.c.bf16 %v5205_v32, %v5204_v35  ;;  %v11845_v35 = vld [vmem:[%s12571_s7 + $0x3a0] sm:$0xff] }
 0x7b9   : > { %7570 = vmatmul.mubr.msk.f32.gmra.mrb[224].mxu0 %vm4853_vm13, %v4988_v31  ;;  %v5216_v31 = vld [vmem:[%s12571_s7 + $0xd0] sm:$0xff] }
 0x7ba   : > { %7572 = vmatprep.mubr.msk.f32.mxu0 %vm4853_vm13, %v4989_v40  ;;  %8271 = vmatpush3.bf16.msra.mxu0 %v8270_v30  ;;  %v8310_v40 = vpack.c.bf16 %v5231_v2, %v5230_v49  ;;  %v5270_v30 = vld [vmem:[%s12571_s7 + $0x280] sm:$0xff] }
 0x7bb   : > { %8273 = vmatprep.subr.bf16.mxu0 %v8272_v6  ;;  %v8324_v57 = vpack.c.bf16 %v5271_v48, %v5270_v30  ;;  %v8356_v6 = vpack.c.bf16 %v5303_v51, %v5302_v24  ;;  %v5259_v30 = vld [vmem:[%s12571_s7 + $0x228] sm:$0xff]  ;;  %v5290_v48 = vld [vmem:[%s12571_s7 + $0x320] sm:$0xff]  ;;  %v8330_v51 = vpack.c.bf16 %v5257_v43, %v11821_v22  ;;  %v5313_v22 = vld [vmem:[%s12571_s7 + $0x3d8] sm:$0xff] }
 0x7bc   : > { %8311 = vmatpush3.bf16.msra.mxu1 %v8310_v40  ;;  %v5291_v24 = vld [vmem:[%s12571_s7 + $0x328] sm:$0xff]  ;;  %v5264_v43 = vld [vmem:[%s12571_s7 + $0x250] sm:$0xff] }
 0x7bd   : > { %7573 = vmatmul.mubr.msk.f32.gmra.mrb[226].mxu0 %vm4853_vm13, %v4990_v1  ;;  %v5217_v1 = vld [vmem:[%s12571_s7 + $0xd8] sm:$0xff]  ;;  %8313 = vmatprep.subr.bf16.mxu1 %v8312_v11 }
 0x7be   : > { %8275 = vmatpush3.bf16.msra.mxu0 %v8274_v25  ;;  %v8280_v9 = vpack.c.bf16 %v5217_v1, %v5216_v31 }
 0x7bf   : > { %8277 = vmatprep.subr.bf16.mxu0 %v8276_v21 }
 0x7c0   : > { %8315 = vmatpush3.bf16.msra.mxu1 %v8314_v61  ;;  %v5273_v61 = vld [vmem:[%s12571_s7 + $0x298] sm:$0xff] }
 0x7c1   : > { %8317 = vmatprep.subr.bf16.mxu1 %v8316_v12  ;;  %v8358_v12 = vpack.c.bf16 %v5287_v56, %v5286_v0  ;;  %v8328_v8 = vpack.c.bf16 %v5273_v61, %v5272_v54  ;;  %v5294_v56 = vld [vmem:[%s12571_s7 + $0x340] sm:$0xff]  ;;  %v5295_v54 = vld [vmem:[%s12571_s7 + $0x348] sm:$0xff]  ;;  %v5280_v61 = vld [vmem:[%s12571_s7 + $0x2d0] sm:$0xff] }
 0x7c2   : > { %8279 = vmatpush3.bf16.msra.mxu0 %v8278_v7 }
 0x7c3   : > { %8281 = vmatprep.subr.bf16.mxu0 %v8280_v9 }
 0x7c4   : > { %8319 = vmatpush3.bf16.msra.mxu1 %v8318_v45 }
 0x7c5   : > { %8321 = vmatprep.subr.bf16.mxu1 %v8320_v29 }
 0x7c6   : > { %8283 = vmatpush3.bf16.msra.mxu0 %v8282_v15  ;;  %v5255_v15 = vld [vmem:[%s12571_s7 + $0x208] sm:$0xff] }
 0x7c7   : > { %8285 = vmatprep.subr.bf16.mxu0 %v8284_v20  ;;  %v5304_v20 = vld [vmem:[%s12571_s7 + $0x390] sm:$0xff]  ;;  %v8326_v55 = vpack.c.bf16 %v5255_v15, %v5254_v27  ;;  %v5263_v27 = vld [vmem:[%s12571_s7 + $0x248] sm:$0xff] }
 0x7c8   : > { %8323 = vmatpush3.bf16.msra.mxu1 %v8322_v4  ;;  %v8360_v45 = vpack.c.bf16 %v5305_v16, %v5304_v20  ;;  %v5276_v4 = vld [vmem:[%s12571_s7 + $0x2b0] sm:$0xff]  ;;  %v5281_v20 = vld [vmem:[%s12571_s7 + $0x2d8] sm:$0xff] }
 0x7c9   : > { %8357 = vmatprep.subr.bf16.mxu1 %v8356_v6  ;;  %v5308_v6 = vld [vmem:[%s12571_s7 + $0x3b0] sm:$0xff] }
 0x7ca   : > { %8287 = vmatpush3.bf16.msra.mxu0 %v8286_v26  ;;  %v5312_v16 = vld [vmem:[%s12571_s7 + $0x3d0] sm:$0xff] }
 0x7cb   : > { %8289 = vmatprep.subr.bf16.mxu0 %v8288_v19  ;;  %v11835_v19 = vld [vmem:[%s12571_s7 + $0x2a0] sm:$0xff] }
 0x7ce   : > { %8291 = vmatpush3.bf16.msra.mxu0 %v8290_v52  ;;  %v8362_v52 = vpack.c.bf16 %v5289_v14, %v5288_v18  ;;  %v5265_v18 = vld [vmem:[%s12571_s7 + $0x258] sm:$0xff]  ;;  %v8344_v14 = vpack.c.bf16 %v5281_v20, %v5280_v61  ;;  %v5767_v20 = vld [vmem:[%s12573_s9 + $0x80] sm:$0xff] }
 0x7cf   : > { %8325 = vmatprep.subr.bf16.mxu0 %v8324_v57  ;;  %v5277_v57 = vld [vmem:[%s12571_s7 + $0x2b8] sm:$0xff] }
 0x874   : > { %v7541_v33 = vpop.f32.mrb[212].mxu0 }
 0x875   : > { %v4944_v47 = vpop.f32.mrb[213].mxu0 }
 0x878   : > { %v7544_v60 = vpop.f32.mrb[214].mxu0 }
 0x879   : > { %v4954_v46 = vpop.f32.mrb[215].mxu0 }
 0x87c   : > { %v7547_v25 = vpop.f32.mrb[216].mxu0 }
 0x87d   : > { %v5121_v62 = vmax.f32 %v7541_v33, %v7547_v25  ;;  %v4964_v23 = vpop.f32.mrb[217].mxu0  ;;  %v5309_v33 = vld [vmem:[%s12571_s7 + $0x3b8] sm:$0xff] }
 0x87e   : > { %v5120_v37 = vmax.f32 %v4944_v47, %v4964_v23 }
 0x880   : > { %v7550_v63 = vpop.f32.mrb[218].mxu0 }
 0x881   : > { %v5123_v50 = vmax.f32 %v7544_v60, %v7550_v63  ;;  %v4974_v42 = vpop.f32.mrb[219].mxu0  ;;  %v8364_v63 = vpack.c.bf16 %v5307_v17, %v11845_v35  ;;  %v8346_v35 = vpack.c.bf16 %v5265_v18, %v5264_v43  ;;  %v5266_v17 = vld [vmem:[%s12571_s7 + $0x260] sm:$0xff]  ;;  %v5752_v43 = vld [vmem:[%s12573_s9 + $0x8] sm:$0xff] }
 0x882   : > { %v5122_v21 = vmax.f32 %v4954_v46, %v4974_v42 }
 0x884   : > { %v7565_v5 = vpop.f32.mrb[220].mxu0 }
 0x885   : > { %v5081_v41 = vpop.f32.mrb[221].mxu0 }
 0x888   : > { %v7568_v53 = vpop.f32.mrb[222].mxu0 }
 0x889   : > { %v5091_v34 = vpop.f32.mrb[223].mxu0 }
 0x88c   : > { %v7571_v7 = vpop.f32.mrb[224].mxu0 }
 0x88d   : > { %v5125_v49 = vmax.f32 %v7565_v5, %v7571_v7  ;;  %v5101_v2 = vpop.f32.mrb[225].mxu0  ;;  %v5261_v7 = vld [vmem:[%s12571_s7 + $0x238] sm:$0xff] }
 0x88e   : > { %v5124_v31 = vmax.f32 %v5081_v41, %v5101_v2  ;;  %v8334_v41 = vpack.c.bf16 %v5259_v30, %v5258_v10  ;;  %v8368_v2 = vpack.c.bf16 %v5309_v33, %v5308_v6  ;;  %v5267_v10 = vld [vmem:[%s12571_s7 + $0x268] sm:$0xff]  ;;  %v5317_v6 = vld [vmem:[%s12571_s7 + $0x3f8] sm:$0xff] }
 0x88f   : > { %v11791_v40 = vmax.f32 %v5121_v62, %v5125_v49  ;;  %v8336_v49 = vpack.c.bf16 %v5277_v57, %v5276_v4  ;;  %v5285_v4 = vld [vmem:[%s12571_s7 + $0x2f8] sm:$0xff]  ;;  %v5316_v57 = vld [vmem:[%s12571_s7 + $0x3f0] sm:$0xff]  ;;  %v8350_v33 = vpack.c.bf16 %v5267_v10, %v5266_v17 }
 0x890   : > { %v5128_v1 = vmax.f32 %v5120_v37, %v5124_v31  ;;  %v7574_v38 = vpop.f32.mrb[226].mxu0  ;;  %v8332_v37 = vpack.c.bf16 %v11840_v28, %v11835_v19  ;;  %v5292_v31 = vld [vmem:[%s12571_s7 + $0x330] sm:$0xff]  ;;  %v5314_v19 = vld [vmem:[%s12571_s7 + $0x3e0] sm:$0xff]  ;;  %v5315_v28 = vld [vmem:[%s12571_s7 + $0x3e8] sm:$0xff] }
 0x891   : > { %5133 = vst [vmem:[#allocation6 + $0x8] sm:$0xff] %v11791_v40  ;;  %v5127_v13 = vmax.f32 %v7568_v53, %v7574_v38  ;;  %v5111_v9 = vpop.f32.mrb[227].mxu0  ;;  %v8366_v53 = vpack.c.bf16 %v5291_v24, %v5290_v48  ;;  %v5279_v38 = vld [vmem:[%s12571_s7 + $0x2c8] sm:$0xff]  ;;  %v8380_v48 = vpack.c.bf16 %v5315_v28, %v5314_v19  ;;  %v5298_v24 = vld [vmem:[%s12571_s7 + $0x360] sm:$0xff]  ;;  %v5801_v19 = vld [vmem:[%s12573_s9 + $0x190] sm:$0xff] }
 0x892   : > { %5132 = vst [vmem:[#allocation6] sm:$0xff] %v5128_v1  ;;  %5138 = vst [vmem:[#allocation2] sm:$0xff] %v5128_v1  ;;  %v5126_v11 = vmax.f32 %v5091_v34, %v5111_v9  ;;  %v5260_v34 = vld [vmem:[%s12571_s7 + $0x230] sm:$0xff]  ;;  %v5311_v9 = vld [vmem:[%s12571_s7 + $0x3c8] sm:$0xff] }
 0x893   : > { %v5131_v58 = vmax.f32 %v5123_v50, %v5127_v13  ;;  %v5310_v13 = vld [vmem:[%s12571_s7 + $0x3c0] sm:$0xff]  ;;  %v5802_v28 = vld [vmem:[%s12573_s9 + $0x198] sm:$0xff]  ;;  %v5753_v17 = vld [vmem:[%s12573_s9 + $0x10] sm:$0xff] }
 0x894   : > { %v5130_v3 = vmax.f32 %v5122_v21, %v5126_v11  ;;  %v8338_v11 = vpack.c.bf16 %v5261_v7, %v5260_v34  ;;  %v8372_v0 = vpack.c.bf16 %v5311_v9, %v5310_v13  ;;  %v5318_v34 = vld [vmem:[%s12571_s7 + $0x400] sm:$0xff]  ;;  %v5319_v7 = vld [vmem:[%s12571_s7 + $0x408] sm:$0xff]  ;;  %v5754_v10 = vld [vmem:[%s12573_s9 + $0x18] sm:$0xff] }
 0x895   : > { %5135 = vst [vmem:[#allocation6 + $0x18] sm:$0xff] %v5131_v58  ;;  %v5322_v13 = vld [vmem:[%s12571_s7 + $0x420] sm:$0xff]  ;;  %v5323_v9 = vld [vmem:[%s12571_s7 + $0x428] sm:$0xff] }
 0x896   : > { %5134 = vst [vmem:[#allocation6 + $0x10] sm:$0xff] %v5130_v3  ;;  %v5262_v3 = vld [vmem:[%s12571_s7 + $0x240] sm:$0xff] }
 0x899   : > { %v5140_v26 = vld [vmem:[#allocation6 + $0x1] sm:$0xff] }
 0x89a   : > { %v5144_v36 = vld [vmem:[#allocation6 + $0x2] sm:$0xff]  ;;  %5142 = vst [vmem:[#allocation2 + $0x8] sm:$0xff] %v5140_v26  ;;  %5405 = vmatprep.mubr.f32.mxu0 %v5140_v26  ;;  %v8376_v26 = vpack.c.bf16 %v5313_v22, %v5312_v16 }
 0x89b   : > { %v5148_v59 = vld [vmem:[#allocation6 + $0x5] sm:$0xff]  ;;  %5146 = vst [vmem:[#allocation2 + $0x10] sm:$0xff] %v5144_v36  ;;  %5406 = vmatmul.mubr.f32.vlgmr.msra.gmra.mrb[228].mxu0 %v5128_v1 }
 0x89c   : > { %v11847_v32 = vld [vmem:[#allocation6 + $0x6] sm:$0xff]  ;;  %5150 = vst [vmem:[#allocation2 + $0x18] sm:$0xff] %v5148_v59  ;;  %5480 = vmatprep.mubr.f32.mxu1 %v5148_v59  ;;  %8327 = vmatpush3.bf16.msra.mxu0 %v8326_v55  ;;  %v8342_v55 = vpack.c.bf16 %v5263_v27, %v5262_v3  ;;  %v5297_v59 = vld [vmem:[%s12571_s7 + $0x358] sm:$0xff] }
 0x89d   : > { %v5156_v29 = vld [vmem:[#allocation6 + $0x7] sm:$0xff]  ;;  %5154 = vst [vmem:[#allocation2 + $0x20] sm:$0xff] %v11847_v32  ;;  %5481 = vmatmul.mubr.f32.vlgmr.msra.gmra.mrb[78].mxu1 %v5144_v36  ;;  %8329 = vmatprep.subr.bf16.mxu0 %v8328_v8  ;;  %v11882_v62 = vld [vmem:[#allocation6 + $0xf] sm:$0xff] }
 0x89e   : > { %5158 = vst [vmem:[#allocation2 + $0x28] sm:$0xff] %v5156_v29  ;;  %8359 = vmatpush3.bf16.msra.mxu1 %v8358_v12  ;;  %v5141_v47 = vld [vmem:[#allocation6 + $0x9] sm:$0xff]  ;;  %v11884_v23 = vld [vmem:[#allocation6 + $0x12] sm:$0xff]  ;;  %5159 = vst [vmem:[#allocation2 + $0x70] sm:$0xff] %v11882_v62  ;;  %v8374_v12 = vpack.c.bf16 %v5295_v54, %v5294_v56 }
 0x89f   : > { %v11878_v60 = vld [vmem:[#allocation6 + $0xa] sm:$0xff]  ;;  %8361 = vmatprep.subr.bf16.mxu1 %v8360_v45  ;;  %5410 = vmatprep.mubr.f32.mxu0 %v5141_v47  ;;  %v11891_v42 = vld [vmem:[#allocation6 + $0x13] sm:$0xff]  ;;  %5163 = vst [vmem:[#allocation2 + $0x78] sm:$0xff] %v11884_v23  ;;  %v5278_v1 = vld [vmem:[%s12571_s7 + $0x2c0] sm:$0xff] }
 0x8a0   : > { %v5149_v46 = vld [vmem:[#allocation6 + $0xd] sm:$0xff]  ;;  %5162 = vst [vmem:[#allocation2 + $0x30] sm:$0xff] %v11878_v60  ;;  %5147 = vst [vmem:[#allocation2 + $0x58] sm:$0xff] %v11878_v60  ;;  %5411 = vmatmul.mubr.f32.gmra.mrb[230].mxu0 %v11791_v40  ;;  %v5293_v40 = vld [vmem:[%s12571_s7 + $0x338] sm:$0xff]  ;;  %v8340_v15 = vpack.c.bf16 %v5279_v38, %v5278_v1 }
 0x8a1   : > { %v11880_v25 = vld [vmem:[#allocation6 + $0xe] sm:$0xff]  ;;  %5151 = vst [vmem:[#allocation2 + $0x60] sm:$0xff] %v5149_v46  ;;  %5485 = vmatprep.mubr.f32.mxu1 %v5149_v46  ;;  %5167 = vst [vmem:[#allocation2 + $0x80] sm:$0xff] %v11891_v42  ;;  %8331 = vmatpush3.bf16.msra.mxu0 %v8330_v51  ;;  %v8370_v58 = vpack.c.bf16 %v5293_v40, %v5292_v31  ;;  %v5282_v8 = vld [vmem:[%s12571_s7 + $0x2e0] sm:$0xff]  ;;  %v8388_v31 = vpack.c.bf16 %v5319_v7, %v5318_v34 }
 0x8a2   : > { %v5164_v50 = vld [vmem:[#allocation6 + $0xb] sm:$0xff]  ;;  %5155 = vst [vmem:[#allocation2 + $0x68] sm:$0xff] %v11880_v25  ;;  %5486 = vmatmul.mubr.f32.gmra.mrb[80].mxu1 %v11878_v60  ;;  %v11900_v5 = vld [vmem:[#allocation6 + $0x14] sm:$0xff]  ;;  %5555 = vmatprep.mubr.f32.mxu0 %v5156_v29  ;;  %v5330_v27 = vld [vmem:[%s12571_s7 + $0x460] sm:$0xff] }
 0x8a3   : > { %v11893_v21 = vld [vmem:[#allocation6 + $0xc] sm:$0xff]  ;;  %5166 = vst [vmem:[#allocation2 + $0x38] sm:$0xff] %v5164_v50  ;;  %8363 = vmatpush3.bf16.msra.mxu1 %v8362_v52  ;;  %5171 = vst [vmem:[#allocation2 + $0x88] sm:$0xff] %v11900_v5  ;;  %5630 = vmatprep.mubr.f32.mxu1 %v5164_v50  ;;  %v5269_v50 = vld [vmem:[%s12571_s7 + $0x278] sm:$0xff] }
 0x8a4   : > { %5170 = vst [vmem:[#allocation2 + $0x40] sm:$0xff] %v11893_v21  ;;  %8333 = vmatprep.subr.bf16.mxu0 %v8332_v37  ;;  %8365 = vmatprep.subr.bf16.mxu1 %v8364_v63  ;;  %v5296_v36 = vld [vmem:[%s12571_s7 + $0x350] sm:$0xff]  ;;  %v5283_v45 = vld [vmem:[%s12571_s7 + $0x2e8] sm:$0xff]  ;;  %v8384_v63 = vpack.c.bf16 %v5317_v6, %v5316_v57  ;;  %v5321_v1 = vld [vmem:[%s12571_s7 + $0x418] sm:$0xff] }
 0x8a5   : > { %8335 = vmatpush3.bf16.msra.mxu0 %v8334_v41  ;;  %v8378_v29 = vpack.c.bf16 %v5297_v59, %v5296_v36  ;;  %v8348_v30 = vpack.c.bf16 %v5283_v45, %v5282_v8  ;;  %v5299_v51 = vld [vmem:[%s12571_s7 + $0x368] sm:$0xff]  ;;  %v5284_v52 = vld [vmem:[%s12571_s7 + $0x2f0] sm:$0xff]  ;;  %v5333_v54 = vld [vmem:[%s12571_s7 + $0x478] sm:$0xff] }
 0x8a6   : > { %8337 = vmatprep.subr.bf16.mxu0 %v8336_v49  ;;  %v8382_v47 = vpack.c.bf16 %v5299_v51, %v5298_v24  ;;  %v5268_v46 = vld [vmem:[%s12571_s7 + $0x270] sm:$0xff]  ;;  %v8352_v37 = vpack.c.bf16 %v5285_v4, %v5284_v52  ;;  %v5768_v16 = vld [vmem:[%s12573_s9 + $0x88] sm:$0xff]  ;;  %v5799_v22 = vld [vmem:[%s12573_s9 + $0x180] sm:$0xff] }
 0x8a7   : > { %8367 = vmatpush3.bf16.msra.mxu1 %v8366_v53  ;;  %v5300_v41 = vld [vmem:[%s12571_s7 + $0x370] sm:$0xff]  ;;  %v5301_v53 = vld [vmem:[%s12571_s7 + $0x378] sm:$0xff]  ;;  %v8354_v49 = vpack.c.bf16 %v5269_v50, %v5268_v46  ;;  %v5784_v36 = vld [vmem:[%s12573_s9 + $0x108] sm:$0xff] }
 0x8a8   : > { %8369 = vmatprep.subr.bf16.mxu1 %v8368_v2  ;;  %v8386_v2 = vpack.c.bf16 %v5301_v53, %v5300_v41  ;;  %v5320_v40 = vld [vmem:[%s12571_s7 + $0x410] sm:$0xff]  ;;  %v5770_v45 = vld [vmem:[%s12573_s9 + $0x98] sm:$0xff]  ;;  %v5771_v51 = vld [vmem:[%s12573_s9 + $0xa0] sm:$0xff] }
 0x8a9   : > { %8339 = vmatpush3.bf16.msra.mxu0 %v8338_v11  ;;  %v8392_v38 = vpack.c.bf16 %v5321_v1, %v5320_v40  ;;  %v8396_v11 = vpack.c.bf16 %v5323_v9, %v5322_v13  ;;  %v5332_v56 = vld [vmem:[%s12571_s7 + $0x470] sm:$0xff]  ;;  %v5786_v24 = vld [vmem:[%s12573_s9 + $0x118] sm:$0xff]  ;;  %v5772_v52 = vld [vmem:[%s12573_s9 + $0xa8] sm:$0xff] }
 0x8aa   : > { %8341 = vmatprep.subr.bf16.mxu0 %v8340_v15  ;;  %v5331_v15 = vld [vmem:[%s12571_s7 + $0x468] sm:$0xff]  ;;  %v8416_v61 = vpack.c.bf16 %v5333_v54, %v5332_v56  ;;  %v5769_v59 = vld [vmem:[%s12573_s9 + $0x90] sm:$0xff]  ;;  %v8428_v57 = vpack.c.bf16 %v5772_v52, %v5771_v51  ;;  %v5803_v6 = vld [vmem:[%s12573_s9 + $0x1a0] sm:$0xff] }
 0x8ab   : > { %8371 = vmatpush3.bf16.msra.mxu1 %v8370_v58  ;;  %v5328_v58 = vld [vmem:[%s12571_s7 + $0x450] sm:$0xff]  ;;  %v5755_v46 = vld [vmem:[%s12573_s9 + $0x20] sm:$0xff]  ;;  %v5788_v41 = vld [vmem:[%s12573_s9 + $0x128] sm:$0xff] }
 0x8ac   : > { %8373 = vmatprep.subr.bf16.mxu1 %v8372_v0  ;;  %v8412_v0 = vpack.c.bf16 %v5331_v15, %v5330_v27  ;;  %v5773_v34 = vld [vmem:[%s12573_s9 + $0xb0] sm:$0xff]  ;;  %v5774_v7 = vld [vmem:[%s12573_s9 + $0xb8] sm:$0xff]  ;;  %v5791_v27 = vld [vmem:[%s12573_s9 + $0x140] sm:$0xff] }
 0x8ad   : > { %8343 = vmatpush3.bf16.msra.mxu0 %v8342_v55  ;;  %v8420_v55 = vpack.c.bf16 %v5768_v16, %v5767_v20  ;;  %v5757_v40 = vld [vmem:[%s12573_s9 + $0x30] sm:$0xff]  ;;  %v5758_v1 = vld [vmem:[%s12573_s9 + $0x38] sm:$0xff] }
 0x8ae   : > { %8345 = vmatprep.subr.bf16.mxu0 %v8344_v14  ;;  %v8434_v13 = vpack.c.bf16 %v5758_v1, %v5757_v40  ;;  %v5789_v9 = vld [vmem:[%s12573_s9 + $0x130] sm:$0xff]  ;;  %v5778_v54 = vld [vmem:[%s12573_s9 + $0xd8] sm:$0xff]  ;;  %v6401_v1 = vld [vmem:[%s12572_s8] ss:$0 sm:$0xff] }
 0x8af   : > { %8375 = vmatpush3.bf16.msra.mxu1 %v8374_v12  ;;  %v5800_v12 = vld [vmem:[%s12573_s9 + $0x188] sm:$0xff]  ;;  %v5777_v56 = vld [vmem:[%s12573_s9 + $0xd0] sm:$0xff]  ;;  %v5814_v51 = vld [vmem:[%s12573_s9 + $0x1f8] sm:$0xff] }
 0x8b0   : > { %8377 = vmatprep.subr.bf16.mxu1 %v8376_v26  ;;  %v8452_v18 = vpack.c.bf16 %v5800_v12, %v5799_v22  ;;  %v5783_v26 = vld [vmem:[%s12573_s9 + $0x100] sm:$0xff]  ;;  %v8440_v20 = vpack.c.bf16 %v5778_v54, %v5777_v56  ;;  %v5809_v16 = vld [vmem:[%s12573_s9 + $0x1d0] sm:$0xff]  ;;  %v5810_v22 = vld [vmem:[%s12573_s9 + $0x1d8] sm:$0xff] }
 0x8b1   : > { %8347 = vmatpush3.bf16.msra.mxu0 %v8346_v35  ;;  %v8454_v8 = vpack.c.bf16 %v5784_v36, %v5783_v26  ;;  %v8424_v35 = vpack.c.bf16 %v5770_v45, %v5769_v59  ;;  %v8472_v12 = vpack.c.bf16 %v5810_v22, %v5809_v16  ;;  %v5779_v26 = vld [vmem:[%s12573_s9 + $0xe0] sm:$0xff]  ;;  %v5780_v36 = vld [vmem:[%s12573_s9 + $0xe8] sm:$0xff] }
 0x8b2   : > { %8349 = vmatprep.subr.bf16.mxu0 %v8348_v30  ;;  %v5785_v30 = vld [vmem:[%s12573_s9 + $0x110] sm:$0xff]  ;;  %v5811_v59 = vld [vmem:[%s12573_s9 + $0x1e0] sm:$0xff]  ;;  %v8444_v45 = vpack.c.bf16 %v5780_v36, %v5779_v26 }
 0x8b3   : > { %8379 = vmatpush3.bf16.msra.mxu1 %v8378_v29  ;;  %v8456_v29 = vpack.c.bf16 %v5802_v28, %v5801_v19  ;;  %v8458_v4 = vpack.c.bf16 %v5786_v24, %v5785_v30  ;;  %v5812_v19 = vld [vmem:[%s12573_s9 + $0x1e8] sm:$0xff]  ;;  %v5763_v28 = vld [vmem:[%s12573_s9 + $0x60] sm:$0xff]  ;;  %v5781_v30 = vld [vmem:[%s12573_s9 + $0xf0] sm:$0xff] }
 0x8b4   : > { %8381 = vmatprep.subr.bf16.mxu1 %v8380_v48  ;;  %v8426_v48 = vpack.c.bf16 %v5754_v10, %v5753_v17  ;;  %v5795_v17 = vld [vmem:[%s12573_s9 + $0x160] sm:$0xff]  ;;  %v5796_v10 = vld [vmem:[%s12573_s9 + $0x168] sm:$0xff]  ;;  %v5813_v24 = vld [vmem:[%s12573_s9 + $0x1f0] sm:$0xff] }
 0x8b5   : > { %8351 = vmatpush3.bf16.msra.mxu0 %v8350_v33  ;;  %v5804_v33 = vld [vmem:[%s12573_s9 + $0x1a8] sm:$0xff] }
 0x8b6   : > { %8353 = vmatprep.subr.bf16.mxu0 %v8352_v37  ;;  %v5756_v37 = vld [vmem:[%s12573_s9 + $0x28] sm:$0xff] }
 0x8b7   : > { %8383 = vmatpush3.bf16.msra.mxu1 %v8382_v47  ;;  %v8460_v47 = vpack.c.bf16 %v5804_v33, %v5803_v6  ;;  %v8430_v50 = vpack.c.bf16 %v5756_v37, %v5755_v46  ;;  %v5765_v6 = vld [vmem:[%s12573_s9 + $0x70] sm:$0xff]  ;;  %v5766_v33 = vld [vmem:[%s12573_s9 + $0x78] sm:$0xff]  ;;  %v8480_v46 = vpack.c.bf16 %v5814_v51, %v5813_v24 }
 0x8b8   : > { %8385 = vmatprep.subr.bf16.mxu1 %v8384_v63  ;;  %v5787_v63 = vld [vmem:[%s12573_s9 + $0x120] sm:$0xff]  ;;  %v5798_v37 = vld [vmem:[%s12573_s9 + $0x178] sm:$0xff] }
 0x8b9   : > { %8355 = vmatpush3.bf16.msra.mxu0 %v8354_v49  ;;  %v8462_v53 = vpack.c.bf16 %v5788_v41, %v5787_v63  ;;  %v5805_v49 = vld [vmem:[%s12573_s9 + $0x1b0] sm:$0xff]  ;;  %v5831_v63 = vld [vmem:[%s12573_s9 + $0x280] sm:$0xff] }
 0x8ba   : > { %8389 = vmatprep.subr.bf16.mxu0 %v8388_v31  ;;  %v5863_v41 = vld [vmem:[%s12573_s9 + $0x380] sm:$0xff] }
 0x8bb   : > { %8387 = vmatpush3.bf16.msra.mxu1 %v8386_v2  ;;  %v8432_v2 = vpack.c.bf16 %v5774_v7, %v5773_v34  ;;  %v8450_v34 = vpack.c.bf16 %v5766_v33, %v5765_v6  ;;  %v5815_v33 = vld [vmem:[%s12573_s9 + $0x200] sm:$0xff] }
 0x8bc   : > { %5556 = vmatmul.mubr.f32.vlgmr.msra.gmra.mrb[232].mxu0 %v11847_v32  ;;  %v5324_v32 = vld [vmem:[%s12571_s7 + $0x430] sm:$0xff]  ;;  %8421 = vmatprep.subr.bf16.mxu1 %v8420_v55 }
 0x8bd   : > { %5560 = vmatprep.mubr.f32.mxu0 %v11882_v62  ;;  %8391 = vmatpush3.bf16.msra.mxu0 %v8388_v31  ;;  %v5806_v31 = vld [vmem:[%s12573_s9 + $0x1b8] sm:$0xff]  ;;  %v5761_v55 = vld [vmem:[%s12573_s9 + $0x50] sm:$0xff] }
 0x8be   : > { %5631 = vmatmul.mubr.f32.vlgmr.msra.gmra.mrb[82].mxu1 %v11878_v60  ;;  %8393 = vmatprep.subr.bf16.mxu0 %v8392_v38  ;;  %v5325_v60 = vld [vmem:[%s12571_s7 + $0x438] sm:$0xff] }
 0x8bf   : > { %5635 = vmatprep.mubr.f32.mxu1 %v11891_v42  ;;  %v8400_v62 = vpack.c.bf16 %v5325_v60, %v5324_v32  ;;  %v5326_v42 = vld [vmem:[%s12571_s7 + $0x440] sm:$0xff] }
 0x8c0   : > { %5561 = vmatmul.mubr.f32.gmra.mrb[234].mxu0 %v11880_v25  ;;  %v5327_v25 = vld [vmem:[%s12571_s7 + $0x448] sm:$0xff]  ;;  %v5775_v32 = vld [vmem:[%s12573_s9 + $0xc0] sm:$0xff] }
 0x8c1   : > { %7607 = vmatprep.mubr.f32.mxu0 %v11893_v21  ;;  %8395 = vmatpush3.bf16.msra.mxu0 %v8392_v38  ;;  %v5329_v21 = vld [vmem:[%s12571_s7 + $0x458] sm:$0xff]  ;;  %v8464_v38 = vpack.c.bf16 %v5806_v31, %v5805_v49 }
 0x8c2   : > { %5636 = vmatmul.mubr.f32.gmra.mrb[84].mxu1 %v11884_v23  ;;  %8397 = vmatprep.subr.bf16.mxu0 %v8396_v11  ;;  %v8404_v23 = vpack.c.bf16 %v5327_v25, %v5326_v42  ;;  %v8408_v3 = vpack.c.bf16 %v5329_v21, %v5328_v58  ;;  %v5807_v42 = vld [vmem:[%s12573_s9 + $0x1c0] sm:$0xff]  ;;  %v5808_v25 = vld [vmem:[%s12573_s9 + $0x1c8] sm:$0xff] }
 0x8c3   : > { %v8468_v58 = vpack.c.bf16 %v5808_v25, %v5807_v42  ;;  %v5759_v21 = vld [vmem:[%s12573_s9 + $0x40] sm:$0xff] }
 0x8c5   : > { %8399 = vmatpush3.bf16.msra.mxu0 %v8396_v11  ;;  %v5790_v11 = vld [vmem:[%s12573_s9 + $0x138] sm:$0xff] }
 0x8c6   : > { %8401 = vmatprep.subr.bf16.mxu0 %v8400_v62  ;;  %v8466_v60 = vpack.c.bf16 %v5790_v11, %v5789_v9 }
 0x8c9   : > { %8403 = vmatpush3.bf16.msra.mxu0 %v8400_v62  ;;  %v5776_v62 = vld [vmem:[%s12573_s9 + $0xc8] sm:$0xff] }
 0x8ca   : > { %8405 = vmatprep.subr.bf16.mxu0 %v8404_v23 }
 0x8cd   : > { %8407 = vmatpush3.bf16.msra.mxu0 %v8404_v23  ;;  %v8436_v23 = vpack.c.bf16 %v5776_v62, %v5775_v32 }
 0x8ce   : > { %8409 = vmatprep.subr.bf16.mxu0 %v8408_v3 }
 0x8d1   : > { %8411 = vmatpush3.bf16.msra.mxu0 %v8408_v3  ;;  %v5760_v3 = vld [vmem:[%s12573_s9 + $0x48] sm:$0xff] }
 0x8d2   : > { %8413 = vmatprep.subr.bf16.mxu0 %v8412_v0  ;;  %v8438_v15 = vpack.c.bf16 %v5760_v3, %v5759_v21 }
 0x8d5   : > { %8415 = vmatpush3.bf16.msra.mxu0 %v8412_v0  ;;  %v5792_v0 = vld [vmem:[%s12573_s9 + $0x148] sm:$0xff] }
 0x8d6   : > { %8417 = vmatprep.subr.bf16.mxu0 %v8416_v61 }
 0x8d9   : > { %8419 = vmatpush3.bf16.msra.mxu0 %v8416_v61  ;;  %v8470_v61 = vpack.c.bf16 %v5792_v0, %v5791_v27 }
 0x8da   : > { %8453 = vmatprep.subr.bf16.mxu0 %v8452_v18  ;;  %v5794_v18 = vld [vmem:[%s12573_s9 + $0x158] sm:$0xff] }
 0x8dc   : > { %7608 = vmatmul.mubr.f32.vlgmr.msra.gmra.mrb[236].mxu0 %v11900_v5  ;;  %v5751_v5 = vld [vmem:[%s12573_s9] sm:$0xff] }
 0x8dd   : > { %v8422_v14 = vpack.c.bf16 %v5752_v43, %v5751_v5  ;;  %8455 = vmatpush3.bf16.msra.mxu0 %v8454_v8  ;;  %v5762_v5 = vld [vmem:[%s12573_s9 + $0x58] sm:$0xff]  ;;  %v5793_v43 = vld [vmem:[%s12573_s9 + $0x150] sm:$0xff] }
 0x8de   : > { %8457 = vmatprep.subr.bf16.mxu0 %v8456_v29  ;;  %v8474_v8 = vpack.c.bf16 %v5794_v18, %v5793_v43  ;;  %v8476_v29 = vpack.c.bf16 %v5812_v19, %v5811_v59 }
 0x8df   : > { %8423 = vmatpush3.bf16.msra.mxu1 %v8422_v14  ;;  %v8442_v14 = vpack.c.bf16 %v5762_v5, %v5761_v55 }
 0x8e0   : > { %8425 = vmatprep.subr.bf16.mxu1 %v8424_v35  ;;  %v5764_v35 = vld [vmem:[%s12573_s9 + $0x68] sm:$0xff] }
 0x8e1   : > { %8459 = vmatpush3.bf16.msra.mxu0 %v8458_v4  ;;  %v8446_v52 = vpack.c.bf16 %v5764_v35, %v5763_v28  ;;  %v8478_v4 = vpack.c.bf16 %v5796_v10, %v5795_v17 }
 0x8e2   : > { %8461 = vmatprep.subr.bf16.mxu0 %v8460_v47  ;;  %v5797_v47 = vld [vmem:[%s12573_s9 + $0x170] sm:$0xff] }
 0x8e3   : > { %8427 = vmatpush3.bf16.msra.mxu1 %v8426_v48  ;;  %v5782_v48 = vld [vmem:[%s12573_s9 + $0xf8] sm:$0xff]  ;;  %v8482_v7 = vpack.c.bf16 %v5798_v37, %v5797_v47  ;;  %v5816_v47 = vld [vmem:[%s12573_s9 + $0x208] sm:$0xff] }
 0x8e4   : > { %8429 = vmatprep.subr.bf16.mxu1 %v8428_v57  ;;  %v8448_v57 = vpack.c.bf16 %v5782_v48, %v5781_v30  ;;  %v5848_v37 = vld [vmem:[%s12573_s9 + $0x308] sm:$0xff] }
 0x8e5   : > { %8463 = vmatpush3.bf16.msra.mxu0 %v8462_v53  ;;  %v5864_v53 = vld [vmem:[%s12573_s9 + $0x388] sm:$0xff] }
 0x8e6   : > { %8465 = vmatprep.subr.bf16.mxu0 %v8464_v38 }
 0x8e7   : > { %8431 = vmatpush3.bf16.msra.mxu1 %v8430_v50  ;;  %v5832_v50 = vld [vmem:[%s12573_s9 + $0x288] sm:$0xff] }
 0x8e8   : > { %8433 = vmatprep.subr.bf16.mxu1 %v8432_v2  ;;  %v8484_v49 = vpack.c.bf16 %v5832_v50, %v5831_v63  ;;  %v8516_v2 = vpack.c.bf16 %v5864_v53, %v5863_v41  ;;  %v5833_v63 = vld [vmem:[%s12573_s9 + $0x290] sm:$0xff]  ;;  %v5834_v50 = vld [vmem:[%s12573_s9 + $0x298] sm:$0xff] }
 0x8e9   : > { %8467 = vmatpush3.bf16.msra.mxu0 %v8466_v60  ;;  %v5865_v41 = vld [vmem:[%s12573_s9 + $0x390] sm:$0xff]  ;;  %v5866_v53 = vld [vmem:[%s12573_s9 + $0x398] sm:$0xff] }
 0x8ea   : > { %8469 = vmatprep.subr.bf16.mxu0 %v8468_v58 }
 0x8eb   : > { %8435 = vmatpush3.bf16.msra.mxu1 %v8434_v13 }
 0x8ec   : > { %8437 = vmatprep.subr.bf16.mxu1 %v8436_v23 }
 0x8ed   : > { %8471 = vmatpush3.bf16.msra.mxu0 %v8470_v61 }
 0x8ee   : > { %8473 = vmatprep.subr.bf16.mxu0 %v8472_v12 }
 0x8ef   : > { %8439 = vmatpush3.bf16.msra.mxu1 %v8438_v15 }
 0x8f0   : > { %8441 = vmatprep.subr.bf16.mxu1 %v8440_v20 }
 0x8f1   : > { %8475 = vmatpush3.bf16.msra.mxu0 %v8474_v8 }
 0x8f2   : > { %8477 = vmatprep.subr.bf16.mxu0 %v8476_v29 }
 0x8f3   : > { %8443 = vmatpush3.bf16.msra.mxu1 %v8442_v14 }
 0x8f4   : > { %8445 = vmatprep.subr.bf16.mxu1 %v8444_v45 }
 0x8f5   : > { %8479 = vmatpush3.bf16.msra.mxu0 %v8478_v4 }
 0x8f6   : > { %8481 = vmatprep.subr.bf16.mxu0 %v8480_v46  ;;  %v5847_v46 = vld [vmem:[%s12573_s9 + $0x300] sm:$0xff] }
 0x8f7   : > { %8447 = vmatpush3.bf16.msra.mxu1 %v8446_v52 }
 0x8f8   : > { %8449 = vmatprep.subr.bf16.mxu1 %v8448_v57 }
 0x8f9   : > { %8483 = vmatpush3.bf16.msra.mxu0 %v8482_v7  ;;  %v5818_v7 = vld [vmem:[%s12573_s9 + $0x218] sm:$0xff] }
 0x8fa   : > { %8517 = vmatprep.subr.bf16.mxu0 %v8516_v2  ;;  %v8486_v2 = vpack.c.bf16 %v5816_v47, %v5815_v33 }
 0x8fb   : > { %8451 = vmatpush3.bf16.msra.mxu1 %v8450_v34  ;;  %v5817_v34 = vld [vmem:[%s12573_s9 + $0x210] sm:$0xff] }
 0x8fc   : > { %8485 = vmatprep.subr.bf16.mxu1 %v8484_v49  ;;  %v5849_v49 = vld [vmem:[%s12573_s9 + $0x310] sm:$0xff] }
 0x96e   : > { %v6860_v31 = vpop.f32.mrb[228].mxu0 }
 0x96f   : > { %v6861_v38 = vpop.f32.mrb[229].mxu0 }
 0x970   : > { %v6898_v40 = vpop.f32.mrb[78].mxu1  ;;  %v6862_v9 = vadd.f32 %v6861_v38, %v6860_v31  ;;  %v8518_v31 = vpack.c.bf16 %v5848_v37, %v5847_v46  ;;  %v5836_v38 = vld [vmem:[%s12573_s9 + $0x2a8] sm:$0xff]  ;;  %v5825_v46 = vld [vmem:[%s12573_s9 + $0x250] sm:$0xff]  ;;  %v5826_v37 = vld [vmem:[%s12573_s9 + $0x258] sm:$0xff] }
 0x971   : > { %v6899_v13 = vpop.f32.mrb[79].mxu1 }
 0x972   : > { %v6900_v11 = vadd.f32 %v6899_v13, %v6898_v40  ;;  %v5408_v32 = vadd.f32 %v6862_v9, %v6401_v1  ;;  %v5850_v40 = vld [vmem:[%s12573_s9 + $0x318] sm:$0xff] }
 0x973   : > { %v6863_v60 = vpop.f32.mrb[230].mxu0 }
 0x974   : > { %v6864_v42 = vpop.f32.mrb[231].mxu0  ;;  %v5483_v23 = vadd.f32 %v6900_v11, %v5408_v32 }
 0x975   : > { %v6901_v62 = vpop.f32.mrb[80].mxu1  ;;  %v6865_v58 = vadd.f32 %v6864_v42, %v6863_v60  ;;  %v8488_v60 = vpack.c.bf16 %v5834_v50, %v5833_v63  ;;  %v5867_v42 = vld [vmem:[%s12573_s9 + $0x3a0] sm:$0xff] }
 0x976   : > { %v6902_v25 = vpop.f32.mrb[81].mxu1 }
 0x977   : > { %v6903_v21 = vadd.f32 %v6902_v25, %v6901_v62  ;;  %v5413_v3 = vadd.f32 %v6865_v58, %v6401_v1  ;;  %v5835_v1 = vld [vmem:[%s12573_s9 + $0x2a0] sm:$0xff]  ;;  %v8520_v62 = vpack.c.bf16 %v5866_v53, %v5865_v41  ;;  %v5868_v25 = vld [vmem:[%s12573_s9 + $0x3a8] sm:$0xff]  ;;  %v5857_v41 = vld [vmem:[%s12573_s9 + $0x350] sm:$0xff] }
 0x978   : > { %v5858_v53 = vld [vmem:[%s12573_s9 + $0x358] sm:$0xff] }
 0x979   : > { %v5488_v27 = vadd.f32 %v6903_v21, %v5413_v3  ;;  %v8490_v3 = vpack.c.bf16 %v5818_v7, %v5817_v34  ;;  %v5843_v34 = vld [vmem:[%s12573_s9 + $0x2e0] sm:$0xff]  ;;  %v5844_v7 = vld [vmem:[%s12573_s9 + $0x2e8] sm:$0xff] }
 0x98f   : > { %v6936_v15 = vpop.f32.mrb[232].mxu0 }
 0x990   : > { %v6937_v56 = vpop.f32.mrb[233].mxu0 }
 0x991   : > { %v6974_v0 = vpop.f32.mrb[82].mxu1  ;;  %v6938_v61 = vadd.f32 %v6937_v56, %v6936_v15  ;;  %v5820_v15 = vld [vmem:[%s12573_s9 + $0x228] sm:$0xff]  ;;  %v8524_v56 = vpack.c.bf16 %v5868_v25, %v5867_v42  ;;  %v5877_v42 = vld [vmem:[%s12573_s9 + $0x3f0] sm:$0xff]  ;;  %v5878_v25 = vld [vmem:[%s12573_s9 + $0x3f8] sm:$0xff] }
 0x992   : > { %v6975_v54 = vpop.f32.mrb[83].mxu1 }
 0x993   : > { %v6976_v20 = vadd.f32 %v6975_v54, %v6974_v0  ;;  %v5558_v16 = vadd.f32 %v6938_v61, %v5483_v23  ;;  %v6939_v22 = vpop.f32.mrb[234].mxu0  ;;  %v5819_v23 = vld [vmem:[%s12573_s9 + $0x220] sm:$0xff]  ;;  %v8492_v0 = vpack.c.bf16 %v5836_v38, %v5835_v1  ;;  %v5852_v61 = vld [vmem:[%s12573_s9 + $0x328] sm:$0xff] }
 0x994   : > { %v6940_v12 = vpop.f32.mrb[235].mxu0  ;;  %v5851_v54 = vld [vmem:[%s12573_s9 + $0x320] sm:$0xff]  ;;  %v5828_v38 = vld [vmem:[%s12573_s9 + $0x268] sm:$0xff] }
 0x995   : > { %v6977_v55 = vpop.f32.mrb[84].mxu1  ;;  %v6941_v43 = vadd.f32 %v6940_v12, %v6939_v22  ;;  %v5633_v14 = vadd.f32 %v6976_v20, %v5558_v16  ;;  %v5837_v20 = vld [vmem:[%s12573_s9 + $0x2b0] sm:$0xff]  ;;  %v5838_v16 = vld [vmem:[%s12573_s9 + $0x2b8] sm:$0xff]  ;;  %v8494_v12 = vpack.c.bf16 %v5820_v15, %v5819_v23  ;;  %v5827_v1 = vld [vmem:[%s12573_s9 + $0x260] sm:$0xff] }
 0x996   : > { %v6978_v5 = vpop.f32.mrb[85].mxu1  ;;  %v5869_v22 = vld [vmem:[%s12573_s9 + $0x3b0] sm:$0xff]  ;;  %v8510_v23 = vpack.c.bf16 %v5828_v38, %v5827_v1  ;;  %v5830_v15 = vld [vmem:[%s12573_s9 + $0x278] sm:$0xff] }
 0x997   : > { %v6979_v18 = vadd.f32 %v6978_v5, %v6977_v55  ;;  %v5563_v26 = vadd.f32 %v6941_v43, %v5488_v27  ;;  %v8522_v27 = vpack.c.bf16 %v5850_v40, %v5849_v49  ;;  %v5870_v55 = vld [vmem:[%s12573_s9 + $0x3b8] sm:$0xff]  ;;  %v8526_v5 = vpack.c.bf16 %v5852_v61, %v5851_v54  ;;  %v5821_v43 = vld [vmem:[%s12573_s9 + $0x230] sm:$0xff]  ;;  %v5875_v49 = vld [vmem:[%s12573_s9 + $0x3e0] sm:$0xff] }
 0x998   : > { %v8538_v40 = vpack.c.bf16 %v5858_v53, %v5857_v41 }
 0x999   : > { %v5638_v36 = vadd.f32 %v6979_v18, %v5563_v26  ;;  %v5822_v18 = vld [vmem:[%s12573_s9 + $0x238] sm:$0xff]  ;;  %v8528_v26 = vpack.c.bf16 %v5870_v55, %v5869_v22  ;;  %v5881_v55 = vld [vmem:[%s12573_s9 + $0x410] sm:$0xff] }
 0x9af   : > { %v7609_v59 = vpop.f32.mrb[236].mxu0 }
 0x9b0   : > { %v5713_v8 = vadd.f32 %v7609_v59, %v5638_v36  ;;  %v5707_v45 = vpop.f32.mrb[237].mxu0  ;;  %v5853_v36 = vld [vmem:[%s12573_s9 + $0x330] sm:$0xff]  ;;  %v5854_v59 = vld [vmem:[%s12573_s9 + $0x338] sm:$0xff] }
 0x9b1   : > { %v5708_v19 = vadd.f32 %v5707_v45, %v5633_v14  ;;  %v8496_v14 = vpack.c.bf16 %v5838_v16, %v5837_v20  ;;  %v5840_v45 = vld [vmem:[%s12573_s9 + $0x2c8] sm:$0xff]  ;;  %v5879_v20 = vld [vmem:[%s12573_s9 + $0x400] sm:$0xff] }
 0x9b2   : > { %vm5717_vm12 = vcmp.gt.f32.partialorder %v5713_v8, 0.0  ;;  %v5719_v28 = vmul.f32 0.1, %v5713_v8  ;;  %v5880_v16 = vld [vmem:[%s12573_s9 + $0x408] sm:$0xff] }
 0x9b3   : > { %vm5716_vm14 = vcmp.gt.f32.partialorder %v5708_v19, 0.0  ;;  %v5718_v35 = vmul.f32 0.1, %v5708_v19  ;;  %v8549_v22 = vpack.c.bf16 %v5880_v16, %v5879_v20 }
 0x9b4   : > { %v5721_v29 = vsel %vm5717_vm12, %v5713_v8, %v5719_v28  ;;  %v5839_v8 = vld [vmem:[%s12573_s9 + $0x2c0] sm:$0xff]  ;;  %v5872_v28 = vld [vmem:[%s12573_s9 + $0x3c8] sm:$0xff] }
 0x9b5   : > { %5723 = vst [vmem:[#allocation3 + $0x8] sm:$0xff] %v5721_v29  ;;  %v5720_v17 = vsel %vm5716_vm14, %v5708_v19, %v5718_v35  ;;  %v5871_v19 = vld [vmem:[%s12573_s9 + $0x3c0] sm:$0xff]  ;;  %v8498_v35 = vpack.c.bf16 %v5822_v18, %v5821_v43  ;;  %v8530_v29 = vpack.c.bf16 %v5854_v59, %v5853_v36  ;;  %v5885_v59 = vld [vmem:[%s12573_s9 + $0x430] sm:$0xff] }
 0x9b6   : > { %5722 = vst [vmem:[#allocation3] sm:$0xff] %v5720_v17  ;;  %v5823_v17 = vld [vmem:[%s12573_s9 + $0x240] sm:$0xff] }
 0x9bc   : > { %v5738_v10 = vld [vmem:[#allocation3 + $0xb] sm:$0x1]  ;;  %v5736_v30 = vld [vmem:[#allocation3 + $0xa] sm:$0x1]  ;;  %v5740_v48 = vld [vmem:[#allocation3 + $0xc] sm:$0x1] }
 0x9bd   : > { %v5724_v24 = vld [vmem:[#allocation3] sm:$0x1]  ;;  %v5726_v51 = vld [vmem:[#allocation3 + $0x1] sm:$0x1]  ;;  %v5730_v52 = vld [vmem:[#allocation3 + $0x5] sm:$0x1] }
 0x9be   : > { %5739 = vst [vmem:[#allocation2 + $0x38] sm:$0x1] %v5738_v10  ;;  %5737 = vst [vmem:[#allocation2 + $0x30] sm:$0x1] %v5736_v30  ;;  %v5728_v4 = vld [vmem:[#allocation3 + $0x2] sm:$0x1]  ;;  %v8500_v30 = vpack.c.bf16 %v5840_v45, %v5839_v8 }
 0x9bf   : > { %5741 = vst [vmem:[#allocation2 + $0x40] sm:$0x1] %v5740_v48  ;;  %5725 = vst [vmem:[#allocation2] sm:$0x1] %v5724_v24  ;;  %v5734_v57 = vld [vmem:[#allocation3 + $0x7] sm:$0x1]  ;;  %v8532_v48 = vpack.c.bf16 %v5872_v28, %v5871_v19 }
 0x9c0   : > { %5727 = vst [vmem:[#allocation2 + $0x8] sm:$0x1] %v5726_v51  ;;  %5731 = vst [vmem:[#allocation2 + $0x18] sm:$0x1] %v5730_v52  ;;  %v5732_v6 = vld [vmem:[#allocation3 + $0x6] sm:$0x1] }
 0x9c1   : > { %5729 = vst [vmem:[#allocation2 + $0x10] sm:$0x1] %v5728_v4  ;;  %5735 = vst [vmem:[#allocation2 + $0x28] sm:$0x1] %v5734_v57  ;;  %v5824_v10 = vld [vmem:[%s12573_s9 + $0x248] sm:$0xff]  ;;  %v5855_v24 = vld [vmem:[%s12573_s9 + $0x340] sm:$0xff] }
 0x9c2   : > { %5733 = vst [vmem:[#allocation2 + $0x20] sm:$0x1] %v5732_v6  ;;  %v5856_v51 = vld [vmem:[%s12573_s9 + $0x348] sm:$0xff]  ;;  %v5841_v52 = vld [vmem:[%s12573_s9 + $0x2d0] sm:$0xff]  ;;  %v5842_v4 = vld [vmem:[%s12573_s9 + $0x2d8] sm:$0xff]  ;;  %v8502_v33 = vpack.c.bf16 %v5824_v10, %v5823_v17 }
 0x9c3   : > { %v5873_v57 = vld [vmem:[%s12573_s9 + $0x3d0] sm:$0xff]  ;;  %v5874_v6 = vld [vmem:[%s12573_s9 + $0x3d8] sm:$0xff]  ;;  %v8534_v47 = vpack.c.bf16 %v5856_v51, %v5855_v24  ;;  %v8504_v63 = vpack.c.bf16 %v5842_v4, %v5841_v52  ;;  %v5887_v45 = vld [vmem:[%s12573_s9 + $0x440] sm:$0xff] }
 0x9c4   : > { %v8536_v50 = vpack.c.bf16 %v5874_v6, %v5873_v57  ;;  %v5888_v19 = vld [vmem:[%s12573_s9 + $0x448] sm:$0xff]  ;;  %v5891_v10 = vld [vmem:[%s12573_s9 + $0x460] sm:$0xff]  ;;  %v5893_v24 = vld [vmem:[%s12573_s9 + $0x470] sm:$0xff] }
 0x9c5   : > { %v5749_v21 = vld [vmem:[#allocation2 + $0x38] sm:$0xff]  ;;  %v5748_v43 = vld [vmem:[#allocation2 + $0x30] sm:$0xff]  ;;  %v8561_v28 = vpack.c.bf16 %v5888_v19, %v5887_v45 }
 0x9c6   : > { %v5742_v11 = vld [vmem:[#allocation2] sm:$0xff]  ;;  %v5894_v51 = vld [vmem:[%s12573_s9 + $0x478] sm:$0xff] }
 0x9c7   : > { %v5743_v13 = vld [vmem:[#allocation2 + $0x8] sm:$0xff]  ;;  %v5745_v9 = vld [vmem:[#allocation2 + $0x18] sm:$0xff]  ;;  %v8570_v52 = vpack.c.bf16 %v5894_v51, %v5893_v24  ;;  %v5750_v4 = vld [vmem:[#allocation2 + $0x40] sm:$0xff] }
 0x9c8   : > { %5959 = vmatprep.mubr.f32.mxu1 %v5743_v13  ;;  %6029 = vmatprep.mubr.f32.mxu0 %v5745_v9  ;;  %v5744_v32 = vld [vmem:[#allocation2 + $0x10] sm:$0xff]  ;;  %v5747_v58 = vld [vmem:[#allocation2 + $0x28] sm:$0xff]  ;;  %v8508_v13 = vpack.c.bf16 %v5844_v7, %v5843_v34 }
 0x9c9   : > { %5960 = vmatmul.mubr.f32.vlgmr.msra.gmra.mrb[86].mxu1 %v5742_v11  ;;  %6030 = vmatmul.mubr.f32.vlgmr.msra.gmra.mrb[238].mxu0 %v5744_v32  ;;  %v5859_v11 = vld [vmem:[%s12573_s9 + $0x360] sm:$0xff]  ;;  %v5860_v32 = vld [vmem:[%s12573_s9 + $0x368] sm:$0xff] }
 0x9ca   : > { %8487 = vmatpush3.bf16.msra.mxu1 %v8486_v2  ;;  %8519 = vmatpush3.bf16.msra.mxu0 %v8518_v31  ;;  %v5876_v2 = vld [vmem:[%s12573_s9 + $0x3e8] sm:$0xff]  ;;  %v8506_v31 = vpack.c.bf16 %v5826_v37, %v5825_v46 }
 0x9cb   : > { %6099 = vmatprep.mubr.f32.mxu1 %v5747_v58  ;;  %6169 = vmatprep.mubr.f32.mxu0 %v5749_v21  ;;  %v8540_v9 = vpack.c.bf16 %v5876_v2, %v5875_v49  ;;  %v8542_v58 = vpack.c.bf16 %v5860_v32, %v5859_v11  ;;  %v5829_v21 = vld [vmem:[%s12573_s9 + $0x270] sm:$0xff] }
 0x9cc   : > { %8489 = vmatprep.subr.bf16.mxu1 %v8488_v60  ;;  %8521 = vmatprep.subr.bf16.mxu0 %v8520_v62  ;;  %v5845_v60 = vld [vmem:[%s12573_s9 + $0x2f0] sm:$0xff]  ;;  %v5846_v62 = vld [vmem:[%s12573_s9 + $0x2f8] sm:$0xff]  ;;  %v8514_v54 = vpack.c.bf16 %v5830_v15, %v5829_v21 }
 0x9ce   : > { %8491 = vmatpush3.bf16.msra.mxu1 %v8490_v3  ;;  %8523 = vmatpush3.bf16.msra.mxu0 %v8522_v27  ;;  %v8512_v3 = vpack.c.bf16 %v5846_v62, %v5845_v60  ;;  %v8544_v27 = vpack.c.bf16 %v5878_v25, %v5877_v42 }
 0x9cf   : > { %8493 = vmatprep.subr.bf16.mxu1 %v8492_v0  ;;  %8525 = vmatprep.subr.bf16.mxu0 %v8524_v56  ;;  %v5861_v0 = vld [vmem:[%s12573_s9 + $0x370] sm:$0xff]  ;;  %v5862_v56 = vld [vmem:[%s12573_s9 + $0x378] sm:$0xff] }
 0x9d0   : > { %v8546_v61 = vpack.c.bf16 %v5862_v56, %v5861_v0 }
 0x9d2   : > { %8495 = vmatpush3.bf16.msra.mxu1 %v8494_v12  ;;  %8527 = vmatpush3.bf16.msra.mxu0 %v8526_v5  ;;  %v5882_v12 = vld [vmem:[%s12573_s9 + $0x418] sm:$0xff]  ;;  %v5746_v5 = vld [vmem:[#allocation2 + $0x20] sm:$0xff] }
 0x9d3   : > { %8497 = vmatprep.subr.bf16.mxu1 %v8496_v14  ;;  %8529 = vmatprep.subr.bf16.mxu0 %v8528_v26  ;;  %v8552_v18 = vpack.c.bf16 %v5882_v12, %v5881_v55  ;;  %v5883_v14 = vld [vmem:[%s12573_s9 + $0x420] sm:$0xff]  ;;  %v5884_v26 = vld [vmem:[%s12573_s9 + $0x428] sm:$0xff] }
 0x9d4   : > { %v8555_v36 = vpack.c.bf16 %v5884_v26, %v5883_v14 }
 0x9d6   : > { %8499 = vmatpush3.bf16.msra.mxu1 %v8498_v35  ;;  %8531 = vmatpush3.bf16.msra.mxu0 %v8530_v29  ;;  %v5889_v35 = vld [vmem:[%s12573_s9 + $0x450] sm:$0xff]  ;;  %v5890_v29 = vld [vmem:[%s12573_s9 + $0x458] sm:$0xff] }
 0x9d7   : > { %8501 = vmatprep.subr.bf16.mxu1 %v8500_v30  ;;  %8533 = vmatprep.subr.bf16.mxu0 %v8532_v48  ;;  %v8564_v17 = vpack.c.bf16 %v5890_v29, %v5889_v35  ;;  %v5892_v30 = vld [vmem:[%s12573_s9 + $0x468] sm:$0xff] }
 0x9d8   : > { %v8567_v48 = vpack.c.bf16 %v5892_v30, %v5891_v10 }
 0x9da   : > { %8503 = vmatpush3.bf16.msra.mxu1 %v8502_v33  ;;  %8535 = vmatpush3.bf16.msra.mxu0 %v8534_v47 }
 0x9db   : > { %8505 = vmatprep.subr.bf16.mxu1 %v8504_v63  ;;  %8537 = vmatprep.subr.bf16.mxu0 %v8536_v50 }
 0x9de   : > { %8507 = vmatpush3.bf16.msra.mxu1 %v8506_v31  ;;  %8539 = vmatpush3.bf16.msra.mxu0 %v8538_v40  ;;  %v6245_v40 = vld [vmem:[%s12574_s10] sm:$0x1] }
 0x9df   : > { %8509 = vmatprep.subr.bf16.mxu1 %v8508_v13  ;;  %8541 = vmatprep.subr.bf16.mxu0 %v8540_v9 }
 0x9e2   : > { %8511 = vmatpush3.bf16.msra.mxu1 %v8510_v23  ;;  %8543 = vmatpush3.bf16.msra.mxu0 %v8542_v58 }
 0x9e3   : > { %8513 = vmatprep.subr.bf16.mxu1 %v8512_v3  ;;  %8545 = vmatprep.subr.bf16.mxu0 %v8544_v27 }
 0x9e6   : > { %8515 = vmatpush3.bf16.msra.mxu1 %v8514_v54  ;;  %8547 = vmatpush3.bf16.msra.mxu0 %v8546_v61 }
 0x9e7   : > { %8548 = vmatprep.subr.bf16.mxu1 %v12606_v44 }
 0x9e9   : > { %6100 = vmatmul.mubr.f32.vlgmr.msra.gmra.mrb[88].mxu1 %v5746_v5  ;;  %6170 = vmatmul.mubr.f32.vlgmr.msra.gmra.mrb[240].mxu0 %v5748_v43 }
 0x9ea   : > { %8550 = vmatpush3.bf16.msra.mxu1 %v8549_v22  ;;  %7642 = vmatprep.mubr.msk.f32.mxu1 %vm8869_vm0, %v8870_v39  ;;  %v5886_v39 = vld [vmem:[%s12573_s9 + $0x438] sm:$0xff] }
 0x9eb   : > { %8551 = vmatprep.subr.bf16.mxu1 %v12606_v44  ;;  %v8558_v8 = vpack.c.bf16 %v5886_v39, %v5885_v59 }
 0x9ee   : > { %8553 = vmatpush3.bf16.msra.mxu1 %v8552_v18 }
 0x9ef   : > { %8554 = vmatprep.subr.bf16.mxu1 %v12606_v44 }
 0x9f2   : > { %8556 = vmatpush3.bf16.msra.mxu1 %v8555_v36 }
 0x9f3   : > { %8557 = vmatprep.subr.bf16.mxu1 %v12606_v44 }
 0x9f6   : > { %8559 = vmatpush3.bf16.msra.mxu1 %v8558_v8 }
 0x9f7   : > { %8560 = vmatprep.subr.bf16.mxu1 %v12606_v44 }
 0x9fa   : > { %8562 = vmatpush3.bf16.msra.mxu1 %v8561_v28 }
 0x9fb   : > { %8563 = vmatprep.subr.bf16.mxu1 %v12606_v44 }
 0x9fe   : > { %8565 = vmatpush3.bf16.msra.mxu1 %v8564_v17 }
 0x9ff   : > { %8566 = vmatprep.subr.bf16.mxu1 %v12606_v44 }
 0xa02   : > { %8568 = vmatpush3.bf16.msra.mxu1 %v8567_v48 }
 0xa03   : > { %8569 = vmatprep.subr.bf16.mxu1 %v12606_v44 }
 0xa06   : > { %8571 = vmatpush3.bf16.msra.mxu1 %v8570_v52 }
 0xa09   : > { %7643 = vmatmul.mubr.f32.vlgmr.msra.gmra.mrb[90].mxu1 %v5750_v4 }
 0xa9c   : > { %v7030_v57 = vpop.f32.mrb[86].mxu1  ;;  %v7065_v6 = vpop.f32.mrb[238].mxu0 }
 0xa9d   : > { %v7031_v33 = vpop.f32.mrb[87].mxu1  ;;  %v7066_v47 = vpop.f32.mrb[239].mxu0 }
 0xa9e   : > { %v7032_v46 = vadd.f32 %v7031_v33, %v7030_v57  ;;  %v7067_v37 = vadd.f32 %v7066_v47, %v7065_v6 }
 0xaa0   : > { %v6032_v63 = vadd.f32 %v7067_v37, %v7032_v46 }
 0xabc   : > { %v7100_v50 = vpop.f32.mrb[88].mxu1  ;;  %v7135_v41 = vpop.f32.mrb[240].mxu0 }
 0xabd   : > { %v7101_v53 = vpop.f32.mrb[89].mxu1  ;;  %v7136_v34 = vpop.f32.mrb[241].mxu0 }
 0xabe   : > { %v7102_v7 = vadd.f32 %v7101_v53, %v7100_v50  ;;  %v7137_v49 = vadd.f32 %v7136_v34, %v7135_v41 }
 0xac0   : > { %v6102_v2 = vadd.f32 %v7102_v7, %v6032_v63 }
 0xac2   : > { %v6172_v44 = vadd.f32 %v7137_v49, %v6102_v2 }
 0xadc   : > { %v6241_v31 = vpop.f32.mrb[90].mxu1 }
 0xadd   : > { %v6242_v1 = vadd.f32 %v6241_v31, %v6172_v44  ;;  %v7644_v38 = vpop.f32.mrb[91].mxu1 }
 0xadf   : > { %v6246_v13 = vadd.f32 %v6245_v40, %v6242_v1 }
 0xae1   : > { %6247 = vst [vmem:[%s459_s15] sm:$0x1] %v6246_v13 }
 0xae2   : > { %8817 = shalt.err (!%p8814_p3)
}
 0xae3   : > { %s8818_s22 = scalar_lea.hbm %s12522_s0, 16  ;;  %s8822_s15 = scalar_lea.hbm %s12578_s14, 32 }
 0xae4   : > { %p8819_p4 = scmp.ne.s32.totalorder %s12522_s0, %s8818_s22  ;;  %p8823_p9 = scmp.lt.u32.totalorder %s12522_s0, %s12578_s14 }
 0xae5   : > { %p8824_p10 = scmp.lt.u32.totalorder %s8822_s15, %s8818_s22  ;;  %p8826_p12 = scmp.lt.u32.totalorder %s8818_s22, %s12522_s0 }
 0xae6   : > { %p8820_p7 = pnand %p8819_p4, %p8985_p5 }
 0xae7   : > { %p8825_p11 = por %p8824_p10, %p8823_p9 }
 0xae8   : > { %p8821_p8 = pneg %p8820_p7 }
 0xae9   : > { %p8827_p13 = por %p8826_p12, %p8825_p11 }
 0xaeb   : > { %p8828_p0 = pnand %p8827_p13, %p8821_p8 }
 0xaed   : > { %8831 = shalt.err (!%p8828_p0)
}
 0xaee   : > { %8762 = dma.vmem_to_hbm [thread:$0]  (%p8985_p5), %s12524_s21, 16, %s12522_s0, %s6249_s28  }
 0xaef PF: > { %p8768_p1 = scmp.ge.s32.totalorder %s8866_s16, 2  ;;  %s6273_s18 = sand.u32 1, %s8854_s29  }
 0xaf0   : > { %s6274_s17 = scalar_lea.sflag [#allocation8], %s6273_s18 }
 0xaf1   : > { %p8765_p2 = pnand %p8768_p1, %p8989_p6 }
 0xaf3   : > { %8849 = dma.done.wait (!%p8765_p2), %s6274_s17, 16  }
 0xaf4   : > { %8851 = vsyncadd (!%p8765_p2), %s6274_s17, 4294967280  ;;  %s12621_s1 = sld [smem:[#allocation10_spill]]  ;;  %s12622_s15 = sld [smem:[#allocation11_spill]] }
 0xaf5   : > { %p24_p3 = scmp.ge.s32.totalorder %s8972_s19, 4   ;;  %s12623_s29 = smov %s8858_s30 }
 0xaf6   : > { %s12625_s16 = smov %s8972_s19 }
 0xaf7   :  { %26 = sbr.rel (!%p24_p3) target bundleno = 7 (0x7), region = 111 }
 0xafa   : > { %s12624_s30 = smov %s12621_s1 }
 0xafe   :  { %6278 = vsyncpa [#allocation8], 1 }
 0xaff   :  { %6280 = vsyncpa [#allocation8 + $0x1], 1 }

</bundles_post_ra>
